<compile_context>
chip_gen: v7x
topology: tpu7x:2x2x1
jax: 0.10.0
libtpu: 0.0.40
codegen_flags: <defaults>
</compile_context>

<pallas_src>
import math
import functools

import jax
import jax.numpy as jnp
from jax.experimental import pallas as pl
from jax.experimental.pallas import tpu as pltpu


def _round_up(x, m):
    return (x + m - 1) // m * m


def _vmem_limit_bytes(frac=0.85):
    """Per-generation VMEM limit (~85% of physical); None -> compiler default."""
    try:
        cap = pltpu.get_tpu_info().vmem_capacity_bytes
        return int(cap * frac)
    except Exception:
        return None


# ---------------------------------------------------------------------------
# Kernel
# ---------------------------------------------------------------------------
def _specialized_mha_kernel(q_ref, k_ref, v_ref,
                            wq_ref, bq_ref, wk_ref, bk_ref, wv_ref, bv_ref,
                            wo_ref, bo_ref, o_ref, k_scr, v_scr,
                            *, num_heads, head_dim, scale):
    # K/V projections depend only on the batch index -> compute once per batch
    # (first q tile) into persistent bf16 VMEM scratch.
    @pl.when(pl.program_id(1) == 0)
    def _():
        xk = k_ref[...].astype(jnp.bfloat16)                      # (Sk, H)
        xv = v_ref[...].astype(jnp.bfloat16)
        k_scr[...] = (jnp.dot(xk, wk_ref[...],
                              preferred_element_type=jnp.float32)
                      + bk_ref[...]).astype(jnp.bfloat16)
        v_scr[...] = (jnp.dot(xv, wv_ref[...],
                              preferred_element_type=jnp.float32)
                      + bv_ref[...]).astype(jnp.bfloat16)

    # Q projection for this q tile: full-width (TQ,H)x(H,H) MXU matmul.
    xq = q_ref[...].astype(jnp.bfloat16)                          # (TQ, H)
    q2 = jnp.dot(xq, wq_ref[...],
                 preferred_element_type=jnp.float32) + bq_ref[...]
    q2 = (q2 * scale).astype(jnp.bfloat16)                        # fold 1/sqrt(hd)

    # Per-head attention: static unrolled loop over lane-aligned head slices of
    # the concat-ordered projections (no (nh, TQ, *) intermediates).
    parts = []
    for h in range(num_heads):
        lo = h * head_dim
        qh = q2[:, lo:lo + head_dim]                              # (TQ, hd) bf16
        kh = k_scr[:, lo:lo + head_dim]                           # (Sk, hd) bf16
        vh = v_scr[:, lo:lo + head_dim]                           # (Sk, hd) bf16

        s = jax.lax.dot_general(qh, kh, (((1,), (1,)), ((), ())),
                                preferred_element_type=jnp.float32)  # (TQ, Sk) f32
        m = jnp.max(s, axis=-1, keepdims=True)
        p = jnp.exp(s - m)                                        # unnormalized
        l = jnp.sum(p, axis=-1, keepdims=True)
        # TODO(synk): nn.Dropout(0.1) on attention weights omitted (eval-mode identity).
        pv = jnp.dot(p.astype(jnp.bfloat16), vh,
                     preferred_element_type=jnp.float32)          # (TQ, hd) f32
        # Normalize after the PV matmul: TQ*hd multiplies instead of TQ*Sk.
        pv = pv * pl.reciprocal(l, approx=True)
        parts.append(pv.astype(jnp.bfloat16))

    # Heads are already in the PyTorch concat order -> one fused output
    # projection with contraction K = H.
    attn = jnp.concatenate(parts, axis=-1)                        # (TQ, H) bf16
    out = jnp.dot(attn, wo_ref[...],
                  preferred_element_type=jnp.float32) + bo_ref[...]
    # TODO(synk): on memory-bound v5e a bf16 output would halve HBM writeback;
    # kept f32 for parity with the float32 PyTorch module.
    o_ref[...] = out.astype(o_ref.dtype)


# ---------------------------------------------------------------------------
# Wrapper
# ---------------------------------------------------------------------------
def _build_call(B, sq_pad, Sk, H, tq, nh, hd, scale, vmem_limit,
                single_buffer_weights):
    kernel = functools.partial(_specialized_mha_kernel,
                               num_heads=nh, head_dim=hd, scale=scale)

    w_extra = ({"pipeline_mode": pl.Buffered(1)}
               if single_buffer_weights else {})

    def wspec(shape):
        # Constant index -> VMEM-resident; single-buffered when supported.
        return pl.BlockSpec(shape, lambda b, s: (0,) * len(shape), **w_extra)

    q_spec = pl.BlockSpec((None, tq, H), lambda b, s: (b, s, 0))
    kv_spec = pl.BlockSpec((None, Sk, H), lambda b, s: (b, 0, 0))
    o_spec = pl.BlockSpec((None, tq, H), lambda b, s: (b, s, 0))

    return pl.pallas_call(
        kernel,
        out_shape=jax.ShapeDtypeStruct((B, sq_pad, H), jnp.float32),
        grid=(B, sq_pad // tq),
        in_specs=[q_spec, kv_spec, kv_spec,
                  wspec((H, H)), wspec((1, H)),    # Q proj
                  wspec((H, H)), wspec((1, H)),    # K proj
                  wspec((H, H)), wspec((1, H)),    # V proj
                  wspec((H, H)), wspec((1, H))],   # out proj
        out_specs=o_spec,
        scratch_shapes=[pltpu.VMEM((Sk, H), jnp.bfloat16),   # projected K
                        pltpu.VMEM((Sk, H), jnp.bfloat16)],  # projected V
        compiler_params=pltpu.CompilerParams(
            # batch "parallel" (megacore / 2 TCs on v7x; keep B >= 2);
            # q-tile axis "arbitrary" so the per-batch K/V hoist is valid.
            dimension_semantics=("parallel", "arbitrary"),
            vmem_limit_bytes=vmem_limit),
    )


def specialized_mha(query, key, value, params, num_heads, *, q_tile=128):
    """params = (Wq, bq, Wk, bk, Wv, bv, Wo, bo); W's are (in, out), b's are (out,)."""
    Wq, bq, Wk, bk, Wv, bv, Wo, bo = params
    B, Sq, H = query.shape
    Sk = key.shape[1]
    nh = num_heads
    hd = H // nh
    scale = 1.0 / math.sqrt(hd)

    # Tile / padding plan: tq divides the padded Sq; no silent full-seq fallback.
    tq = min(q_tile, _round_up(Sq, 8))
    sq_pad = _round_up(Sq, tq)
    q_in = query
    if sq_pad != Sq:
        q_in = jnp.pad(query, ((0, 0), (0, sq_pad - Sq), (0, 0)))

    # bf16 weights (halves resident weight VMEM; MXU operands are bf16 anyway),
    # f32 biases. Activations stay f32 and are cast inside the kernel.
    wq2 = Wq.astype(jnp.bfloat16)
    wk2 = Wk.astype(jnp.bfloat16)
    wv2 = Wv.astype(jnp.bfloat16)
    wo2 = Wo.astype(jnp.bfloat16)
    bq2 = bq.reshape(1, H).astype(jnp.float32)
    bk2 = bk.reshape(1, H).astype(jnp.float32)
    bv2 = bv.reshape(1, H).astype(jnp.float32)
    bo2 = bo.reshape(1, H).astype(jnp.float32)

    args = (q_in, key, value, wq2, bq2, wk2, bk2, wv2, bv2, wo2, bo2)
    vmem_limit = _vmem_limit_bytes()

    try:
        out = _build_call(B, sq_pad, Sk, H, tq, nh, hd, scale, vmem_limit,
                          single_buffer_weights=True)(*args)
    except Exception:
        # Fallback for JAX builds where Buffered(1) single-buffering on the
        # top-level pallas_call pipeline is not supported.
        out = _build_call(B, sq_pad, Sk, H, tq, nh, hd, scale, vmem_limit,
                          single_buffer_weights=False)(*args)

    if sq_pad != Sq:
        out = out[:, :Sq, :]
    return out


# ---------------------------------------------------------------------------
# Parameter construction (mirrors nn.Linear default init, deterministically)
# ---------------------------------------------------------------------------
def _linear_init(key, out_dim, in_dim):
    kw, kb = jax.random.split(key)
    bound = 1.0 / math.sqrt(in_dim)
    w = jax.random.uniform(kw, (out_dim, in_dim), jnp.float32, -bound, bound)
    b = jax.random.uniform(kb, (out_dim,), jnp.float32, -bound, bound)
    return w, b


def build_params(key, hidden_dim, num_heads, head_division):
    head_dim = hidden_dim // num_heads
    metafunctions = list(head_division.keys())
    per_func = {}
    keys = jax.random.split(key, 3 * len(metafunctions) + 1)
    ki = 0
    for func in metafunctions:
        out_dim = head_division[func] * head_dim
        per_func[func] = {}
        for name in ("q", "k", "v"):
            per_func[func][name] = _linear_init(keys[ki], out_dim, hidden_dim)
            ki += 1
    wo, bo = _linear_init(keys[ki], hidden_dim, hidden_dim)

    def concat(name):
        w = jnp.concatenate([per_func[f][name][0] for f in metafunctions], axis=0)
        b = jnp.concatenate([per_func[f][name][1] for f in metafunctions], axis=0)
        return w.T, b                         # (in, out), (out,)

    Wq, bq = concat("q")
    Wk, bk = concat("k")
    Wv, bv = concat("v")
    fused = (Wq, bq, Wk, bk, Wv, bv, wo.T, bo)
    return fused, per_func, (wo, bo), metafunctions


# ---------------------------------------------------------------------------
# Pure-JAX reference (faithful per-metafunction loop, eval-mode dropout, f32)
# ---------------------------------------------------------------------------
def reference_mha(query, key, value, per_func, out_wb, metafunctions,
                  hidden_dim, num_heads, head_division):
    B, Sq, _ = query.shape
    Sk = key.shape[1]
    head_dim = hidden_dim // num_heads
    outs = []
    for func in metafunctions:
        nh = head_division[func]
        (wq, bq) = per_func[func]["q"]
        (wk, bk) = per_func[func]["k"]
        (wv, bv) = per_func[func]["v"]
        Q = query @ wq.T + bq
        K = key @ wk.T + bk
        V = value @ wv.T + bv
        Q = Q.reshape(B, Sq, nh, head_dim).transpose(0, 2, 1, 3)
        K = K.reshape(B, Sk, nh, head_dim).transpose(0, 2, 1, 3)
        V = V.reshape(B, Sk, nh, head_dim).transpose(0, 2, 1, 3)
        scores = jnp.einsum("bhqd,bhkd->bhqk", Q, K) / math.sqrt(head_dim)
        attn = jax.nn.softmax(scores, axis=-1)
        o = jnp.einsum("bhqk,bhkd->bhqd", attn, V)
        o = o.transpose(0, 2, 1, 3).reshape(B, Sq, nh * head_dim)
        outs.append(o)
    concatenated = jnp.concatenate(outs, axis=-1)
    wo, bo = out_wb
    return concatenated @ wo.T + bo


if __name__ == "__main__":
    # Small but TPU-aligned shapes: head_dim = 128 (full lane width),
    # Sq tiles of 128 -> grid (B, Sq//128) = (2, 2); batch axis parallel.
    B, Sq, Sk = 2, 256, 128
    hidden_dim, num_heads = 256, 2
    head_division = {"syntax": 1, "semantics": 1}

    root = jax.random.PRNGKey(0)
    kq, kk, kv, kp = jax.random.split(root, 4)
    query = jax.random.normal(kq, (B, Sq, hidden_dim), jnp.float32)
    key = jax.random.normal(kk, (B, Sk, hidden_dim), jnp.float32)
    value = jax.random.normal(kv, (B, Sk, hidden_dim), jnp.float32)

    fused_params, per_func, out_wb, metafunctions = build_params(
        kp, hidden_dim, num_heads, head_division)

    out = specialized_mha(query, key, value, fused_params, num_heads)
    out = jax.block_until_ready(out)

    ref = reference_mha(query, key, value, per_func, out_wb, metafunctions,
                        hidden_dim, num_heads, head_division)
    assert out.shape == (B, Sq, hidden_dim)
    max_err = float(jnp.max(jnp.abs(out - ref)))
    # bf16 MXU operands + approx reciprocal vs f32 reference -> loosened tolerance.
    assert jnp.allclose(out, ref, atol=2e-2, rtol=2e-2), (
        f"mismatch vs JAX reference (max abs err {max_err})")

    print("KERNEL_OK")
</pallas_src>

<mosaic_0001>
module attributes {stable_mosaic.version = 11 : i64} {
  func.func @_specialized_mha_kernel(%arg0: i32, %arg1: i32, %arg2: memref<1x128x256xf32, #tpu.memory_space<vmem>>, %arg3: memref<1x128x256xf32, #tpu.memory_space<vmem>>, %arg4: memref<1x128x256xf32, #tpu.memory_space<vmem>>, %arg5: memref<256x256xbf16, #tpu.memory_space<vmem>>, %arg6: memref<1x256xf32, #tpu.memory_space<vmem>>, %arg7: memref<256x256xbf16, #tpu.memory_space<vmem>>, %arg8: memref<1x256xf32, #tpu.memory_space<vmem>>, %arg9: memref<256x256xbf16, #tpu.memory_space<vmem>>, %arg10: memref<1x256xf32, #tpu.memory_space<vmem>>, %arg11: memref<256x256xbf16, #tpu.memory_space<vmem>>, %arg12: memref<1x256xf32, #tpu.memory_space<vmem>>, %arg13: memref<1x128x256xf32, #tpu.memory_space<vmem>>, %arg14: memref<128x256xbf16, #tpu.memory_space<vmem>>, %arg15: memref<128x256xbf16, #tpu.memory_space<vmem>>) attributes {dimension_semantics = [#tpu.dimension_semantics<parallel>, #tpu.dimension_semantics<arbitrary>], iteration_bounds = array<i64: 2, 2>, scalar_prefetch = 0 : i64, scratch_operands = 2 : i64, tpu.core_type = #tpu.core_type<tc>, window_params = [{transform_indices = @transform_0, window_bounds = array<i64: 1, 128, 256>}, {transform_indices = @transform_1, window_bounds = array<i64: 1, 128, 256>}, {transform_indices = @transform_2, window_bounds = array<i64: 1, 128, 256>}, {pipeline_mode = #tpu.pipeline_mode<synchronous>, transform_indices = @transform_3, window_bounds = array<i64: 256, 256>}, {pipeline_mode = #tpu.pipeline_mode<synchronous>, transform_indices = @transform_4, window_bounds = array<i64: 1, 256>}, {pipeline_mode = #tpu.pipeline_mode<synchronous>, transform_indices = @transform_5, window_bounds = array<i64: 256, 256>}, {pipeline_mode = #tpu.pipeline_mode<synchronous>, transform_indices = @transform_6, window_bounds = array<i64: 1, 256>}, {pipeline_mode = #tpu.pipeline_mode<synchronous>, transform_indices = @transform_7, window_bounds = array<i64: 256, 256>}, {pipeline_mode = #tpu.pipeline_mode<synchronous>, transform_indices = @transform_8, window_bounds = array<i64: 1, 256>}, {pipeline_mode = #tpu.pipeline_mode<synchronous>, transform_indices = @transform_9, window_bounds = array<i64: 256, 256>}, {pipeline_mode = #tpu.pipeline_mode<synchronous>, transform_indices = @transform_10, window_bounds = array<i64: 1, 256>}, {transform_indices = @transform_11, window_bounds = array<i64: 1, 128, 256>}]} {
    %c0_i32 = arith.constant 0 : i32
    %0 = arith.cmpi eq, %arg1, %c0_i32 : i32
    %1 = arith.extui %0 : i1 to i32
    %c0_i32_0 = arith.constant 0 : i32
    %2 = arith.cmpi ne, %1, %c0_i32_0 : i32
    scf.if %2 {
      %c0_31 = arith.constant 0 : index
      %c0_32 = arith.constant 0 : index
      %c0_33 = arith.constant 0 : index
      %57 = vector.load %arg3[%c0_31, %c0_32, %c0_33] : memref<1x128x256xf32, #tpu.memory_space<vmem>>, vector<1x128x256xf32>
      %58 = vector.shape_cast %57 : vector<1x128x256xf32> to vector<128x256xf32>
      %59 = arith.truncf %58 : vector<128x256xf32> to vector<128x256xbf16>
      %c0_34 = arith.constant 0 : index
      %c0_35 = arith.constant 0 : index
      %c0_36 = arith.constant 0 : index
      %60 = vector.load %arg4[%c0_34, %c0_35, %c0_36] : memref<1x128x256xf32, #tpu.memory_space<vmem>>, vector<1x128x256xf32>
      %61 = vector.shape_cast %60 : vector<1x128x256xf32> to vector<128x256xf32>
      %62 = arith.truncf %61 : vector<128x256xf32> to vector<128x256xbf16>
      %c0_37 = arith.constant 0 : index
      %c0_38 = arith.constant 0 : index
      %63 = vector.load %arg7[%c0_37, %c0_38] : memref<256x256xbf16, #tpu.memory_space<vmem>>, vector<256x256xbf16>
      %cst_39 = arith.constant dense<0.000000e+00> : vector<128x256xf32>
      %64 = tpu.matmul %59, %63, %cst_39 {dimension_numbers = #tpu.dot_dimension_numbers<[1], [0], [0], [1], [0, 0, 1, 1], [], []>} : vector<128x256xbf16>, vector<256x256xbf16>, vector<128x256xf32> -> vector<128x256xf32>
      %c0_40 = arith.constant 0 : index
      %c0_41 = arith.constant 0 : index
      %65 = vector.load %arg8[%c0_40, %c0_41] : memref<1x256xf32, #tpu.memory_space<vmem>>, vector<1x256xf32>
      %66 = vector.broadcast %65 : vector<1x256xf32> to vector<128x256xf32>
      %67 = arith.addf %64, %66 : vector<128x256xf32>
      %68 = arith.truncf %67 : vector<128x256xf32> to vector<128x256xbf16>
      %c0_42 = arith.constant 0 : index
      %c0_43 = arith.constant 0 : index
      %69 = vector.load %arg14[%c0_42, %c0_43] : memref<128x256xbf16, #tpu.memory_space<vmem>>, vector<128x256xbf16>
      tpu.vector_store %arg14[%c0_42, %c0_43], %68 {strides = array<i32>} : memref<128x256xbf16, #tpu.memory_space<vmem>>, vector<128x256xbf16>,
      %c0_44 = arith.constant 0 : index
      %c0_45 = arith.constant 0 : index
      %70 = vector.load %arg9[%c0_44, %c0_45] : memref<256x256xbf16, #tpu.memory_space<vmem>>, vector<256x256xbf16>
      %cst_46 = arith.constant dense<0.000000e+00> : vector<128x256xf32>
      %71 = tpu.matmul %62, %70, %cst_46 {dimension_numbers = #tpu.dot_dimension_numbers<[1], [0], [0], [1], [0, 0, 1, 1], [], []>} : vector<128x256xbf16>, vector<256x256xbf16>, vector<128x256xf32> -> vector<128x256xf32>
      %c0_47 = arith.constant 0 : index
      %c0_48 = arith.constant 0 : index
      %72 = vector.load %arg10[%c0_47, %c0_48] : memref<1x256xf32, #tpu.memory_space<vmem>>, vector<1x256xf32>
      %73 = vector.broadcast %72 : vector<1x256xf32> to vector<128x256xf32>
      %74 = arith.addf %71, %73 : vector<128x256xf32>
      %75 = arith.truncf %74 : vector<128x256xf32> to vector<128x256xbf16>
      %c0_49 = arith.constant 0 : index
      %c0_50 = arith.constant 0 : index
      %76 = vector.load %arg15[%c0_49, %c0_50] : memref<128x256xbf16, #tpu.memory_space<vmem>>, vector<128x256xbf16>
      tpu.vector_store %arg15[%c0_49, %c0_50], %75 {strides = array<i32>} : memref<128x256xbf16, #tpu.memory_space<vmem>>, vector<128x256xbf16>,
    } else {
    }
    %c0 = arith.constant 0 : index
    %c0_1 = arith.constant 0 : index
    %c0_2 = arith.constant 0 : index
    %3 = vector.load %arg2[%c0, %c0_1, %c0_2] : memref<1x128x256xf32, #tpu.memory_space<vmem>>, vector<1x128x256xf32>
    %4 = vector.shape_cast %3 : vector<1x128x256xf32> to vector<128x256xf32>
    %5 = arith.truncf %4 : vector<128x256xf32> to vector<128x256xbf16>
    %c0_3 = arith.constant 0 : index
    %c0_4 = arith.constant 0 : index
    %6 = vector.load %arg5[%c0_3, %c0_4] : memref<256x256xbf16, #tpu.memory_space<vmem>>, vector<256x256xbf16>
    %cst = arith.constant dense<0.000000e+00> : vector<128x256xf32>
    %7 = tpu.matmul %5, %6, %cst {dimension_numbers = #tpu.dot_dimension_numbers<[1], [0], [0], [1], [0, 0, 1, 1], [], []>} : vector<128x256xbf16>, vector<256x256xbf16>, vector<128x256xf32> -> vector<128x256xf32>
    %c0_5 = arith.constant 0 : index
    %c0_6 = arith.constant 0 : index
    %8 = vector.load %arg6[%c0_5, %c0_6] : memref<1x256xf32, #tpu.memory_space<vmem>>, vector<1x256xf32>
    %9 = vector.broadcast %8 : vector<1x256xf32> to vector<128x256xf32>
    %10 = arith.addf %7, %9 : vector<128x256xf32>
    %cst_7 = arith.constant 0.0883883461 : f32
    %11 = vector.broadcast %cst_7 : f32 to vector<128x256xf32>
    %12 = arith.mulf %10, %11 : vector<128x256xf32>
    %13 = arith.truncf %12 : vector<128x256xf32> to vector<128x256xbf16>
    %14 = vector.extract_strided_slice %13 {offsets = [0, 0], sizes = [128, 128], strides = [1, 1]} : vector<128x256xbf16> to vector<128x128xbf16>
    %c0_8 = arith.constant 0 : index
    %c0_9 = arith.constant 0 : index
    %15 = vector.load %arg14[%c0_8, %c0_9] : memref<128x256xbf16, #tpu.memory_space<vmem>>, vector<128x128xbf16>
    %c0_10 = arith.constant 0 : index
    %c0_11 = arith.constant 0 : index
    %16 = vector.load %arg15[%c0_10, %c0_11] : memref<128x256xbf16, #tpu.memory_space<vmem>>, vector<128x128xbf16>
    %cst_12 = arith.constant dense<0.000000e+00> : vector<128x128xf32>
    %17 = tpu.matmul %14, %15, %cst_12 {dimension_numbers = #tpu.dot_dimension_numbers<[1], [1], [0], [0], [0, 0, 1, 0], [], []>} : vector<128x128xbf16>, vector<128x128xbf16>, vector<128x128xf32> -> vector<128x128xf32>
    %cst_13 = arith.constant dense<0xFF800000> : vector<128xf32>
    %18 = vector.multi_reduction <maximumf>, %17, %cst_13 [1] : vector<128x128xf32> to vector<128xf32>
    %19 = vector.shape_cast %18 : vector<128xf32> to vector<128x1xf32>
    %20 = vector.broadcast %19 : vector<128x1xf32> to vector<128x128xf32>
    %21 = arith.subf %17, %20 : vector<128x128xf32>
    %22 = math.exp %21 : vector<128x128xf32>
    %cst_14 = arith.constant dense<0.000000e+00> : vector<128xf32>
    %23 = vector.multi_reduction <add>, %22, %cst_14 [1] : vector<128x128xf32> to vector<128xf32>
    %24 = vector.shape_cast %23 : vector<128xf32> to vector<128x1xf32>
    %25 = arith.truncf %22 : vector<128x128xf32> to vector<128x128xbf16>
    %cst_15 = arith.constant dense<0.000000e+00> : vector<128x128xf32>
    %26 = tpu.matmul %25, %16, %cst_15 {dimension_numbers = #tpu.dot_dimension_numbers<[1], [0], [0], [1], [0, 0, 1, 1], [], []>} : vector<128x128xbf16>, vector<128x128xbf16>, vector<128x128xf32> -> vector<128x128xf32>
    %27 = tpu.reciprocal %24 {approx = true} : vector<128x1xf32> -> vector<128x1xf32>
    %28 = vector.broadcast %27 : vector<128x1xf32> to vector<128x128xf32>
    %29 = arith.mulf %26, %28 : vector<128x128xf32>
    %30 = arith.truncf %29 : vector<128x128xf32> to vector<128x128xbf16>
    %31 = vector.extract_strided_slice %13 {offsets = [0, 128], sizes = [128, 128], strides = [1, 1]} : vector<128x256xbf16> to vector<128x128xbf16>
    %c0_16 = arith.constant 0 : index
    %c128 = arith.constant 128 : index
    %32 = vector.load %arg14[%c0_16, %c128] : memref<128x256xbf16, #tpu.memory_space<vmem>>, vector<128x128xbf16>
    %c0_17 = arith.constant 0 : index
    %c128_18 = arith.constant 128 : index
    %33 = vector.load %arg15[%c0_17, %c128_18] : memref<128x256xbf16, #tpu.memory_space<vmem>>, vector<128x128xbf16>
    %cst_19 = arith.constant dense<0.000000e+00> : vector<128x128xf32>
    %34 = tpu.matmul %31, %32, %cst_19 {dimension_numbers = #tpu.dot_dimension_numbers<[1], [1], [0], [0], [0, 0, 1, 0], [], []>} : vector<128x128xbf16>, vector<128x128xbf16>, vector<128x128xf32> -> vector<128x128xf32>
    %cst_20 = arith.constant dense<0xFF800000> : vector<128xf32>
    %35 = vector.multi_reduction <maximumf>, %34, %cst_20 [1] : vector<128x128xf32> to vector<128xf32>
    %36 = vector.shape_cast %35 : vector<128xf32> to vector<128x1xf32>
    %37 = vector.broadcast %36 : vector<128x1xf32> to vector<128x128xf32>
    %38 = arith.subf %34, %37 : vector<128x128xf32>
    %39 = math.exp %38 : vector<128x128xf32>
    %cst_21 = arith.constant dense<0.000000e+00> : vector<128xf32>
    %40 = vector.multi_reduction <add>, %39, %cst_21 [1] : vector<128x128xf32> to vector<128xf32>
    %41 = vector.shape_cast %40 : vector<128xf32> to vector<128x1xf32>
    %42 = arith.truncf %39 : vector<128x128xf32> to vector<128x128xbf16>
    %cst_22 = arith.constant dense<0.000000e+00> : vector<128x128xf32>
    %43 = tpu.matmul %42, %33, %cst_22 {dimension_numbers = #tpu.dot_dimension_numbers<[1], [0], [0], [1], [0, 0, 1, 1], [], []>} : vector<128x128xbf16>, vector<128x128xbf16>, vector<128x128xf32> -> vector<128x128xf32>
    %44 = tpu.reciprocal %41 {approx = true} : vector<128x1xf32> -> vector<128x1xf32>
    %45 = vector.broadcast %44 : vector<128x1xf32> to vector<128x128xf32>
    %46 = arith.mulf %43, %45 : vector<128x128xf32>
    %47 = arith.truncf %46 : vector<128x128xf32> to vector<128x128xbf16>
    %48 = tpu.concatenate %30, %47 in 1 : vector<128x128xbf16>, vector<128x128xbf16> -> vector<128x256xbf16>
    %c0_23 = arith.constant 0 : index
    %c0_24 = arith.constant 0 : index
    %49 = vector.load %arg11[%c0_23, %c0_24] : memref<256x256xbf16, #tpu.memory_space<vmem>>, vector<256x256xbf16>
    %cst_25 = arith.constant dense<0.000000e+00> : vector<128x256xf32>
    %50 = tpu.matmul %48, %49, %cst_25 {dimension_numbers = #tpu.dot_dimension_numbers<[1], [0], [0], [1], [0, 0, 1, 1], [], []>} : vector<128x256xbf16>, vector<256x256xbf16>, vector<128x256xf32> -> vector<128x256xf32>
    %c0_26 = arith.constant 0 : index
    %c0_27 = arith.constant 0 : index
    %51 = vector.load %arg12[%c0_26, %c0_27] : memref<1x256xf32, #tpu.memory_space<vmem>>, vector<1x256xf32>
    %52 = vector.broadcast %51 : vector<1x256xf32> to vector<128x256xf32>
    %53 = arith.addf %50, %52 : vector<128x256xf32>
    %c0_28 = arith.constant 0 : index
    %c0_29 = arith.constant 0 : index
    %c0_30 = arith.constant 0 : index
    %54 = vector.load %arg13[%c0_28, %c0_29, %c0_30] : memref<1x128x256xf32, #tpu.memory_space<vmem>>, vector<1x128x256xf32>
    %55 = vector.shape_cast %54 : vector<1x128x256xf32> to vector<128x256xf32>
    %56 = vector.shape_cast %53 : vector<128x256xf32> to vector<1x128x256xf32>
    tpu.vector_store %arg13[%c0_28, %c0_29, %c0_30], %56 {strides = array<i32>} : memref<1x128x256xf32, #tpu.memory_space<vmem>>, vector<1x128x256xf32>,
    return
  }
  func.func @transform_0(%arg0: i32, %arg1: i32) -> (i32, i32, i32) {
    %c0_i32 = arith.constant 0 : i32
    %c0_i32_0 = arith.constant 0 : i32
    return %arg0, %arg1, %c0_i32 : i32, i32, i32
  }
  func.func @transform_1(%arg0: i32, %arg1: i32) -> (i32, i32, i32) {
    %c0_i32 = arith.constant 0 : i32
    %c0_i32_0 = arith.constant 0 : i32
    %c0_i32_1 = arith.constant 0 : i32
    return %arg0, %c0_i32, %c0_i32_0 : i32, i32, i32
  }
  func.func @transform_2(%arg0: i32, %arg1: i32) -> (i32, i32, i32) {
    %c0_i32 = arith.constant 0 : i32
    %c0_i32_0 = arith.constant 0 : i32
    %c0_i32_1 = arith.constant 0 : i32
    return %arg0, %c0_i32, %c0_i32_0 : i32, i32, i32
  }
  func.func @transform_3(%arg0: i32, %arg1: i32) -> (i32, i32) {
    %c0_i32 = arith.constant 0 : i32
    %c0_i32_0 = arith.constant 0 : i32
    %c0_i32_1 = arith.constant 0 : i32
    return %c0_i32, %c0_i32_0 : i32, i32
  }
  func.func @transform_4(%arg0: i32, %arg1: i32) -> (i32, i32) {
    %c0_i32 = arith.constant 0 : i32
    %c0_i32_0 = arith.constant 0 : i32
    %c0_i32_1 = arith.constant 0 : i32
    return %c0_i32, %c0_i32_0 : i32, i32
  }
  func.func @transform_5(%arg0: i32, %arg1: i32) -> (i32, i32) {
    %c0_i32 = arith.constant 0 : i32
    %c0_i32_0 = arith.constant 0 : i32
    %c0_i32_1 = arith.constant 0 : i32
    return %c0_i32, %c0_i32_0 : i32, i32
  }
  func.func @transform_6(%arg0: i32, %arg1: i32) -> (i32, i32) {
    %c0_i32 = arith.constant 0 : i32
    %c0_i32_0 = arith.constant 0 : i32
    %c0_i32_1 = arith.constant 0 : i32
    return %c0_i32, %c0_i32_0 : i32, i32
  }
  func.func @transform_7(%arg0: i32, %arg1: i32) -> (i32, i32) {
    %c0_i32 = arith.constant 0 : i32
    %c0_i32_0 = arith.constant 0 : i32
    %c0_i32_1 = arith.constant 0 : i32
    return %c0_i32, %c0_i32_0 : i32, i32
  }
  func.func @transform_8(%arg0: i32, %arg1: i32) -> (i32, i32) {
    %c0_i32 = arith.constant 0 : i32
    %c0_i32_0 = arith.constant 0 : i32
    %c0_i32_1 = arith.constant 0 : i32
    return %c0_i32, %c0_i32_0 : i32, i32
  }
  func.func @transform_9(%arg0: i32, %arg1: i32) -> (i32, i32) {
    %c0_i32 = arith.constant 0 : i32
    %c0_i32_0 = arith.constant 0 : i32
    %c0_i32_1 = arith.constant 0 : i32
    return %c0_i32, %c0_i32_0 : i32, i32
  }
  func.func @transform_10(%arg0: i32, %arg1: i32) -> (i32, i32) {
    %c0_i32 = arith.constant 0 : i32
    %c0_i32_0 = arith.constant 0 : i32
    %c0_i32_1 = arith.constant 0 : i32
    return %c0_i32, %c0_i32_0 : i32, i32
  }
  func.func @transform_11(%arg0: i32, %arg1: i32) -> (i32, i32, i32) {
    %c0_i32 = arith.constant 0 : i32
    %c0_i32_0 = arith.constant 0 : i32
    return %arg0, %arg1, %c0_i32 : i32, i32, i32
  }
}

module attributes {stable_mosaic.version = 11 : i64} {
  func.func @_specialized_mha_kernel(%arg0: i32, %arg1: i32, %arg2: memref<1x128x256xf32, #tpu.memory_space<vmem>>, %arg3: memref<1x128x256xf32, #tpu.memory_space<vmem>>, %arg4: memref<1x128x256xf32, #tpu.memory_space<vmem>>, %arg5: memref<256x256xbf16, #tpu.memory_space<vmem>>, %arg6: memref<1x256xf32, #tpu.memory_space<vmem>>, %arg7: memref<256x256xbf16, #tpu.memory_space<vmem>>, %arg8: memref<1x256xf32, #tpu.memory_space<vmem>>, %arg9: memref<256x256xbf16, #tpu.memory_space<vmem>>, %arg10: memref<1x256xf32, #tpu.memory_space<vmem>>, %arg11: memref<256x256xbf16, #tpu.memory_space<vmem>>, %arg12: memref<1x256xf32, #tpu.memory_space<vmem>>, %arg13: memref<1x128x256xf32, #tpu.memory_space<vmem>>, %arg14: memref<128x256xbf16, #tpu.memory_space<vmem>>, %arg15: memref<128x256xbf16, #tpu.memory_space<vmem>>) attributes {dimension_semantics = [#tpu.dimension_semantics<parallel>, #tpu.dimension_semantics<arbitrary>], iteration_bounds = array<i64: 2, 2>, scalar_prefetch = 0 : i64, scratch_operands = 2 : i64, tpu.core_type = #tpu.core_type<tc>, window_params = [{transform_indices = @transform_0, window_bounds = array<i64: 1, 128, 256>}, {transform_indices = @transform_1, window_bounds = array<i64: 1, 128, 256>}, {transform_indices = @transform_2, window_bounds = array<i64: 1, 128, 256>}, {pipeline_mode = #tpu.pipeline_mode<synchronous>, transform_indices = @transform_3, window_bounds = array<i64: 256, 256>}, {pipeline_mode = #tpu.pipeline_mode<synchronous>, transform_indices = @transform_4, window_bounds = array<i64: 1, 256>}, {pipeline_mode = #tpu.pipeline_mode<synchronous>, transform_indices = @transform_5, window_bounds = array<i64: 256, 256>}, {pipeline_mode = #tpu.pipeline_mode<synchronous>, transform_indices = @transform_6, window_bounds = array<i64: 1, 256>}, {pipeline_mode = #tpu.pipeline_mode<synchronous>, transform_indices = @transform_7, window_bounds = array<i64: 256, 256>}, {pipeline_mode = #tpu.pipeline_mode<synchronous>, transform_indices = @transform_8, window_bounds = array<i64: 1, 256>}, {pipeline_mode = #tpu.pipeline_mode<synchronous>, transform_indices = @transform_9, window_bounds = array<i64: 256, 256>}, {pipeline_mode = #tpu.pipeline_mode<synchronous>, transform_indices = @transform_10, window_bounds = array<i64: 1, 256>}, {transform_indices = @transform_11, window_bounds = array<i64: 1, 128, 256>}]} {
    %c0_i32 = arith.constant 0 : i32
    %0 = arith.cmpi eq, %arg1, %c0_i32 : i32
    %1 = arith.extui %0 : i1 to i32
    %c0_i32_0 = arith.constant 0 : i32
    %2 = arith.cmpi ne, %1, %c0_i32_0 : i32
    scf.if %2 {
      %c0_31 = arith.constant 0 : index
      %c0_32 = arith.constant 0 : index
      %c0_33 = arith.constant 0 : index
      %57 = vector.load %arg3[%c0_31, %c0_32, %c0_33] : memref<1x128x256xf32, #tpu.memory_space<vmem>>, vector<1x128x256xf32>
      %58 = vector.shape_cast %57 : vector<1x128x256xf32> to vector<128x256xf32>
      %59 = arith.truncf %58 : vector<128x256xf32> to vector<128x256xbf16>
      %c0_34 = arith.constant 0 : index
      %c0_35 = arith.constant 0 : index
      %c0_36 = arith.constant 0 : index
      %60 = vector.load %arg4[%c0_34, %c0_35, %c0_36] : memref<1x128x256xf32, #tpu.memory_space<vmem>>, vector<1x128x256xf32>
      %61 = vector.shape_cast %60 : vector<1x128x256xf32> to vector<128x256xf32>
      %62 = arith.truncf %61 : vector<128x256xf32> to vector<128x256xbf16>
      %c0_37 = arith.constant 0 : index
      %c0_38 = arith.constant 0 : index
      %63 = vector.load %arg7[%c0_37, %c0_38] : memref<256x256xbf16, #tpu.memory_space<vmem>>, vector<256x256xbf16>
      %cst_39 = arith.constant dense<0.000000e+00> : vector<128x256xf32>
      %64 = tpu.matmul %59, %63, %cst_39 {dimension_numbers = #tpu.dot_dimension_numbers<[1], [0], [0], [1], [0, 0, 1, 1], [], []>} : vector<128x256xbf16>, vector<256x256xbf16>, vector<128x256xf32> -> vector<128x256xf32>
      %c0_40 = arith.constant 0 : index
      %c0_41 = arith.constant 0 : index
      %65 = vector.load %arg8[%c0_40, %c0_41] : memref<1x256xf32, #tpu.memory_space<vmem>>, vector<1x256xf32>
      %66 = vector.broadcast %65 : vector<1x256xf32> to vector<128x256xf32>
      %67 = arith.addf %64, %66 : vector<128x256xf32>
      %68 = arith.truncf %67 : vector<128x256xf32> to vector<128x256xbf16>
      %c0_42 = arith.constant 0 : index
      %c0_43 = arith.constant 0 : index
      %69 = vector.load %arg14[%c0_42, %c0_43] : memref<128x256xbf16, #tpu.memory_space<vmem>>, vector<128x256xbf16>
      tpu.vector_store %arg14[%c0_42, %c0_43], %68 {strides = array<i32>} : memref<128x256xbf16, #tpu.memory_space<vmem>>, vector<128x256xbf16>,
      %c0_44 = arith.constant 0 : index
      %c0_45 = arith.constant 0 : index
      %70 = vector.load %arg9[%c0_44, %c0_45] : memref<256x256xbf16, #tpu.memory_space<vmem>>, vector<256x256xbf16>
      %cst_46 = arith.constant dense<0.000000e+00> : vector<128x256xf32>
      %71 = tpu.matmul %62, %70, %cst_46 {dimension_numbers = #tpu.dot_dimension_numbers<[1], [0], [0], [1], [0, 0, 1, 1], [], []>} : vector<128x256xbf16>, vector<256x256xbf16>, vector<128x256xf32> -> vector<128x256xf32>
      %c0_47 = arith.constant 0 : index
      %c0_48 = arith.constant 0 : index
      %72 = vector.load %arg10[%c0_47, %c0_48] : memref<1x256xf32, #tpu.memory_space<vmem>>, vector<1x256xf32>
      %73 = vector.broadcast %72 : vector<1x256xf32> to vector<128x256xf32>
      %74 = arith.addf %71, %73 : vector<128x256xf32>
      %75 = arith.truncf %74 : vector<128x256xf32> to vector<128x256xbf16>
      %c0_49 = arith.constant 0 : index
      %c0_50 = arith.constant 0 : index
      %76 = vector.load %arg15[%c0_49, %c0_50] : memref<128x256xbf16, #tpu.memory_space<vmem>>, vector<128x256xbf16>
      tpu.vector_store %arg15[%c0_49, %c0_50], %75 {strides = array<i32>} : memref<128x256xbf16, #tpu.memory_space<vmem>>, vector<128x256xbf16>,
    } else {
    }
    %c0 = arith.constant 0 : index
    %c0_1 = arith.constant 0 : index
    %c0_2 = arith.constant 0 : index
    %3 = vector.load %arg2[%c0, %c0_1, %c0_2] : memref<1x128x256xf32, #tpu.memory_space<vmem>>, vector<1x128x256xf32>
    %4 = vector.shape_cast %3 : vector<1x128x256xf32> to vector<128x256xf32>
    %5 = arith.truncf %4 : vector<128x256xf32> to vector<128x256xbf16>
    %c0_3 = arith.constant 0 : index
    %c0_4 = arith.constant 0 : index
    %6 = vector.load %arg5[%c0_3, %c0_4] : memref<256x256xbf16, #tpu.memory_space<vmem>>, vector<256x256xbf16>
    %cst = arith.constant dense<0.000000e+00> : vector<128x256xf32>
    %7 = tpu.matmul %5, %6, %cst {dimension_numbers = #tpu.dot_dimension_numbers<[1], [0], [0], [1], [0, 0, 1, 1], [], []>} : vector<128x256xbf16>, vector<256x256xbf16>, vector<128x256xf32> -> vector<128x256xf32>
    %c0_5 = arith.constant 0 : index
    %c0_6 = arith.constant 0 : index
    %8 = vector.load %arg6[%c0_5, %c0_6] : memref<1x256xf32, #tpu.memory_space<vmem>>, vector<1x256xf32>
    %9 = vector.broadcast %8 : vector<1x256xf32> to vector<128x256xf32>
    %10 = arith.addf %7, %9 : vector<128x256xf32>
    %cst_7 = arith.constant 0.0883883461 : f32
    %11 = vector.broadcast %cst_7 : f32 to vector<128x256xf32>
    %12 = arith.mulf %10, %11 : vector<128x256xf32>
    %13 = arith.truncf %12 : vector<128x256xf32> to vector<128x256xbf16>
    %14 = vector.extract_strided_slice %13 {offsets = [0, 0], sizes = [128, 128], strides = [1, 1]} : vector<128x256xbf16> to vector<128x128xbf16>
    %c0_8 = arith.constant 0 : index
    %c0_9 = arith.constant 0 : index
    %15 = vector.load %arg14[%c0_8, %c0_9] : memref<128x256xbf16, #tpu.memory_space<vmem>>, vector<128x128xbf16>
    %c0_10 = arith.constant 0 : index
    %c0_11 = arith.constant 0 : index
    %16 = vector.load %arg15[%c0_10, %c0_11] : memref<128x256xbf16, #tpu.memory_space<vmem>>, vector<128x128xbf16>
    %cst_12 = arith.constant dense<0.000000e+00> : vector<128x128xf32>
    %17 = tpu.matmul %14, %15, %cst_12 {dimension_numbers = #tpu.dot_dimension_numbers<[1], [1], [0], [0], [0, 0, 1, 0], [], []>} : vector<128x128xbf16>, vector<128x128xbf16>, vector<128x128xf32> -> vector<128x128xf32>
    %cst_13 = arith.constant dense<0xFF800000> : vector<128xf32>
    %18 = vector.multi_reduction <maximumf>, %17, %cst_13 [1] : vector<128x128xf32> to vector<128xf32>
    %19 = vector.shape_cast %18 : vector<128xf32> to vector<128x1xf32>
    %20 = vector.broadcast %19 : vector<128x1xf32> to vector<128x128xf32>
    %21 = arith.subf %17, %20 : vector<128x128xf32>
    %22 = math.exp %21 : vector<128x128xf32>
    %cst_14 = arith.constant dense<0.000000e+00> : vector<128xf32>
    %23 = vector.multi_reduction <add>, %22, %cst_14 [1] : vector<128x128xf32> to vector<128xf32>
    %24 = vector.shape_cast %23 : vector<128xf32> to vector<128x1xf32>
    %25 = arith.truncf %22 : vector<128x128xf32> to vector<128x128xbf16>
    %cst_15 = arith.constant dense<0.000000e+00> : vector<128x128xf32>
    %26 = tpu.matmul %25, %16, %cst_15 {dimension_numbers = #tpu.dot_dimension_numbers<[1], [0], [0], [1], [0, 0, 1, 1], [], []>} : vector<128x128xbf16>, vector<128x128xbf16>, vector<128x128xf32> -> vector<128x128xf32>
    %27 = tpu.reciprocal %24 {approx = true} : vector<128x1xf32> -> vector<128x1xf32>
    %28 = vector.broadcast %27 : vector<128x1xf32> to vector<128x128xf32>
    %29 = arith.mulf %26, %28 : vector<128x128xf32>
    %30 = arith.truncf %29 : vector<128x128xf32> to vector<128x128xbf16>
    %31 = vector.extract_strided_slice %13 {offsets = [0, 128], sizes = [128, 128], strides = [1, 1]} : vector<128x256xbf16> to vector<128x128xbf16>
    %c0_16 = arith.constant 0 : index
    %c128 = arith.constant 128 : index
    %32 = vector.load %arg14[%c0_16, %c128] : memref<128x256xbf16, #tpu.memory_space<vmem>>, vector<128x128xbf16>
    %c0_17 = arith.constant 0 : index
    %c128_18 = arith.constant 128 : index
    %33 = vector.load %arg15[%c0_17, %c128_18] : memref<128x256xbf16, #tpu.memory_space<vmem>>, vector<128x128xbf16>
    %cst_19 = arith.constant dense<0.000000e+00> : vector<128x128xf32>
    %34 = tpu.matmul %31, %32, %cst_19 {dimension_numbers = #tpu.dot_dimension_numbers<[1], [1], [0], [0], [0, 0, 1, 0], [], []>} : vector<128x128xbf16>, vector<128x128xbf16>, vector<128x128xf32> -> vector<128x128xf32>
    %cst_20 = arith.constant dense<0xFF800000> : vector<128xf32>
    %35 = vector.multi_reduction <maximumf>, %34, %cst_20 [1] : vector<128x128xf32> to vector<128xf32>
    %36 = vector.shape_cast %35 : vector<128xf32> to vector<128x1xf32>
    %37 = vector.broadcast %36 : vector<128x1xf32> to vector<128x128xf32>
    %38 = arith.subf %34, %37 : vector<128x128xf32>
    %39 = math.exp %38 : vector<128x128xf32>
    %cst_21 = arith.constant dense<0.000000e+00> : vector<128xf32>
    %40 = vector.multi_reduction <add>, %39, %cst_21 [1] : vector<128x128xf32> to vector<128xf32>
    %41 = vector.shape_cast %40 : vector<128xf32> to vector<128x1xf32>
    %42 = arith.truncf %39 : vector<128x128xf32> to vector<128x128xbf16>
    %cst_22 = arith.constant dense<0.000000e+00> : vector<128x128xf32>
    %43 = tpu.matmul %42, %33, %cst_22 {dimension_numbers = #tpu.dot_dimension_numbers<[1], [0], [0], [1], [0, 0, 1, 1], [], []>} : vector<128x128xbf16>, vector<128x128xbf16>, vector<128x128xf32> -> vector<128x128xf32>
    %44 = tpu.reciprocal %41 {approx = true} : vector<128x1xf32> -> vector<128x1xf32>
    %45 = vector.broadcast %44 : vector<128x1xf32> to vector<128x128xf32>
    %46 = arith.mulf %43, %45 : vector<128x128xf32>
    %47 = arith.truncf %46 : vector<128x128xf32> to vector<128x128xbf16>
    %48 = tpu.concatenate %30, %47 in 1 : vector<128x128xbf16>, vector<128x128xbf16> -> vector<128x256xbf16>
    %c0_23 = arith.constant 0 : index
    %c0_24 = arith.constant 0 : index
    %49 = vector.load %arg11[%c0_23, %c0_24] : memref<256x256xbf16, #tpu.memory_space<vmem>>, vector<256x256xbf16>
    %cst_25 = arith.constant dense<0.000000e+00> : vector<128x256xf32>
    %50 = tpu.matmul %48, %49, %cst_25 {dimension_numbers = #tpu.dot_dimension_numbers<[1], [0], [0], [1], [0, 0, 1, 1], [], []>} : vector<128x256xbf16>, vector<256x256xbf16>, vector<128x256xf32> -> vector<128x256xf32>
    %c0_26 = arith.constant 0 : index
    %c0_27 = arith.constant 0 : index
    %51 = vector.load %arg12[%c0_26, %c0_27] : memref<1x256xf32, #tpu.memory_space<vmem>>, vector<1x256xf32>
    %52 = vector.broadcast %51 : vector<1x256xf32> to vector<128x256xf32>
    %53 = arith.addf %50, %52 : vector<128x256xf32>
    %c0_28 = arith.constant 0 : index
    %c0_29 = arith.constant 0 : index
    %c0_30 = arith.constant 0 : index
    %54 = vector.load %arg13[%c0_28, %c0_29, %c0_30] : memref<1x128x256xf32, #tpu.memory_space<vmem>>, vector<1x128x256xf32>
    %55 = vector.shape_cast %54 : vector<1x128x256xf32> to vector<128x256xf32>
    %56 = vector.shape_cast %53 : vector<128x256xf32> to vector<1x128x256xf32>
    tpu.vector_store %arg13[%c0_28, %c0_29, %c0_30], %56 {strides = array<i32>} : memref<1x128x256xf32, #tpu.memory_space<vmem>>, vector<1x128x256xf32>,
    return
  }
  func.func @transform_0(%arg0: i32, %arg1: i32) -> (i32, i32, i32) {
    %c0_i32 = arith.constant 0 : i32
    %c0_i32_0 = arith.constant 0 : i32
    return %arg0, %arg1, %c0_i32 : i32, i32, i32
  }
  func.func @transform_1(%arg0: i32, %arg1: i32) -> (i32, i32, i32) {
    %c0_i32 = arith.constant 0 : i32
    %c0_i32_0 = arith.constant 0 : i32
    %c0_i32_1 = arith.constant 0 : i32
    return %arg0, %c0_i32, %c0_i32_0 : i32, i32, i32
  }
  func.func @transform_2(%arg0: i32, %arg1: i32) -> (i32, i32, i32) {
    %c0_i32 = arith.constant 0 : i32
    %c0_i32_0 = arith.constant 0 : i32
    %c0_i32_1 = arith.constant 0 : i32
    return %arg0, %c0_i32, %c0_i32_0 : i32, i32, i32
  }
  func.func @transform_3(%arg0: i32, %arg1: i32) -> (i32, i32) {
    %c0_i32 = arith.constant 0 : i32
    %c0_i32_0 = arith.constant 0 : i32
    %c0_i32_1 = arith.constant 0 : i32
    return %c0_i32, %c0_i32_0 : i32, i32
  }
  func.func @transform_4(%arg0: i32, %arg1: i32) -> (i32, i32) {
    %c0_i32 = arith.constant 0 : i32
    %c0_i32_0 = arith.constant 0 : i32
    %c0_i32_1 = arith.constant 0 : i32
    return %c0_i32, %c0_i32_0 : i32, i32
  }
  func.func @transform_5(%arg0: i32, %arg1: i32) -> (i32, i32) {
    %c0_i32 = arith.constant 0 : i32
    %c0_i32_0 = arith.constant 0 : i32
    %c0_i32_1 = arith.constant 0 : i32
    return %c0_i32, %c0_i32_0 : i32, i32
  }
  func.func @transform_6(%arg0: i32, %arg1: i32) -> (i32, i32) {
    %c0_i32 = arith.constant 0 : i32
    %c0_i32_0 = arith.constant 0 : i32
    %c0_i32_1 = arith.constant 0 : i32
    return %c0_i32, %c0_i32_0 : i32, i32
  }
  func.func @transform_7(%arg0: i32, %arg1: i32) -> (i32, i32) {
    %c0_i32 = arith.constant 0 : i32
    %c0_i32_0 = arith.constant 0 : i32
    %c0_i32_1 = arith.constant 0 : i32
    return %c0_i32, %c0_i32_0 : i32, i32
  }
  func.func @transform_8(%arg0: i32, %arg1: i32) -> (i32, i32) {
    %c0_i32 = arith.constant 0 : i32
    %c0_i32_0 = arith.constant 0 : i32
    %c0_i32_1 = arith.constant 0 : i32
    return %c0_i32, %c0_i32_0 : i32, i32
  }
  func.func @transform_9(%arg0: i32, %arg1: i32) -> (i32, i32) {
    %c0_i32 = arith.constant 0 : i32
    %c0_i32_0 = arith.constant 0 : i32
    %c0_i32_1 = arith.constant 0 : i32
    return %c0_i32, %c0_i32_0 : i32, i32
  }
  func.func @transform_10(%arg0: i32, %arg1: i32) -> (i32, i32) {
    %c0_i32 = arith.constant 0 : i32
    %c0_i32_0 = arith.constant 0 : i32
    %c0_i32_1 = arith.constant 0 : i32
    return %c0_i32, %c0_i32_0 : i32, i32
  }
  func.func @transform_11(%arg0: i32, %arg1: i32) -> (i32, i32, i32) {
    %c0_i32 = arith.constant 0 : i32
    %c0_i32_0 = arith.constant 0 : i32
    return %arg0, %arg1, %c0_i32 : i32, i32, i32
  }
}

</mosaic_0001>

<bundles_post_ra>
// kernel: tpu_custom_call.1
= control target key start
LH: loop header
LB: loop body
LE: loop exit
PB: predicated region body
PF: predicated region fallthrough
CT: control target
= control target key end

     0   :  { %s5390_s0 = inlined_call_operand.hbm [shape: f32[2,256,256], index: 0, kind: input, shape index: {}]   ;;  %s5391_s1 = inlined_call_operand.hbm [shape: f32[2,128,256], index: 1, kind: input, shape index: {}]   ;;  %s5392_s2 = inlined_call_operand.hbm [shape: f32[2,128,256], index: 2, kind: input, shape index: {}]   ;;  %s5393_s3 = inlined_call_operand.hbm [shape: bf16[256,256], index: 3, kind: input, shape index: {}]   ;;  %s5394_s4 = inlined_call_operand.vmem [shape: f32[1,256], index: 4, kind: input, shape index: {}]   ;;  %s5395_s5 = inlined_call_operand.hbm [shape: bf16[256,256], index: 5, kind: input, shape index: {}]   ;;  %s5396_s6 = inlined_call_operand.vmem [shape: f32[1,256], index: 6, kind: input, shape index: {}]   ;;  %s5397_s7 = inlined_call_operand.hbm [shape: bf16[256,256], index: 7, kind: input, shape index: {}]   ;;  %s5398_s8 = inlined_call_operand.vmem [shape: f32[1,256], index: 8, kind: input, shape index: {}]   ;;  %s5399_s9 = inlined_call_operand.hbm [shape: bf16[256,256], index: 9, kind: input, shape index: {}]   ;;  %s5400_s10 = inlined_call_operand.vmem [shape: f32[1,256], index: 10, kind: input, shape index: {}]   ;;  %s5401_s11 = inlined_call_operand.hbm [shape: f32[2,256,256], index: 11, kind: output, shape index: {}]  }
   0x1   :  { %5433 = sst [smem:[#allocation30_spill]] %s5390_s0 }
   0x2   :  { %5434 = sst [smem:[#allocation31_spill]] %s5391_s1 }
   0x3   :  { %5435 = sst [smem:[#allocation32_spill]] %s5393_s3 }
   0x4   :  { %5436 = sst [smem:[#allocation33_spill]] %s5394_s4 }
   0x5   :  { %5437 = sst [smem:[#allocation34_spill]] %s5395_s5 }
   0x6   :  { %5438 = sst [smem:[#allocation35_spill]] %s5396_s6 }
   0x7   :  { %5439 = sst [smem:[#allocation36_spill]] %s5397_s7 }
   0x8   :  { %5440 = sst [smem:[#allocation37_spill]] %s5398_s8 }
   0x9   :  { %5441 = sst [smem:[#allocation38_spill]] %s5399_s9 }
   0xa   :  { %5442 = sst [smem:[#allocation39_spill]] %s5400_s10 }
   0xb   :  { %5443 = sst [smem:[#allocation40_spill]] %s5401_s11 }
   0xc   :  { %16 = vsyncpa [#allocation5], 0 }
   0xd   :  { %18 = vsyncpa [#allocation5 + $0x1], 0 }
   0xe   :  { %19 = vsyncpa [#allocation8], 0 }
   0xf   :  { %21 = vsyncpa [#allocation8 + $0x1], 0 }
  0x10   :  { %22 = vsyncpa [#allocation11], 0 }
  0x11   :  { %23 = vsyncpa [#allocation14], 0 }
  0x12   :  { %24 = vsyncpa [#allocation6], 0 }
  0x13   :  { %26 = vsyncpa [#allocation6 + $0x1], 0  ;;  %s4301_s17 = smov 0   ;;  %s4303_s18 = smov 0  }
  0x14   :  { %s4305_s19 = smov 0   ;;  %s4307_s20 = smov 0  }
  0x15   :  { %s4309_s21 = smov 0   ;;  %s4311_s22 = smov 0  }
  0x16   :  { %s4313_s23 = smov 0   ;;  %s4315_s24 = smov 0  }
  0x17   :  { %s4317_s25 = smov 0   ;;  %s4319_s26 = smov 0  }
  0x18   :  { %s4321_s27 = smov 0  }
  0x19 LB: > { %5444 = sst [smem:[#allocation22_spill]] %s4189_s18  ;;  %s4357_s28 = sadd.s32 4294967295, %s4225_s27   ;;  %s4225_s27 = sphi %s4321_s27, %s32_s27   ;;  %s4221_s26 = sphi %s4319_s26, %s5517_s26   ;;  %s4217_s25 = sphi %s4317_s25, %s5516_s25   ;;  %s4213_s24 = sphi %s4315_s24, %s5515_s24   ;;  %s4209_s23 = sphi %s4313_s23, %s5514_s23   ;;  %s4205_s22 = sphi %s4311_s22, %s5513_s22   ;;  %s4201_s21 = sphi %s4309_s21, %s5512_s21   ;;  %s4197_s20 = sphi %s4307_s20, %s5511_s20   ;;  %s4193_s19 = sphi %s4305_s19, %s5510_s19   ;;  %s4189_s18 = sphi %s4303_s18, %s5509_s18   ;;  %s4185_s17 = sphi %s4301_s17, %s5505_s17  }
  0x1a   : > { %5445 = sst [smem:[#allocation23_spill]] %s4193_s19  ;;  %p3052_p0 = scmp.ge.s32.totalorder %s4225_s27, 1 }
  0x1b   : > { %5446 = sst [smem:[#allocation24_spill]] %s4209_s23  ;;  %p5403_p1 = scmp.eq.s32.totalorder %s4357_s28, 0 }
  0x1c   : > { %5447 = sst [smem:[#allocation25_spill]] %s4213_s24  ;;  %p325_p2 = scmp.lt.s32.totalorder %s4225_s27, 5 }
  0x1d   : > { %s4227_s30 = smov [#allocation10]   ;;  %s4228_s14 = smov [#allocation13]  }
  0x1e   : > { %p4362_p3 = pnand %p3052_p0, %p325_p2  ;;  %s337_s12 = sshll.u32 %s4227_s30, 4  ;;  %s338_s12 = int_to_ptr.vmem [resolvable:$true] %s337_s12 }
  0x1f   : > { %s369_s15 = sshll.u32 %s4228_s14, 4  ;;  %s5451_s3 = sld [smem:[#allocation32_spill]]  ;;  %s4374_s15 = int_to_ptr.vmem [resolvable:$true] %s369_s15 }
  0x20   : > { %s5448_s29 = scalar_select %p4362_p3, 1, 0 }
  0x21   : > { %p3434_p4 = pneg %p4362_p3 }
  0x22   : > { %5449 = sst [smem:[#allocation26_spill]] %s5448_s29 }
  0x23   : > { %p4370_p5 = pnand %p3434_p4, %p5403_p1 }
  0x25   : > { %s5450_s13 = scalar_select %p4370_p5, 1, 0 }
  0x26   : > { %s3889_s24 = scalar_lea.hbm %s5451_s3, 4096  ;;  %p4384_p7 = pneg %p4370_p5 }
  0x27   : > { %p3890_p6 = scmp.ne.s32.totalorder %s5451_s3, %s3889_s24  ;;  %p3896_p10 = scmp.lt.u32.totalorder %s3889_s24, %s5451_s3 }
  0x29   : > { %p3892_p8 = pnand %p4384_p7, %p3890_p6 }
  0x2b   : > { %p3893_p9 = pneg %p3892_p8 }
  0x2d   : > { %p3898_p11 = pnand %p3896_p10, %p3893_p9 }
  0x2f   : > { %3901 = shalt.err (!%p3898_p11)
}
  0x30   : > { %s3902_s11 = scalar_lea.vmem %s338_s12, 4096  ;;  %p3910_p2 = scmp.lt.s32.totalorder %s338_s12, %s338_s12 }
  0x31   : > { %p3903_p12 = scmp.ne.s32.totalorder %s338_s12, %s3902_s11  ;;  %p3911_p4 = scmp.lt.s32.totalorder %s3902_s11, %s3902_s11 }
  0x33   : > { %p3905_p13 = pnand %p3903_p12, %p4384_p7  ;;  %p3912_p1 = por %p3911_p4, %p3910_p2 }
  0x35   : > { %p3906_p0 = pneg %p3905_p13 }
  0x37   : > { %p3913_p3 = pnand %p3912_p1, %p3906_p0 }
  0x39   : > { %3916 = shalt.err (!%p3913_p3)
}
  0x3a   : > { %s5407_s4 = smov 128   ;;  %s5409_s10 = smov 8  }
  0x3b   : > { %3437 = dma.hbm_to_vmem [thread:$0]  (!%p4370_p5), %s5451_s3, 4096, %s338_s12, [#allocation11], %s5407_s4, %s5407_s4, %s5409_s10  }
  0x3c   : > { %s5453_s7 = sld [smem:[#allocation36_spill]] }
  0x42   : > { %s3917_s6 = scalar_lea.hbm %s5453_s7, 4096 }
  0x43   : > { %p3918_p1 = scmp.ne.s32.totalorder %s5453_s7, %s3917_s6  ;;  %p3924_p8 = scmp.lt.u32.totalorder %s3917_s6, %s5453_s7 }
  0x45   : > { %p3920_p3 = pnand %p3918_p1, %p4384_p7 }
  0x47   : > { %p3921_p6 = pneg %p3920_p3 }
  0x49   : > { %p3926_p9 = pnand %p3924_p8, %p3921_p6 }
  0x4b   : > { %3929 = shalt.err (!%p3926_p9)
}
  0x4c   : > { %s3930_s12 = scalar_lea.vmem %s4374_s15, 4096  ;;  %p3938_p13 = scmp.lt.s32.totalorder %s4374_s15, %s4374_s15 }
  0x4d   : > { %p3931_p10 = scmp.ne.s32.totalorder %s4374_s15, %s3930_s12  ;;  %p3939_p0 = scmp.lt.s32.totalorder %s3930_s12, %s3930_s12 }
  0x4f   : > { %p3933_p11 = pnand %p3931_p10, %p4384_p7  ;;  %p3940_p2 = por %p3939_p0, %p3938_p13 }
  0x51   : > { %p3934_p12 = pneg %p3933_p11 }
  0x53   : > { %p3941_p4 = pnand %p3940_p2, %p3934_p12 }
  0x55   : > { %3944 = shalt.err (!%p3941_p4)
}
  0x56   : > { %3443 = dma.hbm_to_vmem [thread:$0]  (!%p4370_p5), %s5453_s7, 4096, %s4374_s15, [#allocation14], %s5407_s4, %s5407_s4, %s5409_s10  }
  0x57   : > { %p5413_p3 = scmp.eq.s32.totalorder %s4225_s27, 0  ;;  %p86_p6 = scmp.ne.s32.totalorder %s4193_s19, %s4189_s18 }
  0x58   : > { %p92_p8 = scmp.ne.s32.totalorder %s4189_s18, %s4185_s17  ;;  %p5412_p9 = scmp.lt.s32.totalorder %s4225_s27, 4 }
  0x59   : > { %p88_p10 = por %p86_p6, %p5413_p3  ;;  %p5454_p11 = scmp.eq.s32.totalorder %s4357_s28, 0 }
  0x5a   : > { %s426_s8 = sand.u32 1, %s4225_s27   ;;  %s428_s24 = sand.u32 1, %s4193_s19  }
  0x5b   : > { %p4441_p12 = por %p92_p8, %p5454_p11  ;;  %s4447_s16 = sshll.u32 %s428_s24, 8 }
  0x5c   : > { %s5411_s15 = sshll.u32 %s4221_s26, 12  ;;  %s5457_s1 = sld [smem:[#allocation31_spill]] }
  0x5d   : > { %s5455_s29 = scalar_select %p4441_p12, 1, 0 }
  0x5e   : > { %s430_s17 = scalar_lea.vmem [#allocation7], %s4447_s16  ;;  %p4460_p13 = pnand %p5412_p9, %p88_p10 }
  0x5f   : > { %5456 = sst [smem:[#allocation27_spill]] %s5455_s29  ;;  %s437_s0 = sshll.u32 %s430_s17, 4  ;;  %s4465_s0 = int_to_ptr.vmem [resolvable:$true] %s437_s0 }
  0x60   : > { %s5458_s6 = scalar_select %p4460_p13, 1, 0 }
  0x61   : > { %s4467_s23 = scalar_lea.sflag [#allocation8], %s426_s8  ;;  %p5424_p2 = pneg %p4460_p13 }
  0x62   : > { %s4455_s12 = scalar_lea.hbm %s5457_s1, %s5411_s15  ;;  %5459 = sst [smem:[#allocation28_spill]] %s5458_s6 }
  0x63   : > { %s3945_s14 = scalar_lea.hbm %s4455_s12, 4096  ;;  %s3950_s4 = scalar_lea.hbm %s5457_s1, 8192 }
  0x64   : > { %p3946_p0 = scmp.ne.s32.totalorder %s4455_s12, %s3945_s14  ;;  %p3951_p8 = scmp.lt.u32.totalorder %s4455_s12, %s5457_s1 }
  0x65   : > { %p3952_p10 = scmp.lt.u32.totalorder %s3950_s4, %s3945_s14  ;;  %p3954_p9 = scmp.lt.u32.totalorder %s3945_s14, %s4455_s12 }
  0x66   : > { %p3948_p4 = pnand %p5424_p2, %p3946_p0 }
  0x67   : > { %p3953_p11 = por %p3952_p10, %p3951_p8 }
  0x68   : > { %p3949_p6 = pneg %p3948_p4 }
  0x69   : > { %p3955_p1 = por %p3954_p9, %p3953_p11 }
  0x6b   : > { %p3956_p3 = pnand %p3955_p1, %p3949_p6 }
  0x6d   : > { %3959 = shalt.err (!%p3956_p3)
}
  0x6e   : > { %s3960_s8 = scalar_lea.vmem %s4465_s0, 4096  ;;  %s4231_s11 = smov [#allocation7]  }
  0x6f   : > { %p3961_p0 = scmp.ne.s32.totalorder %s4465_s0, %s3960_s8  ;;  %s3965_s17 = sshll.u32 %s4231_s11, 4  ;;  %s3966_s17 = int_to_ptr.vmem [resolvable:$false] %s3965_s17 }
  0x70   : > { %s3967_s10 = scalar_lea.vmem %s3966_s17, 8192  ;;  %p3968_p5 = scmp.lt.s32.totalorder %s4465_s0, %s3966_s17 }
  0x71   : > { %p3963_p4 = pnand %p3961_p0, %p5424_p2  ;;  %p3969_p8 = scmp.lt.s32.totalorder %s3967_s10, %s3960_s8 }
  0x73   : > { %p3964_p12 = pneg %p3963_p4  ;;  %p3970_p10 = por %p3969_p8, %p3968_p5 }
  0x75   : > { %p3971_p9 = pnand %p3970_p10, %p3964_p12 }
  0x77   : > { %3974 = shalt.err (!%p3971_p9)
}
  0x78   : > { %s5427_s4 = smov 256   ;;  %s5429_s15 = smov 16  }
  0x79   : > { %3453 = dma.hbm_to_vmem [thread:$0]  (!%p4460_p13), %s4455_s12, 4096, %s4465_s0, %s4467_s23, %s5427_s4, %s5427_s4, %s5429_s15  }
  0x7a   : > { %s5460_s14 = sshll.u32 %s4221_s26, 12  ;;  %s451_s10 = scalar_lea.vmem [#allocation9], %s4447_s16 }
  0x7b   : > { %s4503_s17 = scalar_lea.hbm %s5392_s2, %s5460_s14  ;;  %s4506_s24 = sshll.u32 %s451_s10, 4  ;;  %s4612_s24 = int_to_ptr.vmem [resolvable:$true] %s4506_s24 }
  0x7c   : > { %s4234_s1 = smov [#allocation12]   ;;  %s5461_s5 = sld [smem:[#allocation34_spill]] }
  0x7d   : > { %s353_s3 = sshll.u32 %s4234_s1, 4  ;;  %s354_s3 = int_to_ptr.vmem [resolvable:$true] %s353_s3 }
  0x82   : > { %s3975_s18 = scalar_lea.hbm %s5461_s5, 4096 }
  0x83   : > { %p3976_p5 = scmp.ne.s32.totalorder %s5461_s5, %s3975_s18  ;;  %p3982_p12 = scmp.lt.u32.totalorder %s3975_s18, %s5461_s5 }
  0x85   : > { %p3978_p1 = pnand %p3976_p5, %p4384_p7 }
  0x87   : > { %p3979_p3 = pneg %p3978_p1 }
  0x89   : > { %p3984_p6 = pnand %p3982_p12, %p3979_p3 }
  0x8b   : > { %3987 = shalt.err (!%p3984_p6)
}
  0x8c   : > { %s3988_s16 = scalar_lea.vmem %s354_s3, 4096  ;;  %p3996_p8 = scmp.lt.s32.totalorder %s354_s3, %s354_s3 }
  0x8d   : > { %p3989_p11 = scmp.ne.s32.totalorder %s354_s3, %s3988_s16  ;;  %p3997_p10 = scmp.lt.s32.totalorder %s3988_s16, %s3988_s16 }
  0x8f   : > { %p3991_p0 = pnand %p3989_p11, %p4384_p7  ;;  %p3998_p9 = por %p3997_p10, %p3996_p8 }
  0x91   : > { %p3992_p4 = pneg %p3991_p0 }
  0x93   : > { %p3999_p2 = pnand %p3998_p9, %p3992_p4 }
  0x95   : > { %4002 = shalt.err (!%p3999_p2)
}
  0x96   : > { %p5462_p5 = scmp.ne.s32.totalorder %s5450_s13, 0  ;;  %s5463_s1 = smov 8  }
  0x97   : > { %s5464_s7 = smov 128   ;;  %s4235_s29 = smov [#allocation15]  }
  0x98   : > { %3440 = dma.hbm_to_vmem [thread:$0]  (!%p5462_p5), %s5461_s5, 4096, %s354_s3, [#allocation11], %s5464_s7, %s5464_s7, %s5463_s1  }
  0x99   : > { %s385_s6 = sshll.u32 %s4235_s29, 4  ;;  %s5465_s9 = sld [smem:[#allocation38_spill]]  ;;  %s386_s6 = int_to_ptr.vmem [resolvable:$true] %s385_s6 }
  0x9f   : > { %s4003_s8 = scalar_lea.hbm %s5465_s9, 4096 }
  0xa0   : > { %p4004_p2 = scmp.ne.s32.totalorder %s5465_s9, %s4003_s8  ;;  %p4010_p12 = scmp.lt.u32.totalorder %s4003_s8, %s5465_s9 }
  0xa2   : > { %p4006_p1 = pnand %p4004_p2, %p4384_p7 }
  0xa4   : > { %p4007_p3 = pneg %p4006_p1 }
  0xa6   : > { %p4012_p6 = pnand %p4010_p12, %p4007_p3 }
  0xa8   : > { %4015 = shalt.err (!%p4012_p6)
}
  0xa9   : > { %s4016_s3 = scalar_lea.vmem %s386_s6, 4096  ;;  %p4024_p8 = scmp.lt.s32.totalorder %s386_s6, %s386_s6 }
  0xaa   : > { %p4017_p11 = scmp.ne.s32.totalorder %s386_s6, %s4016_s3  ;;  %p4025_p10 = scmp.lt.s32.totalorder %s4016_s3, %s4016_s3 }
  0xac   : > { %p4019_p0 = pnand %p4017_p11, %p4384_p7  ;;  %p4026_p9 = por %p4025_p10, %p4024_p8 }
  0xae   : > { %p4020_p4 = pneg %p4019_p0 }
  0xb0   : > { %p4027_p13 = pnand %p4026_p9, %p4020_p4 }
  0xb2   : > { %4030 = shalt.err (!%p4027_p13)
}
  0xb3   : > { %3446 = dma.hbm_to_vmem [thread:$0]  (!%p5462_p5), %s5465_s9, 4096, %s386_s6, [#allocation14], %s5464_s7, %s5464_s7, %s5463_s1  }
  0xb4   : > { %s3051_s13 = sadd.s32 4294967294, %s4225_s27   ;;  %s41_s30 = sadd.s32 1, %s4217_s25 }
  0xb5   : > { %p42_p7 = scmp.ge.s32.totalorder %s41_s30, 2  ;;  %s53_s29 = sadd.s32 1, %s4205_s22 }
  0xb6   : > { %p60_p13 = scmp.ne.s32.totalorder %s4205_s22, %s4201_s21  ;;  %p66_p2 = scmp.ne.s32.totalorder %s4201_s21, %s4197_s20 }
  0xb7   : > { %s5519_s30 = smov (%p42_p7, %s41_s30), 0  ;;  %s5467_s14 = sadd.s32 1, %s4221_s26 }
  0xb8   : > { %5466 = sst [smem:[#allocation29_spill]] %s5519_s30  ;;  %s5468_s11 = sld [smem:[#allocation23_spill]] }
  0xb9   : > { %s5521_s14 = smov (!%p42_p7, %s5467_s14), %s4221_s26  ;;  %s49_s8 = ssub.s32 %s4217_s25, %s5519_s30 }
  0xba   : > { %p5469_p1 = scmp.eq.s32.totalorder %s4225_s27, 0  ;;  %p46_p3 = scmp.ge.s32.totalorder %s5521_s14, 2 }
  0xbb   : > { %p5471_p12 = scmp.eq.s32.totalorder %s4357_s28, 0  ;;  %p5473_p11 = scmp.eq.s32.totalorder %s4357_s28, 3 }
  0xbc   : > { %p4566_p5 = por %p5469_p1, %p60_p13  ;;  %p318_p4 = scmp.eq.s32.totalorder %s3051_s13, 3 }
  0xbd   : > { %p4572_p6 = por %p5471_p12, %p66_p2  ;;  %p4578_p0 = por %p5473_p11, %p60_p13 }
  0xbe   : > { %s5523_s14 = smov (%p46_p3, %s5521_s14), 0  ;;  %p4584_p8 = por %p318_p4, %p66_p2 }
  0xbf   : > { %s5474_s6 = scalar_select %p4578_p0, 1, 0 }
  0xc0   : > { %s5475_s10 = scalar_select %p4584_p8, 1, 0 }
  0xc1   : > { %s402_s12 = sand.u32 1, %s4205_s22   ;;  %s48_s0 = ssub.s32 %s4221_s26, %s5523_s14 }
  0xc2   : > { %s50_s16 = sor.u32 %s49_s8, %s48_s0  ;;  %p77_p10 = scmp.eq.s32.totalorder %s48_s0, 0 }
  0xc3   : > { %p51_p9 = scmp.eq.s32.totalorder %s50_s16, 0  ;;  %s3058_s3 = sshll.u32 %s402_s12, 8 }
  0xc4   : > { %s5476_s19 = sadd.s32 1, %s5468_s11  ;;  %s3214_s13 = sshll.u32 %s4217_s25, 5 }
  0xc5   : > { %s5525_s11 = smov (!%p77_p10, %s5468_s11), %s5476_s19  ;;  %s3061_s4 = sshll.u32 %s4221_s26, 6 }
  0xc6   : > { %s4597_s18 = scalar_select %p51_p9, %s4205_s22, %s53_s29  }
  0xc7   : > { %s406_s15 = scalar_lea.vmem [#allocation4], %s3058_s3  ;;  %s413_s9 = sadd.s32 %s3214_s13, %s3061_s4 }
  0xc8   : > { %s416_s5 = sshll.u32 %s406_s15, 4  ;;  %s3062_s30 = sshll.u32 %s413_s9, 7  ;;  %s4601_s5 = int_to_ptr.vmem [resolvable:$true] %s416_s5 }
  0xc9   : > { %p5477_p7 = scmp.lt.s32.totalorder %s4225_s27, 4  ;;  %s5479_s16 = sld [smem:[#allocation30_spill]] }
  0xca   : > { %s4619_s9 = scalar_lea.sflag [#allocation5], %s402_s12 }
  0xcb   : > { %p4607_p13 = pnand %p5477_p7, %p4566_p5 }
  0xcd   : > { %p4033_p1 = pneg %p4607_p13 }
  0xcf   : > { %s4617_s19 = scalar_lea.hbm %s5479_s16, %s3062_s30  ;;  %s4036_s3 = scalar_lea.hbm %s5479_s16, 16384 }
  0xd0   : > { %s4031_s4 = scalar_lea.hbm %s4617_s19, 4096  ;;  %p4037_p12 = scmp.lt.u32.totalorder %s4617_s19, %s5479_s16 }
  0xd1   : > { %p4032_p2 = scmp.ne.s32.totalorder %s4617_s19, %s4031_s4  ;;  %p4038_p11 = scmp.lt.u32.totalorder %s4036_s3, %s4031_s4 }
  0xd2   : > { %p4040_p10 = scmp.lt.u32.totalorder %s4031_s4, %s4617_s19 }
  0xd3   : > { %p4034_p5 = pnand %p4033_p1, %p4032_p2  ;;  %p4039_p4 = por %p4038_p11, %p4037_p12 }
  0xd5   : > { %p4035_p3 = pneg %p4034_p5  ;;  %p4041_p9 = por %p4040_p10, %p4039_p4 }
  0xd7   : > { %p4042_p7 = pnand %p4041_p9, %p4035_p3 }
  0xd9   : > { %4045 = shalt.err (!%p4042_p7)
}
  0xda   : > { %s4046_s12 = scalar_lea.vmem %s4601_s5, 4096  ;;  %s4236_s29 = smov [#allocation4]  }
  0xdb   : > { %p4047_p2 = scmp.ne.s32.totalorder %s4601_s5, %s4046_s12  ;;  %s4051_s0 = sshll.u32 %s4236_s29, 4  ;;  %s4052_s0 = int_to_ptr.vmem [resolvable:$false] %s4051_s0 }
  0xdc   : > { %s4053_s15 = scalar_lea.vmem %s4052_s0, 8192  ;;  %p4054_p0 = scmp.lt.s32.totalorder %s4601_s5, %s4052_s0 }
  0xdd   : > { %p4049_p5 = pnand %p4047_p2, %p4033_p1  ;;  %p4055_p12 = scmp.lt.s32.totalorder %s4053_s15, %s4046_s12 }
  0xdf   : > { %p4050_p8 = pneg %p4049_p5  ;;  %p4056_p11 = por %p4055_p12, %p4054_p0 }
  0xe1   : > { %p4057_p4 = pnand %p4056_p11, %p4050_p8 }
  0xe3   : > { %4060 = shalt.err (!%p4057_p4)
}
  0xe4   : > { %s5480_s4 = smov 16   ;;  %s5481_s1 = smov 256  }
  0xe5   : > { %s5482_s3 = sld [smem:[#allocation28_spill]]  ;;  %s4061_s30 = scalar_lea.hbm %s4503_s17, 4096 }
  0xe6   : > { %3450 = dma.hbm_to_vmem [thread:$0]  (!%p4607_p13), %s4617_s19, 4096, %s4601_s5, %s4619_s9, %s5481_s1, %s5481_s1, %s5480_s4  }
  0xe7   : > { %p4062_p1 = scmp.ne.s32.totalorder %s4503_s17, %s4061_s30  ;;  %s4066_s12 = scalar_lea.hbm %s5392_s2, 8192 }
  0xe8   : > { %p4067_p9 = scmp.lt.u32.totalorder %s4503_s17, %s5392_s2  ;;  %p4068_p7 = scmp.lt.u32.totalorder %s4066_s12, %s4061_s30 }
  0xe9   : > { %p4070_p5 = scmp.lt.u32.totalorder %s4061_s30, %s4503_s17 }
  0xea   : > { %p4069_p2 = por %p4068_p7, %p4067_p9 }
  0xeb   : > { %p5483_p3 = scmp.ne.s32.totalorder %s5482_s3, 0 }
  0xec   : > { %p4071_p12 = por %p4070_p5, %p4069_p2 }
  0xed   : > { %p5484_p0 = pneg %p5483_p3 }
  0xef   : > { %p4064_p8 = pnand %p4062_p1, %p5484_p0 }
  0xf1   : > { %p4065_p10 = pneg %p4064_p8 }
  0xf3   : > { %p4072_p11 = pnand %p4071_p12, %p4065_p10 }
  0xf5   : > { %4075 = shalt.err (!%p4072_p11)
}
  0xf6   : > { %s4076_s5 = scalar_lea.vmem %s4612_s24, 4096  ;;  %p5485_p4 = pmov %p5484_p0 }
  0xf7   : > { %p4077_p13 = scmp.ne.s32.totalorder %s4612_s24, %s4076_s5  ;;  %s4237_s19 = smov [#allocation9]  }
  0xf8   : > { %s4081_s9 = sshll.u32 %s4237_s19, 4  ;;  %s4082_s9 = int_to_ptr.vmem [resolvable:$false] %s4081_s9 }
  0xf9   : > { %p4079_p1 = pnand %p4077_p13, %p5485_p4  ;;  %s4083_s15 = scalar_lea.vmem %s4082_s9, 8192 }
  0xfa   : > { %p4084_p8 = scmp.lt.s32.totalorder %s4612_s24, %s4082_s9  ;;  %p4085_p9 = scmp.lt.s32.totalorder %s4083_s15, %s4076_s5 }
  0xfb   : > { %p4080_p0 = pneg %p4079_p1 }
  0xfc   : > { %p4086_p7 = por %p4085_p9, %p4084_p8 }
  0xfe   : > { %p4087_p2 = pnand %p4086_p7, %p4080_p0 }
 0x100   : > { %4090 = shalt.err (!%p4087_p2)
}
 0x101   : > { %3456 = dma.hbm_to_vmem [thread:$0]  (!%p5483_p3), %s4503_s17, 4096, %s4612_s24, %s4467_s23, %s5481_s1, %s5481_s1, %s5480_s4  }
 0x102   : > { %s5486_s30 = sld [smem:[#allocation26_spill]] }
 0x108   : > { %p5487_p10 = scmp.ne.s32.totalorder %s5486_s30, 0 }
 0x109   : > { %s4680_s13 = sand.u32 (!%p5487_p10), 1, %s4201_s21  }
 0x10a   : > { %470 = sbr.rel (%p5487_p10) target bundleno = 1874 (0x752), region = 64  ;;  %s3070_s8 = sshll.u32 (!%p5487_p10), %s4680_s13, 8 }
 0x10b   : > { %s473_s12 = scalar_lea.sflag (!%p5487_p10), [#allocation5], %s4680_s13  ;;  %s4684_s29 = scalar_lea.vmem (!%p5487_p10), [#allocation4], %s3070_s8 }
 0x111   : > { %4164 = dma.done.wait (%p4572_p6), %s473_s12, 4096  }
 0x112   : > { %4166 = vsyncadd (%p4572_p6), %s473_s12, 4294963200  ;;  %s5488_s23 = sld [smem:[#allocation22_spill]]  ;;  %s5489_s24 = sld [smem:[#allocation27_spill]] }
 0x113   : > { %s481_s17 = sand.u32 1, %s4357_s28  }
 0x114   : > { %s482_s3 = scalar_lea.sflag [#allocation8], %s481_s17 }
 0x118   : > { %s483_s4 = sand.u32 1, %s5488_s23   ;;  %p5490_p3 = scmp.ne.s32.totalorder %s5489_s24, 0 }
 0x119   : > { %s3071_s1 = sshll.u32 %s483_s4, 8 }
 0x11a   : > { %s4692_s0 = scalar_lea.vmem [#allocation7], %s3071_s1 }
 0x11b   : > { %4168 = dma.done.wait (%p5490_p3), %s482_s3, 8192  }
 0x11c   : > { %4170 = vsyncadd (%p5490_p3), %s482_s3, 4294959104  ;;  %s4698_s5 = scalar_lea.vmem [#allocation9], %s3071_s1  ;;  %p5491_p5 = scmp.eq.s32.totalorder %s4357_s28, 0 }
 0x11e   : > { %4172 = dma.done.wait (%p5491_p5), [#allocation11], 8192   ;;  %p5492_p6 = pmov %p5491_p5 }
 0x11f   : > { %p5493_p12 = pmov %p5491_p5 }
 0x120   : > { %4174 = vsyncadd (%p5492_p6), [#allocation11], 4294959104 }
 0x121   : > { %4176 = dma.done.wait (%p5493_p12), [#allocation14], 8192   ;;  %p5494_p11 = pmov %p5491_p5 }
 0x122   : > { %s4708_s7 = scalar_lea.vmem [#allocation16], %s3070_s8  ;;  %s5495_s19 = sld [smem:[#allocation24_spill]] }
 0x123   : > { %4178 = vsyncadd (%p5494_p11), [#allocation14], 4294959104 }
 0x128   : > { %p3078_p13 = scmp.ne.s32.totalorder %s5495_s19, 0 }
 0x129   : > { %v3569_v0 = vld [vmem:[#allocation12 + $0x4] ss:$8 sps:$4 sm:$0xff] (!%p3078_p13)   ;;  %v3573_v2 = vld [vmem:[#allocation12] ss:$8 sps:$4 sm:$0xff] (!%p3078_p13)   ;;  %v3575_v4 = vld [vmem:[#allocation12 + $0x14] ss:$8 sps:$4 sm:$0xff] (!%p3078_p13)  }
 0x12a   : > { %565 = sbr.rel (%p3078_p13) target bundleno = 639 (0x27f), region = 96  ;;  %v3571_v1 = vld [vmem:[#allocation13 + $0x4] ss:$8 sps:$4 sm:$0xff] (!%p3078_p13)   ;;  %866 = vmatprep.subr.bf16.mxu0 (!%p3078_p13), %v3569_v0  ;;  %v3574_v3 = vld [vmem:[#allocation13] ss:$8 sps:$4 sm:$0xff] (!%p3078_p13)   ;;  %v569_v47 = vld [vmem:[%s4692_s0 + $0x18] sm:$0xff] (!%p3078_p13) }
 0x12b   : > { %1215 = vmatprep.subr.bf16.mxu1 (!%p3078_p13), %v3571_v1  ;;  %867 = vmatpush1.bf16.msra.mxu0 (!%p3078_p13), %v3573_v2  ;;  %v3577_v5 = vld [vmem:[#allocation13 + $0x14] ss:$8 sps:$4 sm:$0xff] (!%p3078_p13)   ;;  %v3579_v6 = vld [vmem:[#allocation12 + $0x10] ss:$8 sps:$4 sm:$0xff] (!%p3078_p13)   ;;  %v3581_v8 = vld [vmem:[#allocation12 + $0x24] ss:$8 sps:$4 sm:$0xff] (!%p3078_p13)  }
 0x12c   : > { %1216 = vmatpush1.bf16.msra.mxu1 (!%p3078_p13), %v3574_v3  ;;  %868 = vmatprep.subr.bf16.mxu0 (!%p3078_p13), %v3575_v4  ;;  %v3580_v7 = vld [vmem:[#allocation13 + $0x10] ss:$8 sps:$4 sm:$0xff] (!%p3078_p13)   ;;  %v3583_v9 = vld [vmem:[#allocation13 + $0x24] ss:$8 sps:$4 sm:$0xff] (!%p3078_p13)   ;;  %v3585_v10 = vld [vmem:[#allocation12 + $0x20] ss:$8 sps:$4 sm:$0xff] (!%p3078_p13)  }
 0x12d   : > { %1217 = vmatprep.subr.bf16.mxu1 (!%p3078_p13), %v3577_v5  ;;  %v3586_v11 = vld [vmem:[#allocation13 + $0x20] ss:$8 sps:$4 sm:$0xff] (!%p3078_p13)   ;;  %v3587_v12 = vld [vmem:[#allocation12 + $0x34] ss:$8 sps:$4 sm:$0xff] (!%p3078_p13)   ;;  %v3591_v14 = vld [vmem:[#allocation12 + $0x30] ss:$8 sps:$4 sm:$0xff] (!%p3078_p13)  }
 0x12e   : > { %v3589_v13 = vld [vmem:[#allocation13 + $0x34] ss:$8 sps:$4 sm:$0xff] (!%p3078_p13)   ;;  %v3592_v15 = vld [vmem:[#allocation13 + $0x30] ss:$8 sps:$4 sm:$0xff] (!%p3078_p13)   ;;  %v3593_v16 = vld [vmem:[#allocation12 + $0x44] ss:$8 sps:$4 sm:$0xff] (!%p3078_p13)  }
 0x12f   : > { %869 = vmatpush1.bf16.msra.mxu0 (!%p3078_p13), %v3579_v6  ;;  %v3595_v17 = vld [vmem:[#allocation13 + $0x44] ss:$8 sps:$4 sm:$0xff] (!%p3078_p13)   ;;  %v3597_v18 = vld [vmem:[#allocation12 + $0x40] ss:$8 sps:$4 sm:$0xff] (!%p3078_p13)   ;;  %v3599_v20 = vld [vmem:[#allocation12 + $0x54] ss:$8 sps:$4 sm:$0xff] (!%p3078_p13)  }
 0x130   : > { %1218 = vmatpush1.bf16.msra.mxu1 (!%p3078_p13), %v3580_v7  ;;  %870 = vmatprep.subr.bf16.mxu0 (!%p3078_p13), %v3581_v8  ;;  %v3598_v19 = vld [vmem:[#allocation13 + $0x40] ss:$8 sps:$4 sm:$0xff] (!%p3078_p13)   ;;  %v3601_v21 = vld [vmem:[#allocation13 + $0x54] ss:$8 sps:$4 sm:$0xff] (!%p3078_p13)   ;;  %v3603_v22 = vld [vmem:[#allocation12 + $0x50] ss:$8 sps:$4 sm:$0xff] (!%p3078_p13)  }
 0x131   : > { %1219 = vmatprep.subr.bf16.mxu1 %v3583_v9  ;;  %v3604_v23 = vld [vmem:[#allocation13 + $0x50] ss:$8 sps:$4 sm:$0xff]   ;;  %v3605_v24 = vld [vmem:[#allocation12 + $0x64] ss:$8 sps:$4 sm:$0xff]   ;;  %v3609_v26 = vld [vmem:[#allocation12 + $0x60] ss:$8 sps:$4 sm:$0xff]  }
 0x132   : > { %v3607_v25 = vld [vmem:[#allocation13 + $0x64] ss:$8 sps:$4 sm:$0xff]   ;;  %v3610_v27 = vld [vmem:[#allocation13 + $0x60] ss:$8 sps:$4 sm:$0xff]   ;;  %v3611_v28 = vld [vmem:[#allocation12 + $0x74] ss:$8 sps:$4 sm:$0xff]  }
 0x133   : > { %871 = vmatpush1.bf16.msra.mxu0 %v3585_v10  ;;  %v3613_v29 = vld [vmem:[#allocation13 + $0x74] ss:$8 sps:$4 sm:$0xff]   ;;  %v3615_v30 = vld [vmem:[#allocation12 + $0x70] ss:$8 sps:$4 sm:$0xff]   ;;  %v3617_v32 = vld [vmem:[#allocation12 + $0x84] ss:$8 sps:$4 sm:$0xff]  }
 0x134   : > { %1220 = vmatpush1.bf16.msra.mxu1 %v3586_v11  ;;  %872 = vmatprep.subr.bf16.mxu0 %v3587_v12  ;;  %v3616_v31 = vld [vmem:[#allocation13 + $0x70] ss:$8 sps:$4 sm:$0xff]   ;;  %v3619_v33 = vld [vmem:[#allocation13 + $0x84] ss:$8 sps:$4 sm:$0xff]   ;;  %v3621_v34 = vld [vmem:[#allocation12 + $0x80] ss:$8 sps:$4 sm:$0xff]  }
 0x135   : > { %1221 = vmatprep.subr.bf16.mxu1 %v3589_v13  ;;  %v3622_v35 = vld [vmem:[#allocation13 + $0x80] ss:$8 sps:$4 sm:$0xff]   ;;  %v3623_v36 = vld [vmem:[#allocation12 + $0x94] ss:$8 sps:$4 sm:$0xff]   ;;  %v3627_v38 = vld [vmem:[#allocation12 + $0x90] ss:$8 sps:$4 sm:$0xff]  }
 0x136   : > { %v3625_v37 = vld [vmem:[#allocation13 + $0x94] ss:$8 sps:$4 sm:$0xff]   ;;  %v3628_v39 = vld [vmem:[#allocation13 + $0x90] ss:$8 sps:$4 sm:$0xff]   ;;  %v3629_v40 = vld [vmem:[#allocation12 + $0xa4] ss:$8 sps:$4 sm:$0xff]  }
 0x137   : > { %873 = vmatpush1.bf16.msra.mxu0 %v3591_v14  ;;  %v3631_v41 = vld [vmem:[#allocation13 + $0xa4] ss:$8 sps:$4 sm:$0xff]   ;;  %v3633_v42 = vld [vmem:[#allocation12 + $0xa0] ss:$8 sps:$4 sm:$0xff]   ;;  %v3635_v44 = vld [vmem:[#allocation12 + $0xb4] ss:$8 sps:$4 sm:$0xff]  }
 0x138   : > { %1222 = vmatpush1.bf16.msra.mxu1 %v3592_v15  ;;  %874 = vmatprep.subr.bf16.mxu0 %v3593_v16  ;;  %v3634_v43 = vld [vmem:[#allocation13 + $0xa0] ss:$8 sps:$4 sm:$0xff]   ;;  %v3637_v45 = vld [vmem:[#allocation13 + $0xb4] ss:$8 sps:$4 sm:$0xff]   ;;  %v3639_v50 = vld [vmem:[#allocation12 + $0xb0] ss:$8 sps:$4 sm:$0xff]  }
 0x139   : > { %1223 = vmatprep.subr.bf16.mxu1 %v3595_v17  ;;  %v567_v46 = vld [vmem:[%s4692_s0 + $0x8] sm:$0xff]  ;;  %v617_v49 = vld [vmem:[%s4698_s5 + $0x18] sm:$0xff]  ;;  %v566_v6 = vld [vmem:[%s4692_s0] sm:$0xff]  ;;  %s5496_s15 = sld [smem:[#allocation35_spill]]  ;;  %s5497_s12 = sld [smem:[#allocation37_spill]] }
 0x13a   : > { %v615_v48 = vld [vmem:[%s4698_s5 + $0x8] sm:$0xff]  ;;  %v3640_v51 = vld [vmem:[#allocation13 + $0xb0] ss:$8 sps:$4 sm:$0xff]   ;;  %v599_v52 = vpack.c.bf16 %v569_v47, %v567_v46  ;;  %v3647_v58 = vld [vmem:[#allocation12 + $0xd4] ss:$8 sps:$4 sm:$0xff]  }
 0x13b   : > { %875 = vmatpush1.bf16.msra.mxu0 %v3597_v18  ;;  %v647_v53 = vpack.c.bf16 %v617_v49, %v615_v48  ;;  %v3641_v54 = vld [vmem:[#allocation12 + $0xc4] ss:$8 sps:$4 sm:$0xff]   ;;  %v3645_v56 = vld [vmem:[#allocation12 + $0xc0] ss:$8 sps:$4 sm:$0xff]   ;;  %v3649_v59 = vld [vmem:[#allocation13 + $0xd4] ss:$8 sps:$4 sm:$0xff]  }
 0x13c   : > { %1224 = vmatpush1.bf16.msra.mxu1 %v3598_v19  ;;  %876 = vmatprep.subr.bf16.mxu0 %v3599_v20  ;;  %v3643_v55 = vld [vmem:[#allocation13 + $0xc4] ss:$8 sps:$4 sm:$0xff]   ;;  %v3646_v57 = vld [vmem:[#allocation13 + $0xc0] ss:$8 sps:$4 sm:$0xff]   ;;  %v3651_v60 = vld [vmem:[#allocation12 + $0xd0] ss:$8 sps:$4 sm:$0xff]  }
 0x13d   : > { %1225 = vmatprep.subr.bf16.mxu1 %v3601_v21  ;;  %898 = vmatprep.mubr.bf16.mxu0 %v599_v52  ;;  %v3652_v61 = vld [vmem:[#allocation13 + $0xd0] ss:$8 sps:$4 sm:$0xff]   ;;  %v3653_v62 = vld [vmem:[#allocation12 + $0xe4] ss:$8 sps:$4 sm:$0xff]   ;;  %v3657_v0 = vld [vmem:[#allocation12 + $0xe0] ss:$8 sps:$4 sm:$0xff]  }
 0x13e   : > { %1247 = vmatprep.mubr.bf16.mxu1 %v647_v53  ;;  %v3655_v63 = vld [vmem:[#allocation13 + $0xe4] ss:$8 sps:$4 sm:$0xff]   ;;  %v3658_v1 = vld [vmem:[#allocation13 + $0xe0] ss:$8 sps:$4 sm:$0xff]   ;;  %v3659_v2 = vld [vmem:[#allocation12 + $0xf4] ss:$8 sps:$4 sm:$0xff]  }
 0x13f   : > { %877 = vmatpush1.bf16.msra.mxu0 %v3603_v22  ;;  %v3661_v3 = vld [vmem:[#allocation13 + $0xf4] ss:$8 sps:$4 sm:$0xff]   ;;  %v3663_v4 = vld [vmem:[#allocation12 + $0xf0] ss:$8 sps:$4 sm:$0xff]   ;;  %v614_v8 = vld [vmem:[%s4698_s5] sm:$0xff] }
 0x140   : > { %1226 = vmatpush1.bf16.msra.mxu1 %v3604_v23  ;;  %878 = vmatprep.subr.bf16.mxu0 %v3605_v24  ;;  %v3664_v5 = vld [vmem:[#allocation13 + $0xf0] ss:$8 sps:$4 sm:$0xff]   ;;  %v571_v10 = vld [vmem:[%s4692_s0 + $0x28] sm:$0xff]  ;;  %v570_v18 = vld [vmem:[%s4692_s0 + $0x20] sm:$0xff] }
 0x141   : > { %1227 = vmatprep.subr.bf16.mxu1 %v3607_v25  ;;  %v568_v7 = vld [vmem:[%s4692_s0 + $0x10] sm:$0xff]  ;;  %v573_v11 = vld [vmem:[%s4692_s0 + $0x38] sm:$0xff]  ;;  %v619_v12 = vld [vmem:[%s4698_s5 + $0x28] sm:$0xff] }
 0x142   : > { %v616_v9 = vld [vmem:[%s4698_s5 + $0x10] sm:$0xff]  ;;  %v621_v13 = vld [vmem:[%s4698_s5 + $0x38] sm:$0xff]  ;;  %v598_v14 = vpack.c.bf16 %v568_v7, %v566_v6  ;;  %v601_v16 = vpack.c.bf16 %v573_v11, %v571_v10  ;;  %v618_v20 = vld [vmem:[%s4698_s5 + $0x20] sm:$0xff] }
 0x143   : > { %879 = vmatpush1.bf16.msra.mxu0 %v3609_v26  ;;  %v646_v15 = vpack.c.bf16 %v616_v9, %v614_v8  ;;  %v649_v17 = vpack.c.bf16 %v621_v13, %v619_v12  ;;  %v572_v19 = vld [vmem:[%s4692_s0 + $0x30] sm:$0xff]  ;;  %v575_v22 = vld [vmem:[%s4692_s0 + $0x48] sm:$0xff]  ;;  %v577_v23 = vld [vmem:[%s4692_s0 + $0x58] sm:$0xff] }
 0x144   : > { %1228 = vmatpush1.bf16.msra.mxu1 %v3610_v27  ;;  %880 = vmatprep.subr.bf16.mxu0 %v3611_v28  ;;  %v620_v21 = vld [vmem:[%s4698_s5 + $0x30] sm:$0xff]  ;;  %v623_v24 = vld [vmem:[%s4698_s5 + $0x48] sm:$0xff]  ;;  %v625_v25 = vld [vmem:[%s4698_s5 + $0x58] sm:$0xff]  ;;  %v600_v26 = vpack.c.bf16 %v572_v19, %v570_v18  ;;  %v603_v28 = vpack.c.bf16 %v577_v23, %v575_v22 }
 0x145   : > { %1229 = vmatprep.subr.bf16.mxu1 %v3613_v29  ;;  %v648_v27 = vpack.c.bf16 %v620_v21, %v618_v20  ;;  %v651_v29 = vpack.c.bf16 %v625_v25, %v623_v24  ;;  %v583_v46 = vld [vmem:[%s4692_s0 + $0x88] sm:$0xff]  ;;  %v585_v47 = vld [vmem:[%s4692_s0 + $0x98] sm:$0xff] }
 0x146   : > { %v631_v48 = vld [vmem:[%s4698_s5 + $0x88] sm:$0xff]  ;;  %v633_v49 = vld [vmem:[%s4698_s5 + $0x98] sm:$0xff]  ;;  %v607_v52 = vpack.c.bf16 %v585_v47, %v583_v46 }
 0x147   : > { %881 = vmatpush1.bf16.msra.mxu0 %v3615_v30  ;;  %v574_v30 = vld [vmem:[%s4692_s0 + $0x40] sm:$0xff]  ;;  %v655_v53 = vpack.c.bf16 %v633_v49, %v631_v48  ;;  %v591_v6 = vld [vmem:[%s4692_s0 + $0xc8] sm:$0xff]  ;;  %v593_v7 = vld [vmem:[%s4692_s0 + $0xd8] sm:$0xff] }
 0x148   : > { %1230 = vmatpush1.bf16.msra.mxu1 %v3616_v31  ;;  %882 = vmatprep.subr.bf16.mxu0 %v3617_v32  ;;  %v576_v31 = vld [vmem:[%s4692_s0 + $0x50] sm:$0xff]  ;;  %v622_v32 = vld [vmem:[%s4698_s5 + $0x40] sm:$0xff]  ;;  %v639_v8 = vld [vmem:[%s4698_s5 + $0xc8] sm:$0xff]  ;;  %v611_v12 = vpack.c.bf16 %v593_v7, %v591_v6 }
 0x149   : > { %1231 = vmatprep.subr.bf16.mxu1 %v3619_v33  ;;  %v624_v33 = vld [vmem:[%s4698_s5 + $0x50] sm:$0xff]  ;;  %v641_v9 = vld [vmem:[%s4698_s5 + $0xd8] sm:$0xff]  ;;  %v595_v18 = vld [vmem:[%s4692_s0 + $0xe8] sm:$0xff] }
 0x14a   : > { %v659_v13 = vpack.c.bf16 %v641_v9, %v639_v8  ;;  %v597_v19 = vld [vmem:[%s4692_s0 + $0xf8] sm:$0xff]  ;;  %v643_v20 = vld [vmem:[%s4698_s5 + $0xe8] sm:$0xff] }
 0x14b   : > { %883 = vmatpush1.bf16.msra.mxu0 %v3621_v34  ;;  %v579_v34 = vld [vmem:[%s4692_s0 + $0x68] sm:$0xff]  ;;  %v645_v21 = vld [vmem:[%s4698_s5 + $0xf8] sm:$0xff]  ;;  %v613_v24 = vpack.c.bf16 %v597_v19, %v595_v18 }
 0x14c   : > { %1232 = vmatpush1.bf16.msra.mxu1 %v3622_v35  ;;  %884 = vmatprep.subr.bf16.mxu0 %v3623_v36  ;;  %v581_v35 = vld [vmem:[%s4692_s0 + $0x78] sm:$0xff]  ;;  %v627_v36 = vld [vmem:[%s4698_s5 + $0x68] sm:$0xff]  ;;  %v661_v25 = vpack.c.bf16 %v645_v21, %v643_v20 }
 0x14d   : > { %1233 = vmatprep.subr.bf16.mxu1 %v3625_v37  ;;  %v629_v37 = vld [vmem:[%s4698_s5 + $0x78] sm:$0xff] }
 0x14f   : > { %885 = vmatpush1.bf16.msra.mxu0 %v3627_v38  ;;  %v602_v38 = vpack.c.bf16 %v576_v31, %v574_v30 }
 0x150   : > { %1234 = vmatpush1.bf16.msra.mxu1 %v3628_v39  ;;  %886 = vmatprep.subr.bf16.mxu0 %v3629_v40  ;;  %v650_v39 = vpack.c.bf16 %v624_v33, %v622_v32  ;;  %v605_v40 = vpack.c.bf16 %v581_v35, %v579_v34  ;;  %v696_v32 = vlaneseq  ;;  %v694_v35 = vld [vmem:[%s5496_s15] sm:$0x3] }
 0x151   : > { %1235 = vmatprep.subr.bf16.mxu1 %v3631_v41  ;;  %v653_v41 = vpack.c.bf16 %v629_v37, %v627_v36  ;;  %v1043_v36 = vld [vmem:[%s5497_s12] sm:$0x3] }
 0x152   : > { %v697_v33 = vshrl.u32 %v696_v32, 7 }
 0x153   : > { %887 = vmatpush1.bf16.msra.mxu0 %v3633_v42  ;;  %v578_v42 = vld [vmem:[%s4692_s0 + $0x60] sm:$0xff] }
 0x154   : > { %1236 = vmatpush1.bf16.msra.mxu1 %v3634_v43  ;;  %888 = vmatprep.subr.bf16.mxu0 %v3635_v44  ;;  %v580_v43 = vld [vmem:[%s4692_s0 + $0x70] sm:$0xff]  ;;  %v626_v44 = vld [vmem:[%s4698_s5 + $0x60] sm:$0xff]  ;;  %v698_v34 = vsub.s32 0, %v697_v33  ;;  %v702_v37 = vsub.s32 1, %v697_v33 }
 0x155   : > { %1237 = vmatprep.subr.bf16.mxu1 %v3637_v45  ;;  %v628_v45 = vld [vmem:[%s4698_s5 + $0x70] sm:$0xff] }
 0x157   : > { %889 = vmatpush1.bf16.msra.mxu0 %v3639_v50  ;;  %v604_v50 = vpack.c.bf16 %v580_v43, %v578_v42  ;;  %v4785_v42 = vrot.slane %v694_v35, %v702_v37  ;;  %v4787_v43 = vrot.slane %v1043_v36, %v702_v37 }
 0x158   : > { %1238 = vmatpush1.bf16.msra.mxu1 %v3640_v51  ;;  %890 = vmatprep.subr.bf16.mxu0 %v3641_v54  ;;  %v652_v51 = vpack.c.bf16 %v628_v45, %v626_v44  ;;  %v582_v54 = vld [vmem:[%s4692_s0 + $0x80] sm:$0xff] }
 0x159   : > { %1239 = vmatprep.subr.bf16.mxu1 %v3643_v55  ;;  %v584_v55 = vld [vmem:[%s4692_s0 + $0x90] sm:$0xff] }
 0x15b   : > { %891 = vmatpush1.bf16.msra.mxu0 %v3645_v56  ;;  %v630_v56 = vld [vmem:[%s4698_s5 + $0x80] sm:$0xff] }
 0x15c   : > { %1240 = vmatpush1.bf16.msra.mxu1 %v3646_v57  ;;  %892 = vmatprep.subr.bf16.mxu0 %v3647_v58  ;;  %v632_v57 = vld [vmem:[%s4698_s5 + $0x90] sm:$0xff]  ;;  %v587_v58 = vld [vmem:[%s4692_s0 + $0xa8] sm:$0xff] }
 0x15d   : > { %1241 = vmatprep.subr.bf16.mxu1 %v3649_v59  ;;  %v589_v59 = vld [vmem:[%s4692_s0 + $0xb8] sm:$0xff] }
 0x15f   : > { %893 = vmatpush1.bf16.msra.mxu0 %v3651_v60  ;;  %v635_v60 = vld [vmem:[%s4698_s5 + $0xa8] sm:$0xff] }
 0x160   : > { %1242 = vmatpush1.bf16.msra.mxu1 %v3652_v61  ;;  %894 = vmatprep.subr.bf16.mxu0 %v3653_v62  ;;  %v637_v61 = vld [vmem:[%s4698_s5 + $0xb8] sm:$0xff]  ;;  %v606_v62 = vpack.c.bf16 %v584_v55, %v582_v54 }
 0x161   : > { %1243 = vmatprep.subr.bf16.mxu1 %v3655_v63  ;;  %v654_v63 = vpack.c.bf16 %v632_v57, %v630_v56 }
 0x163   : > { %895 = vmatpush1.bf16.msra.mxu0 %v3657_v0  ;;  %v609_v0 = vpack.c.bf16 %v589_v59, %v587_v58 }
 0x164   : > { %1244 = vmatpush1.bf16.msra.mxu1 %v3658_v1  ;;  %896 = vmatprep.subr.bf16.mxu0 %v3659_v2  ;;  %v657_v1 = vpack.c.bf16 %v637_v61, %v635_v60  ;;  %v586_v2 = vld [vmem:[%s4692_s0 + $0xa0] sm:$0xff] }
 0x165   : > { %1245 = vmatprep.subr.bf16.mxu1 %v3661_v3  ;;  %v588_v3 = vld [vmem:[%s4692_s0 + $0xb0] sm:$0xff] }
 0x166   : > { %v608_v10 = vpack.c.bf16 %v588_v3, %v586_v2 }
 0x167   : > { %897 = vmatpush1.bf16.msra.mxu0 %v3663_v4  ;;  %v634_v4 = vld [vmem:[%s4698_s5 + $0xa0] sm:$0xff] }
 0x168   : > { %1246 = vmatpush1.bf16.msra.mxu1 %v3664_v5  ;;  %v636_v5 = vld [vmem:[%s4698_s5 + $0xb0] sm:$0xff] }
 0x169   : > { %v656_v11 = vpack.c.bf16 %v636_v5, %v634_v4 }
 0x16a   : > { %899 = vmatmul.mubr.bf16.vlgmr.msra.gmra.mrb[0].mxu0 %v598_v14  ;;  %v590_v14 = vld [vmem:[%s4692_s0 + $0xc0] sm:$0xff] }
 0x16b   : > { %1248 = vmatmul.mubr.bf16.vlgmr.msra.gmra.mrb[0].mxu1 %v646_v15  ;;  %908 = vmatprep.mubr.bf16.mxu0 %v601_v16  ;;  %v592_v15 = vld [vmem:[%s4692_s0 + $0xd0] sm:$0xff]  ;;  %v638_v16 = vld [vmem:[%s4698_s5 + $0xc0] sm:$0xff] }
 0x16c   : > { %1257 = vmatprep.mubr.bf16.mxu1 %v649_v17  ;;  %v640_v17 = vld [vmem:[%s4698_s5 + $0xd0] sm:$0xff]  ;;  %v610_v22 = vpack.c.bf16 %v592_v15, %v590_v14 }
 0x16d   : > { %v658_v23 = vpack.c.bf16 %v640_v17, %v638_v16 }
 0x172   : > { %909 = vmatmul.mubr.bf16.gmra.mrb[4].mxu0 %v600_v26  ;;  %v594_v26 = vld [vmem:[%s4692_s0 + $0xe0] sm:$0xff] }
 0x173   : > { %1258 = vmatmul.mubr.bf16.gmra.mrb[4].mxu1 %v648_v27  ;;  %918 = vmatprep.mubr.bf16.mxu0 %v603_v28  ;;  %v596_v27 = vld [vmem:[%s4692_s0 + $0xf0] sm:$0xff]  ;;  %v642_v28 = vld [vmem:[%s4698_s5 + $0xe0] sm:$0xff] }
 0x174   : > { %1267 = vmatprep.mubr.bf16.mxu1 %v651_v29  ;;  %v644_v29 = vld [vmem:[%s4698_s5 + $0xf0] sm:$0xff]  ;;  %v612_v30 = vpack.c.bf16 %v596_v27, %v594_v26 }
 0x175   : > { %v660_v31 = vpack.c.bf16 %v644_v29, %v642_v28 }
 0x17a   : > { %919 = vmatmul.mubr.bf16.gmra.mrb[8].mxu0 %v602_v38  ;;  %v4781_v38 = vrot.slane %v694_v35, %v698_v34 }
 0x17b   : > { %1268 = vmatmul.mubr.bf16.gmra.mrb[8].mxu1 %v650_v39  ;;  %928 = vmatprep.mubr.bf16.mxu0 %v605_v40  ;;  %v4783_v39 = vrot.slane %v1043_v36, %v698_v34 }
 0x17c   : > { %1277 = vmatprep.mubr.bf16.mxu1 %v653_v41 }
 0x182   : > { %929 = vmatmul.mubr.bf16.gmra.mrb[12].mxu0 %v604_v50 }
 0x183   : > { %1278 = vmatmul.mubr.bf16.gmra.mrb[12].mxu1 %v652_v51  ;;  %938 = vmatprep.mubr.bf16.mxu0 %v607_v52 }
 0x184   : > { %1287 = vmatprep.mubr.bf16.mxu1 %v655_v53 }
 0x18a   : > { %939 = vmatmul.mubr.bf16.gmra.mrb[16].mxu0 %v606_v62 }
 0x18b   : > { %1288 = vmatmul.mubr.bf16.gmra.mrb[16].mxu1 %v654_v63  ;;  %948 = vmatprep.mubr.bf16.mxu0 %v609_v0 }
 0x18c   : > { %1297 = vmatprep.mubr.bf16.mxu1 %v657_v1 }
 0x192   : > { %949 = vmatmul.mubr.bf16.gmra.mrb[20].mxu0 %v608_v10 }
 0x193   : > { %1298 = vmatmul.mubr.bf16.gmra.mrb[20].mxu1 %v656_v11  ;;  %958 = vmatprep.mubr.bf16.mxu0 %v611_v12 }
 0x194   : > { %1307 = vmatprep.mubr.bf16.mxu1 %v659_v13 }
 0x19a   : > { %959 = vmatmul.mubr.bf16.gmra.mrb[24].mxu0 %v610_v22 }
 0x19b   : > { %1308 = vmatmul.mubr.bf16.gmra.mrb[24].mxu1 %v658_v23  ;;  %968 = vmatprep.mubr.bf16.mxu0 %v613_v24 }
 0x19c   : > { %1317 = vmatprep.mubr.bf16.mxu1 %v661_v25 }
 0x1a2   : > { %969 = vmatmul.mubr.bf16.gmra.mrb[28].mxu0 %v612_v30 }
 0x1a3   : > { %1318 = vmatmul.mubr.bf16.gmra.mrb[28].mxu1 %v660_v31 }
 0x23d   : > { %v900_v40 = vpop.f32.mrb[0].mxu0 }
 0x23e   : > { %v1249_v41 = vpop.f32.mrb[0].mxu1  ;;  %v902_v44 = vpop.f32.mrb[1].mxu0  ;;  %v901_v48 = vadd.f32 %v900_v40, %v4781_v38 }
 0x23f   : > { %v1251_v45 = vpop.f32.mrb[1].mxu1  ;;  %v904_v46 = vpop.f32.mrb[2].mxu0  ;;  %v1250_v49 = vadd.f32 %v1249_v41, %v4783_v39  ;;  %v903_v54 = vadd.f32 %v902_v44, %v4785_v42 }
 0x240   : > { %v1253_v47 = vpop.f32.mrb[2].mxu1  ;;  %v905_v50 = vadd.f32 %v904_v46, %v4781_v38  ;;  %v906_v52 = vpop.f32.mrb[3].mxu0  ;;  %v1252_v55 = vadd.f32 %v1251_v45, %v4787_v43 }
 0x241   : > { %v1254_v51 = vadd.f32 %v1253_v47, %v4783_v39  ;;  %v1255_v53 = vpop.f32.mrb[3].mxu1  ;;  %v907_v56 = vadd.f32 %v906_v52, %v4785_v42 }
 0x242   : > { %v1256_v57 = vadd.f32 %v1255_v53, %v4787_v43  ;;  %v979_v58 = vpack.c.bf16 %v905_v50, %v901_v48 }
 0x243   : > { %v1328_v59 = vpack.c.bf16 %v1254_v51, %v1250_v49  ;;  %v980_v60 = vpack.c.bf16 %v907_v56, %v903_v54 }
 0x244   : > { %v1329_v61 = vpack.c.bf16 %v1256_v57, %v1252_v55  ;;  %995 = vst [vmem:[#allocation2] sm:$0xff] %v979_v58 }
 0x245   : > { %1344 = vst [vmem:[#allocation3] sm:$0xff] %v1328_v59  ;;  %996 = vst [vmem:[#allocation2 + $0x8] sm:$0xff] %v980_v60  ;;  %v910_v62 = vpop.f32.mrb[4].mxu0 }
 0x246   : > { %1345 = vst [vmem:[#allocation3 + $0x8] sm:$0xff] %v1329_v61  ;;  %v1259_v63 = vpop.f32.mrb[4].mxu1  ;;  %v912_v0 = vpop.f32.mrb[5].mxu0  ;;  %v911_v4 = vadd.f32 %v910_v62, %v4781_v38 }
 0x247   : > { %v1261_v1 = vpop.f32.mrb[5].mxu1  ;;  %v914_v2 = vpop.f32.mrb[6].mxu0  ;;  %v1260_v5 = vadd.f32 %v1259_v63, %v4783_v39  ;;  %v913_v10 = vadd.f32 %v912_v0, %v4785_v42 }
 0x248   : > { %v1263_v3 = vpop.f32.mrb[6].mxu1  ;;  %v915_v6 = vadd.f32 %v914_v2, %v4781_v38  ;;  %v916_v8 = vpop.f32.mrb[7].mxu0  ;;  %v1262_v11 = vadd.f32 %v1261_v1, %v4787_v43 }
 0x249   : > { %v1264_v7 = vadd.f32 %v1263_v3, %v4783_v39  ;;  %v1265_v9 = vpop.f32.mrb[7].mxu1  ;;  %v917_v12 = vadd.f32 %v916_v8, %v4785_v42 }
 0x24a   : > { %v1266_v13 = vadd.f32 %v1265_v9, %v4787_v43  ;;  %v981_v14 = vpack.c.bf16 %v915_v6, %v911_v4 }
 0x24b   : > { %v1330_v15 = vpack.c.bf16 %v1264_v7, %v1260_v5  ;;  %v982_v16 = vpack.c.bf16 %v917_v12, %v913_v10 }
 0x24c   : > { %v1331_v17 = vpack.c.bf16 %v1266_v13, %v1262_v11  ;;  %997 = vst [vmem:[#allocation2 + $0x10] sm:$0xff] %v981_v14 }
 0x24d   : > { %1346 = vst [vmem:[#allocation3 + $0x10] sm:$0xff] %v1330_v15  ;;  %998 = vst [vmem:[#allocation2 + $0x18] sm:$0xff] %v982_v16  ;;  %v920_v18 = vpop.f32.mrb[8].mxu0 }
 0x24e   : > { %1347 = vst [vmem:[#allocation3 + $0x18] sm:$0xff] %v1331_v17  ;;  %v1269_v19 = vpop.f32.mrb[8].mxu1  ;;  %v922_v20 = vpop.f32.mrb[9].mxu0  ;;  %v921_v24 = vadd.f32 %v920_v18, %v4781_v38 }
 0x24f   : > { %v1271_v21 = vpop.f32.mrb[9].mxu1  ;;  %v924_v22 = vpop.f32.mrb[10].mxu0  ;;  %v1270_v25 = vadd.f32 %v1269_v19, %v4783_v39  ;;  %v923_v30 = vadd.f32 %v922_v20, %v4785_v42 }
 0x250   : > { %v1273_v23 = vpop.f32.mrb[10].mxu1  ;;  %v925_v26 = vadd.f32 %v924_v22, %v4781_v38  ;;  %v926_v28 = vpop.f32.mrb[11].mxu0  ;;  %v1272_v31 = vadd.f32 %v1271_v21, %v4787_v43 }
 0x251   : > { %v1274_v27 = vadd.f32 %v1273_v23, %v4783_v39  ;;  %v1275_v29 = vpop.f32.mrb[11].mxu1  ;;  %v927_v32 = vadd.f32 %v926_v28, %v4785_v42 }
 0x252   : > { %v1276_v33 = vadd.f32 %v1275_v29, %v4787_v43  ;;  %v983_v34 = vpack.c.bf16 %v925_v26, %v921_v24 }
 0x253   : > { %v1332_v35 = vpack.c.bf16 %v1274_v27, %v1270_v25  ;;  %v984_v36 = vpack.c.bf16 %v927_v32, %v923_v30 }
 0x254   : > { %v1333_v37 = vpack.c.bf16 %v1276_v33, %v1272_v31  ;;  %999 = vst [vmem:[#allocation2 + $0x20] sm:$0xff] %v983_v34 }
 0x255   : > { %1348 = vst [vmem:[#allocation3 + $0x20] sm:$0xff] %v1332_v35  ;;  %1000 = vst [vmem:[#allocation2 + $0x28] sm:$0xff] %v984_v36  ;;  %v930_v40 = vpop.f32.mrb[12].mxu0 }
 0x256   : > { %1349 = vst [vmem:[#allocation3 + $0x28] sm:$0xff] %v1333_v37  ;;  %v1279_v41 = vpop.f32.mrb[12].mxu1  ;;  %v932_v44 = vpop.f32.mrb[13].mxu0  ;;  %v931_v48 = vadd.f32 %v930_v40, %v4781_v38 }
 0x257   : > { %v1281_v45 = vpop.f32.mrb[13].mxu1  ;;  %v934_v46 = vpop.f32.mrb[14].mxu0  ;;  %v1280_v49 = vadd.f32 %v1279_v41, %v4783_v39  ;;  %v933_v54 = vadd.f32 %v932_v44, %v4785_v42 }
 0x258   : > { %v1283_v47 = vpop.f32.mrb[14].mxu1  ;;  %v935_v50 = vadd.f32 %v934_v46, %v4781_v38  ;;  %v936_v52 = vpop.f32.mrb[15].mxu0  ;;  %v1282_v55 = vadd.f32 %v1281_v45, %v4787_v43 }
 0x259   : > { %v1284_v51 = vadd.f32 %v1283_v47, %v4783_v39  ;;  %v1285_v53 = vpop.f32.mrb[15].mxu1  ;;  %v937_v56 = vadd.f32 %v936_v52, %v4785_v42 }
 0x25a   : > { %v1286_v57 = vadd.f32 %v1285_v53, %v4787_v43  ;;  %v985_v58 = vpack.c.bf16 %v935_v50, %v931_v48 }
 0x25b   : > { %v1334_v59 = vpack.c.bf16 %v1284_v51, %v1280_v49  ;;  %v986_v60 = vpack.c.bf16 %v937_v56, %v933_v54 }
 0x25c   : > { %v1335_v61 = vpack.c.bf16 %v1286_v57, %v1282_v55  ;;  %1001 = vst [vmem:[#allocation2 + $0x30] sm:$0xff] %v985_v58 }
 0x25d   : > { %1350 = vst [vmem:[#allocation3 + $0x30] sm:$0xff] %v1334_v59  ;;  %1002 = vst [vmem:[#allocation2 + $0x38] sm:$0xff] %v986_v60  ;;  %v940_v62 = vpop.f32.mrb[16].mxu0 }
 0x25e   : > { %1351 = vst [vmem:[#allocation3 + $0x38] sm:$0xff] %v1335_v61  ;;  %v1289_v63 = vpop.f32.mrb[16].mxu1  ;;  %v942_v0 = vpop.f32.mrb[17].mxu0  ;;  %v941_v4 = vadd.f32 %v940_v62, %v4781_v38 }
 0x25f   : > { %v1291_v1 = vpop.f32.mrb[17].mxu1  ;;  %v944_v2 = vpop.f32.mrb[18].mxu0  ;;  %v1290_v5 = vadd.f32 %v1289_v63, %v4783_v39  ;;  %v943_v10 = vadd.f32 %v942_v0, %v4785_v42 }
 0x260   : > { %v1293_v3 = vpop.f32.mrb[18].mxu1  ;;  %v945_v6 = vadd.f32 %v944_v2, %v4781_v38  ;;  %v946_v8 = vpop.f32.mrb[19].mxu0  ;;  %v1292_v11 = vadd.f32 %v1291_v1, %v4787_v43 }
 0x261   : > { %v1294_v7 = vadd.f32 %v1293_v3, %v4783_v39  ;;  %v1295_v9 = vpop.f32.mrb[19].mxu1  ;;  %v947_v12 = vadd.f32 %v946_v8, %v4785_v42 }
 0x262   : > { %v1296_v13 = vadd.f32 %v1295_v9, %v4787_v43  ;;  %v987_v14 = vpack.c.bf16 %v945_v6, %v941_v4 }
 0x263   : > { %v1336_v15 = vpack.c.bf16 %v1294_v7, %v1290_v5  ;;  %v988_v16 = vpack.c.bf16 %v947_v12, %v943_v10 }
 0x264   : > { %v1337_v17 = vpack.c.bf16 %v1296_v13, %v1292_v11  ;;  %1003 = vst [vmem:[#allocation2 + $0x40] sm:$0xff] %v987_v14 }
 0x265   : > { %1352 = vst [vmem:[#allocation3 + $0x40] sm:$0xff] %v1336_v15  ;;  %1004 = vst [vmem:[#allocation2 + $0x48] sm:$0xff] %v988_v16  ;;  %v950_v18 = vpop.f32.mrb[20].mxu0 }
 0x266   : > { %1353 = vst [vmem:[#allocation3 + $0x48] sm:$0xff] %v1337_v17  ;;  %v1299_v19 = vpop.f32.mrb[20].mxu1  ;;  %v952_v20 = vpop.f32.mrb[21].mxu0  ;;  %v951_v24 = vadd.f32 %v950_v18, %v4781_v38 }
 0x267   : > { %v1301_v21 = vpop.f32.mrb[21].mxu1  ;;  %v954_v22 = vpop.f32.mrb[22].mxu0  ;;  %v1300_v25 = vadd.f32 %v1299_v19, %v4783_v39  ;;  %v953_v30 = vadd.f32 %v952_v20, %v4785_v42 }
 0x268   : > { %v1303_v23 = vpop.f32.mrb[22].mxu1  ;;  %v955_v26 = vadd.f32 %v954_v22, %v4781_v38  ;;  %v956_v28 = vpop.f32.mrb[23].mxu0  ;;  %v1302_v31 = vadd.f32 %v1301_v21, %v4787_v43 }
 0x269   : > { %v1304_v27 = vadd.f32 %v1303_v23, %v4783_v39  ;;  %v1305_v29 = vpop.f32.mrb[23].mxu1  ;;  %v957_v32 = vadd.f32 %v956_v28, %v4785_v42 }
 0x26a   : > { %v1306_v33 = vadd.f32 %v1305_v29, %v4787_v43  ;;  %v989_v34 = vpack.c.bf16 %v955_v26, %v951_v24 }
 0x26b   : > { %v1338_v35 = vpack.c.bf16 %v1304_v27, %v1300_v25  ;;  %v990_v36 = vpack.c.bf16 %v957_v32, %v953_v30 }
 0x26c   : > { %v1339_v37 = vpack.c.bf16 %v1306_v33, %v1302_v31  ;;  %1005 = vst [vmem:[#allocation2 + $0x50] sm:$0xff] %v989_v34 }
 0x26d   : > { %1354 = vst [vmem:[#allocation3 + $0x50] sm:$0xff] %v1338_v35  ;;  %1006 = vst [vmem:[#allocation2 + $0x58] sm:$0xff] %v990_v36  ;;  %v960_v40 = vpop.f32.mrb[24].mxu0 }
 0x26e   : > { %1355 = vst [vmem:[#allocation3 + $0x58] sm:$0xff] %v1339_v37  ;;  %v1309_v41 = vpop.f32.mrb[24].mxu1  ;;  %v962_v44 = vpop.f32.mrb[25].mxu0  ;;  %v961_v48 = vadd.f32 %v960_v40, %v4781_v38 }
 0x26f   : > { %v1311_v45 = vpop.f32.mrb[25].mxu1  ;;  %v964_v46 = vpop.f32.mrb[26].mxu0  ;;  %v1310_v49 = vadd.f32 %v1309_v41, %v4783_v39  ;;  %v963_v54 = vadd.f32 %v962_v44, %v4785_v42 }
 0x270   : > { %v1313_v47 = vpop.f32.mrb[26].mxu1  ;;  %v965_v50 = vadd.f32 %v964_v46, %v4781_v38  ;;  %v966_v52 = vpop.f32.mrb[27].mxu0  ;;  %v1312_v55 = vadd.f32 %v1311_v45, %v4787_v43 }
 0x271   : > { %v1314_v51 = vadd.f32 %v1313_v47, %v4783_v39  ;;  %v1315_v53 = vpop.f32.mrb[27].mxu1  ;;  %v967_v56 = vadd.f32 %v966_v52, %v4785_v42 }
 0x272   : > { %v1316_v57 = vadd.f32 %v1315_v53, %v4787_v43  ;;  %v991_v58 = vpack.c.bf16 %v965_v50, %v961_v48 }
 0x273   : > { %v1340_v59 = vpack.c.bf16 %v1314_v51, %v1310_v49  ;;  %v992_v60 = vpack.c.bf16 %v967_v56, %v963_v54 }
 0x274   : > { %v1341_v61 = vpack.c.bf16 %v1316_v57, %v1312_v55  ;;  %1007 = vst [vmem:[#allocation2 + $0x60] sm:$0xff] %v991_v58 }
 0x275   : > { %1356 = vst [vmem:[#allocation3 + $0x60] sm:$0xff] %v1340_v59  ;;  %1008 = vst [vmem:[#allocation2 + $0x68] sm:$0xff] %v992_v60  ;;  %v970_v62 = vpop.f32.mrb[28].mxu0 }
 0x276   : > { %1357 = vst [vmem:[#allocation3 + $0x68] sm:$0xff] %v1341_v61  ;;  %v1319_v63 = vpop.f32.mrb[28].mxu1  ;;  %v972_v0 = vpop.f32.mrb[29].mxu0  ;;  %v971_v4 = vadd.f32 %v970_v62, %v4781_v38 }
 0x277   : > { %v1321_v1 = vpop.f32.mrb[29].mxu1  ;;  %v974_v2 = vpop.f32.mrb[30].mxu0  ;;  %v1320_v5 = vadd.f32 %v1319_v63, %v4783_v39  ;;  %v973_v10 = vadd.f32 %v972_v0, %v4785_v42 }
 0x278   : > { %v1323_v3 = vpop.f32.mrb[30].mxu1  ;;  %v975_v6 = vadd.f32 %v974_v2, %v4781_v38  ;;  %v976_v8 = vpop.f32.mrb[31].mxu0  ;;  %v1322_v11 = vadd.f32 %v1321_v1, %v4787_v43 }
 0x279   : > { %v1324_v7 = vadd.f32 %v1323_v3, %v4783_v39  ;;  %v1325_v9 = vpop.f32.mrb[31].mxu1  ;;  %v977_v12 = vadd.f32 %v976_v8, %v4785_v42 }
 0x27a   : > { %v1326_v13 = vadd.f32 %v1325_v9, %v4787_v43  ;;  %v993_v14 = vpack.c.bf16 %v975_v6, %v971_v4 }
 0x27b   : > { %v1342_v15 = vpack.c.bf16 %v1324_v7, %v1320_v5  ;;  %v994_v16 = vpack.c.bf16 %v977_v12, %v973_v10 }
 0x27c   : > { %v1343_v17 = vpack.c.bf16 %v1326_v13, %v1322_v11  ;;  %1009 = vst [vmem:[#allocation2 + $0x70] sm:$0xff] %v993_v14 }
 0x27d   : > { %1358 = vst [vmem:[#allocation3 + $0x70] sm:$0xff] %v1342_v15  ;;  %1010 = vst [vmem:[#allocation2 + $0x78] sm:$0xff] %v994_v16 }
 0x27e   : > { %1359 = vst [vmem:[#allocation3 + $0x78] sm:$0xff] %v1343_v17 }
 0x27f PF: > { %v3665_v38 = vld [vmem:[#allocation10 + $0x4] ss:$8 sps:$4 sm:$0xff]   ;;  %v3667_v39 = vld [vmem:[#allocation10] ss:$8 sps:$4 sm:$0xff]   ;;  %v3668_v18 = vld [vmem:[#allocation10 + $0x14] ss:$8 sps:$4 sm:$0xff]  }
 0x280   : > { %1612 = vmatprep.subr.bf16.mxu1 %v3665_v38  ;;  %v3670_v19 = vld [vmem:[#allocation10 + $0x10] ss:$8 sps:$4 sm:$0xff]   ;;  %v3671_v20 = vld [vmem:[#allocation10 + $0x24] ss:$8 sps:$4 sm:$0xff]   ;;  %v3673_v42 = vld [vmem:[#allocation10 + $0x20] ss:$8 sps:$4 sm:$0xff]  }
 0x281   : > { %1613 = vmatpush1.bf16.msra.mxu1 %v3667_v39  ;;  %v3674_v43 = vld [vmem:[#allocation10 + $0x34] ss:$8 sps:$4 sm:$0xff]   ;;  %v3676_v21 = vld [vmem:[#allocation10 + $0x30] ss:$8 sps:$4 sm:$0xff]   ;;  %v3677_v22 = vld [vmem:[#allocation10 + $0x44] ss:$8 sps:$4 sm:$0xff]  }
 0x282   : > { %1614 = vmatprep.subr.bf16.mxu1 %v3668_v18  ;;  %v3679_v23 = vld [vmem:[#allocation10 + $0x40] ss:$8 sps:$4 sm:$0xff]   ;;  %v3680_v24 = vld [vmem:[#allocation10 + $0x54] ss:$8 sps:$4 sm:$0xff]   ;;  %v3682_v25 = vld [vmem:[#allocation10 + $0x50] ss:$8 sps:$4 sm:$0xff]  }
 0x283   : > { %v3683_v26 = vld [vmem:[#allocation10 + $0x64] ss:$8 sps:$4 sm:$0xff]   ;;  %v1363_v28 = vld [vmem:[%s4684_s29 + $0x18] sm:$0xff]  ;;  %v3685_v30 = vld [vmem:[#allocation10 + $0x60] ss:$8 sps:$4 sm:$0xff]   ;;  %s5498_s24 = sld [smem:[#allocation33_spill]] }
 0x284   : > { %v1361_v27 = vld [vmem:[%s4684_s29 + $0x8] sm:$0xff]  ;;  %v3686_v31 = vld [vmem:[#allocation10 + $0x74] ss:$8 sps:$4 sm:$0xff]   ;;  %v3688_v32 = vld [vmem:[#allocation10 + $0x70] ss:$8 sps:$4 sm:$0xff]   ;;  %s5499_s1 = sld [smem:[#allocation39_spill]] }
 0x285   : > { %1615 = vmatpush1.bf16.msra.mxu1 %v3670_v19  ;;  %v1393_v29 = vpack.c.bf16 %v1363_v28, %v1361_v27  ;;  %v3689_v33 = vld [vmem:[#allocation10 + $0x84] ss:$8 sps:$4 sm:$0xff]   ;;  %v3691_v34 = vld [vmem:[#allocation10 + $0x80] ss:$8 sps:$4 sm:$0xff]   ;;  %v3692_v35 = vld [vmem:[#allocation10 + $0x94] ss:$8 sps:$4 sm:$0xff]  }
 0x286   : > { %1616 = vmatprep.subr.bf16.mxu1 %v3671_v20  ;;  %v2143_v36 = vld [vmem:[#allocation2 + $0x8] sm:$0xff]  ;;  %v2144_v37 = vld [vmem:[#allocation2 + $0x18] sm:$0xff]  ;;  %v1360_v58 = vld [vmem:[%s4684_s29] sm:$0xff]  ;;  %s5500_s3 = sld [smem:[#allocation24_spill]]  ;;  %s5501_s0 = sld [smem:[#allocation25_spill]] }
 0x287   : > { %1644 = vmatprep.mubr.bf16.mxu1 %v1393_v29  ;;  %3346 = vmatprep.subr.bf16.mxu0 %v2143_v36  ;;  %v3694_v40 = vld [vmem:[#allocation10 + $0x90] ss:$8 sps:$4 sm:$0xff]   ;;  %v3695_v41 = vld [vmem:[#allocation10 + $0xa4] ss:$8 sps:$4 sm:$0xff]   ;;  %v3697_v44 = vld [vmem:[#allocation10 + $0xa0] ss:$8 sps:$4 sm:$0xff]  }
 0x288   : > { %3347 = vmatpush3.bf16.xpose.msra.mxu0 %v2143_v36  ;;  %v3698_v45 = vld [vmem:[#allocation10 + $0xb4] ss:$8 sps:$4 sm:$0xff]   ;;  %v2145_v46 = vld [vmem:[#allocation2 + $0x28] sm:$0xff]  ;;  %v3700_v47 = vld [vmem:[#allocation10 + $0xb0] ss:$8 sps:$4 sm:$0xff]   ;;  %s2879_s15 = sshll.u32 %s4708_s7, 4  ;;  %s5323_s15 = int_to_ptr.vmem [resolvable:$true] %s2879_s15 }
 0x289   : > { %1617 = vmatpush1.bf16.msra.mxu1 %v3673_v42  ;;  %3348 = vmatprep.subr.bf16.mxu0 %v2144_v37  ;;  %v3701_v48 = vld [vmem:[#allocation10 + $0xc4] ss:$8 sps:$4 sm:$0xff]   ;;  %v3703_v49 = vld [vmem:[#allocation10 + $0xc0] ss:$8 sps:$4 sm:$0xff]   ;;  %v3704_v50 = vld [vmem:[#allocation10 + $0xd4] ss:$8 sps:$4 sm:$0xff]  }
 0x28a   : > { %1618 = vmatprep.subr.bf16.mxu1 %v3674_v43  ;;  %v2146_v51 = vld [vmem:[#allocation2 + $0x38] sm:$0xff]  ;;  %v3707_v53 = vld [vmem:[#allocation10 + $0xe4] ss:$8 sps:$4 sm:$0xff]   ;;  %v3709_v54 = vld [vmem:[#allocation10 + $0xe0] ss:$8 sps:$4 sm:$0xff]   ;;  %s5502_s12 = sld [smem:[#allocation40_spill]] }
 0x28b   : > { %v3706_v52 = vld [vmem:[#allocation10 + $0xd0] ss:$8 sps:$4 sm:$0xff]   ;;  %v3710_v55 = vld [vmem:[#allocation10 + $0xf4] ss:$8 sps:$4 sm:$0xff]   ;;  %v2147_v56 = vld [vmem:[#allocation2 + $0x48] sm:$0xff]  ;;  %s2863_s23 = scalar_lea.sflag [#allocation6], %s4680_s13 }
 0x28c   : > { %v3712_v57 = vld [vmem:[#allocation10 + $0xf0] ss:$8 sps:$4 sm:$0xff]   ;;  %v1365_v60 = vld [vmem:[%s4684_s29 + $0x28] sm:$0xff]  ;;  %v1773_v62 = vld [vmem:[#allocation2] sm:$0xff]  ;;  %s3217_s5 = sshll.u32 %s5500_s3, 5  ;;  %s3210_s19 = sshll.u32 %s5501_s0, 6 }
 0x28d   : > { %1619 = vmatpush1.bf16.msra.mxu1 %v3676_v21  ;;  %v1362_v59 = vld [vmem:[%s4684_s29 + $0x10] sm:$0xff]  ;;  %v1367_v61 = vld [vmem:[%s4684_s29 + $0x38] sm:$0xff]  ;;  %v1364_v2 = vld [vmem:[%s4684_s29 + $0x20] sm:$0xff]  ;;  %s2876_s28 = sadd.s32 %s3217_s5, %s3210_s19  ;;  %p5503_p1 = scmp.ne.s32.totalorder %s5474_s6, 0 }
 0x28e   : > { %1620 = vmatprep.subr.bf16.mxu1 %v3677_v22  ;;  %v1392_v63 = vpack.c.bf16 %v1362_v59, %v1360_v58  ;;  %v1395_v0 = vpack.c.bf16 %v1367_v61, %v1365_v60  ;;  %v2148_v1 = vld [vmem:[#allocation2 + $0x58] sm:$0xff]  ;;  %v1366_v3 = vld [vmem:[%s4684_s29 + $0x30] sm:$0xff]  ;;  %v1369_v4 = vld [vmem:[%s4684_s29 + $0x48] sm:$0xff]  ;;  %s3211_s9 = sshll.u32 %s2876_s28, 7  ;;  %s4238_s17 = smov [#allocation16]  }
 0x28f   : > { %v1371_v5 = vld [vmem:[%s4684_s29 + $0x58] sm:$0xff]  ;;  %v1394_v6 = vpack.c.bf16 %v1366_v3, %v1364_v2  ;;  %v1774_v7 = vld [vmem:[#allocation2 + $0x10] sm:$0xff]  ;;  %v1368_v9 = vld [vmem:[%s4684_s29 + $0x40] sm:$0xff]  ;;  %s4095_s4 = sshll.u32 %s4238_s17, 4  ;;  %s4096_s4 = int_to_ptr.vmem [resolvable:$false] %s4095_s4 }
 0x290   : > { %3349 = vmatpush3.bf16.xpose.msra.mxu0 %v2144_v37  ;;  %v1397_v8 = vpack.c.bf16 %v1371_v5, %v1369_v4  ;;  %v1370_v10 = vld [vmem:[%s4684_s29 + $0x50] sm:$0xff]  ;;  %v1373_v11 = vld [vmem:[%s4684_s29 + $0x68] sm:$0xff]  ;;  %v1375_v12 = vld [vmem:[%s4684_s29 + $0x78] sm:$0xff]  ;;  %p4098_p9 = scmp.lt.s32.totalorder %s5323_s15, %s4096_s4 }
 0x291   : > { %1621 = vmatpush1.bf16.msra.mxu1 %v3679_v23  ;;  %3350 = vmatprep.subr.bf16.mxu0 %v2145_v46  ;;  %v1396_v13 = vpack.c.bf16 %v1370_v10, %v1368_v9  ;;  %v1775_v14 = vld [vmem:[#allocation2 + $0x20] sm:$0xff]  ;;  %v1399_v15 = vpack.c.bf16 %v1375_v12, %v1373_v11  ;;  %v1374_v17 = vld [vmem:[%s4684_s29 + $0x70] sm:$0xff]  ;;  %v1377_v38 = vld [vmem:[%s4684_s29 + $0x88] sm:$0xff] }
 0x292   : > { %1622 = vmatprep.subr.bf16.mxu1 %v3680_v24  ;;  %v1372_v16 = vld [vmem:[%s4684_s29 + $0x60] sm:$0xff]  ;;  %v1379_v39 = vld [vmem:[%s4684_s29 + $0x98] sm:$0xff]  ;;  %v1776_v19 = vld [vmem:[#allocation2 + $0x30] sm:$0xff] }
 0x293   : > { %v1398_v18 = vpack.c.bf16 %v1374_v17, %v1372_v16  ;;  %v1401_v20 = vpack.c.bf16 %v1379_v39, %v1377_v38  ;;  %v1376_v42 = vld [vmem:[%s4684_s29 + $0x80] sm:$0xff]  ;;  %v1378_v43 = vld [vmem:[%s4684_s29 + $0x90] sm:$0xff]  ;;  %v1381_v21 = vld [vmem:[%s4684_s29 + $0xa8] sm:$0xff] }
 0x294   : > { %v1383_v22 = vld [vmem:[%s4684_s29 + $0xb8] sm:$0xff]  ;;  %v1400_v23 = vpack.c.bf16 %v1378_v43, %v1376_v42  ;;  %v1777_v24 = vld [vmem:[#allocation2 + $0x40] sm:$0xff]  ;;  %v1382_v27 = vld [vmem:[%s4684_s29 + $0xb0] sm:$0xff] }
 0x295   : > { %1623 = vmatpush1.bf16.msra.mxu1 %v3682_v25  ;;  %v1403_v25 = vpack.c.bf16 %v1383_v22, %v1381_v21  ;;  %v1385_v28 = vld [vmem:[%s4684_s29 + $0xc8] sm:$0xff]  ;;  %v1387_v29 = vld [vmem:[%s4684_s29 + $0xd8] sm:$0xff] }
 0x296   : > { %1624 = vmatprep.subr.bf16.mxu1 %v3683_v26  ;;  %v1380_v26 = vld [vmem:[%s4684_s29 + $0xa0] sm:$0xff]  ;;  %v1391_v36 = vld [vmem:[%s4684_s29 + $0xf8] sm:$0xff] }
 0x298   : > { %3351 = vmatpush3.bf16.xpose.msra.mxu0 %v2145_v46  ;;  %v1779_v46 = vld [vmem:[#allocation2 + $0x60] sm:$0xff] }
 0x299   : > { %1625 = vmatpush1.bf16.msra.mxu1 %v3685_v30  ;;  %3352 = vmatprep.subr.bf16.mxu0 %v2146_v51  ;;  %v1402_v30 = vpack.c.bf16 %v1382_v27, %v1380_v26 }
 0x29a   : > { %1626 = vmatprep.subr.bf16.mxu1 %v3686_v31  ;;  %v1778_v31 = vld [vmem:[#allocation2 + $0x50] sm:$0xff] }
 0x29d   : > { %1627 = vmatpush1.bf16.msra.mxu1 %v3688_v32  ;;  %v1405_v32 = vpack.c.bf16 %v1387_v29, %v1385_v28 }
 0x29e   : > { %1628 = vmatprep.subr.bf16.mxu1 %v3689_v33  ;;  %v1384_v33 = vld [vmem:[%s4684_s29 + $0xc0] sm:$0xff] }
 0x2a0   : > { %3353 = vmatpush3.bf16.xpose.msra.mxu0 %v2146_v51 }
 0x2a1   : > { %1629 = vmatpush1.bf16.msra.mxu1 %v3691_v34  ;;  %3354 = vmatprep.subr.bf16.mxu0 %v2147_v56  ;;  %v1386_v34 = vld [vmem:[%s4684_s29 + $0xd0] sm:$0xff] }
 0x2a2   : > { %1630 = vmatprep.subr.bf16.mxu1 %v3692_v35  ;;  %v1389_v35 = vld [vmem:[%s4684_s29 + $0xe8] sm:$0xff]  ;;  %v1404_v37 = vpack.c.bf16 %v1386_v34, %v1384_v33 }
 0x2a5   : > { %1631 = vmatpush1.bf16.msra.mxu1 %v3694_v40  ;;  %v1407_v40 = vpack.c.bf16 %v1391_v36, %v1389_v35 }
 0x2a6   : > { %1632 = vmatprep.subr.bf16.mxu1 %v3695_v41  ;;  %v1388_v41 = vld [vmem:[%s4684_s29 + $0xe0] sm:$0xff] }
 0x2a8   : > { %3355 = vmatpush3.bf16.xpose.msra.mxu0 %v2147_v56 }
 0x2a9   : > { %1633 = vmatpush1.bf16.msra.mxu1 %v3697_v44  ;;  %3356 = vmatprep.subr.bf16.mxu0 %v2148_v1  ;;  %v1390_v44 = vld [vmem:[%s4684_s29 + $0xf0] sm:$0xff]  ;;  %s5321_s29 = scalar_lea.hbm %s5502_s12, %s3211_s9 }
 0x2aa   : > { %1634 = vmatprep.subr.bf16.mxu1 %v3698_v45  ;;  %v1406_v45 = vpack.c.bf16 %v1390_v44, %v1388_v41 }
 0x2ad   : > { %1635 = vmatpush1.bf16.msra.mxu1 %v3700_v47  ;;  %v2149_v47 = vld [vmem:[#allocation2 + $0x68] sm:$0xff] }
 0x2ae   : > { %1636 = vmatprep.subr.bf16.mxu1 %v3701_v48  ;;  %v1780_v48 = vld [vmem:[#allocation2 + $0x70] sm:$0xff] }
 0x2b0   : > { %3357 = vmatpush3.bf16.xpose.msra.mxu0 %v2148_v1 }
 0x2b1   : > { %1637 = vmatpush1.bf16.msra.mxu1 %v3703_v49  ;;  %3358 = vmatprep.subr.bf16.mxu0 %v2149_v47  ;;  %v2150_v49 = vld [vmem:[#allocation2 + $0x78] sm:$0xff] }
 0x2b2   : > { %1638 = vmatprep.subr.bf16.mxu1 %v3704_v50  ;;  %v1442_v50 = vlaneseq }
 0x2b4   : > { %v4885_v51 = vshrl.u32 %v1442_v50, 7 }
 0x2b5   : > { %1639 = vmatpush1.bf16.msra.mxu1 %v3706_v52 }
 0x2b6   : > { %1640 = vmatprep.subr.bf16.mxu1 %v3707_v53  ;;  %v1444_v52 = vsub.s32 0, %v4885_v51  ;;  %v1440_v53 = vld [vmem:[%s5498_s24] sm:$0x3]  ;;  %s4091_s24 = scalar_lea.vmem %s5323_s15, 4096 }
 0x2b7   : > { %p4092_p4 = scmp.ne.s32.totalorder %s5323_s15, %s4091_s24 }
 0x2b8   : > { %3359 = vmatpush3.bf16.xpose.msra.mxu0 %v2149_v47 }
 0x2b9   : > { %1641 = vmatpush1.bf16.msra.mxu1 %v3709_v54  ;;  %3360 = vmatprep.subr.bf16.mxu0 %v2150_v49  ;;  %v1448_v54 = vsub.s32 1, %v4885_v51  ;;  %p4093_p0 = pnand %p4092_p4, %p5503_p1 }
 0x2ba   : > { %1642 = vmatprep.subr.bf16.mxu1 %v3710_v55  ;;  %v4894_v55 = vrot.slane %v1440_v53, %v1444_v52 }
 0x2bb   : > { %v4898_v56 = vrot.slane %v1440_v53, %v1448_v54  ;;  %p4094_p8 = pneg %p4093_p0 }
 0x2bd   : > { %1643 = vmatpush1.bf16.msra.mxu1 %v3712_v57 }
 0x2be   : > { %3282 = vmatprep.subr.bf16.mxu1 %v1773_v62 }
 0x2c0   : > { %1645 = vmatmul.mubr.bf16.vlgmr.msra.gmra.mrb[0].mxu1 %v1392_v63  ;;  %3361 = vmatpush3.bf16.xpose.msra.mxu0 %v2150_v49 }
 0x2c1   : > { %1654 = vmatprep.mubr.bf16.mxu1 %v1395_v0 }
 0x2c6   : > { %3283 = vmatpush3.bf16.xpose.msra.mxu1 %v1773_v62 }
 0x2c7   : > { %3284 = vmatprep.subr.bf16.mxu1 %v1774_v7 }
 0x2c8   : > { %1655 = vmatmul.mubr.bf16.gmra.mrb[4].mxu1 %v1394_v6 }
 0x2c9   : > { %1664 = vmatprep.mubr.bf16.mxu1 %v1397_v8 }
 0x2ce   : > { %3285 = vmatpush3.bf16.xpose.msra.mxu1 %v1774_v7 }
 0x2cf   : > { %3286 = vmatprep.subr.bf16.mxu1 %v1775_v14 }
 0x2d0   : > { %1665 = vmatmul.mubr.bf16.gmra.mrb[8].mxu1 %v1396_v13 }
 0x2d1   : > { %1674 = vmatprep.mubr.bf16.mxu1 %v1399_v15 }
 0x2d6   : > { %3287 = vmatpush3.bf16.xpose.msra.mxu1 %v1775_v14 }
 0x2d7   : > { %3288 = vmatprep.subr.bf16.mxu1 %v1776_v19 }
 0x2d8   : > { %1675 = vmatmul.mubr.bf16.gmra.mrb[12].mxu1 %v1398_v18 }
 0x2d9   : > { %1684 = vmatprep.mubr.bf16.mxu1 %v1401_v20 }
 0x2de   : > { %3289 = vmatpush3.bf16.xpose.msra.mxu1 %v1776_v19 }
 0x2df   : > { %3290 = vmatprep.subr.bf16.mxu1 %v1777_v24 }
 0x2e0   : > { %1685 = vmatmul.mubr.bf16.gmra.mrb[16].mxu1 %v1400_v23 }
 0x2e1   : > { %1694 = vmatprep.mubr.bf16.mxu1 %v1403_v25 }
 0x2e6   : > { %3291 = vmatpush3.bf16.xpose.msra.mxu1 %v1777_v24 }
 0x2e7   : > { %3292 = vmatprep.subr.bf16.mxu1 %v1778_v31 }
 0x2e8   : > { %1695 = vmatmul.mubr.bf16.gmra.mrb[20].mxu1 %v1402_v30 }
 0x2e9   : > { %1704 = vmatprep.mubr.bf16.mxu1 %v1405_v32 }
 0x2ee   : > { %3293 = vmatpush3.bf16.xpose.msra.mxu1 %v1778_v31 }
 0x2ef   : > { %3294 = vmatprep.subr.bf16.mxu1 %v1779_v46 }
 0x2f0   : > { %1705 = vmatmul.mubr.bf16.gmra.mrb[24].mxu1 %v1404_v37 }
 0x2f1   : > { %1714 = vmatprep.mubr.bf16.mxu1 %v1407_v40 }
 0x2f6   : > { %3295 = vmatpush3.bf16.xpose.msra.mxu1 %v1779_v46 }
 0x2f7   : > { %3296 = vmatprep.subr.bf16.mxu1 %v1780_v48 }
 0x2f8   : > { %1715 = vmatmul.mubr.bf16.gmra.mrb[28].mxu1 %v1406_v45 }
 0x2fe   : > { %3297 = vmatpush3.bf16.xpose.msra.mxu1 %v1780_v48 }
 0x393   : > { %v1646_v57 = vpop.f32.mrb[0].mxu1 }
 0x394   : > { %v1647_v58 = vadd.f32 %v1646_v57, %v4894_v55  ;;  %v1648_v59 = vpop.f32.mrb[1].mxu1 }
 0x395   : > { %v1649_v60 = vadd.f32 %v1648_v59, %v4898_v56  ;;  %v1650_v61 = vpop.f32.mrb[2].mxu1 }
 0x396   : > { %v1651_v62 = vadd.f32 %v1650_v61, %v4894_v55  ;;  %v1652_v63 = vpop.f32.mrb[3].mxu1  ;;  %v1725_v1 = vmul.f32 0.088388346, %v1647_v58 }
 0x397   : > { %v1653_v0 = vadd.f32 %v1652_v63, %v4898_v56  ;;  %v1726_v3 = vmul.f32 0.088388346, %v1649_v60 }
 0x398   : > { %v1727_v2 = vmul.f32 0.088388346, %v1651_v62 }
 0x399   : > { %v1728_v4 = vmul.f32 0.088388346, %v1653_v0 }
 0x39a   : > { %v1757_v5 = vpack.c.bf16 %v1727_v2, %v1725_v1 }
 0x39b   : > { %v1656_v6 = vpop.f32.mrb[4].mxu1  ;;  %v1758_v7 = vpack.c.bf16 %v1728_v4, %v1726_v3 }
 0x39c   : > { %v1657_v8 = vadd.f32 %v1656_v6, %v4894_v55  ;;  %v1658_v9 = vpop.f32.mrb[5].mxu1  ;;  %3298 = vmatprep.mubr.bf16.mxu1 %v1757_v5 }
 0x39d   : > { %v1659_v10 = vadd.f32 %v1658_v9, %v4898_v56  ;;  %v1660_v11 = vpop.f32.mrb[6].mxu1  ;;  %3362 = vmatprep.mubr.bf16.mxu0 %v1758_v7 }
 0x39e   : > { %v1661_v12 = vadd.f32 %v1660_v11, %v4894_v55  ;;  %v1662_v13 = vpop.f32.mrb[7].mxu1  ;;  %v1729_v15 = vmul.f32 0.088388346, %v1657_v8 }
 0x39f   : > { %v1663_v14 = vadd.f32 %v1662_v13, %v4898_v56  ;;  %v1730_v17 = vmul.f32 0.088388346, %v1659_v10 }
 0x3a0   : > { %v1731_v16 = vmul.f32 0.088388346, %v1661_v12 }
 0x3a1   : > { %v1732_v38 = vmul.f32 0.088388346, %v1663_v14 }
 0x3a2   : > { %v1759_v39 = vpack.c.bf16 %v1731_v16, %v1729_v15 }
 0x3a3   : > { %v1760_v18 = vpack.c.bf16 %v1732_v38, %v1730_v17  ;;  %v1666_v19 = vpop.f32.mrb[8].mxu1 }
 0x3a4   : > { %v1667_v20 = vadd.f32 %v1666_v19, %v4894_v55  ;;  %v1668_v42 = vpop.f32.mrb[9].mxu1  ;;  %3299 = vmatmul.mubr.bf16.vlgmr.msra.gmra.mrb[32].mxu1 %v1759_v39 }
 0x3a5   : > { %v1669_v43 = vadd.f32 %v1668_v42, %v4898_v56  ;;  %v1670_v21 = vpop.f32.mrb[10].mxu1  ;;  %3363 = vmatmul.mubr.bf16.vlgmr.msra.gmra.mrb[0].mxu0 %v1760_v18 }
 0x3a6   : > { %v1671_v22 = vadd.f32 %v1670_v21, %v4894_v55  ;;  %v1672_v23 = vpop.f32.mrb[11].mxu1  ;;  %v1733_v25 = vmul.f32 0.088388346, %v1667_v20 }
 0x3a7   : > { %v1673_v24 = vadd.f32 %v1672_v23, %v4898_v56  ;;  %v1734_v27 = vmul.f32 0.088388346, %v1669_v43 }
 0x3a8   : > { %v1735_v26 = vmul.f32 0.088388346, %v1671_v22 }
 0x3a9   : > { %v1736_v28 = vmul.f32 0.088388346, %v1673_v24 }
 0x3aa   : > { %v1761_v29 = vpack.c.bf16 %v1735_v26, %v1733_v25 }
 0x3ab   : > { %v1762_v30 = vpack.c.bf16 %v1736_v28, %v1734_v27  ;;  %v1676_v31 = vpop.f32.mrb[12].mxu1 }
 0x3ac   : > { %v1677_v32 = vadd.f32 %v1676_v31, %v4894_v55  ;;  %v1678_v33 = vpop.f32.mrb[13].mxu1  ;;  %3302 = vmatprep.mubr.bf16.mxu1 %v1761_v29 }
 0x3ad   : > { %v1679_v34 = vadd.f32 %v1678_v33, %v4898_v56  ;;  %v1680_v35 = vpop.f32.mrb[14].mxu1  ;;  %3366 = vmatprep.mubr.bf16.mxu0 %v1762_v30 }
 0x3ae   : > { %v1681_v36 = vadd.f32 %v1680_v35, %v4894_v55  ;;  %v1682_v37 = vpop.f32.mrb[15].mxu1  ;;  %v1737_v41 = vmul.f32 0.088388346, %v1677_v32 }
 0x3af   : > { %v1683_v40 = vadd.f32 %v1682_v37, %v4898_v56  ;;  %v1738_v45 = vmul.f32 0.088388346, %v1679_v34 }
 0x3b0   : > { %v1739_v44 = vmul.f32 0.088388346, %v1681_v36 }
 0x3b1   : > { %v1740_v46 = vmul.f32 0.088388346, %v1683_v40 }
 0x3b2   : > { %v1763_v47 = vpack.c.bf16 %v1739_v44, %v1737_v41 }
 0x3b3   : > { %v1764_v48 = vpack.c.bf16 %v1740_v46, %v1738_v45  ;;  %v1686_v49 = vpop.f32.mrb[16].mxu1  ;;  %v1781_v46 = vld [vmem:[#allocation3] sm:$0xff] }
 0x3b4   : > { %v1687_v50 = vadd.f32 %v1686_v49, %v4894_v55  ;;  %v1688_v53 = vpop.f32.mrb[17].mxu1  ;;  %3303 = vmatmul.mubr.bf16.gmra.mrb[36].mxu1 %v1763_v47  ;;  %v1782_v47 = vld [vmem:[#allocation3 + $0x10] sm:$0xff]  ;;  %3314 = vmatprep.subr.bf16.mxu1 %v1781_v46 }
 0x3b5   : > { %v1689_v57 = vadd.f32 %v1688_v53, %v4898_v56  ;;  %v1690_v58 = vpop.f32.mrb[18].mxu1  ;;  %3367 = vmatmul.mubr.bf16.gmra.mrb[4].mxu0 %v1764_v48  ;;  %3315 = vmatpush3.bf16.msra.mxu1 %v1781_v46  ;;  %v1783_v48 = vld [vmem:[#allocation3 + $0x20] sm:$0xff] }
 0x3b6   : > { %v1691_v59 = vadd.f32 %v1690_v58, %v4894_v55  ;;  %v1692_v60 = vpop.f32.mrb[19].mxu1  ;;  %v1741_v62 = vmul.f32 0.088388346, %v1687_v50  ;;  %3316 = vmatprep.subr.bf16.mxu1 %v1782_v47 }
 0x3b7   : > { %v1693_v61 = vadd.f32 %v1692_v60, %v4898_v56  ;;  %v1742_v0 = vmul.f32 0.088388346, %v1689_v57 }
 0x3b8   : > { %v1743_v63 = vmul.f32 0.088388346, %v1691_v59 }
 0x3b9   : > { %v1744_v1 = vmul.f32 0.088388346, %v1693_v61  ;;  %3317 = vmatpush3.bf16.msra.mxu1 %v1782_v47 }
 0x3ba   : > { %v1765_v2 = vpack.c.bf16 %v1743_v63, %v1741_v62  ;;  %3318 = vmatprep.subr.bf16.mxu1 %v1783_v48  ;;  %v1784_v63 = vld [vmem:[#allocation3 + $0x30] sm:$0xff] }
 0x3bb   : > { %v1766_v3 = vpack.c.bf16 %v1744_v1, %v1742_v0  ;;  %v1696_v4 = vpop.f32.mrb[20].mxu1 }
 0x3bc   : > { %v1697_v5 = vadd.f32 %v1696_v4, %v4894_v55  ;;  %v1698_v6 = vpop.f32.mrb[21].mxu1  ;;  %3306 = vmatprep.mubr.bf16.mxu1 %v1765_v2 }
 0x3bd   : > { %v1699_v7 = vadd.f32 %v1698_v6, %v4898_v56  ;;  %v1700_v8 = vpop.f32.mrb[22].mxu1  ;;  %3370 = vmatprep.mubr.bf16.mxu0 %v1766_v3  ;;  %3319 = vmatpush3.bf16.msra.mxu1 %v1783_v48  ;;  %v1786_v6 = vld [vmem:[#allocation3 + $0x50] sm:$0xff] }
 0x3be   : > { %v1701_v9 = vadd.f32 %v1700_v8, %v4894_v55  ;;  %v1702_v10 = vpop.f32.mrb[23].mxu1  ;;  %v1745_v12 = vmul.f32 0.088388346, %v1697_v5  ;;  %3320 = vmatprep.subr.bf16.mxu1 %v1784_v63  ;;  %v1785_v5 = vld [vmem:[#allocation3 + $0x40] sm:$0xff] }
 0x3bf   : > { %v1703_v11 = vadd.f32 %v1702_v10, %v4898_v56  ;;  %v1746_v14 = vmul.f32 0.088388346, %v1699_v7  ;;  %v1787_v7 = vld [vmem:[#allocation3 + $0x60] sm:$0xff] }
 0x3c0   : > { %v1747_v13 = vmul.f32 0.088388346, %v1701_v9 }
 0x3c1   : > { %v1748_v15 = vmul.f32 0.088388346, %v1703_v11  ;;  %3321 = vmatpush3.bf16.msra.mxu1 %v1784_v63  ;;  %v1788_v11 = vld [vmem:[#allocation3 + $0x70] sm:$0xff] }
 0x3c2   : > { %v1767_v16 = vpack.c.bf16 %v1747_v13, %v1745_v12  ;;  %3322 = vmatprep.subr.bf16.mxu1 %v1785_v5 }
 0x3c3   : > { %v1768_v17 = vpack.c.bf16 %v1748_v15, %v1746_v14  ;;  %v1706_v38 = vpop.f32.mrb[24].mxu1 }
 0x3c4   : > { %v1707_v39 = vadd.f32 %v1706_v38, %v4894_v55  ;;  %v1708_v18 = vpop.f32.mrb[25].mxu1  ;;  %3307 = vmatmul.mubr.bf16.gmra.mrb[40].mxu1 %v1767_v16 }
 0x3c5   : > { %v1709_v19 = vadd.f32 %v1708_v18, %v4898_v56  ;;  %v1710_v20 = vpop.f32.mrb[26].mxu1  ;;  %3371 = vmatmul.mubr.bf16.gmra.mrb[8].mxu0 %v1768_v17  ;;  %3323 = vmatpush3.bf16.msra.mxu1 %v1785_v5 }
 0x3c6   : > { %v1711_v42 = vadd.f32 %v1710_v20, %v4894_v55  ;;  %v1712_v43 = vpop.f32.mrb[27].mxu1  ;;  %v1749_v22 = vmul.f32 0.088388346, %v1707_v39  ;;  %3324 = vmatprep.subr.bf16.mxu1 %v1786_v6 }
 0x3c7   : > { %v1713_v21 = vadd.f32 %v1712_v43, %v4898_v56  ;;  %v1750_v24 = vmul.f32 0.088388346, %v1709_v19 }
 0x3c8   : > { %v1751_v23 = vmul.f32 0.088388346, %v1711_v42 }
 0x3c9   : > { %v1752_v25 = vmul.f32 0.088388346, %v1713_v21  ;;  %3325 = vmatpush3.bf16.msra.mxu1 %v1786_v6  ;;  %v2151_v21 = vld [vmem:[#allocation3 + $0x8] sm:$0xff] }
 0x3ca   : > { %v1769_v26 = vpack.c.bf16 %v1751_v23, %v1749_v22  ;;  %3326 = vmatprep.subr.bf16.mxu1 %v1787_v7  ;;  %v2153_v6 = vld [vmem:[#allocation3 + $0x28] sm:$0xff] }
 0x3cb   : > { %v1770_v27 = vpack.c.bf16 %v1752_v25, %v1750_v24  ;;  %v1716_v28 = vpop.f32.mrb[28].mxu1 }
 0x3cc   : > { %v1717_v29 = vadd.f32 %v1716_v28, %v4894_v55  ;;  %v1718_v30 = vpop.f32.mrb[29].mxu1  ;;  %3310 = vmatprep.mubr.bf16.mxu1 %v1769_v26 }
 0x3cd   : > { %v1719_v31 = vadd.f32 %v1718_v30, %v4898_v56  ;;  %v1720_v32 = vpop.f32.mrb[30].mxu1  ;;  %3374 = vmatprep.mubr.bf16.mxu0 %v1770_v27  ;;  %3327 = vmatpush3.bf16.msra.mxu1 %v1787_v7 }
 0x3ce   : > { %v1721_v33 = vadd.f32 %v1720_v32, %v4894_v55  ;;  %v1722_v34 = vpop.f32.mrb[31].mxu1  ;;  %v1753_v36 = vmul.f32 0.088388346, %v1717_v29  ;;  %3328 = vmatprep.subr.bf16.mxu1 %v1788_v11 }
 0x3cf   : > { %v1723_v35 = vadd.f32 %v1722_v34, %v4898_v56  ;;  %v1754_v40 = vmul.f32 0.088388346, %v1719_v31 }
 0x3d0   : > { %v1755_v37 = vmul.f32 0.088388346, %v1721_v33 }
 0x3d1   : > { %v1756_v41 = vmul.f32 0.088388346, %v1723_v35  ;;  %3329 = vmatpush3.bf16.msra.mxu1 %v1788_v11 }
 0x3d2   : > { %v1771_v44 = vpack.c.bf16 %v1755_v37, %v1753_v36  ;;  %3378 = vmatprep.subr.bf16.mxu1 %v2151_v21 }
 0x3d3   : > { %v1772_v45 = vpack.c.bf16 %v1756_v41, %v1754_v40 }
 0x3d4   : > { %3311 = vmatmul.mubr.bf16.gmra.mrb[44].mxu1 %v1771_v44 }
 0x3d5   : > { %3375 = vmatmul.mubr.bf16.gmra.mrb[12].mxu0 %v1772_v45 }
 0x477   : > { %v4932_v55 = vpop.f32.mrb[32].mxu1 }
 0x478   : > { %v4934_v56 = vpop.f32.mrb[0].mxu0  ;;  %1890 = vmax.xlane.f32.xlu1 %v4932_v55  ;;  %v4937_v49 = vpop.f32.mrb[33].mxu1 }
 0x479   : > { %v4939_v50 = vpop.f32.mrb[1].mxu0  ;;  %1886 = vmax.xlane.f32.xlu0 %v4937_v49  ;;  %v4942_v53 = vpop.f32.mrb[34].mxu1 }
 0x47a   : > { %v4944_v57 = vpop.f32.mrb[35].mxu1  ;;  %v4946_v58 = vpop.f32.mrb[2].mxu0 }
 0x47b   : > { %v4948_v59 = vpop.f32.mrb[3].mxu0 }
 0x47c   : > { %1892 = vmax.xlane.f32.xlu1 %v4942_v53 }
 0x47d   : > { %1888 = vmax.xlane.f32.xlu0 %v4944_v57 }
 0x487   : > { %v4952_v60 = vpop.f32.mrb[36].mxu1 }
 0x488   : > { %v4954_v61 = vpop.f32.mrb[37].mxu1  ;;  %v4956_v62 = vpop.f32.mrb[4].mxu0 }
 0x489   : > { %v4958_v0 = vpop.f32.mrb[5].mxu0  ;;  %1894 = vmax.xlane.f32.xlu0 %v4954_v61  ;;  %v4961_v1 = vpop.f32.mrb[38].mxu1 }
 0x48a   : > { %v4963_v2 = vpop.f32.mrb[39].mxu1  ;;  %v4965_v3 = vpop.f32.mrb[6].mxu0 }
 0x48b   : > { %v4967_v4 = vpop.f32.mrb[7].mxu0  ;;  %1896 = vmax.xlane.f32.xlu1 %v4963_v2 }
 0x48d   : > { %1898 = vmax.xlane.f32.xlu0 %v4952_v60 }
 0x48f   : > { %1900 = vmax.xlane.f32.xlu1 %v4961_v1 }
 0x497   : > { %v4972_v8 = vpop.f32.mrb[40].mxu1 }
 0x498   : > { %v4974_v9 = vpop.f32.mrb[41].mxu1  ;;  %v4976_v10 = vpop.f32.mrb[8].mxu0 }
 0x499   : > { %v4978_v12 = vpop.f32.mrb[9].mxu0  ;;  %1902 = vmax.xlane.f32.xlu0 %v4974_v9  ;;  %v4981_v13 = vpop.f32.mrb[42].mxu1 }
 0x49a   : > { %v4983_v14 = vpop.f32.mrb[43].mxu1  ;;  %v4985_v15 = vpop.f32.mrb[10].mxu0 }
 0x49b   : > { %v4987_v16 = vpop.f32.mrb[11].mxu0  ;;  %1904 = vmax.xlane.f32.xlu1 %v4983_v14 }
 0x49d   : > { %1906 = vmax.xlane.f32.xlu0 %v4972_v8 }
 0x49f   : > { %1908 = vmax.xlane.f32.xlu1 %v4981_v13 }
 0x4a7   : > { %v4992_v17 = vpop.f32.mrb[44].mxu1 }
 0x4a8   : > { %v4994_v38 = vpop.f32.mrb[45].mxu1  ;;  %v4996_v39 = vpop.f32.mrb[12].mxu0 }
 0x4a9   : > { %v4998_v18 = vpop.f32.mrb[13].mxu0  ;;  %1910 = vmax.xlane.f32.xlu0 %v4994_v38  ;;  %v5001_v19 = vpop.f32.mrb[46].mxu1 }
 0x4aa   : > { %v5003_v20 = vpop.f32.mrb[47].mxu1  ;;  %v5005_v42 = vpop.f32.mrb[14].mxu0 }
 0x4ab   : > { %v5007_v43 = vpop.f32.mrb[15].mxu0  ;;  %1912 = vmax.xlane.f32.xlu1 %v5003_v20 }
 0x4ad   : > { %1914 = vmax.xlane.f32.xlu0 %v4992_v17 }
 0x4af   : > { %1916 = vmax.xlane.f32.xlu1 %v5001_v19 }
 0x4b1   : > { %2256 = vmax.xlane.f32.xlu0 %v4939_v50 }
 0x4b3   : > { %2258 = vmax.xlane.f32.xlu1 %v4948_v59 }
 0x4b5   : > { %2260 = vmax.xlane.f32.xlu0 %v4934_v56 }
 0x4b7   : > { %2262 = vmax.xlane.f32.xlu1 %v4946_v58 }
 0x4b9   : > { %2264 = vmax.xlane.f32.xlu0 %v4958_v0 }
 0x4bb   : > { %2266 = vmax.xlane.f32.xlu1 %v4967_v4 }
 0x4bd   : > { %2268 = vmax.xlane.f32.xlu0 %v4956_v62 }
 0x4bf   : > { %2270 = vmax.xlane.f32.xlu1 %v4965_v3 }
 0x4c1   : > { %2272 = vmax.xlane.f32.xlu0 %v4978_v12 }
 0x4c3   : > { %2274 = vmax.xlane.f32.xlu1 %v4987_v16 }
 0x4c5   : > { %2276 = vmax.xlane.f32.xlu0 %v4976_v10 }
 0x4c7   : > { %2278 = vmax.xlane.f32.xlu1 %v4985_v15 }
 0x4c9   : > { %2280 = vmax.xlane.f32.xlu0 %v4998_v18 }
 0x4cb   : > { %2282 = vmax.xlane.f32.xlu1 %v5007_v43 }
 0x4cd   : > { %2284 = vmax.xlane.f32.xlu0 %v4996_v39 }
 0x4cf   : > { %2286 = vmax.xlane.f32.xlu1 %v5005_v42 }
 0x505   : > { %v1891_v22 = vpop.xlane.xlu1 %1890 }
 0x506   : > { %v1887_v23 = vpop.xlane.xlu0 %1886  ;;  %v1920_v25 = vsub.f32 %v4932_v55, %v1891_v22 }
 0x507   : > { %v1918_v24 = vsub.f32 %v4937_v49, %v1887_v23 }
 0x508   : > { %v1938_v31 = vmul.f32 1.442695, %v1920_v25 }
 0x509   : > { %v1934_v26 = vmul.f32 1.442695, %v1918_v24  ;;  %v1893_v27 = vpop.xlane.xlu1 %1892  ;;  %v2155_v24 = vld [vmem:[#allocation3 + $0x48] sm:$0xff] }
 0x50a   : > { %v1921_v28 = vsub.f32 %v4942_v53, %v1893_v27  ;;  %v1889_v29 = vpop.xlane.xlu0 %1888 }
 0x50b   : > { %v1919_v30 = vsub.f32 %v4944_v57, %v1889_v29  ;;  %3761 = vpow2.f32 %v1934_v26 }
 0x50c   : > { %v1940_v32 = vmul.f32 1.442695, %v1921_v28 }
 0x50d   : > { %v1936_v33 = vmul.f32 1.442695, %v1919_v30 }
 0x50e   : > { %3763 = vpow2.f32 %v1940_v32 }
 0x50f   : > { %3765 = vpow2.f32 %v1936_v33 }
 0x510   : > { %3767 = vpow2.f32 %v1938_v31 }
 0x515   : > { %v5032_v35 = vpop.eup %3761 }
 0x516   : > { %v1895_v34 = vpop.xlane.xlu0 %1894 }
 0x517   : > { %v1922_v36 = vsub.f32 %v4954_v61, %v1895_v34  ;;  %v2152_v61 = vld [vmem:[#allocation3 + $0x18] sm:$0xff] }
 0x518   : > { %v5035_v37 = vpop.eup %3763  ;;  %v1897_v40 = vpop.xlane.xlu1 %1896  ;;  %v2156_v34 = vld [vmem:[#allocation3 + $0x58] sm:$0xff] }
 0x519   : > { %v5037_v41 = vpop.eup %3765  ;;  %v1942_v44 = vmul.f32 1.442695, %v1922_v36  ;;  %v1923_v45 = vsub.f32 %v4963_v2, %v1897_v40  ;;  %v2157_v40 = vld [vmem:[#allocation3 + $0x68] sm:$0xff] }
 0x51a   : > { %v5040_v46 = vpop.eup %3767  ;;  %v1899_v47 = vpop.xlane.xlu0 %1898  ;;  %v1998_v48 = vpack.c.bf16 %v5037_v41, %v5032_v35 }
 0x51b   : > { %v1944_v55 = vmul.f32 1.442695, %v1923_v45  ;;  %v1924_v49 = vsub.f32 %v4952_v60, %v1899_v47  ;;  %v1999_v53 = vpack.c.bf16 %v5035_v37, %v5040_v46  ;;  %3769 = vpow2.f32 %v1942_v44  ;;  %v2154_v60 = vld [vmem:[#allocation3 + $0x38] sm:$0xff] }
 0x51c   : > { %3330 = vmatprep.mubr.bf16.mxu1 %v1998_v48  ;;  %v1901_v57 = vpop.xlane.xlu1 %1900 }
 0x51d   : > { %3771 = vpow2.f32 %v1944_v55  ;;  %v1946_v63 = vmul.f32 1.442695, %v1924_v49  ;;  %v1925_v2 = vsub.f32 %v4961_v1, %v1901_v57  ;;  %3331 = vmatmul.mubr.bf16.vlgmr.msra.gmra.mrb[48].mxu1 %v1999_v53 }
 0x51e   : > { %3379 = vmatpush3.bf16.msra.mxu1 %v2151_v21 }
 0x51f   : > { %v1948_v5 = vmul.f32 1.442695, %v1925_v2  ;;  %3380 = vmatprep.subr.bf16.mxu1 %v2152_v61  ;;  %3773 = vpow2.f32 %v1946_v63 }
 0x521   : > { %3775 = vpow2.f32 %v1948_v5 }
 0x522   : > { %3381 = vmatpush3.bf16.msra.mxu1 %v2152_v61 }
 0x523   : > { %3382 = vmatprep.subr.bf16.mxu1 %v2153_v6 }
 0x525   : > { %v5048_v7 = vpop.eup %3769 }
 0x526   : > { %v1903_v11 = vpop.xlane.xlu0 %1902  ;;  %3383 = vmatpush3.bf16.msra.mxu1 %v2153_v6 }
 0x527   : > { %v5050_v22 = vpop.eup %3771  ;;  %v1926_v23 = vsub.f32 %v4974_v9, %v1903_v11  ;;  %3384 = vmatprep.subr.bf16.mxu1 %v2154_v60 }
 0x528   : > { %v1905_v1 = vpop.xlane.xlu1 %1904  ;;  %v2000_v21 = vpack.c.bf16 %v5050_v22, %v5048_v7 }
 0x529   : > { %v1950_v25 = vmul.f32 1.442695, %v1926_v23  ;;  %v1927_v26 = vsub.f32 %v4983_v14, %v1905_v1  ;;  %v5056_v27 = vpop.eup %3773 }
 0x52a   : > { %3334 = vmatprep.mubr.bf16.mxu1 %v2000_v21  ;;  %v1907_v28 = vpop.xlane.xlu0 %1906  ;;  %3385 = vmatpush3.bf16.msra.mxu1 %v2154_v60 }
 0x52b   : > { %v5058_v29 = vpop.eup %3775  ;;  %v1952_v30 = vmul.f32 1.442695, %v1927_v26  ;;  %v1928_v31 = vsub.f32 %v4972_v8, %v1907_v28  ;;  %3386 = vmatprep.subr.bf16.mxu1 %v2155_v24  ;;  %3777 = vpow2.f32 %v1950_v25  ;;  %v2158_v8 = vld [vmem:[#allocation3 + $0x78] sm:$0xff] }
 0x52c   : > { %v1909_v9 = vpop.xlane.xlu1 %1908  ;;  %v2001_v32 = vpack.c.bf16 %v5058_v29, %v5056_v27 }
 0x52d   : > { %3779 = vpow2.f32 %v1952_v30  ;;  %v1954_v33 = vmul.f32 1.442695, %v1928_v31  ;;  %v1929_v14 = vsub.f32 %v4981_v13, %v1909_v9 }
 0x52e   : > { %3335 = vmatmul.mubr.bf16.gmra.mrb[52].mxu1 %v2001_v32 }
 0x52f   : > { %v1956_v36 = vmul.f32 1.442695, %v1929_v14  ;;  %3387 = vmatpush3.bf16.msra.mxu1 %v2155_v24  ;;  %3781 = vpow2.f32 %v1954_v33 }
 0x530   : > { %3388 = vmatprep.subr.bf16.mxu1 %v2156_v34 }
 0x531   : > { %3783 = vpow2.f32 %v1956_v36 }
 0x533   : > { %3389 = vmatpush3.bf16.msra.mxu1 %v2156_v34 }
 0x534   : > { %3390 = vmatprep.subr.bf16.mxu1 %v2157_v40 }
 0x535   : > { %v5064_v44 = vpop.eup %3777 }
 0x536   : > { %v1911_v45 = vpop.xlane.xlu0 %1910 }
 0x537   : > { %v5066_v47 = vpop.eup %3779  ;;  %v1930_v48 = vsub.f32 %v4994_v38, %v1911_v45  ;;  %3391 = vmatpush3.bf16.msra.mxu1 %v2157_v40 }
 0x538   : > { %v1913_v13 = vpop.xlane.xlu1 %1912  ;;  %v2002_v55 = vpack.c.bf16 %v5066_v47, %v5064_v44  ;;  %3392 = vmatprep.subr.bf16.mxu1 %v2158_v8 }
 0x539   : > { %v1958_v49 = vmul.f32 1.442695, %v1930_v48  ;;  %v1931_v53 = vsub.f32 %v5003_v20, %v1913_v13  ;;  %v5072_v57 = vpop.eup %3781 }
 0x53a   : > { %3338 = vmatprep.mubr.bf16.mxu1 %v2002_v55  ;;  %v1915_v61 = vpop.xlane.xlu0 %1914 }
 0x53b   : > { %v5074_v63 = vpop.eup %3783  ;;  %v1960_v2 = vmul.f32 1.442695, %v1931_v53  ;;  %v1932_v5 = vsub.f32 %v4992_v17, %v1915_v61  ;;  %3393 = vmatpush3.bf16.msra.mxu1 %v2158_v8  ;;  %3785 = vpow2.f32 %v1958_v49 }
 0x53c   : > { %v1917_v38 = vpop.xlane.xlu1 %1916  ;;  %v2003_v6 = vpack.c.bf16 %v5074_v63, %v5072_v57 }
 0x53d   : > { %3787 = vpow2.f32 %v1960_v2  ;;  %v1962_v60 = vmul.f32 1.442695, %v1932_v5  ;;  %v1933_v11 = vsub.f32 %v5001_v19, %v1917_v38 }
 0x53e   : > { %3339 = vmatmul.mubr.bf16.gmra.mrb[56].mxu1 %v2003_v6  ;;  %v2257_v20 = vpop.xlane.xlu0 %2256 }
 0x53f   : > { %v1964_v23 = vmul.f32 1.442695, %v1933_v11  ;;  %v2288_v1 = vsub.f32 %v4939_v50, %v2257_v20  ;;  %3789 = vpow2.f32 %v1962_v60 }
 0x540   : > { %v2259_v21 = vpop.xlane.xlu1 %2258 }
 0x541   : > { %3791 = vpow2.f32 %v1964_v23  ;;  %v2304_v24 = vmul.f32 1.442695, %v2288_v1  ;;  %v2289_v17 = vsub.f32 %v4948_v59, %v2259_v21 }
 0x542   : > { %v2261_v25 = vpop.xlane.xlu0 %2260 }
 0x543   : > { %3793 = vpow2.f32 %v2304_v24  ;;  %v2306_v26 = vmul.f32 1.442695, %v2289_v17  ;;  %v2290_v28 = vsub.f32 %v4934_v56, %v2261_v25 }
 0x544   : > { %v2263_v30 = vpop.xlane.xlu1 %2262 }
 0x545   : > { %3795 = vpow2.f32 %v2306_v26  ;;  %v2308_v31 = vmul.f32 1.442695, %v2290_v28  ;;  %v2291_v19 = vsub.f32 %v4946_v58, %v2263_v30  ;;  %v5084_v9 = vpop.eup %3785 }
 0x546   : > { %v2265_v32 = vpop.xlane.xlu0 %2264 }
 0x547   : > { %v5086_v50 = vpop.eup %3787  ;;  %v2310_v33 = vmul.f32 1.442695, %v2291_v19  ;;  %v2292_v14 = vsub.f32 %v4958_v0, %v2265_v32  ;;  %3797 = vpow2.f32 %v2308_v31 }
 0x548   : > { %v2267_v59 = vpop.xlane.xlu1 %2266  ;;  %v2004_v34 = vpack.c.bf16 %v5086_v50, %v5084_v9 }
 0x549   : > { %3799 = vpow2.f32 %v2310_v33  ;;  %v2312_v56 = vmul.f32 1.442695, %v2292_v14  ;;  %v2293_v36 = vsub.f32 %v4967_v4, %v2267_v59  ;;  %v5092_v40 = vpop.eup %3789 }
 0x54a   : > { %v2269_v58 = vpop.xlane.xlu0 %2268  ;;  %3342 = vmatprep.mubr.bf16.mxu1 %v2004_v34 }
 0x54b   : > { %v5094_v8 = vpop.eup %3791  ;;  %v2314_v45 = vmul.f32 1.442695, %v2293_v36  ;;  %v2294_v48 = vsub.f32 %v4956_v62, %v2269_v58  ;;  %3801 = vpow2.f32 %v2312_v56 }
 0x54c   : > { %v2271_v0 = vpop.xlane.xlu1 %2270  ;;  %v2005_v13 = vpack.c.bf16 %v5094_v8, %v5092_v40 }
 0x54d   : > { %v3794_v55 = vpop.eup %3793  ;;  %3803 = vpow2.f32 %v2314_v45  ;;  %v2316_v49 = vmul.f32 1.442695, %v2294_v48  ;;  %v2295_v53 = vsub.f32 %v4965_v3, %v2271_v0 }
 0x54e   : > { %2336 = vadd.xlane.f32.xlu0 %v3794_v55  ;;  %v2273_v4 = vpop.xlane.xlu0 %2272  ;;  %3343 = vmatmul.mubr.bf16.gmra.mrb[60].mxu1 %v2005_v13 }
 0x54f   : > { %v3796_v61 = vpop.eup %3795  ;;  %v2318_v2 = vmul.f32 1.442695, %v2295_v53  ;;  %v2296_v5 = vsub.f32 %v4978_v12, %v2273_v4  ;;  %3805 = vpow2.f32 %v2316_v49  ;;  %v3718_v53 = vld [vmem:[#allocation15 + $0x14] ss:$8 sps:$4 sm:$0xff]   ;;  %v3716_v4 = vld [vmem:[#allocation15 + $0x10] ss:$8 sps:$4 sm:$0xff]  }
 0x550   : > { %2338 = vadd.xlane.f32.xlu1 %v3796_v61  ;;  %v2275_v62 = vpop.xlane.xlu1 %2274  ;;  %v2368_v38 = vpack.c.bf16 %v3796_v61, %v3794_v55  ;;  %v3724_v61 = vld [vmem:[#allocation15 + $0x34] ss:$8 sps:$4 sm:$0xff]  }
 0x551   : > { %3807 = vpow2.f32 %v2318_v2  ;;  %v2320_v6 = vmul.f32 1.442695, %v2296_v5  ;;  %v2297_v60 = vsub.f32 %v4987_v16, %v2275_v62  ;;  %v3798_v11 = vpop.eup %3797  ;;  %v3725_v2 = vld [vmem:[#allocation15 + $0x40] ss:$8 sps:$4 sm:$0xff]   ;;  %v3730_v5 = vld [vmem:[#allocation15 + $0x54] ss:$8 sps:$4 sm:$0xff]  }
 0x552   : > { %1966 = vadd.xlane.f32.xlu0 %v5032_v35  ;;  %v2277_v20 = vpop.xlane.xlu0 %2276  ;;  %3394 = vmatprep.mubr.bf16.mxu1 %v2368_v38  ;;  %v3731_v62 = vld [vmem:[#allocation15 + $0x60] ss:$8 sps:$4 sm:$0xff]   ;;  %v3736_v38 = vld [vmem:[#allocation15 + $0x74] ss:$8 sps:$4 sm:$0xff]  }
 0x553   : > { %v3800_v3 = vpop.eup %3799  ;;  %v2322_v23 = vmul.f32 1.442695, %v2297_v60  ;;  %v2298_v1 = vsub.f32 %v4976_v10, %v2277_v20  ;;  %3809 = vpow2.f32 %v2320_v6  ;;  %v3739_v6 = vld [vmem:[#allocation15 + $0x84] ss:$8 sps:$4 sm:$0xff]   ;;  %v3742_v60 = vld [vmem:[#allocation15 + $0x94] ss:$8 sps:$4 sm:$0xff]  }
 0x554   : > { %1968 = vadd.xlane.f32.xlu1 %v5037_v41  ;;  %v2279_v12 = vpop.xlane.xlu1 %2278  ;;  %v2369_v21 = vpack.c.bf16 %v3800_v3, %v3798_v11  ;;  %v3745_v20 = vld [vmem:[#allocation15 + $0xa4] ss:$8 sps:$4 sm:$0xff]  }
 0x555   : > { %3811 = vpow2.f32 %v2322_v23  ;;  %v2324_v24 = vmul.f32 1.442695, %v2298_v1  ;;  %v2299_v17 = vsub.f32 %v4985_v15, %v2279_v12  ;;  %v3802_v25 = vpop.eup %3801  ;;  %v3746_v23 = vld [vmem:[#allocation15 + $0xb0] ss:$8 sps:$4 sm:$0xff]   ;;  %v3749_v1 = vld [vmem:[#allocation15 + $0xc0] ss:$8 sps:$4 sm:$0xff]  }
 0x556   : > { %2340 = vadd.xlane.f32.xlu0 %v3798_v11  ;;  %v2281_v16 = vpop.xlane.xlu0 %2280  ;;  %3395 = vmatmul.mubr.bf16.vlgmr.msra.gmra.mrb[64].mxu1 %v2369_v21  ;;  %v3740_v11 = vld [vmem:[#allocation15 + $0x90] ss:$8 sps:$4 sm:$0xff]   ;;  %v3754_v12 = vld [vmem:[#allocation15 + $0xd4] ss:$8 sps:$4 sm:$0xff]  }
 0x557   : > { %v3804_v35 = vpop.eup %3803  ;;  %v2326_v26 = vmul.f32 1.442695, %v2299_v17  ;;  %v2300_v28 = vsub.f32 %v4998_v18, %v2281_v16  ;;  %3813 = vpow2.f32 %v2324_v24  ;;  %v3752_v21 = vld [vmem:[#allocation15 + $0xd0] ss:$8 sps:$4 sm:$0xff]   ;;  %v3757_v24 = vld [vmem:[#allocation15 + $0xe4] ss:$8 sps:$4 sm:$0xff]  }
 0x558   : > { %2342 = vadd.xlane.f32.xlu1 %v3800_v3  ;;  %v2283_v10 = vpop.xlane.xlu1 %2282  ;;  %v2370_v30 = vpack.c.bf16 %v3804_v35, %v3802_v25  ;;  %v3743_v3 = vld [vmem:[#allocation15 + $0xa0] ss:$8 sps:$4 sm:$0xff]   ;;  %v3758_v16 = vld [vmem:[#allocation15 + $0xf0] ss:$8 sps:$4 sm:$0xff]  }
 0x559   : > { %3815 = vpow2.f32 %v2326_v26  ;;  %v2328_v41 = vmul.f32 1.442695, %v2300_v28  ;;  %v2301_v31 = vsub.f32 %v5007_v43, %v2283_v10  ;;  %v3806_v19 = vpop.eup %3805  ;;  %v3755_v17 = vld [vmem:[#allocation15 + $0xe0] ss:$8 sps:$4 sm:$0xff]  }
 0x55a   : > { %1970 = vadd.xlane.f32.xlu0 %v5040_v46  ;;  %v2285_v15 = vpop.xlane.xlu0 %2284  ;;  %3398 = vmatprep.mubr.bf16.mxu1 %v2370_v30 }
 0x55b   : > { %v3808_v32 = vpop.eup %3807  ;;  %v2330_v33 = vmul.f32 1.442695, %v2301_v31  ;;  %v2302_v14 = vsub.f32 %v4996_v39, %v2285_v15  ;;  %3817 = vpow2.f32 %v2328_v41 }
 0x55c   : > { %1972 = vadd.xlane.f32.xlu1 %v5035_v37  ;;  %v2287_v18 = vpop.xlane.xlu1 %2286  ;;  %v2371_v59 = vpack.c.bf16 %v3808_v32, %v3806_v19 }
 0x55d   : > { %3819 = vpow2.f32 %v2330_v33  ;;  %v2332_v34 = vmul.f32 1.442695, %v2302_v14  ;;  %v2303_v56 = vsub.f32 %v5005_v42, %v2287_v18  ;;  %v3810_v36 = vpop.eup %3809 }
 0x55e   : > { %2344 = vadd.xlane.f32.xlu0 %v3802_v25  ;;  %3399 = vmatmul.mubr.bf16.gmra.mrb[68].mxu1 %v2371_v59  ;;  %v3760_v25 = vld [vmem:[#allocation15 + $0xf4] ss:$8 sps:$4 sm:$0xff]  }
 0x55f   : > { %v3812_v43 = vpop.eup %3811  ;;  %v2334_v46 = vmul.f32 1.442695, %v2303_v56  ;;  %3821 = vpow2.f32 %v2332_v34 }
 0x560   : > { %2346 = vadd.xlane.f32.xlu1 %v3804_v35  ;;  %v2372_v58 = vpack.c.bf16 %v3812_v43, %v3810_v36 }
 0x561   : > { %3823 = vpow2.f32 %v2334_v46  ;;  %v3814_v45 = vpop.eup %3813 }
 0x562   : > { %1974 = vadd.xlane.f32.xlu0 %v5048_v7  ;;  %3402 = vmatprep.mubr.bf16.mxu1 %v2372_v58  ;;  %v3715_v7 = vld [vmem:[#allocation15 + $0x4] ss:$8 sps:$4 sm:$0xff]  }
 0x563   : > { %v3816_v39 = vpop.eup %3815  ;;  %2717 = vmatprep.subr.bf16.mxu0 %v3715_v7 }
 0x564   : > { %1976 = vadd.xlane.f32.xlu1 %v5050_v22  ;;  %v2373_v37 = vpack.c.bf16 %v3816_v39, %v3814_v45  ;;  %v3713_v22 = vld [vmem:[#allocation15] ss:$8 sps:$4 sm:$0xff]  }
 0x565   : > { %v3818_v48 = vpop.eup %3817  ;;  %2718 = vmatpush1.bf16.msra.mxu0 %v3713_v22 }
 0x566   : > { %2348 = vadd.xlane.f32.xlu0 %v3806_v19  ;;  %3403 = vmatmul.mubr.bf16.gmra.mrb[72].mxu1 %v2373_v37 }
 0x567   : > { %v3820_v42 = vpop.eup %3819  ;;  %2719 = vmatprep.subr.bf16.mxu0 %v3718_v53 }
 0x568   : > { %2350 = vadd.xlane.f32.xlu1 %v3808_v32  ;;  %v2374_v0 = vpack.c.bf16 %v3820_v42, %v3818_v48 }
 0x569   : > { %v3822_v13 = vpop.eup %3821  ;;  %2720 = vmatpush1.bf16.msra.mxu0 %v3716_v4 }
 0x56a   : > { %1978 = vadd.xlane.f32.xlu0 %v5056_v27  ;;  %3406 = vmatprep.mubr.bf16.mxu1 %v2374_v0  ;;  %v3721_v27 = vld [vmem:[#allocation15 + $0x24] ss:$8 sps:$4 sm:$0xff]  }
 0x56b   : > { %v3824_v55 = vpop.eup %3823  ;;  %2721 = vmatprep.subr.bf16.mxu0 %v3721_v27 }
 0x56c   : > { %1980 = vadd.xlane.f32.xlu1 %v5058_v29  ;;  %v2375_v49 = vpack.c.bf16 %v3824_v55, %v3822_v13  ;;  %v3719_v29 = vld [vmem:[#allocation15 + $0x20] ss:$8 sps:$4 sm:$0xff]  }
 0x56d   : > { %2722 = vmatpush1.bf16.msra.mxu0 %v3719_v29 }
 0x56e   : > { %2352 = vadd.xlane.f32.xlu0 %v3810_v36  ;;  %3407 = vmatmul.mubr.bf16.gmra.mrb[76].mxu1 %v2375_v49 }
 0x56f   : > { %2723 = vmatprep.subr.bf16.mxu0 %v3724_v61 }
 0x570   : > { %2354 = vadd.xlane.f32.xlu1 %v3812_v43 }
 0x572   : > { %1982 = vadd.xlane.f32.xlu0 %v5064_v44  ;;  %v3722_v44 = vld [vmem:[#allocation15 + $0x30] ss:$8 sps:$4 sm:$0xff]  }
 0x573   : > { %2724 = vmatpush1.bf16.msra.mxu0 %v3722_v44 }
 0x574   : > { %1984 = vadd.xlane.f32.xlu1 %v5066_v47  ;;  %v3727_v47 = vld [vmem:[#allocation15 + $0x44] ss:$8 sps:$4 sm:$0xff]  }
 0x575   : > { %2725 = vmatprep.subr.bf16.mxu0 %v3727_v47 }
 0x576   : > { %2356 = vadd.xlane.f32.xlu0 %v3814_v45 }
 0x577   : > { %2726 = vmatpush1.bf16.msra.mxu0 %v3725_v2 }
 0x578   : > { %2358 = vadd.xlane.f32.xlu1 %v3816_v39  ;;  %2727 = vmatprep.subr.bf16.mxu0 %v3730_v5 }
 0x57a   : > { %1986 = vadd.xlane.f32.xlu0 %v5072_v57  ;;  %v3728_v57 = vld [vmem:[#allocation15 + $0x50] ss:$8 sps:$4 sm:$0xff]  }
 0x57b   : > { %2728 = vmatpush1.bf16.msra.mxu0 %v3728_v57 }
 0x57c   : > { %1988 = vadd.xlane.f32.xlu1 %v5074_v63  ;;  %v3733_v63 = vld [vmem:[#allocation15 + $0x64] ss:$8 sps:$4 sm:$0xff]  }
 0x57d   : > { %2729 = vmatprep.subr.bf16.mxu0 %v3733_v63 }
 0x57e   : > { %2360 = vadd.xlane.f32.xlu0 %v3818_v48 }
 0x57f   : > { %2730 = vmatpush1.bf16.msra.mxu0 %v3731_v62 }
 0x580   : > { %2362 = vadd.xlane.f32.xlu1 %v3820_v42  ;;  %2731 = vmatprep.subr.bf16.mxu0 %v3736_v38 }
 0x582   : > { %1990 = vadd.xlane.f32.xlu0 %v5084_v9  ;;  %v3734_v9 = vld [vmem:[#allocation15 + $0x70] ss:$8 sps:$4 sm:$0xff]  }
 0x583   : > { %2732 = vmatpush1.bf16.msra.mxu0 %v3734_v9 }
 0x584   : > { %1992 = vadd.xlane.f32.xlu1 %v5086_v50  ;;  %v3737_v50 = vld [vmem:[#allocation15 + $0x80] ss:$8 sps:$4 sm:$0xff]   ;;  %2733 = vmatprep.subr.bf16.mxu0 %v3739_v6 }
 0x586   : > { %2364 = vadd.xlane.f32.xlu0 %v3822_v13 }
 0x587   : > { %2734 = vmatpush1.bf16.msra.mxu0 %v3737_v50 }
 0x588   : > { %2366 = vadd.xlane.f32.xlu1 %v3824_v55  ;;  %2735 = vmatprep.subr.bf16.mxu0 %v3742_v60 }
 0x58a   : > { %1994 = vadd.xlane.f32.xlu0 %v5092_v40  ;;  %v3748_v40 = vld [vmem:[#allocation15 + $0xb4] ss:$8 sps:$4 sm:$0xff]  }
 0x58b   : > { %2736 = vmatpush1.bf16.msra.mxu0 %v3740_v11 }
 0x58c   : > { %1996 = vadd.xlane.f32.xlu1 %v5094_v8  ;;  %2737 = vmatprep.subr.bf16.mxu0 %v3745_v20  ;;  %v3751_v8 = vld [vmem:[#allocation15 + $0xc4] ss:$8 sps:$4 sm:$0xff]  }
 0x58f   : > { %2738 = vmatpush1.bf16.msra.mxu0 %v3743_v3 }
 0x590   : > { %2739 = vmatprep.subr.bf16.mxu0 %v3748_v40 }
 0x593   : > { %2740 = vmatpush1.bf16.msra.mxu0 %v3746_v23 }
 0x594   : > { %2741 = vmatprep.subr.bf16.mxu0 %v3751_v8 }
 0x597   : > { %2742 = vmatpush1.bf16.msra.mxu0 %v3749_v1 }
 0x598   : > { %2743 = vmatprep.subr.bf16.mxu0 %v3754_v12 }
 0x59b   : > { %2744 = vmatpush1.bf16.msra.mxu0 %v3752_v21 }
 0x59c   : > { %2745 = vmatprep.subr.bf16.mxu0 %v3757_v24 }
 0x59f   : > { %2746 = vmatpush1.bf16.msra.mxu0 %v3755_v17 }
 0x5a0   : > { %2747 = vmatprep.subr.bf16.mxu0 %v3760_v25 }
 0x5a3   : > { %2748 = vmatpush1.bf16.msra.mxu0 %v3758_v16 }
 0x5db   : > { %v5124_v35 = vpop.xlane.xlu0 %2336 }
 0x5dd   : > { %v5126_v26 = vpop.xlane.xlu1 %2338 }
 0x5df   : > { %v1967_v28 = vpop.xlane.xlu0 %1966 }
 0x5e0   : > { %3825 = vrcp.f32 %v1967_v28 }
 0x5e1   : > { %v1969_v10 = vpop.xlane.xlu1 %1968 }
 0x5e3   : > { %v5128_v30 = vpop.xlane.xlu0 %2340 }
 0x5e5   : > { %v5130_v41 = vpop.xlane.xlu1 %2342 }
 0x5e7   : > { %v1971_v31 = vpop.xlane.xlu0 %1970 }
 0x5e8   : > { %3827 = vrcp.f32 %v1971_v31 }
 0x5e9   : > { %3829 = vrcp.f32 %v1969_v10  ;;  %v1973_v19 = vpop.xlane.xlu1 %1972 }
 0x5ea   : > { %3831 = vrcp.f32 %v1973_v19  ;;  %v3826_v18 = vpop.eup %3825 }
 0x5eb   : > { %v5132_v15 = vpop.xlane.xlu0 %2344 }
 0x5ed   : > { %v5134_v32 = vpop.xlane.xlu1 %2346 }
 0x5ef   : > { %v1975_v33 = vpop.xlane.xlu0 %1974 }
 0x5f0   : > { %v3332_v14 = vpop.f32.mrb[48].mxu1  ;;  %3833 = vrcp.f32 %v1975_v33 }
 0x5f1   : > { %v1977_v59 = vpop.xlane.xlu1 %1976  ;;  %v2040_v34 = vpop.f32.mrb[49].mxu1 }
 0x5f2   : > { %v3828_v56 = vpop.eup %3827  ;;  %v3333_v36 = vpop.f32.mrb[50].mxu1  ;;  %v5138_v39 = vmul.f32 %v3826_v18, %v2040_v34 }
 0x5f3   : > { %v3830_v43 = vpop.eup %3829  ;;  %v5136_v46 = vpop.xlane.xlu0 %2348  ;;  %v5142_v48 = vmul.f32 %v3828_v56, %v3332_v14 }
 0x5f4   : > { %v2043_v58 = vpop.f32.mrb[51].mxu1  ;;  %v3832_v45 = vpop.eup %3831 }
 0x5f5   : > { %v5140_v37 = vmul.f32 %v3830_v43, %v2043_v58  ;;  %v5144_v42 = vmul.f32 %v3832_v45, %v3333_v36  ;;  %v5146_v0 = vpop.xlane.xlu1 %2350 }
 0x5f7   : > { %v2135_v13 = vpack.c.bf16 %v5140_v37, %v5138_v39  ;;  %v2136_v55 = vpack.c.bf16 %v5144_v42, %v5142_v48  ;;  %v1979_v49 = vpop.xlane.xlu0 %1978 }
 0x5f8   : > { %3835 = vrcp.f32 %v1979_v49 }
 0x5f9   : > { %3837 = vrcp.f32 %v1977_v59  ;;  %v1981_v7 = vpop.xlane.xlu1 %1980 }
 0x5fa   : > { %3839 = vrcp.f32 %v1981_v7  ;;  %v3834_v27 = vpop.eup %3833 }
 0x5fb   : > { %v5152_v22 = vpop.xlane.xlu0 %2352 }
 0x5fd   : > { %v5154_v53 = vpop.xlane.xlu1 %2354 }
 0x5ff   : > { %v1983_v4 = vpop.xlane.xlu0 %1982 }
 0x600   : > { %3841 = vrcp.f32 %v1983_v4 }
 0x601   : > { %v1985_v29 = vpop.xlane.xlu1 %1984  ;;  %v3336_v61 = vpop.f32.mrb[52].mxu1 }
 0x602   : > { %v3836_v44 = vpop.eup %3835  ;;  %v2056_v47 = vpop.f32.mrb[53].mxu1 }
 0x603   : > { %v3838_v2 = vpop.eup %3837  ;;  %v5156_v5 = vpop.xlane.xlu0 %2356  ;;  %v5158_v38 = vmul.f32 %v3836_v44, %v3336_v61  ;;  %v5160_v9 = vmul.f32 %v3834_v27, %v2056_v47 }
 0x604   : > { %v3337_v57 = vpop.f32.mrb[54].mxu1  ;;  %v3840_v63 = vpop.eup %3839 }
 0x605   : > { %v2059_v62 = vpop.f32.mrb[55].mxu1  ;;  %v5162_v6 = vmul.f32 %v3840_v63, %v3337_v57  ;;  %v5166_v60 = vpop.xlane.xlu1 %2358 }
 0x606   : > { %v5164_v50 = vmul.f32 %v3838_v2, %v2059_v62 }
 0x607   : > { %v2138_v11 = vpack.c.bf16 %v5162_v6, %v5158_v38  ;;  %v1987_v3 = vpop.xlane.xlu0 %1986  ;;  %v2545_v38 = vld [vmem:[%s5499_s1] sm:$0x3]  ;;  %s4097_s1 = scalar_lea.vmem %s4096_s4, 8192 }
 0x608   : > { %v2137_v20 = vpack.c.bf16 %v5164_v50, %v5160_v9  ;;  %3843 = vrcp.f32 %v1987_v3  ;;  %v5249_v9 = vrot.slane %v2545_v38, %v1444_v52  ;;  %v5253_v6 = vrot.slane %v2545_v38, %v1448_v54  ;;  %p4099_p7 = scmp.lt.s32.totalorder %s4097_s1, %s4091_s24 }
 0x609   : > { %3845 = vrcp.f32 %v1985_v29  ;;  %v1989_v40 = vpop.xlane.xlu1 %1988 }
 0x60a   : > { %3847 = vrcp.f32 %v1989_v40  ;;  %v3842_v12 = vpop.eup %3841  ;;  %p4100_p2 = por %p4099_p7, %p4098_p9 }
 0x60b   : > { %v5172_v23 = vpop.xlane.xlu0 %2360 }
 0x60c   : > { %p4101_p10 = pnand %p4100_p2, %p4094_p8 }
 0x60d   : > { %v5174_v8 = vpop.xlane.xlu1 %2362 }
 0x60f   : > { %v1991_v1 = vpop.xlane.xlu0 %1990 }
 0x610   : > { %3849 = vrcp.f32 %v1991_v1 }
 0x611   : > { %v1993_v21 = vpop.xlane.xlu1 %1992  ;;  %v3340_v24 = vpop.f32.mrb[56].mxu1 }
 0x612   : > { %v3844_v17 = vpop.eup %3843  ;;  %v2072_v25 = vpop.f32.mrb[57].mxu1 }
 0x613   : > { %v3846_v16 = vpop.eup %3845  ;;  %v5176_v28 = vpop.xlane.xlu0 %2364  ;;  %v5178_v33 = vmul.f32 %v3844_v17, %v3340_v24  ;;  %v5180_v14 = vmul.f32 %v3842_v12, %v2072_v25 }
 0x614   : > { %v3341_v10 = vpop.f32.mrb[58].mxu1  ;;  %v3848_v31 = vpop.eup %3847 }
 0x615   : > { %v2075_v19 = vpop.f32.mrb[59].mxu1  ;;  %v5182_v18 = vmul.f32 %v3848_v31, %v3341_v10  ;;  %v5186_v34 = vpop.xlane.xlu1 %2366 }
 0x616   : > { %v5184_v59 = vmul.f32 %v3846_v16, %v2075_v19 }
 0x617   : > { %v2140_v56 = vpack.c.bf16 %v5182_v18, %v5178_v33  ;;  %v1995_v43 = vpop.xlane.xlu0 %1994 }
 0x618   : > { %v2139_v36 = vpack.c.bf16 %v5184_v59, %v5180_v14  ;;  %3851 = vrcp.f32 %v1995_v43 }
 0x619   : > { %3853 = vrcp.f32 %v1993_v21  ;;  %v1997_v58 = vpop.xlane.xlu1 %1996 }
 0x61a   : > { %3855 = vrcp.f32 %v1997_v58  ;;  %v3850_v45 = vpop.eup %3849 }
 0x61b   : > { %3857 = vrcp.f32 %v5124_v35 }
 0x61c   : > { %3859 = vrcp.f32 %v5128_v30 }
 0x61d   : > { %3861 = vrcp.f32 %v5130_v41 }
 0x61e   : > { %3863 = vrcp.f32 %v5126_v26 }
 0x61f   : > { %3865 = vrcp.f32 %v5132_v15 }
 0x620   : > { %3867 = vrcp.f32 %v5136_v46 }
 0x621   : > { %v3344_v49 = vpop.f32.mrb[60].mxu1  ;;  %3869 = vrcp.f32 %v5146_v0 }
 0x622   : > { %v3852_v7 = vpop.eup %3851  ;;  %v2088_v4 = vpop.f32.mrb[61].mxu1  ;;  %3871 = vrcp.f32 %v5134_v32 }
 0x623   : > { %v3854_v27 = vpop.eup %3853  ;;  %v3345_v29 = vpop.f32.mrb[62].mxu1  ;;  %v5196_v47 = vmul.f32 %v3852_v7, %v3344_v49  ;;  %v5198_v2 = vmul.f32 %v3850_v45, %v2088_v4  ;;  %3873 = vrcp.f32 %v5152_v22 }
 0x624   : > { %v3856_v61 = vpop.eup %3855  ;;  %v2091_v44 = vpop.f32.mrb[63].mxu1  ;;  %3875 = vrcp.f32 %v5156_v5 }
 0x625   : > { %v5200_v57 = vmul.f32 %v3856_v61, %v3345_v29  ;;  %v5202_v35 = vmul.f32 %v3854_v27, %v2091_v44  ;;  %v3858_v41 = vpop.eup %3857  ;;  %3877 = vrcp.f32 %v5166_v60 }
 0x626   : > { %v3860_v62 = vpop.eup %3859  ;;  %3879 = vrcp.f32 %v5154_v53 }
 0x627   : > { %v2142_v30 = vpack.c.bf16 %v5200_v57, %v5196_v47  ;;  %v2141_v26 = vpack.c.bf16 %v5202_v35, %v5198_v2  ;;  %v3862_v40 = vpop.eup %3861  ;;  %3881 = vrcp.f32 %v5172_v23 }
 0x628   : > { %v3864_v12 = vpop.eup %3863  ;;  %3883 = vrcp.f32 %v5176_v28 }
 0x629   : > { %v3396_v63 = vpop.f32.mrb[64].mxu1  ;;  %v3866_v0 = vpop.eup %3865  ;;  %3885 = vrcp.f32 %v5186_v34 }
 0x62a   : > { %v2410_v3 = vpop.f32.mrb[65].mxu1  ;;  %v2491_v15 = vmul.f32 %v3860_v62, %v3396_v63  ;;  %v3868_v32 = vpop.eup %3867  ;;  %3887 = vrcp.f32 %v5174_v8 }
 0x62b   : > { %v3397_v1 = vpop.f32.mrb[66].mxu1  ;;  %v2489_v17 = vmul.f32 %v3858_v41, %v2410_v3  ;;  %v3870_v19 = vpop.eup %3869 }
 0x62c   : > { %v2492_v21 = vmul.f32 %v3862_v40, %v3397_v1  ;;  %v2413_v24 = vpop.f32.mrb[67].mxu1  ;;  %v3872_v22 = vpop.eup %3871 }
 0x62d   : > { %v2490_v25 = vmul.f32 %v3864_v12, %v2413_v24  ;;  %v3874_v53 = vpop.eup %3873 }
 0x62e   : > { %v2506_v16 = vpack.c.bf16 %v2492_v21, %v2491_v15  ;;  %v3876_v37 = vpop.eup %3875 }
 0x62f   : > { %v2505_v46 = vpack.c.bf16 %v2490_v25, %v2489_v17  ;;  %v3878_v27 = vpop.eup %3877 }
 0x630   : > { %v3880_v61 = vpop.eup %3879 }
 0x631   : > { %v3400_v10 = vpop.f32.mrb[68].mxu1  ;;  %2749 = vmatprep.mubr.bf16.mxu0 %v2505_v46  ;;  %v3882_v3 = vpop.eup %3881 }
 0x632   : > { %v2426_v31 = vpop.f32.mrb[69].mxu1  ;;  %2750 = vmatmul.mubr.bf16.vlgmr.msra.gmra.mrb[16].mxu0 %v2135_v13  ;;  %v2495_v58 = vmul.f32 %v3868_v32, %v3400_v10  ;;  %v3884_v1 = vpop.eup %3883 }
 0x633   : > { %v3401_v43 = vpop.f32.mrb[70].mxu1  ;;  %2759 = vmatprep.mubr.bf16.mxu0 %v2506_v16  ;;  %v2493_v49 = vmul.f32 %v3866_v0, %v2426_v31  ;;  %v3886_v48 = vpop.eup %3885 }
 0x634   : > { %v2496_v45 = vmul.f32 %v3870_v19, %v3401_v43  ;;  %v2429_v5 = vpop.f32.mrb[71].mxu1 }
 0x635   : > { %v2494_v7 = vmul.f32 %v3872_v22, %v2429_v5 }
 0x636   : > { %v2508_v60 = vpack.c.bf16 %v2496_v45, %v2495_v58 }
 0x637   : > { %v2507_v4 = vpack.c.bf16 %v2494_v7, %v2493_v49 }
 0x639   : > { %v3404_v39 = vpop.f32.mrb[72].mxu1 }
 0x63a   : > { %v2442_v13 = vpop.f32.mrb[73].mxu1  ;;  %2760 = vmatmul.mubr.bf16.gmra.mrb[20].mxu0 %v2136_v55  ;;  %v2499_v23 = vmul.f32 %v3876_v37, %v3404_v39  ;;  %v3888_v55 = vpop.eup %3887 }
 0x63b   : > { %v3405_v29 = vpop.f32.mrb[74].mxu1  ;;  %2769 = vmatprep.mubr.bf16.mxu0 %v2507_v4  ;;  %v2497_v28 = vmul.f32 %v3874_v53, %v2442_v13 }
 0x63c   : > { %v2500_v44 = vmul.f32 %v3878_v27, %v3405_v29  ;;  %v2445_v41 = vpop.f32.mrb[75].mxu1 }
 0x63d   : > { %v2498_v63 = vmul.f32 %v3880_v61, %v2445_v41 }
 0x63e   : > { %v2510_v62 = vpack.c.bf16 %v2500_v44, %v2499_v23 }
 0x63f   : > { %v2509_v34 = vpack.c.bf16 %v2498_v63, %v2497_v28 }
 0x641   : > { %v3408_v40 = vpop.f32.mrb[76].mxu1 }
 0x642   : > { %v2458_v8 = vpop.f32.mrb[77].mxu1  ;;  %2770 = vmatmul.mubr.bf16.gmra.mrb[24].mxu0 %v2137_v20  ;;  %v2503_v12 = vmul.f32 %v3884_v1, %v3408_v40 }
 0x643   : > { %v3409_v42 = vpop.f32.mrb[78].mxu1  ;;  %2779 = vmatprep.mubr.bf16.mxu0 %v2508_v60  ;;  %v2501_v24 = vmul.f32 %v3882_v3, %v2458_v8 }
 0x644   : > { %v2504_v15 = vmul.f32 %v3886_v48, %v3409_v42  ;;  %v2461_v21 = vpop.f32.mrb[79].mxu1 }
 0x645   : > { %v2502_v17 = vmul.f32 %v3888_v55, %v2461_v21 }
 0x646   : > { %v2512_v25 = vpack.c.bf16 %v2504_v15, %v2503_v12 }
 0x647   : > { %v2511_v16 = vpack.c.bf16 %v2502_v17, %v2501_v24 }
 0x64a   : > { %2780 = vmatmul.mubr.bf16.gmra.mrb[28].mxu0 %v2138_v11 }
 0x64b   : > { %2789 = vmatprep.mubr.bf16.mxu0 %v2509_v34 }
 0x652   : > { %2790 = vmatmul.mubr.bf16.gmra.mrb[32].mxu0 %v2139_v36 }
 0x653   : > { %2799 = vmatprep.mubr.bf16.mxu0 %v2510_v62 }
 0x65a   : > { %2800 = vmatmul.mubr.bf16.gmra.mrb[36].mxu0 %v2140_v56 }
 0x65b   : > { %2809 = vmatprep.mubr.bf16.mxu0 %v2511_v16 }
 0x662   : > { %2810 = vmatmul.mubr.bf16.gmra.mrb[40].mxu0 %v2141_v26 }
 0x663   : > { %2819 = vmatprep.mubr.bf16.mxu0 %v2512_v25 }
 0x66a   : > { %2820 = vmatmul.mubr.bf16.gmra.mrb[44].mxu0 %v2142_v30 }
 0x705   : > { %v2751_v50 = vpop.f32.mrb[16].mxu0 }
 0x706   : > { %v2752_v11 = vadd.f32 %v2751_v50, %v5249_v9  ;;  %v2753_v20 = vpop.f32.mrb[17].mxu0 }
 0x707   : > { %v2754_v33 = vadd.f32 %v2753_v20, %v5253_v6  ;;  %v2755_v14 = vpop.f32.mrb[18].mxu0 }
 0x708   : > { %2830 = vst [vmem:[%s4708_s7] sm:$0xff] %v2752_v11  ;;  %v2756_v18 = vadd.f32 %v2755_v14, %v5249_v9  ;;  %v2757_v59 = vpop.f32.mrb[19].mxu0 }
 0x709   : > { %2831 = vst [vmem:[%s4708_s7 + $0x8] sm:$0xff] %v2754_v33  ;;  %v2758_v51 = vadd.f32 %v2757_v59, %v5253_v6 }
 0x70a   : > { %2832 = vst [vmem:[%s4708_s7 + $0x10] sm:$0xff] %v2756_v18 }
 0x70b   : > { %2833 = vst [vmem:[%s4708_s7 + $0x18] sm:$0xff] %v2758_v51 }
 0x70d   : > { %v2761_v52 = vpop.f32.mrb[20].mxu0 }
 0x70e   : > { %v2762_v54 = vadd.f32 %v2761_v52, %v5249_v9  ;;  %v2763_v56 = vpop.f32.mrb[21].mxu0 }
 0x70f   : > { %v2764_v36 = vadd.f32 %v2763_v56, %v5253_v6  ;;  %v2765_v47 = vpop.f32.mrb[22].mxu0 }
 0x710   : > { %2834 = vst [vmem:[%s4708_s7 + $0x20] sm:$0xff] %v2762_v54  ;;  %v2766_v2 = vadd.f32 %v2765_v47, %v5249_v9  ;;  %v2767_v57 = vpop.f32.mrb[23].mxu0 }
 0x711   : > { %2835 = vst [vmem:[%s4708_s7 + $0x28] sm:$0xff] %v2764_v36  ;;  %v2768_v35 = vadd.f32 %v2767_v57, %v5253_v6 }
 0x712   : > { %2836 = vst [vmem:[%s4708_s7 + $0x30] sm:$0xff] %v2766_v2 }
 0x713   : > { %2837 = vst [vmem:[%s4708_s7 + $0x38] sm:$0xff] %v2768_v35 }
 0x715   : > { %v2771_v30 = vpop.f32.mrb[24].mxu0 }
 0x716   : > { %v2772_v26 = vadd.f32 %v2771_v30, %v5249_v9  ;;  %v2773_v46 = vpop.f32.mrb[25].mxu0 }
 0x717   : > { %v2774_v0 = vadd.f32 %v2773_v46, %v5253_v6  ;;  %v2775_v10 = vpop.f32.mrb[26].mxu0 }
 0x718   : > { %2838 = vst [vmem:[%s4708_s7 + $0x40] sm:$0xff] %v2772_v26  ;;  %v2776_v32 = vadd.f32 %v2775_v10, %v5249_v9  ;;  %v2777_v31 = vpop.f32.mrb[27].mxu0 }
 0x719   : > { %2839 = vst [vmem:[%s4708_s7 + $0x48] sm:$0xff] %v2774_v0  ;;  %v2778_v19 = vadd.f32 %v2777_v31, %v5253_v6 }
 0x71a   : > { %2840 = vst [vmem:[%s4708_s7 + $0x50] sm:$0xff] %v2776_v32 }
 0x71b   : > { %2841 = vst [vmem:[%s4708_s7 + $0x58] sm:$0xff] %v2778_v19 }
 0x71d   : > { %v2781_v43 = vpop.f32.mrb[28].mxu0 }
 0x71e   : > { %v2782_v22 = vadd.f32 %v2781_v43, %v5249_v9  ;;  %v2783_v58 = vpop.f32.mrb[29].mxu0 }
 0x71f   : > { %v2784_v45 = vadd.f32 %v2783_v58, %v5253_v6  ;;  %v2785_v5 = vpop.f32.mrb[30].mxu0 }
 0x720   : > { %2842 = vst [vmem:[%s4708_s7 + $0x60] sm:$0xff] %v2782_v22  ;;  %v2786_v49 = vadd.f32 %v2785_v5, %v5249_v9  ;;  %v2787_v7 = vpop.f32.mrb[31].mxu0 }
 0x721   : > { %2843 = vst [vmem:[%s4708_s7 + $0x68] sm:$0xff] %v2784_v45  ;;  %v2788_v60 = vadd.f32 %v2787_v7, %v5253_v6 }
 0x722   : > { %2844 = vst [vmem:[%s4708_s7 + $0x70] sm:$0xff] %v2786_v49 }
 0x723   : > { %2845 = vst [vmem:[%s4708_s7 + $0x78] sm:$0xff] %v2788_v60 }
 0x725   : > { %v2791_v4 = vpop.f32.mrb[32].mxu0 }
 0x726   : > { %v2792_v53 = vadd.f32 %v2791_v4, %v5249_v9  ;;  %v2793_v39 = vpop.f32.mrb[33].mxu0 }
 0x727   : > { %v2794_v37 = vadd.f32 %v2793_v39, %v5253_v6  ;;  %v2795_v13 = vpop.f32.mrb[34].mxu0 }
 0x728   : > { %2846 = vst [vmem:[%s4708_s7 + $0x80] sm:$0xff] %v2792_v53  ;;  %v2796_v27 = vadd.f32 %v2795_v13, %v5249_v9  ;;  %v2797_v29 = vpop.f32.mrb[35].mxu0 }
 0x729   : > { %2847 = vst [vmem:[%s4708_s7 + $0x88] sm:$0xff] %v2794_v37  ;;  %v2798_v61 = vadd.f32 %v2797_v29, %v5253_v6 }
 0x72a   : > { %2848 = vst [vmem:[%s4708_s7 + $0x90] sm:$0xff] %v2796_v27 }
 0x72b   : > { %2849 = vst [vmem:[%s4708_s7 + $0x98] sm:$0xff] %v2798_v61 }
 0x72d   : > { %v2801_v23 = vpop.f32.mrb[36].mxu0 }
 0x72e   : > { %v2802_v44 = vadd.f32 %v2801_v23, %v5249_v9  ;;  %v2803_v41 = vpop.f32.mrb[37].mxu0 }
 0x72f   : > { %v2804_v28 = vadd.f32 %v2803_v41, %v5253_v6  ;;  %v2805_v63 = vpop.f32.mrb[38].mxu0 }
 0x730   : > { %2850 = vst [vmem:[%s4708_s7 + $0xa0] sm:$0xff] %v2802_v44  ;;  %v2806_v62 = vadd.f32 %v2805_v63, %v5249_v9  ;;  %v2807_v34 = vpop.f32.mrb[39].mxu0 }
 0x731   : > { %2851 = vst [vmem:[%s4708_s7 + $0xa8] sm:$0xff] %v2804_v28  ;;  %v2808_v3 = vadd.f32 %v2807_v34, %v5253_v6 }
 0x732   : > { %2852 = vst [vmem:[%s4708_s7 + $0xb0] sm:$0xff] %v2806_v62 }
 0x733   : > { %2853 = vst [vmem:[%s4708_s7 + $0xb8] sm:$0xff] %v2808_v3 }
 0x735   : > { %v2811_v40 = vpop.f32.mrb[40].mxu0 }
 0x736   : > { %v2812_v1 = vadd.f32 %v2811_v40, %v5249_v9  ;;  %v2813_v8 = vpop.f32.mrb[41].mxu0 }
 0x737   : > { %v2814_v48 = vadd.f32 %v2813_v8, %v5253_v6  ;;  %v2815_v42 = vpop.f32.mrb[42].mxu0 }
 0x738   : > { %2854 = vst [vmem:[%s4708_s7 + $0xc0] sm:$0xff] %v2812_v1  ;;  %v2816_v55 = vadd.f32 %v2815_v42, %v5249_v9  ;;  %v2817_v12 = vpop.f32.mrb[43].mxu0 }
 0x739   : > { %2855 = vst [vmem:[%s4708_s7 + $0xc8] sm:$0xff] %v2814_v48  ;;  %v2818_v15 = vadd.f32 %v2817_v12, %v5253_v6 }
 0x73a   : > { %2856 = vst [vmem:[%s4708_s7 + $0xd0] sm:$0xff] %v2816_v55 }
 0x73b   : > { %2857 = vst [vmem:[%s4708_s7 + $0xd8] sm:$0xff] %v2818_v15 }
 0x73d   : > { %v2821_v21 = vpop.f32.mrb[44].mxu0 }
 0x73e   : > { %v2822_v24 = vadd.f32 %v2821_v21, %v5249_v9  ;;  %v2823_v17 = vpop.f32.mrb[45].mxu0 }
 0x73f   : > { %v2824_v25 = vadd.f32 %v2823_v17, %v5253_v6  ;;  %v2825_v16 = vpop.f32.mrb[46].mxu0 }
 0x740   : > { %2858 = vst [vmem:[%s4708_s7 + $0xe0] sm:$0xff] %v2822_v24  ;;  %v2826_v38 = vadd.f32 %v2825_v16, %v5249_v9  ;;  %v2827_v50 = vpop.f32.mrb[47].mxu0 }
 0x741   : > { %2859 = vst [vmem:[%s4708_s7 + $0xe8] sm:$0xff] %v2824_v25  ;;  %v2828_v11 = vadd.f32 %v2827_v50, %v5253_v6 }
 0x742   : > { %2860 = vst [vmem:[%s4708_s7 + $0xf0] sm:$0xff] %v2826_v38 }
 0x743   : > { %2861 = vst [vmem:[%s4708_s7 + $0xf8] sm:$0xff] %v2828_v11 }
 0x744   : > { %4104 = shalt.err (!%p4101_p10)
}
 0x745   : > { %s4105_s7 = scalar_lea.hbm %s5321_s29, 4096  ;;  %s4109_s5 = scalar_lea.hbm %s5502_s12, 16384 }
 0x746   : > { %p4106_p3 = scmp.ne.s32.totalorder %s5321_s29, %s4105_s7  ;;  %p4110_p12 = scmp.lt.u32.totalorder %s5321_s29, %s5502_s12 }
 0x747   : > { %p4111_p11 = scmp.lt.u32.totalorder %s4109_s5, %s4105_s7  ;;  %p4113_p4 = scmp.lt.u32.totalorder %s4105_s7, %s5321_s29 }
 0x748   : > { %p4107_p5 = pnand %p4106_p3, %p5503_p1 }
 0x749   : > { %p4112_p13 = por %p4111_p11, %p4110_p12 }
 0x74a   : > { %p4108_p6 = pneg %p4107_p5 }
 0x74b   : > { %p4114_p0 = por %p4113_p4, %p4112_p13 }
 0x74d   : > { %p4115_p8 = pnand %p4114_p0, %p4108_p6 }
 0x74f   : > { %4118 = shalt.err (!%p4115_p8)
}
 0x750   : > { %s4239_s9 = smov 256   ;;  %s4240_s30 = smov 16  }
 0x751   : > { %3432 = dma.vmem_to_hbm [thread:$0]  (%p5503_p1), %s5323_s15, 4096, %s5321_s29, %s2863_s23, %s4239_s9, %s4239_s9, %s4240_s30  }
 0x752 PF: > { %p3470_p9 = scmp.ge.s32.totalorder %s4225_s27, 2  ;;  %s2894_s8 = sand.u32 1, %s4197_s20  }
 0x753   : > { %p5504_p7 = scmp.ne.s32.totalorder %s5475_s10, 0  ;;  %s2895_s24 = scalar_lea.sflag [#allocation6], %s2894_s8 }
 0x755   : > { %p3458_p2 = pnand %p3470_p9, %p5504_p7 }
 0x757   : > { %4180 = dma.done.wait (!%p3458_p2), %s2895_s24, 4096  }
 0x758   : > { %4182 = vsyncadd (!%p3458_p2), %s2895_s24, 4294963200  ;;  %s32_s27 = sadd.s32 1, %s4225_s27   ;;  %s5505_s17 = sld [smem:[#allocation22_spill]] }
 0x759   : > { %p29_p10 = scmp.ge.s32.totalorder %s32_s27, 6   ;;  %s5506_s4 = sld [smem:[#allocation23_spill]] }
 0x75a   : > { %s5507_s6 = smov %s4597_s18  ;;  %s5508_s13 = sld [smem:[#allocation29_spill]] }
 0x75b   : > { %s5510_s19 = smov %s5525_s11  ;;  %s5511_s20 = smov %s4201_s21 }
 0x75c   : > { %s5512_s21 = smov %s4205_s22  ;;  %s5513_s22 = smov %s5507_s6 }
 0x75d   : > { %s5514_s23 = smov %s4217_s25  ;;  %s5515_s24 = smov %s4221_s26 }
 0x75e   : > { %s5517_s26 = smov %s5523_s14  ;;  %31 = sbr.rel (!%p29_p10) target bundleno = 25 (0x19), region = 153 }
 0x75f   : > { %s5509_s18 = smov %s5506_s4 }
 0x760   : > { %s5516_s25 = smov %s5508_s13 }
 0x765   :  { %2900 = vsyncpa [#allocation5], 1 }
 0x766   :  { %2902 = vsyncpa [#allocation5 + $0x1], 1 }
 0x767   :  { %2903 = vsyncpa [#allocation8], 1 }
 0x768   :  { %2905 = vsyncpa [#allocation8 + $0x1], 1 }
 0x769   :  { %2906 = vsyncpa [#allocation11], 1 }
 0x76a   :  { %2907 = vsyncpa [#allocation14], 1 }
 0x76b   :  { %2908 = vsyncpa [#allocation6], 1 }
 0x76c   :  { %2910 = vsyncpa [#allocation6 + $0x1], 1 }

// kernel: tpu_custom_call.1
= control target key start
LH: loop header
LB: loop body
LE: loop exit
PB: predicated region body
PF: predicated region fallthrough
CT: control target
= control target key end

     0   :  { %s5390_s0 = inlined_call_operand.hbm [shape: f32[2,256,256], index: 0, kind: input, shape index: {}]   ;;  %s5391_s1 = inlined_call_operand.hbm [shape: f32[2,128,256], index: 1, kind: input, shape index: {}]   ;;  %s5392_s2 = inlined_call_operand.hbm [shape: f32[2,128,256], index: 2, kind: input, shape index: {}]   ;;  %s5393_s3 = inlined_call_operand.hbm [shape: bf16[256,256], index: 3, kind: input, shape index: {}]   ;;  %s5394_s4 = inlined_call_operand.vmem [shape: f32[1,256], index: 4, kind: input, shape index: {}]   ;;  %s5395_s5 = inlined_call_operand.hbm [shape: bf16[256,256], index: 5, kind: input, shape index: {}]   ;;  %s5396_s6 = inlined_call_operand.vmem [shape: f32[1,256], index: 6, kind: input, shape index: {}]   ;;  %s5397_s7 = inlined_call_operand.hbm [shape: bf16[256,256], index: 7, kind: input, shape index: {}]   ;;  %s5398_s8 = inlined_call_operand.vmem [shape: f32[1,256], index: 8, kind: input, shape index: {}]   ;;  %s5399_s9 = inlined_call_operand.hbm [shape: bf16[256,256], index: 9, kind: input, shape index: {}]   ;;  %s5400_s10 = inlined_call_operand.vmem [shape: f32[1,256], index: 10, kind: input, shape index: {}]   ;;  %s5401_s11 = inlined_call_operand.hbm [shape: f32[2,256,256], index: 11, kind: output, shape index: {}]  }
   0x1   :  { %5433 = sst [smem:[#allocation30_spill]] %s5390_s0 }
   0x2   :  { %5434 = sst [smem:[#allocation31_spill]] %s5391_s1 }
   0x3   :  { %5435 = sst [smem:[#allocation32_spill]] %s5393_s3 }
   0x4   :  { %5436 = sst [smem:[#allocation33_spill]] %s5394_s4 }
   0x5   :  { %5437 = sst [smem:[#allocation34_spill]] %s5395_s5 }
   0x6   :  { %5438 = sst [smem:[#allocation35_spill]] %s5396_s6 }
   0x7   :  { %5439 = sst [smem:[#allocation36_spill]] %s5397_s7 }
   0x8   :  { %5440 = sst [smem:[#allocation37_spill]] %s5398_s8 }
   0x9   :  { %5441 = sst [smem:[#allocation38_spill]] %s5399_s9 }
   0xa   :  { %5442 = sst [smem:[#allocation39_spill]] %s5400_s10 }
   0xb   :  { %5443 = sst [smem:[#allocation40_spill]] %s5401_s11 }
   0xc   :  { %16 = vsyncpa [#allocation5], 0 }
   0xd   :  { %18 = vsyncpa [#allocation5 + $0x1], 0 }
   0xe   :  { %19 = vsyncpa [#allocation8], 0 }
   0xf   :  { %21 = vsyncpa [#allocation8 + $0x1], 0 }
  0x10   :  { %22 = vsyncpa [#allocation11], 0 }
  0x11   :  { %23 = vsyncpa [#allocation14], 0 }
  0x12   :  { %24 = vsyncpa [#allocation6], 0 }
  0x13   :  { %26 = vsyncpa [#allocation6 + $0x1], 0  ;;  %s4301_s17 = smov 0   ;;  %s4303_s18 = smov 0  }
  0x14   :  { %s4305_s19 = smov 0   ;;  %s4307_s20 = smov 0  }
  0x15   :  { %s4309_s21 = smov 0   ;;  %s4311_s22 = smov 0  }
  0x16   :  { %s4313_s23 = smov 0   ;;  %s4315_s24 = smov 0  }
  0x17   :  { %s4317_s25 = smov 0   ;;  %s4319_s26 = smov 0  }
  0x18   :  { %s4321_s27 = smov 0  }
  0x19 LB: > { %5444 = sst [smem:[#allocation22_spill]] %s4189_s18  ;;  %s4357_s28 = sadd.s32 4294967295, %s4225_s27   ;;  %s4225_s27 = sphi %s4321_s27, %s32_s27   ;;  %s4221_s26 = sphi %s4319_s26, %s5517_s26   ;;  %s4217_s25 = sphi %s4317_s25, %s5516_s25   ;;  %s4213_s24 = sphi %s4315_s24, %s5515_s24   ;;  %s4209_s23 = sphi %s4313_s23, %s5514_s23   ;;  %s4205_s22 = sphi %s4311_s22, %s5513_s22   ;;  %s4201_s21 = sphi %s4309_s21, %s5512_s21   ;;  %s4197_s20 = sphi %s4307_s20, %s5511_s20   ;;  %s4193_s19 = sphi %s4305_s19, %s5510_s19   ;;  %s4189_s18 = sphi %s4303_s18, %s5509_s18   ;;  %s4185_s17 = sphi %s4301_s17, %s5505_s17  }
  0x1a   : > { %5445 = sst [smem:[#allocation23_spill]] %s4193_s19  ;;  %p3052_p0 = scmp.ge.s32.totalorder %s4225_s27, 1 }
  0x1b   : > { %5446 = sst [smem:[#allocation24_spill]] %s4209_s23  ;;  %p5403_p1 = scmp.eq.s32.totalorder %s4357_s28, 0 }
  0x1c   : > { %5447 = sst [smem:[#allocation25_spill]] %s4213_s24  ;;  %p325_p2 = scmp.lt.s32.totalorder %s4225_s27, 5 }
  0x1d   : > { %s4227_s30 = smov [#allocation10]   ;;  %s4228_s14 = smov [#allocation13]  }
  0x1e   : > { %p4362_p3 = pnand %p3052_p0, %p325_p2  ;;  %s337_s12 = sshll.u32 %s4227_s30, 4  ;;  %s338_s12 = int_to_ptr.vmem [resolvable:$true] %s337_s12 }
  0x1f   : > { %s369_s15 = sshll.u32 %s4228_s14, 4  ;;  %s5451_s3 = sld [smem:[#allocation32_spill]]  ;;  %s4374_s15 = int_to_ptr.vmem [resolvable:$true] %s369_s15 }
  0x20   : > { %s5448_s29 = scalar_select %p4362_p3, 1, 0 }
  0x21   : > { %p3434_p4 = pneg %p4362_p3 }
  0x22   : > { %5449 = sst [smem:[#allocation26_spill]] %s5448_s29 }
  0x23   : > { %p4370_p5 = pnand %p3434_p4, %p5403_p1 }
  0x25   : > { %s5450_s13 = scalar_select %p4370_p5, 1, 0 }
  0x26   : > { %s3889_s24 = scalar_lea.hbm %s5451_s3, 4096  ;;  %p4384_p7 = pneg %p4370_p5 }
  0x27   : > { %p3890_p6 = scmp.ne.s32.totalorder %s5451_s3, %s3889_s24  ;;  %p3896_p10 = scmp.lt.u32.totalorder %s3889_s24, %s5451_s3 }
  0x29   : > { %p3892_p8 = pnand %p4384_p7, %p3890_p6 }
  0x2b   : > { %p3893_p9 = pneg %p3892_p8 }
  0x2d   : > { %p3898_p11 = pnand %p3896_p10, %p3893_p9 }
  0x2f   : > { %3901 = shalt.err (!%p3898_p11)
}
  0x30   : > { %s3902_s11 = scalar_lea.vmem %s338_s12, 4096  ;;  %p3910_p2 = scmp.lt.s32.totalorder %s338_s12, %s338_s12 }
  0x31   : > { %p3903_p12 = scmp.ne.s32.totalorder %s338_s12, %s3902_s11  ;;  %p3911_p4 = scmp.lt.s32.totalorder %s3902_s11, %s3902_s11 }
  0x33   : > { %p3905_p13 = pnand %p3903_p12, %p4384_p7  ;;  %p3912_p1 = por %p3911_p4, %p3910_p2 }
  0x35   : > { %p3906_p0 = pneg %p3905_p13 }
  0x37   : > { %p3913_p3 = pnand %p3912_p1, %p3906_p0 }
  0x39   : > { %3916 = shalt.err (!%p3913_p3)
}
  0x3a   : > { %s5407_s4 = smov 128   ;;  %s5409_s10 = smov 8  }
  0x3b   : > { %3437 = dma.hbm_to_vmem [thread:$0]  (!%p4370_p5), %s5451_s3, 4096, %s338_s12, [#allocation11], %s5407_s4, %s5407_s4, %s5409_s10  }
  0x3c   : > { %s5453_s7 = sld [smem:[#allocation36_spill]] }
  0x42   : > { %s3917_s6 = scalar_lea.hbm %s5453_s7, 4096 }
  0x43   : > { %p3918_p1 = scmp.ne.s32.totalorder %s5453_s7, %s3917_s6  ;;  %p3924_p8 = scmp.lt.u32.totalorder %s3917_s6, %s5453_s7 }
  0x45   : > { %p3920_p3 = pnand %p3918_p1, %p4384_p7 }
  0x47   : > { %p3921_p6 = pneg %p3920_p3 }
  0x49   : > { %p3926_p9 = pnand %p3924_p8, %p3921_p6 }
  0x4b   : > { %3929 = shalt.err (!%p3926_p9)
}
  0x4c   : > { %s3930_s12 = scalar_lea.vmem %s4374_s15, 4096  ;;  %p3938_p13 = scmp.lt.s32.totalorder %s4374_s15, %s4374_s15 }
  0x4d   : > { %p3931_p10 = scmp.ne.s32.totalorder %s4374_s15, %s3930_s12  ;;  %p3939_p0 = scmp.lt.s32.totalorder %s3930_s12, %s3930_s12 }
  0x4f   : > { %p3933_p11 = pnand %p3931_p10, %p4384_p7  ;;  %p3940_p2 = por %p3939_p0, %p3938_p13 }
  0x51   : > { %p3934_p12 = pneg %p3933_p11 }
  0x53   : > { %p3941_p4 = pnand %p3940_p2, %p3934_p12 }
  0x55   : > { %3944 = shalt.err (!%p3941_p4)
}
  0x56   : > { %3443 = dma.hbm_to_vmem [thread:$0]  (!%p4370_p5), %s5453_s7, 4096, %s4374_s15, [#allocation14], %s5407_s4, %s5407_s4, %s5409_s10  }
  0x57   : > { %p5413_p3 = scmp.eq.s32.totalorder %s4225_s27, 0  ;;  %p86_p6 = scmp.ne.s32.totalorder %s4193_s19, %s4189_s18 }
  0x58   : > { %p92_p8 = scmp.ne.s32.totalorder %s4189_s18, %s4185_s17  ;;  %p5412_p9 = scmp.lt.s32.totalorder %s4225_s27, 4 }
  0x59   : > { %p88_p10 = por %p86_p6, %p5413_p3  ;;  %p5454_p11 = scmp.eq.s32.totalorder %s4357_s28, 0 }
  0x5a   : > { %s426_s8 = sand.u32 1, %s4225_s27   ;;  %s428_s24 = sand.u32 1, %s4193_s19  }
  0x5b   : > { %p4441_p12 = por %p92_p8, %p5454_p11  ;;  %s4447_s16 = sshll.u32 %s428_s24, 8 }
  0x5c   : > { %s5411_s15 = sshll.u32 %s4221_s26, 12  ;;  %s5457_s1 = sld [smem:[#allocation31_spill]] }
  0x5d   : > { %s5455_s29 = scalar_select %p4441_p12, 1, 0 }
  0x5e   : > { %s430_s17 = scalar_lea.vmem [#allocation7], %s4447_s16  ;;  %p4460_p13 = pnand %p5412_p9, %p88_p10 }
  0x5f   : > { %5456 = sst [smem:[#allocation27_spill]] %s5455_s29  ;;  %s437_s0 = sshll.u32 %s430_s17, 4  ;;  %s4465_s0 = int_to_ptr.vmem [resolvable:$true] %s437_s0 }
  0x60   : > { %s5458_s6 = scalar_select %p4460_p13, 1, 0 }
  0x61   : > { %s4467_s23 = scalar_lea.sflag [#allocation8], %s426_s8  ;;  %p5424_p2 = pneg %p4460_p13 }
  0x62   : > { %s4455_s12 = scalar_lea.hbm %s5457_s1, %s5411_s15  ;;  %5459 = sst [smem:[#allocation28_spill]] %s5458_s6 }
  0x63   : > { %s3945_s14 = scalar_lea.hbm %s4455_s12, 4096  ;;  %s3950_s4 = scalar_lea.hbm %s5457_s1, 8192 }
  0x64   : > { %p3946_p0 = scmp.ne.s32.totalorder %s4455_s12, %s3945_s14  ;;  %p3951_p8 = scmp.lt.u32.totalorder %s4455_s12, %s5457_s1 }
  0x65   : > { %p3952_p10 = scmp.lt.u32.totalorder %s3950_s4, %s3945_s14  ;;  %p3954_p9 = scmp.lt.u32.totalorder %s3945_s14, %s4455_s12 }
  0x66   : > { %p3948_p4 = pnand %p5424_p2, %p3946_p0 }
  0x67   : > { %p3953_p11 = por %p3952_p10, %p3951_p8 }
  0x68   : > { %p3949_p6 = pneg %p3948_p4 }
  0x69   : > { %p3955_p1 = por %p3954_p9, %p3953_p11 }
  0x6b   : > { %p3956_p3 = pnand %p3955_p1, %p3949_p6 }
  0x6d   : > { %3959 = shalt.err (!%p3956_p3)
}
  0x6e   : > { %s3960_s8 = scalar_lea.vmem %s4465_s0, 4096  ;;  %s4231_s11 = smov [#allocation7]  }
  0x6f   : > { %p3961_p0 = scmp.ne.s32.totalorder %s4465_s0, %s3960_s8  ;;  %s3965_s17 = sshll.u32 %s4231_s11, 4  ;;  %s3966_s17 = int_to_ptr.vmem [resolvable:$false] %s3965_s17 }
  0x70   : > { %s3967_s10 = scalar_lea.vmem %s3966_s17, 8192  ;;  %p3968_p5 = scmp.lt.s32.totalorder %s4465_s0, %s3966_s17 }
  0x71   : > { %p3963_p4 = pnand %p3961_p0, %p5424_p2  ;;  %p3969_p8 = scmp.lt.s32.totalorder %s3967_s10, %s3960_s8 }
  0x73   : > { %p3964_p12 = pneg %p3963_p4  ;;  %p3970_p10 = por %p3969_p8, %p3968_p5 }
  0x75   : > { %p3971_p9 = pnand %p3970_p10, %p3964_p12 }
  0x77   : > { %3974 = shalt.err (!%p3971_p9)
}
  0x78   : > { %s5427_s4 = smov 256   ;;  %s5429_s15 = smov 16  }
  0x79   : > { %3453 = dma.hbm_to_vmem [thread:$0]  (!%p4460_p13), %s4455_s12, 4096, %s4465_s0, %s4467_s23, %s5427_s4, %s5427_s4, %s5429_s15  }
  0x7a   : > { %s5460_s14 = sshll.u32 %s4221_s26, 12  ;;  %s451_s10 = scalar_lea.vmem [#allocation9], %s4447_s16 }
  0x7b   : > { %s4503_s17 = scalar_lea.hbm %s5392_s2, %s5460_s14  ;;  %s4506_s24 = sshll.u32 %s451_s10, 4  ;;  %s4612_s24 = int_to_ptr.vmem [resolvable:$true] %s4506_s24 }
  0x7c   : > { %s4234_s1 = smov [#allocation12]   ;;  %s5461_s5 = sld [smem:[#allocation34_spill]] }
  0x7d   : > { %s353_s3 = sshll.u32 %s4234_s1, 4  ;;  %s354_s3 = int_to_ptr.vmem [resolvable:$true] %s353_s3 }
  0x82   : > { %s3975_s18 = scalar_lea.hbm %s5461_s5, 4096 }
  0x83   : > { %p3976_p5 = scmp.ne.s32.totalorder %s5461_s5, %s3975_s18  ;;  %p3982_p12 = scmp.lt.u32.totalorder %s3975_s18, %s5461_s5 }
  0x85   : > { %p3978_p1 = pnand %p3976_p5, %p4384_p7 }
  0x87   : > { %p3979_p3 = pneg %p3978_p1 }
  0x89   : > { %p3984_p6 = pnand %p3982_p12, %p3979_p3 }
  0x8b   : > { %3987 = shalt.err (!%p3984_p6)
}
  0x8c   : > { %s3988_s16 = scalar_lea.vmem %s354_s3, 4096  ;;  %p3996_p8 = scmp.lt.s32.totalorder %s354_s3, %s354_s3 }
  0x8d   : > { %p3989_p11 = scmp.ne.s32.totalorder %s354_s3, %s3988_s16  ;;  %p3997_p10 = scmp.lt.s32.totalorder %s3988_s16, %s3988_s16 }
  0x8f   : > { %p3991_p0 = pnand %p3989_p11, %p4384_p7  ;;  %p3998_p9 = por %p3997_p10, %p3996_p8 }
  0x91   : > { %p3992_p4 = pneg %p3991_p0 }
  0x93   : > { %p3999_p2 = pnand %p3998_p9, %p3992_p4 }
  0x95   : > { %4002 = shalt.err (!%p3999_p2)
}
  0x96   : > { %p5462_p5 = scmp.ne.s32.totalorder %s5450_s13, 0  ;;  %s5463_s1 = smov 8  }
  0x97   : > { %s5464_s7 = smov 128   ;;  %s4235_s29 = smov [#allocation15]  }
  0x98   : > { %3440 = dma.hbm_to_vmem [thread:$0]  (!%p5462_p5), %s5461_s5, 4096, %s354_s3, [#allocation11], %s5464_s7, %s5464_s7, %s5463_s1  }
  0x99   : > { %s385_s6 = sshll.u32 %s4235_s29, 4  ;;  %s5465_s9 = sld [smem:[#allocation38_spill]]  ;;  %s386_s6 = int_to_ptr.vmem [resolvable:$true] %s385_s6 }
  0x9f   : > { %s4003_s8 = scalar_lea.hbm %s5465_s9, 4096 }
  0xa0   : > { %p4004_p2 = scmp.ne.s32.totalorder %s5465_s9, %s4003_s8  ;;  %p4010_p12 = scmp.lt.u32.totalorder %s4003_s8, %s5465_s9 }
  0xa2   : > { %p4006_p1 = pnand %p4004_p2, %p4384_p7 }
  0xa4   : > { %p4007_p3 = pneg %p4006_p1 }
  0xa6   : > { %p4012_p6 = pnand %p4010_p12, %p4007_p3 }
  0xa8   : > { %4015 = shalt.err (!%p4012_p6)
}
  0xa9   : > { %s4016_s3 = scalar_lea.vmem %s386_s6, 4096  ;;  %p4024_p8 = scmp.lt.s32.totalorder %s386_s6, %s386_s6 }
  0xaa   : > { %p4017_p11 = scmp.ne.s32.totalorder %s386_s6, %s4016_s3  ;;  %p4025_p10 = scmp.lt.s32.totalorder %s4016_s3, %s4016_s3 }
  0xac   : > { %p4019_p0 = pnand %p4017_p11, %p4384_p7  ;;  %p4026_p9 = por %p4025_p10, %p4024_p8 }
  0xae   : > { %p4020_p4 = pneg %p4019_p0 }
  0xb0   : > { %p4027_p13 = pnand %p4026_p9, %p4020_p4 }
  0xb2   : > { %4030 = shalt.err (!%p4027_p13)
}
  0xb3   : > { %3446 = dma.hbm_to_vmem [thread:$0]  (!%p5462_p5), %s5465_s9, 4096, %s386_s6, [#allocation14], %s5464_s7, %s5464_s7, %s5463_s1  }
  0xb4   : > { %s3051_s13 = sadd.s32 4294967294, %s4225_s27   ;;  %s41_s30 = sadd.s32 1, %s4217_s25 }
  0xb5   : > { %p42_p7 = scmp.ge.s32.totalorder %s41_s30, 2  ;;  %s53_s29 = sadd.s32 1, %s4205_s22 }
  0xb6   : > { %p60_p13 = scmp.ne.s32.totalorder %s4205_s22, %s4201_s21  ;;  %p66_p2 = scmp.ne.s32.totalorder %s4201_s21, %s4197_s20 }
  0xb7   : > { %s5519_s30 = smov (%p42_p7, %s41_s30), 0  ;;  %s5467_s14 = sadd.s32 1, %s4221_s26 }
  0xb8   : > { %5466 = sst [smem:[#allocation29_spill]] %s5519_s30  ;;  %s5468_s11 = sld [smem:[#allocation23_spill]] }
  0xb9   : > { %s5521_s14 = smov (!%p42_p7, %s5467_s14), %s4221_s26  ;;  %s49_s8 = ssub.s32 %s4217_s25, %s5519_s30 }
  0xba   : > { %p5469_p1 = scmp.eq.s32.totalorder %s4225_s27, 0  ;;  %p46_p3 = scmp.ge.s32.totalorder %s5521_s14, 2 }
  0xbb   : > { %p5471_p12 = scmp.eq.s32.totalorder %s4357_s28, 0  ;;  %p5473_p11 = scmp.eq.s32.totalorder %s4357_s28, 3 }
  0xbc   : > { %p4566_p5 = por %p5469_p1, %p60_p13  ;;  %p318_p4 = scmp.eq.s32.totalorder %s3051_s13, 3 }
  0xbd   : > { %p4572_p6 = por %p5471_p12, %p66_p2  ;;  %p4578_p0 = por %p5473_p11, %p60_p13 }
  0xbe   : > { %s5523_s14 = smov (%p46_p3, %s5521_s14), 0  ;;  %p4584_p8 = por %p318_p4, %p66_p2 }
  0xbf   : > { %s5474_s6 = scalar_select %p4578_p0, 1, 0 }
  0xc0   : > { %s5475_s10 = scalar_select %p4584_p8, 1, 0 }
  0xc1   : > { %s402_s12 = sand.u32 1, %s4205_s22   ;;  %s48_s0 = ssub.s32 %s4221_s26, %s5523_s14 }
  0xc2   : > { %s50_s16 = sor.u32 %s49_s8, %s48_s0  ;;  %p77_p10 = scmp.eq.s32.totalorder %s48_s0, 0 }
  0xc3   : > { %p51_p9 = scmp.eq.s32.totalorder %s50_s16, 0  ;;  %s3058_s3 = sshll.u32 %s402_s12, 8 }
  0xc4   : > { %s5476_s19 = sadd.s32 1, %s5468_s11  ;;  %s3214_s13 = sshll.u32 %s4217_s25, 5 }
  0xc5   : > { %s5525_s11 = smov (!%p77_p10, %s5468_s11), %s5476_s19  ;;  %s3061_s4 = sshll.u32 %s4221_s26, 6 }
  0xc6   : > { %s4597_s18 = scalar_select %p51_p9, %s4205_s22, %s53_s29  }
  0xc7   : > { %s406_s15 = scalar_lea.vmem [#allocation4], %s3058_s3  ;;  %s413_s9 = sadd.s32 %s3214_s13, %s3061_s4 }
  0xc8   : > { %s416_s5 = sshll.u32 %s406_s15, 4  ;;  %s3062_s30 = sshll.u32 %s413_s9, 7  ;;  %s4601_s5 = int_to_ptr.vmem [resolvable:$true] %s416_s5 }
  0xc9   : > { %p5477_p7 = scmp.lt.s32.totalorder %s4225_s27, 4  ;;  %s5479_s16 = sld [smem:[#allocation30_spill]] }
  0xca   : > { %s4619_s9 = scalar_lea.sflag [#allocation5], %s402_s12 }
  0xcb   : > { %p4607_p13 = pnand %p5477_p7, %p4566_p5 }
  0xcd   : > { %p4033_p1 = pneg %p4607_p13 }
  0xcf   : > { %s4617_s19 = scalar_lea.hbm %s5479_s16, %s3062_s30  ;;  %s4036_s3 = scalar_lea.hbm %s5479_s16, 16384 }
  0xd0   : > { %s4031_s4 = scalar_lea.hbm %s4617_s19, 4096  ;;  %p4037_p12 = scmp.lt.u32.totalorder %s4617_s19, %s5479_s16 }
  0xd1   : > { %p4032_p2 = scmp.ne.s32.totalorder %s4617_s19, %s4031_s4  ;;  %p4038_p11 = scmp.lt.u32.totalorder %s4036_s3, %s4031_s4 }
  0xd2   : > { %p4040_p10 = scmp.lt.u32.totalorder %s4031_s4, %s4617_s19 }
  0xd3   : > { %p4034_p5 = pnand %p4033_p1, %p4032_p2  ;;  %p4039_p4 = por %p4038_p11, %p4037_p12 }
  0xd5   : > { %p4035_p3 = pneg %p4034_p5  ;;  %p4041_p9 = por %p4040_p10, %p4039_p4 }
  0xd7   : > { %p4042_p7 = pnand %p4041_p9, %p4035_p3 }
  0xd9   : > { %4045 = shalt.err (!%p4042_p7)
}
  0xda   : > { %s4046_s12 = scalar_lea.vmem %s4601_s5, 4096  ;;  %s4236_s29 = smov [#allocation4]  }
  0xdb   : > { %p4047_p2 = scmp.ne.s32.totalorder %s4601_s5, %s4046_s12  ;;  %s4051_s0 = sshll.u32 %s4236_s29, 4  ;;  %s4052_s0 = int_to_ptr.vmem [resolvable:$false] %s4051_s0 }
  0xdc   : > { %s4053_s15 = scalar_lea.vmem %s4052_s0, 8192  ;;  %p4054_p0 = scmp.lt.s32.totalorder %s4601_s5, %s4052_s0 }
  0xdd   : > { %p4049_p5 = pnand %p4047_p2, %p4033_p1  ;;  %p4055_p12 = scmp.lt.s32.totalorder %s4053_s15, %s4046_s12 }
  0xdf   : > { %p4050_p8 = pneg %p4049_p5  ;;  %p4056_p11 = por %p4055_p12, %p4054_p0 }
  0xe1   : > { %p4057_p4 = pnand %p4056_p11, %p4050_p8 }
  0xe3   : > { %4060 = shalt.err (!%p4057_p4)
}
  0xe4   : > { %s5480_s4 = smov 16   ;;  %s5481_s1 = smov 256  }
  0xe5   : > { %s5482_s3 = sld [smem:[#allocation28_spill]]  ;;  %s4061_s30 = scalar_lea.hbm %s4503_s17, 4096 }
  0xe6   : > { %3450 = dma.hbm_to_vmem [thread:$0]  (!%p4607_p13), %s4617_s19, 4096, %s4601_s5, %s4619_s9, %s5481_s1, %s5481_s1, %s5480_s4  }
  0xe7   : > { %p4062_p1 = scmp.ne.s32.totalorder %s4503_s17, %s4061_s30  ;;  %s4066_s12 = scalar_lea.hbm %s5392_s2, 8192 }
  0xe8   : > { %p4067_p9 = scmp.lt.u32.totalorder %s4503_s17, %s5392_s2  ;;  %p4068_p7 = scmp.lt.u32.totalorder %s4066_s12, %s4061_s30 }
  0xe9   : > { %p4070_p5 = scmp.lt.u32.totalorder %s4061_s30, %s4503_s17 }
  0xea   : > { %p4069_p2 = por %p4068_p7, %p4067_p9 }
  0xeb   : > { %p5483_p3 = scmp.ne.s32.totalorder %s5482_s3, 0 }
  0xec   : > { %p4071_p12 = por %p4070_p5, %p4069_p2 }
  0xed   : > { %p5484_p0 = pneg %p5483_p3 }
  0xef   : > { %p4064_p8 = pnand %p4062_p1, %p5484_p0 }
  0xf1   : > { %p4065_p10 = pneg %p4064_p8 }
  0xf3   : > { %p4072_p11 = pnand %p4071_p12, %p4065_p10 }
  0xf5   : > { %4075 = shalt.err (!%p4072_p11)
}
  0xf6   : > { %s4076_s5 = scalar_lea.vmem %s4612_s24, 4096  ;;  %p5485_p4 = pmov %p5484_p0 }
  0xf7   : > { %p4077_p13 = scmp.ne.s32.totalorder %s4612_s24, %s4076_s5  ;;  %s4237_s19 = smov [#allocation9]  }
  0xf8   : > { %s4081_s9 = sshll.u32 %s4237_s19, 4  ;;  %s4082_s9 = int_to_ptr.vmem [resolvable:$false] %s4081_s9 }
  0xf9   : > { %p4079_p1 = pnand %p4077_p13, %p5485_p4  ;;  %s4083_s15 = scalar_lea.vmem %s4082_s9, 8192 }
  0xfa   : > { %p4084_p8 = scmp.lt.s32.totalorder %s4612_s24, %s4082_s9  ;;  %p4085_p9 = scmp.lt.s32.totalorder %s4083_s15, %s4076_s5 }
  0xfb   : > { %p4080_p0 = pneg %p4079_p1 }
  0xfc   : > { %p4086_p7 = por %p4085_p9, %p4084_p8 }
  0xfe   : > { %p4087_p2 = pnand %p4086_p7, %p4080_p0 }
 0x100   : > { %4090 = shalt.err (!%p4087_p2)
}
 0x101   : > { %3456 = dma.hbm_to_vmem [thread:$0]  (!%p5483_p3), %s4503_s17, 4096, %s4612_s24, %s4467_s23, %s5481_s1, %s5481_s1, %s5480_s4  }
 0x102   : > { %s5486_s30 = sld [smem:[#allocation26_spill]] }
 0x108   : > { %p5487_p10 = scmp.ne.s32.totalorder %s5486_s30, 0 }
 0x109   : > { %s4680_s13 = sand.u32 (!%p5487_p10), 1, %s4201_s21  }
 0x10a   : > { %470 = sbr.rel (%p5487_p10) target bundleno = 1874 (0x752), region = 64  ;;  %s3070_s8 = sshll.u32 (!%p5487_p10), %s4680_s13, 8 }
 0x10b   : > { %s473_s12 = scalar_lea.sflag (!%p5487_p10), [#allocation5], %s4680_s13  ;;  %s4684_s29 = scalar_lea.vmem (!%p5487_p10), [#allocation4], %s3070_s8 }
 0x111   : > { %4164 = dma.done.wait (%p4572_p6), %s473_s12, 4096  }
 0x112   : > { %4166 = vsyncadd (%p4572_p6), %s473_s12, 4294963200  ;;  %s5488_s23 = sld [smem:[#allocation22_spill]]  ;;  %s5489_s24 = sld [smem:[#allocation27_spill]] }
 0x113   : > { %s481_s17 = sand.u32 1, %s4357_s28  }
 0x114   : > { %s482_s3 = scalar_lea.sflag [#allocation8], %s481_s17 }
 0x118   : > { %s483_s4 = sand.u32 1, %s5488_s23   ;;  %p5490_p3 = scmp.ne.s32.totalorder %s5489_s24, 0 }
 0x119   : > { %s3071_s1 = sshll.u32 %s483_s4, 8 }
 0x11a   : > { %s4692_s0 = scalar_lea.vmem [#allocation7], %s3071_s1 }
 0x11b   : > { %4168 = dma.done.wait (%p5490_p3), %s482_s3, 8192  }
 0x11c   : > { %4170 = vsyncadd (%p5490_p3), %s482_s3, 4294959104  ;;  %s4698_s5 = scalar_lea.vmem [#allocation9], %s3071_s1  ;;  %p5491_p5 = scmp.eq.s32.totalorder %s4357_s28, 0 }
 0x11e   : > { %4172 = dma.done.wait (%p5491_p5), [#allocation11], 8192   ;;  %p5492_p6 = pmov %p5491_p5 }
 0x11f   : > { %p5493_p12 = pmov %p5491_p5 }
 0x120   : > { %4174 = vsyncadd (%p5492_p6), [#allocation11], 4294959104 }
 0x121   : > { %4176 = dma.done.wait (%p5493_p12), [#allocation14], 8192   ;;  %p5494_p11 = pmov %p5491_p5 }
 0x122   : > { %s4708_s7 = scalar_lea.vmem [#allocation16], %s3070_s8  ;;  %s5495_s19 = sld [smem:[#allocation24_spill]] }
 0x123   : > { %4178 = vsyncadd (%p5494_p11), [#allocation14], 4294959104 }
 0x128   : > { %p3078_p13 = scmp.ne.s32.totalorder %s5495_s19, 0 }
 0x129   : > { %v3569_v0 = vld [vmem:[#allocation12 + $0x4] ss:$8 sps:$4 sm:$0xff] (!%p3078_p13)   ;;  %v3573_v2 = vld [vmem:[#allocation12] ss:$8 sps:$4 sm:$0xff] (!%p3078_p13)   ;;  %v3575_v4 = vld [vmem:[#allocation12 + $0x14] ss:$8 sps:$4 sm:$0xff] (!%p3078_p13)  }
 0x12a   : > { %565 = sbr.rel (%p3078_p13) target bundleno = 639 (0x27f), region = 96  ;;  %v3571_v1 = vld [vmem:[#allocation13 + $0x4] ss:$8 sps:$4 sm:$0xff] (!%p3078_p13)   ;;  %866 = vmatprep.subr.bf16.mxu0 (!%p3078_p13), %v3569_v0  ;;  %v3574_v3 = vld [vmem:[#allocation13] ss:$8 sps:$4 sm:$0xff] (!%p3078_p13)   ;;  %v569_v47 = vld [vmem:[%s4692_s0 + $0x18] sm:$0xff] (!%p3078_p13) }
 0x12b   : > { %1215 = vmatprep.subr.bf16.mxu1 (!%p3078_p13), %v3571_v1  ;;  %867 = vmatpush1.bf16.msra.mxu0 (!%p3078_p13), %v3573_v2  ;;  %v3577_v5 = vld [vmem:[#allocation13 + $0x14] ss:$8 sps:$4 sm:$0xff] (!%p3078_p13)   ;;  %v3579_v6 = vld [vmem:[#allocation12 + $0x10] ss:$8 sps:$4 sm:$0xff] (!%p3078_p13)   ;;  %v3581_v8 = vld [vmem:[#allocation12 + $0x24] ss:$8 sps:$4 sm:$0xff] (!%p3078_p13)  }
 0x12c   : > { %1216 = vmatpush1.bf16.msra.mxu1 (!%p3078_p13), %v3574_v3  ;;  %868 = vmatprep.subr.bf16.mxu0 (!%p3078_p13), %v3575_v4  ;;  %v3580_v7 = vld [vmem:[#allocation13 + $0x10] ss:$8 sps:$4 sm:$0xff] (!%p3078_p13)   ;;  %v3583_v9 = vld [vmem:[#allocation13 + $0x24] ss:$8 sps:$4 sm:$0xff] (!%p3078_p13)   ;;  %v3585_v10 = vld [vmem:[#allocation12 + $0x20] ss:$8 sps:$4 sm:$0xff] (!%p3078_p13)  }
 0x12d   : > { %1217 = vmatprep.subr.bf16.mxu1 (!%p3078_p13), %v3577_v5  ;;  %v3586_v11 = vld [vmem:[#allocation13 + $0x20] ss:$8 sps:$4 sm:$0xff] (!%p3078_p13)   ;;  %v3587_v12 = vld [vmem:[#allocation12 + $0x34] ss:$8 sps:$4 sm:$0xff] (!%p3078_p13)   ;;  %v3591_v14 = vld [vmem:[#allocation12 + $0x30] ss:$8 sps:$4 sm:$0xff] (!%p3078_p13)  }
 0x12e   : > { %v3589_v13 = vld [vmem:[#allocation13 + $0x34] ss:$8 sps:$4 sm:$0xff] (!%p3078_p13)   ;;  %v3592_v15 = vld [vmem:[#allocation13 + $0x30] ss:$8 sps:$4 sm:$0xff] (!%p3078_p13)   ;;  %v3593_v16 = vld [vmem:[#allocation12 + $0x44] ss:$8 sps:$4 sm:$0xff] (!%p3078_p13)  }
 0x12f   : > { %869 = vmatpush1.bf16.msra.mxu0 (!%p3078_p13), %v3579_v6  ;;  %v3595_v17 = vld [vmem:[#allocation13 + $0x44] ss:$8 sps:$4 sm:$0xff] (!%p3078_p13)   ;;  %v3597_v18 = vld [vmem:[#allocation12 + $0x40] ss:$8 sps:$4 sm:$0xff] (!%p3078_p13)   ;;  %v3599_v20 = vld [vmem:[#allocation12 + $0x54] ss:$8 sps:$4 sm:$0xff] (!%p3078_p13)  }
 0x130   : > { %1218 = vmatpush1.bf16.msra.mxu1 (!%p3078_p13), %v3580_v7  ;;  %870 = vmatprep.subr.bf16.mxu0 (!%p3078_p13), %v3581_v8  ;;  %v3598_v19 = vld [vmem:[#allocation13 + $0x40] ss:$8 sps:$4 sm:$0xff] (!%p3078_p13)   ;;  %v3601_v21 = vld [vmem:[#allocation13 + $0x54] ss:$8 sps:$4 sm:$0xff] (!%p3078_p13)   ;;  %v3603_v22 = vld [vmem:[#allocation12 + $0x50] ss:$8 sps:$4 sm:$0xff] (!%p3078_p13)  }
 0x131   : > { %1219 = vmatprep.subr.bf16.mxu1 %v3583_v9  ;;  %v3604_v23 = vld [vmem:[#allocation13 + $0x50] ss:$8 sps:$4 sm:$0xff]   ;;  %v3605_v24 = vld [vmem:[#allocation12 + $0x64] ss:$8 sps:$4 sm:$0xff]   ;;  %v3609_v26 = vld [vmem:[#allocation12 + $0x60] ss:$8 sps:$4 sm:$0xff]  }
 0x132   : > { %v3607_v25 = vld [vmem:[#allocation13 + $0x64] ss:$8 sps:$4 sm:$0xff]   ;;  %v3610_v27 = vld [vmem:[#allocation13 + $0x60] ss:$8 sps:$4 sm:$0xff]   ;;  %v3611_v28 = vld [vmem:[#allocation12 + $0x74] ss:$8 sps:$4 sm:$0xff]  }
 0x133   : > { %871 = vmatpush1.bf16.msra.mxu0 %v3585_v10  ;;  %v3613_v29 = vld [vmem:[#allocation13 + $0x74] ss:$8 sps:$4 sm:$0xff]   ;;  %v3615_v30 = vld [vmem:[#allocation12 + $0x70] ss:$8 sps:$4 sm:$0xff]   ;;  %v3617_v32 = vld [vmem:[#allocation12 + $0x84] ss:$8 sps:$4 sm:$0xff]  }
 0x134   : > { %1220 = vmatpush1.bf16.msra.mxu1 %v3586_v11  ;;  %872 = vmatprep.subr.bf16.mxu0 %v3587_v12  ;;  %v3616_v31 = vld [vmem:[#allocation13 + $0x70] ss:$8 sps:$4 sm:$0xff]   ;;  %v3619_v33 = vld [vmem:[#allocation13 + $0x84] ss:$8 sps:$4 sm:$0xff]   ;;  %v3621_v34 = vld [vmem:[#allocation12 + $0x80] ss:$8 sps:$4 sm:$0xff]  }
 0x135   : > { %1221 = vmatprep.subr.bf16.mxu1 %v3589_v13  ;;  %v3622_v35 = vld [vmem:[#allocation13 + $0x80] ss:$8 sps:$4 sm:$0xff]   ;;  %v3623_v36 = vld [vmem:[#allocation12 + $0x94] ss:$8 sps:$4 sm:$0xff]   ;;  %v3627_v38 = vld [vmem:[#allocation12 + $0x90] ss:$8 sps:$4 sm:$0xff]  }
 0x136   : > { %v3625_v37 = vld [vmem:[#allocation13 + $0x94] ss:$8 sps:$4 sm:$0xff]   ;;  %v3628_v39 = vld [vmem:[#allocation13 + $0x90] ss:$8 sps:$4 sm:$0xff]   ;;  %v3629_v40 = vld [vmem:[#allocation12 + $0xa4] ss:$8 sps:$4 sm:$0xff]  }
 0x137   : > { %873 = vmatpush1.bf16.msra.mxu0 %v3591_v14  ;;  %v3631_v41 = vld [vmem:[#allocation13 + $0xa4] ss:$8 sps:$4 sm:$0xff]   ;;  %v3633_v42 = vld [vmem:[#allocation12 + $0xa0] ss:$8 sps:$4 sm:$0xff]   ;;  %v3635_v44 = vld [vmem:[#allocation12 + $0xb4] ss:$8 sps:$4 sm:$0xff]  }
 0x138   : > { %1222 = vmatpush1.bf16.msra.mxu1 %v3592_v15  ;;  %874 = vmatprep.subr.bf16.mxu0 %v3593_v16  ;;  %v3634_v43 = vld [vmem:[#allocation13 + $0xa0] ss:$8 sps:$4 sm:$0xff]   ;;  %v3637_v45 = vld [vmem:[#allocation13 + $0xb4] ss:$8 sps:$4 sm:$0xff]   ;;  %v3639_v50 = vld [vmem:[#allocation12 + $0xb0] ss:$8 sps:$4 sm:$0xff]  }
 0x139   : > { %1223 = vmatprep.subr.bf16.mxu1 %v3595_v17  ;;  %v567_v46 = vld [vmem:[%s4692_s0 + $0x8] sm:$0xff]  ;;  %v617_v49 = vld [vmem:[%s4698_s5 + $0x18] sm:$0xff]  ;;  %v566_v6 = vld [vmem:[%s4692_s0] sm:$0xff]  ;;  %s5496_s15 = sld [smem:[#allocation35_spill]]  ;;  %s5497_s12 = sld [smem:[#allocation37_spill]] }
 0x13a   : > { %v615_v48 = vld [vmem:[%s4698_s5 + $0x8] sm:$0xff]  ;;  %v3640_v51 = vld [vmem:[#allocation13 + $0xb0] ss:$8 sps:$4 sm:$0xff]   ;;  %v599_v52 = vpack.c.bf16 %v569_v47, %v567_v46  ;;  %v3647_v58 = vld [vmem:[#allocation12 + $0xd4] ss:$8 sps:$4 sm:$0xff]  }
 0x13b   : > { %875 = vmatpush1.bf16.msra.mxu0 %v3597_v18  ;;  %v647_v53 = vpack.c.bf16 %v617_v49, %v615_v48  ;;  %v3641_v54 = vld [vmem:[#allocation12 + $0xc4] ss:$8 sps:$4 sm:$0xff]   ;;  %v3645_v56 = vld [vmem:[#allocation12 + $0xc0] ss:$8 sps:$4 sm:$0xff]   ;;  %v3649_v59 = vld [vmem:[#allocation13 + $0xd4] ss:$8 sps:$4 sm:$0xff]  }
 0x13c   : > { %1224 = vmatpush1.bf16.msra.mxu1 %v3598_v19  ;;  %876 = vmatprep.subr.bf16.mxu0 %v3599_v20  ;;  %v3643_v55 = vld [vmem:[#allocation13 + $0xc4] ss:$8 sps:$4 sm:$0xff]   ;;  %v3646_v57 = vld [vmem:[#allocation13 + $0xc0] ss:$8 sps:$4 sm:$0xff]   ;;  %v3651_v60 = vld [vmem:[#allocation12 + $0xd0] ss:$8 sps:$4 sm:$0xff]  }
 0x13d   : > { %1225 = vmatprep.subr.bf16.mxu1 %v3601_v21  ;;  %898 = vmatprep.mubr.bf16.mxu0 %v599_v52  ;;  %v3652_v61 = vld [vmem:[#allocation13 + $0xd0] ss:$8 sps:$4 sm:$0xff]   ;;  %v3653_v62 = vld [vmem:[#allocation12 + $0xe4] ss:$8 sps:$4 sm:$0xff]   ;;  %v3657_v0 = vld [vmem:[#allocation12 + $0xe0] ss:$8 sps:$4 sm:$0xff]  }
 0x13e   : > { %1247 = vmatprep.mubr.bf16.mxu1 %v647_v53  ;;  %v3655_v63 = vld [vmem:[#allocation13 + $0xe4] ss:$8 sps:$4 sm:$0xff]   ;;  %v3658_v1 = vld [vmem:[#allocation13 + $0xe0] ss:$8 sps:$4 sm:$0xff]   ;;  %v3659_v2 = vld [vmem:[#allocation12 + $0xf4] ss:$8 sps:$4 sm:$0xff]  }
 0x13f   : > { %877 = vmatpush1.bf16.msra.mxu0 %v3603_v22  ;;  %v3661_v3 = vld [vmem:[#allocation13 + $0xf4] ss:$8 sps:$4 sm:$0xff]   ;;  %v3663_v4 = vld [vmem:[#allocation12 + $0xf0] ss:$8 sps:$4 sm:$0xff]   ;;  %v614_v8 = vld [vmem:[%s4698_s5] sm:$0xff] }
 0x140   : > { %1226 = vmatpush1.bf16.msra.mxu1 %v3604_v23  ;;  %878 = vmatprep.subr.bf16.mxu0 %v3605_v24  ;;  %v3664_v5 = vld [vmem:[#allocation13 + $0xf0] ss:$8 sps:$4 sm:$0xff]   ;;  %v571_v10 = vld [vmem:[%s4692_s0 + $0x28] sm:$0xff]  ;;  %v570_v18 = vld [vmem:[%s4692_s0 + $0x20] sm:$0xff] }
 0x141   : > { %1227 = vmatprep.subr.bf16.mxu1 %v3607_v25  ;;  %v568_v7 = vld [vmem:[%s4692_s0 + $0x10] sm:$0xff]  ;;  %v573_v11 = vld [vmem:[%s4692_s0 + $0x38] sm:$0xff]  ;;  %v619_v12 = vld [vmem:[%s4698_s5 + $0x28] sm:$0xff] }
 0x142   : > { %v616_v9 = vld [vmem:[%s4698_s5 + $0x10] sm:$0xff]  ;;  %v621_v13 = vld [vmem:[%s4698_s5 + $0x38] sm:$0xff]  ;;  %v598_v14 = vpack.c.bf16 %v568_v7, %v566_v6  ;;  %v601_v16 = vpack.c.bf16 %v573_v11, %v571_v10  ;;  %v618_v20 = vld [vmem:[%s4698_s5 + $0x20] sm:$0xff] }
 0x143   : > { %879 = vmatpush1.bf16.msra.mxu0 %v3609_v26  ;;  %v646_v15 = vpack.c.bf16 %v616_v9, %v614_v8  ;;  %v649_v17 = vpack.c.bf16 %v621_v13, %v619_v12  ;;  %v572_v19 = vld [vmem:[%s4692_s0 + $0x30] sm:$0xff]  ;;  %v575_v22 = vld [vmem:[%s4692_s0 + $0x48] sm:$0xff]  ;;  %v577_v23 = vld [vmem:[%s4692_s0 + $0x58] sm:$0xff] }
 0x144   : > { %1228 = vmatpush1.bf16.msra.mxu1 %v3610_v27  ;;  %880 = vmatprep.subr.bf16.mxu0 %v3611_v28  ;;  %v620_v21 = vld [vmem:[%s4698_s5 + $0x30] sm:$0xff]  ;;  %v623_v24 = vld [vmem:[%s4698_s5 + $0x48] sm:$0xff]  ;;  %v625_v25 = vld [vmem:[%s4698_s5 + $0x58] sm:$0xff]  ;;  %v600_v26 = vpack.c.bf16 %v572_v19, %v570_v18  ;;  %v603_v28 = vpack.c.bf16 %v577_v23, %v575_v22 }
 0x145   : > { %1229 = vmatprep.subr.bf16.mxu1 %v3613_v29  ;;  %v648_v27 = vpack.c.bf16 %v620_v21, %v618_v20  ;;  %v651_v29 = vpack.c.bf16 %v625_v25, %v623_v24  ;;  %v583_v46 = vld [vmem:[%s4692_s0 + $0x88] sm:$0xff]  ;;  %v585_v47 = vld [vmem:[%s4692_s0 + $0x98] sm:$0xff] }
 0x146   : > { %v631_v48 = vld [vmem:[%s4698_s5 + $0x88] sm:$0xff]  ;;  %v633_v49 = vld [vmem:[%s4698_s5 + $0x98] sm:$0xff]  ;;  %v607_v52 = vpack.c.bf16 %v585_v47, %v583_v46 }
 0x147   : > { %881 = vmatpush1.bf16.msra.mxu0 %v3615_v30  ;;  %v574_v30 = vld [vmem:[%s4692_s0 + $0x40] sm:$0xff]  ;;  %v655_v53 = vpack.c.bf16 %v633_v49, %v631_v48  ;;  %v591_v6 = vld [vmem:[%s4692_s0 + $0xc8] sm:$0xff]  ;;  %v593_v7 = vld [vmem:[%s4692_s0 + $0xd8] sm:$0xff] }
 0x148   : > { %1230 = vmatpush1.bf16.msra.mxu1 %v3616_v31  ;;  %882 = vmatprep.subr.bf16.mxu0 %v3617_v32  ;;  %v576_v31 = vld [vmem:[%s4692_s0 + $0x50] sm:$0xff]  ;;  %v622_v32 = vld [vmem:[%s4698_s5 + $0x40] sm:$0xff]  ;;  %v639_v8 = vld [vmem:[%s4698_s5 + $0xc8] sm:$0xff]  ;;  %v611_v12 = vpack.c.bf16 %v593_v7, %v591_v6 }
 0x149   : > { %1231 = vmatprep.subr.bf16.mxu1 %v3619_v33  ;;  %v624_v33 = vld [vmem:[%s4698_s5 + $0x50] sm:$0xff]  ;;  %v641_v9 = vld [vmem:[%s4698_s5 + $0xd8] sm:$0xff]  ;;  %v595_v18 = vld [vmem:[%s4692_s0 + $0xe8] sm:$0xff] }
 0x14a   : > { %v659_v13 = vpack.c.bf16 %v641_v9, %v639_v8  ;;  %v597_v19 = vld [vmem:[%s4692_s0 + $0xf8] sm:$0xff]  ;;  %v643_v20 = vld [vmem:[%s4698_s5 + $0xe8] sm:$0xff] }
 0x14b   : > { %883 = vmatpush1.bf16.msra.mxu0 %v3621_v34  ;;  %v579_v34 = vld [vmem:[%s4692_s0 + $0x68] sm:$0xff]  ;;  %v645_v21 = vld [vmem:[%s4698_s5 + $0xf8] sm:$0xff]  ;;  %v613_v24 = vpack.c.bf16 %v597_v19, %v595_v18 }
 0x14c   : > { %1232 = vmatpush1.bf16.msra.mxu1 %v3622_v35  ;;  %884 = vmatprep.subr.bf16.mxu0 %v3623_v36  ;;  %v581_v35 = vld [vmem:[%s4692_s0 + $0x78] sm:$0xff]  ;;  %v627_v36 = vld [vmem:[%s4698_s5 + $0x68] sm:$0xff]  ;;  %v661_v25 = vpack.c.bf16 %v645_v21, %v643_v20 }
 0x14d   : > { %1233 = vmatprep.subr.bf16.mxu1 %v3625_v37  ;;  %v629_v37 = vld [vmem:[%s4698_s5 + $0x78] sm:$0xff] }
 0x14f   : > { %885 = vmatpush1.bf16.msra.mxu0 %v3627_v38  ;;  %v602_v38 = vpack.c.bf16 %v576_v31, %v574_v30 }
 0x150   : > { %1234 = vmatpush1.bf16.msra.mxu1 %v3628_v39  ;;  %886 = vmatprep.subr.bf16.mxu0 %v3629_v40  ;;  %v650_v39 = vpack.c.bf16 %v624_v33, %v622_v32  ;;  %v605_v40 = vpack.c.bf16 %v581_v35, %v579_v34  ;;  %v696_v32 = vlaneseq  ;;  %v694_v35 = vld [vmem:[%s5496_s15] sm:$0x3] }
 0x151   : > { %1235 = vmatprep.subr.bf16.mxu1 %v3631_v41  ;;  %v653_v41 = vpack.c.bf16 %v629_v37, %v627_v36  ;;  %v1043_v36 = vld [vmem:[%s5497_s12] sm:$0x3] }
 0x152   : > { %v697_v33 = vshrl.u32 %v696_v32, 7 }
 0x153   : > { %887 = vmatpush1.bf16.msra.mxu0 %v3633_v42  ;;  %v578_v42 = vld [vmem:[%s4692_s0 + $0x60] sm:$0xff] }
 0x154   : > { %1236 = vmatpush1.bf16.msra.mxu1 %v3634_v43  ;;  %888 = vmatprep.subr.bf16.mxu0 %v3635_v44  ;;  %v580_v43 = vld [vmem:[%s4692_s0 + $0x70] sm:$0xff]  ;;  %v626_v44 = vld [vmem:[%s4698_s5 + $0x60] sm:$0xff]  ;;  %v698_v34 = vsub.s32 0, %v697_v33  ;;  %v702_v37 = vsub.s32 1, %v697_v33 }
 0x155   : > { %1237 = vmatprep.subr.bf16.mxu1 %v3637_v45  ;;  %v628_v45 = vld [vmem:[%s4698_s5 + $0x70] sm:$0xff] }
 0x157   : > { %889 = vmatpush1.bf16.msra.mxu0 %v3639_v50  ;;  %v604_v50 = vpack.c.bf16 %v580_v43, %v578_v42  ;;  %v4785_v42 = vrot.slane %v694_v35, %v702_v37  ;;  %v4787_v43 = vrot.slane %v1043_v36, %v702_v37 }
 0x158   : > { %1238 = vmatpush1.bf16.msra.mxu1 %v3640_v51  ;;  %890 = vmatprep.subr.bf16.mxu0 %v3641_v54  ;;  %v652_v51 = vpack.c.bf16 %v628_v45, %v626_v44  ;;  %v582_v54 = vld [vmem:[%s4692_s0 + $0x80] sm:$0xff] }
 0x159   : > { %1239 = vmatprep.subr.bf16.mxu1 %v3643_v55  ;;  %v584_v55 = vld [vmem:[%s4692_s0 + $0x90] sm:$0xff] }
 0x15b   : > { %891 = vmatpush1.bf16.msra.mxu0 %v3645_v56  ;;  %v630_v56 = vld [vmem:[%s4698_s5 + $0x80] sm:$0xff] }
 0x15c   : > { %1240 = vmatpush1.bf16.msra.mxu1 %v3646_v57  ;;  %892 = vmatprep.subr.bf16.mxu0 %v3647_v58  ;;  %v632_v57 = vld [vmem:[%s4698_s5 + $0x90] sm:$0xff]  ;;  %v587_v58 = vld [vmem:[%s4692_s0 + $0xa8] sm:$0xff] }
 0x15d   : > { %1241 = vmatprep.subr.bf16.mxu1 %v3649_v59  ;;  %v589_v59 = vld [vmem:[%s4692_s0 + $0xb8] sm:$0xff] }
 0x15f   : > { %893 = vmatpush1.bf16.msra.mxu0 %v3651_v60  ;;  %v635_v60 = vld [vmem:[%s4698_s5 + $0xa8] sm:$0xff] }
 0x160   : > { %1242 = vmatpush1.bf16.msra.mxu1 %v3652_v61  ;;  %894 = vmatprep.subr.bf16.mxu0 %v3653_v62  ;;  %v637_v61 = vld [vmem:[%s4698_s5 + $0xb8] sm:$0xff]  ;;  %v606_v62 = vpack.c.bf16 %v584_v55, %v582_v54 }
 0x161   : > { %1243 = vmatprep.subr.bf16.mxu1 %v3655_v63  ;;  %v654_v63 = vpack.c.bf16 %v632_v57, %v630_v56 }
 0x163   : > { %895 = vmatpush1.bf16.msra.mxu0 %v3657_v0  ;;  %v609_v0 = vpack.c.bf16 %v589_v59, %v587_v58 }
 0x164   : > { %1244 = vmatpush1.bf16.msra.mxu1 %v3658_v1  ;;  %896 = vmatprep.subr.bf16.mxu0 %v3659_v2  ;;  %v657_v1 = vpack.c.bf16 %v637_v61, %v635_v60  ;;  %v586_v2 = vld [vmem:[%s4692_s0 + $0xa0] sm:$0xff] }
 0x165   : > { %1245 = vmatprep.subr.bf16.mxu1 %v3661_v3  ;;  %v588_v3 = vld [vmem:[%s4692_s0 + $0xb0] sm:$0xff] }
 0x166   : > { %v608_v10 = vpack.c.bf16 %v588_v3, %v586_v2 }
 0x167   : > { %897 = vmatpush1.bf16.msra.mxu0 %v3663_v4  ;;  %v634_v4 = vld [vmem:[%s4698_s5 + $0xa0] sm:$0xff] }
 0x168   : > { %1246 = vmatpush1.bf16.msra.mxu1 %v3664_v5  ;;  %v636_v5 = vld [vmem:[%s4698_s5 + $0xb0] sm:$0xff] }
 0x169   : > { %v656_v11 = vpack.c.bf16 %v636_v5, %v634_v4 }
 0x16a   : > { %899 = vmatmul.mubr.bf16.vlgmr.msra.gmra.mrb[0].mxu0 %v598_v14  ;;  %v590_v14 = vld [vmem:[%s4692_s0 + $0xc0] sm:$0xff] }
 0x16b   : > { %1248 = vmatmul.mubr.bf16.vlgmr.msra.gmra.mrb[0].mxu1 %v646_v15  ;;  %908 = vmatprep.mubr.bf16.mxu0 %v601_v16  ;;  %v592_v15 = vld [vmem:[%s4692_s0 + $0xd0] sm:$0xff]  ;;  %v638_v16 = vld [vmem:[%s4698_s5 + $0xc0] sm:$0xff] }
 0x16c   : > { %1257 = vmatprep.mubr.bf16.mxu1 %v649_v17  ;;  %v640_v17 = vld [vmem:[%s4698_s5 + $0xd0] sm:$0xff]  ;;  %v610_v22 = vpack.c.bf16 %v592_v15, %v590_v14 }
 0x16d   : > { %v658_v23 = vpack.c.bf16 %v640_v17, %v638_v16 }
 0x172   : > { %909 = vmatmul.mubr.bf16.gmra.mrb[4].mxu0 %v600_v26  ;;  %v594_v26 = vld [vmem:[%s4692_s0 + $0xe0] sm:$0xff] }
 0x173   : > { %1258 = vmatmul.mubr.bf16.gmra.mrb[4].mxu1 %v648_v27  ;;  %918 = vmatprep.mubr.bf16.mxu0 %v603_v28  ;;  %v596_v27 = vld [vmem:[%s4692_s0 + $0xf0] sm:$0xff]  ;;  %v642_v28 = vld [vmem:[%s4698_s5 + $0xe0] sm:$0xff] }
 0x174   : > { %1267 = vmatprep.mubr.bf16.mxu1 %v651_v29  ;;  %v644_v29 = vld [vmem:[%s4698_s5 + $0xf0] sm:$0xff]  ;;  %v612_v30 = vpack.c.bf16 %v596_v27, %v594_v26 }
 0x175   : > { %v660_v31 = vpack.c.bf16 %v644_v29, %v642_v28 }
 0x17a   : > { %919 = vmatmul.mubr.bf16.gmra.mrb[8].mxu0 %v602_v38  ;;  %v4781_v38 = vrot.slane %v694_v35, %v698_v34 }
 0x17b   : > { %1268 = vmatmul.mubr.bf16.gmra.mrb[8].mxu1 %v650_v39  ;;  %928 = vmatprep.mubr.bf16.mxu0 %v605_v40  ;;  %v4783_v39 = vrot.slane %v1043_v36, %v698_v34 }
 0x17c   : > { %1277 = vmatprep.mubr.bf16.mxu1 %v653_v41 }
 0x182   : > { %929 = vmatmul.mubr.bf16.gmra.mrb[12].mxu0 %v604_v50 }
 0x183   : > { %1278 = vmatmul.mubr.bf16.gmra.mrb[12].mxu1 %v652_v51  ;;  %938 = vmatprep.mubr.bf16.mxu0 %v607_v52 }
 0x184   : > { %1287 = vmatprep.mubr.bf16.mxu1 %v655_v53 }
 0x18a   : > { %939 = vmatmul.mubr.bf16.gmra.mrb[16].mxu0 %v606_v62 }
 0x18b   : > { %1288 = vmatmul.mubr.bf16.gmra.mrb[16].mxu1 %v654_v63  ;;  %948 = vmatprep.mubr.bf16.mxu0 %v609_v0 }
 0x18c   : > { %1297 = vmatprep.mubr.bf16.mxu1 %v657_v1 }
 0x192   : > { %949 = vmatmul.mubr.bf16.gmra.mrb[20].mxu0 %v608_v10 }
 0x193   : > { %1298 = vmatmul.mubr.bf16.gmra.mrb[20].mxu1 %v656_v11  ;;  %958 = vmatprep.mubr.bf16.mxu0 %v611_v12 }
 0x194   : > { %1307 = vmatprep.mubr.bf16.mxu1 %v659_v13 }
 0x19a   : > { %959 = vmatmul.mubr.bf16.gmra.mrb[24].mxu0 %v610_v22 }
 0x19b   : > { %1308 = vmatmul.mubr.bf16.gmra.mrb[24].mxu1 %v658_v23  ;;  %968 = vmatprep.mubr.bf16.mxu0 %v613_v24 }
 0x19c   : > { %1317 = vmatprep.mubr.bf16.mxu1 %v661_v25 }
 0x1a2   : > { %969 = vmatmul.mubr.bf16.gmra.mrb[28].mxu0 %v612_v30 }
 0x1a3   : > { %1318 = vmatmul.mubr.bf16.gmra.mrb[28].mxu1 %v660_v31 }
 0x23d   : > { %v900_v40 = vpop.f32.mrb[0].mxu0 }
 0x23e   : > { %v1249_v41 = vpop.f32.mrb[0].mxu1  ;;  %v902_v44 = vpop.f32.mrb[1].mxu0  ;;  %v901_v48 = vadd.f32 %v900_v40, %v4781_v38 }
 0x23f   : > { %v1251_v45 = vpop.f32.mrb[1].mxu1  ;;  %v904_v46 = vpop.f32.mrb[2].mxu0  ;;  %v1250_v49 = vadd.f32 %v1249_v41, %v4783_v39  ;;  %v903_v54 = vadd.f32 %v902_v44, %v4785_v42 }
 0x240   : > { %v1253_v47 = vpop.f32.mrb[2].mxu1  ;;  %v905_v50 = vadd.f32 %v904_v46, %v4781_v38  ;;  %v906_v52 = vpop.f32.mrb[3].mxu0  ;;  %v1252_v55 = vadd.f32 %v1251_v45, %v4787_v43 }
 0x241   : > { %v1254_v51 = vadd.f32 %v1253_v47, %v4783_v39  ;;  %v1255_v53 = vpop.f32.mrb[3].mxu1  ;;  %v907_v56 = vadd.f32 %v906_v52, %v4785_v42 }
 0x242   : > { %v1256_v57 = vadd.f32 %v1255_v53, %v4787_v43  ;;  %v979_v58 = vpack.c.bf16 %v905_v50, %v901_v48 }
 0x243   : > { %v1328_v59 = vpack.c.bf16 %v1254_v51, %v1250_v49  ;;  %v980_v60 = vpack.c.bf16 %v907_v56, %v903_v54 }
 0x244   : > { %v1329_v61 = vpack.c.bf16 %v1256_v57, %v1252_v55  ;;  %995 = vst [vmem:[#allocation2] sm:$0xff] %v979_v58 }
 0x245   : > { %1344 = vst [vmem:[#allocation3] sm:$0xff] %v1328_v59  ;;  %996 = vst [vmem:[#allocation2 + $0x8] sm:$0xff] %v980_v60  ;;  %v910_v62 = vpop.f32.mrb[4].mxu0 }
 0x246   : > { %1345 = vst [vmem:[#allocation3 + $0x8] sm:$0xff] %v1329_v61  ;;  %v1259_v63 = vpop.f32.mrb[4].mxu1  ;;  %v912_v0 = vpop.f32.mrb[5].mxu0  ;;  %v911_v4 = vadd.f32 %v910_v62, %v4781_v38 }
 0x247   : > { %v1261_v1 = vpop.f32.mrb[5].mxu1  ;;  %v914_v2 = vpop.f32.mrb[6].mxu0  ;;  %v1260_v5 = vadd.f32 %v1259_v63, %v4783_v39  ;;  %v913_v10 = vadd.f32 %v912_v0, %v4785_v42 }
 0x248   : > { %v1263_v3 = vpop.f32.mrb[6].mxu1  ;;  %v915_v6 = vadd.f32 %v914_v2, %v4781_v38  ;;  %v916_v8 = vpop.f32.mrb[7].mxu0  ;;  %v1262_v11 = vadd.f32 %v1261_v1, %v4787_v43 }
 0x249   : > { %v1264_v7 = vadd.f32 %v1263_v3, %v4783_v39  ;;  %v1265_v9 = vpop.f32.mrb[7].mxu1  ;;  %v917_v12 = vadd.f32 %v916_v8, %v4785_v42 }
 0x24a   : > { %v1266_v13 = vadd.f32 %v1265_v9, %v4787_v43  ;;  %v981_v14 = vpack.c.bf16 %v915_v6, %v911_v4 }
 0x24b   : > { %v1330_v15 = vpack.c.bf16 %v1264_v7, %v1260_v5  ;;  %v982_v16 = vpack.c.bf16 %v917_v12, %v913_v10 }
 0x24c   : > { %v1331_v17 = vpack.c.bf16 %v1266_v13, %v1262_v11  ;;  %997 = vst [vmem:[#allocation2 + $0x10] sm:$0xff] %v981_v14 }
 0x24d   : > { %1346 = vst [vmem:[#allocation3 + $0x10] sm:$0xff] %v1330_v15  ;;  %998 = vst [vmem:[#allocation2 + $0x18] sm:$0xff] %v982_v16  ;;  %v920_v18 = vpop.f32.mrb[8].mxu0 }
 0x24e   : > { %1347 = vst [vmem:[#allocation3 + $0x18] sm:$0xff] %v1331_v17  ;;  %v1269_v19 = vpop.f32.mrb[8].mxu1  ;;  %v922_v20 = vpop.f32.mrb[9].mxu0  ;;  %v921_v24 = vadd.f32 %v920_v18, %v4781_v38 }
 0x24f   : > { %v1271_v21 = vpop.f32.mrb[9].mxu1  ;;  %v924_v22 = vpop.f32.mrb[10].mxu0  ;;  %v1270_v25 = vadd.f32 %v1269_v19, %v4783_v39  ;;  %v923_v30 = vadd.f32 %v922_v20, %v4785_v42 }
 0x250   : > { %v1273_v23 = vpop.f32.mrb[10].mxu1  ;;  %v925_v26 = vadd.f32 %v924_v22, %v4781_v38  ;;  %v926_v28 = vpop.f32.mrb[11].mxu0  ;;  %v1272_v31 = vadd.f32 %v1271_v21, %v4787_v43 }
 0x251   : > { %v1274_v27 = vadd.f32 %v1273_v23, %v4783_v39  ;;  %v1275_v29 = vpop.f32.mrb[11].mxu1  ;;  %v927_v32 = vadd.f32 %v926_v28, %v4785_v42 }
 0x252   : > { %v1276_v33 = vadd.f32 %v1275_v29, %v4787_v43  ;;  %v983_v34 = vpack.c.bf16 %v925_v26, %v921_v24 }
 0x253   : > { %v1332_v35 = vpack.c.bf16 %v1274_v27, %v1270_v25  ;;  %v984_v36 = vpack.c.bf16 %v927_v32, %v923_v30 }
 0x254   : > { %v1333_v37 = vpack.c.bf16 %v1276_v33, %v1272_v31  ;;  %999 = vst [vmem:[#allocation2 + $0x20] sm:$0xff] %v983_v34 }
 0x255   : > { %1348 = vst [vmem:[#allocation3 + $0x20] sm:$0xff] %v1332_v35  ;;  %1000 = vst [vmem:[#allocation2 + $0x28] sm:$0xff] %v984_v36  ;;  %v930_v40 = vpop.f32.mrb[12].mxu0 }
 0x256   : > { %1349 = vst [vmem:[#allocation3 + $0x28] sm:$0xff] %v1333_v37  ;;  %v1279_v41 = vpop.f32.mrb[12].mxu1  ;;  %v932_v44 = vpop.f32.mrb[13].mxu0  ;;  %v931_v48 = vadd.f32 %v930_v40, %v4781_v38 }
 0x257   : > { %v1281_v45 = vpop.f32.mrb[13].mxu1  ;;  %v934_v46 = vpop.f32.mrb[14].mxu0  ;;  %v1280_v49 = vadd.f32 %v1279_v41, %v4783_v39  ;;  %v933_v54 = vadd.f32 %v932_v44, %v4785_v42 }
 0x258   : > { %v1283_v47 = vpop.f32.mrb[14].mxu1  ;;  %v935_v50 = vadd.f32 %v934_v46, %v4781_v38  ;;  %v936_v52 = vpop.f32.mrb[15].mxu0  ;;  %v1282_v55 = vadd.f32 %v1281_v45, %v4787_v43 }
 0x259   : > { %v1284_v51 = vadd.f32 %v1283_v47, %v4783_v39  ;;  %v1285_v53 = vpop.f32.mrb[15].mxu1  ;;  %v937_v56 = vadd.f32 %v936_v52, %v4785_v42 }
 0x25a   : > { %v1286_v57 = vadd.f32 %v1285_v53, %v4787_v43  ;;  %v985_v58 = vpack.c.bf16 %v935_v50, %v931_v48 }
 0x25b   : > { %v1334_v59 = vpack.c.bf16 %v1284_v51, %v1280_v49  ;;  %v986_v60 = vpack.c.bf16 %v937_v56, %v933_v54 }
 0x25c   : > { %v1335_v61 = vpack.c.bf16 %v1286_v57, %v1282_v55  ;;  %1001 = vst [vmem:[#allocation2 + $0x30] sm:$0xff] %v985_v58 }
 0x25d   : > { %1350 = vst [vmem:[#allocation3 + $0x30] sm:$0xff] %v1334_v59  ;;  %1002 = vst [vmem:[#allocation2 + $0x38] sm:$0xff] %v986_v60  ;;  %v940_v62 = vpop.f32.mrb[16].mxu0 }
 0x25e   : > { %1351 = vst [vmem:[#allocation3 + $0x38] sm:$0xff] %v1335_v61  ;;  %v1289_v63 = vpop.f32.mrb[16].mxu1  ;;  %v942_v0 = vpop.f32.mrb[17].mxu0  ;;  %v941_v4 = vadd.f32 %v940_v62, %v4781_v38 }
 0x25f   : > { %v1291_v1 = vpop.f32.mrb[17].mxu1  ;;  %v944_v2 = vpop.f32.mrb[18].mxu0  ;;  %v1290_v5 = vadd.f32 %v1289_v63, %v4783_v39  ;;  %v943_v10 = vadd.f32 %v942_v0, %v4785_v42 }
 0x260   : > { %v1293_v3 = vpop.f32.mrb[18].mxu1  ;;  %v945_v6 = vadd.f32 %v944_v2, %v4781_v38  ;;  %v946_v8 = vpop.f32.mrb[19].mxu0  ;;  %v1292_v11 = vadd.f32 %v1291_v1, %v4787_v43 }
 0x261   : > { %v1294_v7 = vadd.f32 %v1293_v3, %v4783_v39  ;;  %v1295_v9 = vpop.f32.mrb[19].mxu1  ;;  %v947_v12 = vadd.f32 %v946_v8, %v4785_v42 }
 0x262   : > { %v1296_v13 = vadd.f32 %v1295_v9, %v4787_v43  ;;  %v987_v14 = vpack.c.bf16 %v945_v6, %v941_v4 }
 0x263   : > { %v1336_v15 = vpack.c.bf16 %v1294_v7, %v1290_v5  ;;  %v988_v16 = vpack.c.bf16 %v947_v12, %v943_v10 }
 0x264   : > { %v1337_v17 = vpack.c.bf16 %v1296_v13, %v1292_v11  ;;  %1003 = vst [vmem:[#allocation2 + $0x40] sm:$0xff] %v987_v14 }
 0x265   : > { %1352 = vst [vmem:[#allocation3 + $0x40] sm:$0xff] %v1336_v15  ;;  %1004 = vst [vmem:[#allocation2 + $0x48] sm:$0xff] %v988_v16  ;;  %v950_v18 = vpop.f32.mrb[20].mxu0 }
 0x266   : > { %1353 = vst [vmem:[#allocation3 + $0x48] sm:$0xff] %v1337_v17  ;;  %v1299_v19 = vpop.f32.mrb[20].mxu1  ;;  %v952_v20 = vpop.f32.mrb[21].mxu0  ;;  %v951_v24 = vadd.f32 %v950_v18, %v4781_v38 }
 0x267   : > { %v1301_v21 = vpop.f32.mrb[21].mxu1  ;;  %v954_v22 = vpop.f32.mrb[22].mxu0  ;;  %v1300_v25 = vadd.f32 %v1299_v19, %v4783_v39  ;;  %v953_v30 = vadd.f32 %v952_v20, %v4785_v42 }
 0x268   : > { %v1303_v23 = vpop.f32.mrb[22].mxu1  ;;  %v955_v26 = vadd.f32 %v954_v22, %v4781_v38  ;;  %v956_v28 = vpop.f32.mrb[23].mxu0  ;;  %v1302_v31 = vadd.f32 %v1301_v21, %v4787_v43 }
 0x269   : > { %v1304_v27 = vadd.f32 %v1303_v23, %v4783_v39  ;;  %v1305_v29 = vpop.f32.mrb[23].mxu1  ;;  %v957_v32 = vadd.f32 %v956_v28, %v4785_v42 }
 0x26a   : > { %v1306_v33 = vadd.f32 %v1305_v29, %v4787_v43  ;;  %v989_v34 = vpack.c.bf16 %v955_v26, %v951_v24 }
 0x26b   : > { %v1338_v35 = vpack.c.bf16 %v1304_v27, %v1300_v25  ;;  %v990_v36 = vpack.c.bf16 %v957_v32, %v953_v30 }
 0x26c   : > { %v1339_v37 = vpack.c.bf16 %v1306_v33, %v1302_v31  ;;  %1005 = vst [vmem:[#allocation2 + $0x50] sm:$0xff] %v989_v34 }
 0x26d   : > { %1354 = vst [vmem:[#allocation3 + $0x50] sm:$0xff] %v1338_v35  ;;  %1006 = vst [vmem:[#allocation2 + $0x58] sm:$0xff] %v990_v36  ;;  %v960_v40 = vpop.f32.mrb[24].mxu0 }
 0x26e   : > { %1355 = vst [vmem:[#allocation3 + $0x58] sm:$0xff] %v1339_v37  ;;  %v1309_v41 = vpop.f32.mrb[24].mxu1  ;;  %v962_v44 = vpop.f32.mrb[25].mxu0  ;;  %v961_v48 = vadd.f32 %v960_v40, %v4781_v38 }
 0x26f   : > { %v1311_v45 = vpop.f32.mrb[25].mxu1  ;;  %v964_v46 = vpop.f32.mrb[26].mxu0  ;;  %v1310_v49 = vadd.f32 %v1309_v41, %v4783_v39  ;;  %v963_v54 = vadd.f32 %v962_v44, %v4785_v42 }
 0x270   : > { %v1313_v47 = vpop.f32.mrb[26].mxu1  ;;  %v965_v50 = vadd.f32 %v964_v46, %v4781_v38  ;;  %v966_v52 = vpop.f32.mrb[27].mxu0  ;;  %v1312_v55 = vadd.f32 %v1311_v45, %v4787_v43 }
 0x271   : > { %v1314_v51 = vadd.f32 %v1313_v47, %v4783_v39  ;;  %v1315_v53 = vpop.f32.mrb[27].mxu1  ;;  %v967_v56 = vadd.f32 %v966_v52, %v4785_v42 }
 0x272   : > { %v1316_v57 = vadd.f32 %v1315_v53, %v4787_v43  ;;  %v991_v58 = vpack.c.bf16 %v965_v50, %v961_v48 }
 0x273   : > { %v1340_v59 = vpack.c.bf16 %v1314_v51, %v1310_v49  ;;  %v992_v60 = vpack.c.bf16 %v967_v56, %v963_v54 }
 0x274   : > { %v1341_v61 = vpack.c.bf16 %v1316_v57, %v1312_v55  ;;  %1007 = vst [vmem:[#allocation2 + $0x60] sm:$0xff] %v991_v58 }
 0x275   : > { %1356 = vst [vmem:[#allocation3 + $0x60] sm:$0xff] %v1340_v59  ;;  %1008 = vst [vmem:[#allocation2 + $0x68] sm:$0xff] %v992_v60  ;;  %v970_v62 = vpop.f32.mrb[28].mxu0 }
 0x276   : > { %1357 = vst [vmem:[#allocation3 + $0x68] sm:$0xff] %v1341_v61  ;;  %v1319_v63 = vpop.f32.mrb[28].mxu1  ;;  %v972_v0 = vpop.f32.mrb[29].mxu0  ;;  %v971_v4 = vadd.f32 %v970_v62, %v4781_v38 }
 0x277   : > { %v1321_v1 = vpop.f32.mrb[29].mxu1  ;;  %v974_v2 = vpop.f32.mrb[30].mxu0  ;;  %v1320_v5 = vadd.f32 %v1319_v63, %v4783_v39  ;;  %v973_v10 = vadd.f32 %v972_v0, %v4785_v42 }
 0x278   : > { %v1323_v3 = vpop.f32.mrb[30].mxu1  ;;  %v975_v6 = vadd.f32 %v974_v2, %v4781_v38  ;;  %v976_v8 = vpop.f32.mrb[31].mxu0  ;;  %v1322_v11 = vadd.f32 %v1321_v1, %v4787_v43 }
 0x279   : > { %v1324_v7 = vadd.f32 %v1323_v3, %v4783_v39  ;;  %v1325_v9 = vpop.f32.mrb[31].mxu1  ;;  %v977_v12 = vadd.f32 %v976_v8, %v4785_v42 }
 0x27a   : > { %v1326_v13 = vadd.f32 %v1325_v9, %v4787_v43  ;;  %v993_v14 = vpack.c.bf16 %v975_v6, %v971_v4 }
 0x27b   : > { %v1342_v15 = vpack.c.bf16 %v1324_v7, %v1320_v5  ;;  %v994_v16 = vpack.c.bf16 %v977_v12, %v973_v10 }
 0x27c   : > { %v1343_v17 = vpack.c.bf16 %v1326_v13, %v1322_v11  ;;  %1009 = vst [vmem:[#allocation2 + $0x70] sm:$0xff] %v993_v14 }
 0x27d   : > { %1358 = vst [vmem:[#allocation3 + $0x70] sm:$0xff] %v1342_v15  ;;  %1010 = vst [vmem:[#allocation2 + $0x78] sm:$0xff] %v994_v16 }
 0x27e   : > { %1359 = vst [vmem:[#allocation3 + $0x78] sm:$0xff] %v1343_v17 }
 0x27f PF: > { %v3665_v38 = vld [vmem:[#allocation10 + $0x4] ss:$8 sps:$4 sm:$0xff]   ;;  %v3667_v39 = vld [vmem:[#allocation10] ss:$8 sps:$4 sm:$0xff]   ;;  %v3668_v18 = vld [vmem:[#allocation10 + $0x14] ss:$8 sps:$4 sm:$0xff]  }
 0x280   : > { %1612 = vmatprep.subr.bf16.mxu1 %v3665_v38  ;;  %v3670_v19 = vld [vmem:[#allocation10 + $0x10] ss:$8 sps:$4 sm:$0xff]   ;;  %v3671_v20 = vld [vmem:[#allocation10 + $0x24] ss:$8 sps:$4 sm:$0xff]   ;;  %v3673_v42 = vld [vmem:[#allocation10 + $0x20] ss:$8 sps:$4 sm:$0xff]  }
 0x281   : > { %1613 = vmatpush1.bf16.msra.mxu1 %v3667_v39  ;;  %v3674_v43 = vld [vmem:[#allocation10 + $0x34] ss:$8 sps:$4 sm:$0xff]   ;;  %v3676_v21 = vld [vmem:[#allocation10 + $0x30] ss:$8 sps:$4 sm:$0xff]   ;;  %v3677_v22 = vld [vmem:[#allocation10 + $0x44] ss:$8 sps:$4 sm:$0xff]  }
 0x282   : > { %1614 = vmatprep.subr.bf16.mxu1 %v3668_v18  ;;  %v3679_v23 = vld [vmem:[#allocation10 + $0x40] ss:$8 sps:$4 sm:$0xff]   ;;  %v3680_v24 = vld [vmem:[#allocation10 + $0x54] ss:$8 sps:$4 sm:$0xff]   ;;  %v3682_v25 = vld [vmem:[#allocation10 + $0x50] ss:$8 sps:$4 sm:$0xff]  }
 0x283   : > { %v3683_v26 = vld [vmem:[#allocation10 + $0x64] ss:$8 sps:$4 sm:$0xff]   ;;  %v1363_v28 = vld [vmem:[%s4684_s29 + $0x18] sm:$0xff]  ;;  %v3685_v30 = vld [vmem:[#allocation10 + $0x60] ss:$8 sps:$4 sm:$0xff]   ;;  %s5498_s24 = sld [smem:[#allocation33_spill]] }
 0x284   : > { %v1361_v27 = vld [vmem:[%s4684_s29 + $0x8] sm:$0xff]  ;;  %v3686_v31 = vld [vmem:[#allocation10 + $0x74] ss:$8 sps:$4 sm:$0xff]   ;;  %v3688_v32 = vld [vmem:[#allocation10 + $0x70] ss:$8 sps:$4 sm:$0xff]   ;;  %s5499_s1 = sld [smem:[#allocation39_spill]] }
 0x285   : > { %1615 = vmatpush1.bf16.msra.mxu1 %v3670_v19  ;;  %v1393_v29 = vpack.c.bf16 %v1363_v28, %v1361_v27  ;;  %v3689_v33 = vld [vmem:[#allocation10 + $0x84] ss:$8 sps:$4 sm:$0xff]   ;;  %v3691_v34 = vld [vmem:[#allocation10 + $0x80] ss:$8 sps:$4 sm:$0xff]   ;;  %v3692_v35 = vld [vmem:[#allocation10 + $0x94] ss:$8 sps:$4 sm:$0xff]  }
 0x286   : > { %1616 = vmatprep.subr.bf16.mxu1 %v3671_v20  ;;  %v2143_v36 = vld [vmem:[#allocation2 + $0x8] sm:$0xff]  ;;  %v2144_v37 = vld [vmem:[#allocation2 + $0x18] sm:$0xff]  ;;  %v1360_v58 = vld [vmem:[%s4684_s29] sm:$0xff]  ;;  %s5500_s3 = sld [smem:[#allocation24_spill]]  ;;  %s5501_s0 = sld [smem:[#allocation25_spill]] }
 0x287   : > { %1644 = vmatprep.mubr.bf16.mxu1 %v1393_v29  ;;  %3346 = vmatprep.subr.bf16.mxu0 %v2143_v36  ;;  %v3694_v40 = vld [vmem:[#allocation10 + $0x90] ss:$8 sps:$4 sm:$0xff]   ;;  %v3695_v41 = vld [vmem:[#allocation10 + $0xa4] ss:$8 sps:$4 sm:$0xff]   ;;  %v3697_v44 = vld [vmem:[#allocation10 + $0xa0] ss:$8 sps:$4 sm:$0xff]  }
 0x288   : > { %3347 = vmatpush3.bf16.xpose.msra.mxu0 %v2143_v36  ;;  %v3698_v45 = vld [vmem:[#allocation10 + $0xb4] ss:$8 sps:$4 sm:$0xff]   ;;  %v2145_v46 = vld [vmem:[#allocation2 + $0x28] sm:$0xff]  ;;  %v3700_v47 = vld [vmem:[#allocation10 + $0xb0] ss:$8 sps:$4 sm:$0xff]   ;;  %s2879_s15 = sshll.u32 %s4708_s7, 4  ;;  %s5323_s15 = int_to_ptr.vmem [resolvable:$true] %s2879_s15 }
 0x289   : > { %1617 = vmatpush1.bf16.msra.mxu1 %v3673_v42  ;;  %3348 = vmatprep.subr.bf16.mxu0 %v2144_v37  ;;  %v3701_v48 = vld [vmem:[#allocation10 + $0xc4] ss:$8 sps:$4 sm:$0xff]   ;;  %v3703_v49 = vld [vmem:[#allocation10 + $0xc0] ss:$8 sps:$4 sm:$0xff]   ;;  %v3704_v50 = vld [vmem:[#allocation10 + $0xd4] ss:$8 sps:$4 sm:$0xff]  }
 0x28a   : > { %1618 = vmatprep.subr.bf16.mxu1 %v3674_v43  ;;  %v2146_v51 = vld [vmem:[#allocation2 + $0x38] sm:$0xff]  ;;  %v3707_v53 = vld [vmem:[#allocation10 + $0xe4] ss:$8 sps:$4 sm:$0xff]   ;;  %v3709_v54 = vld [vmem:[#allocation10 + $0xe0] ss:$8 sps:$4 sm:$0xff]   ;;  %s5502_s12 = sld [smem:[#allocation40_spill]] }
 0x28b   : > { %v3706_v52 = vld [vmem:[#allocation10 + $0xd0] ss:$8 sps:$4 sm:$0xff]   ;;  %v3710_v55 = vld [vmem:[#allocation10 + $0xf4] ss:$8 sps:$4 sm:$0xff]   ;;  %v2147_v56 = vld [vmem:[#allocation2 + $0x48] sm:$0xff]  ;;  %s2863_s23 = scalar_lea.sflag [#allocation6], %s4680_s13 }
 0x28c   : > { %v3712_v57 = vld [vmem:[#allocation10 + $0xf0] ss:$8 sps:$4 sm:$0xff]   ;;  %v1365_v60 = vld [vmem:[%s4684_s29 + $0x28] sm:$0xff]  ;;  %v1773_v62 = vld [vmem:[#allocation2] sm:$0xff]  ;;  %s3217_s5 = sshll.u32 %s5500_s3, 5  ;;  %s3210_s19 = sshll.u32 %s5501_s0, 6 }
 0x28d   : > { %1619 = vmatpush1.bf16.msra.mxu1 %v3676_v21  ;;  %v1362_v59 = vld [vmem:[%s4684_s29 + $0x10] sm:$0xff]  ;;  %v1367_v61 = vld [vmem:[%s4684_s29 + $0x38] sm:$0xff]  ;;  %v1364_v2 = vld [vmem:[%s4684_s29 + $0x20] sm:$0xff]  ;;  %s2876_s28 = sadd.s32 %s3217_s5, %s3210_s19  ;;  %p5503_p1 = scmp.ne.s32.totalorder %s5474_s6, 0 }
 0x28e   : > { %1620 = vmatprep.subr.bf16.mxu1 %v3677_v22  ;;  %v1392_v63 = vpack.c.bf16 %v1362_v59, %v1360_v58  ;;  %v1395_v0 = vpack.c.bf16 %v1367_v61, %v1365_v60  ;;  %v2148_v1 = vld [vmem:[#allocation2 + $0x58] sm:$0xff]  ;;  %v1366_v3 = vld [vmem:[%s4684_s29 + $0x30] sm:$0xff]  ;;  %v1369_v4 = vld [vmem:[%s4684_s29 + $0x48] sm:$0xff]  ;;  %s3211_s9 = sshll.u32 %s2876_s28, 7  ;;  %s4238_s17 = smov [#allocation16]  }
 0x28f   : > { %v1371_v5 = vld [vmem:[%s4684_s29 + $0x58] sm:$0xff]  ;;  %v1394_v6 = vpack.c.bf16 %v1366_v3, %v1364_v2  ;;  %v1774_v7 = vld [vmem:[#allocation2 + $0x10] sm:$0xff]  ;;  %v1368_v9 = vld [vmem:[%s4684_s29 + $0x40] sm:$0xff]  ;;  %s4095_s4 = sshll.u32 %s4238_s17, 4  ;;  %s4096_s4 = int_to_ptr.vmem [resolvable:$false] %s4095_s4 }
 0x290   : > { %3349 = vmatpush3.bf16.xpose.msra.mxu0 %v2144_v37  ;;  %v1397_v8 = vpack.c.bf16 %v1371_v5, %v1369_v4  ;;  %v1370_v10 = vld [vmem:[%s4684_s29 + $0x50] sm:$0xff]  ;;  %v1373_v11 = vld [vmem:[%s4684_s29 + $0x68] sm:$0xff]  ;;  %v1375_v12 = vld [vmem:[%s4684_s29 + $0x78] sm:$0xff]  ;;  %p4098_p9 = scmp.lt.s32.totalorder %s5323_s15, %s4096_s4 }
 0x291   : > { %1621 = vmatpush1.bf16.msra.mxu1 %v3679_v23  ;;  %3350 = vmatprep.subr.bf16.mxu0 %v2145_v46  ;;  %v1396_v13 = vpack.c.bf16 %v1370_v10, %v1368_v9  ;;  %v1775_v14 = vld [vmem:[#allocation2 + $0x20] sm:$0xff]  ;;  %v1399_v15 = vpack.c.bf16 %v1375_v12, %v1373_v11  ;;  %v1374_v17 = vld [vmem:[%s4684_s29 + $0x70] sm:$0xff]  ;;  %v1377_v38 = vld [vmem:[%s4684_s29 + $0x88] sm:$0xff] }
 0x292   : > { %1622 = vmatprep.subr.bf16.mxu1 %v3680_v24  ;;  %v1372_v16 = vld [vmem:[%s4684_s29 + $0x60] sm:$0xff]  ;;  %v1379_v39 = vld [vmem:[%s4684_s29 + $0x98] sm:$0xff]  ;;  %v1776_v19 = vld [vmem:[#allocation2 + $0x30] sm:$0xff] }
 0x293   : > { %v1398_v18 = vpack.c.bf16 %v1374_v17, %v1372_v16  ;;  %v1401_v20 = vpack.c.bf16 %v1379_v39, %v1377_v38  ;;  %v1376_v42 = vld [vmem:[%s4684_s29 + $0x80] sm:$0xff]  ;;  %v1378_v43 = vld [vmem:[%s4684_s29 + $0x90] sm:$0xff]  ;;  %v1381_v21 = vld [vmem:[%s4684_s29 + $0xa8] sm:$0xff] }
 0x294   : > { %v1383_v22 = vld [vmem:[%s4684_s29 + $0xb8] sm:$0xff]  ;;  %v1400_v23 = vpack.c.bf16 %v1378_v43, %v1376_v42  ;;  %v1777_v24 = vld [vmem:[#allocation2 + $0x40] sm:$0xff]  ;;  %v1382_v27 = vld [vmem:[%s4684_s29 + $0xb0] sm:$0xff] }
 0x295   : > { %1623 = vmatpush1.bf16.msra.mxu1 %v3682_v25  ;;  %v1403_v25 = vpack.c.bf16 %v1383_v22, %v1381_v21  ;;  %v1385_v28 = vld [vmem:[%s4684_s29 + $0xc8] sm:$0xff]  ;;  %v1387_v29 = vld [vmem:[%s4684_s29 + $0xd8] sm:$0xff] }
 0x296   : > { %1624 = vmatprep.subr.bf16.mxu1 %v3683_v26  ;;  %v1380_v26 = vld [vmem:[%s4684_s29 + $0xa0] sm:$0xff]  ;;  %v1391_v36 = vld [vmem:[%s4684_s29 + $0xf8] sm:$0xff] }
 0x298   : > { %3351 = vmatpush3.bf16.xpose.msra.mxu0 %v2145_v46  ;;  %v1779_v46 = vld [vmem:[#allocation2 + $0x60] sm:$0xff] }
 0x299   : > { %1625 = vmatpush1.bf16.msra.mxu1 %v3685_v30  ;;  %3352 = vmatprep.subr.bf16.mxu0 %v2146_v51  ;;  %v1402_v30 = vpack.c.bf16 %v1382_v27, %v1380_v26 }
 0x29a   : > { %1626 = vmatprep.subr.bf16.mxu1 %v3686_v31  ;;  %v1778_v31 = vld [vmem:[#allocation2 + $0x50] sm:$0xff] }
 0x29d   : > { %1627 = vmatpush1.bf16.msra.mxu1 %v3688_v32  ;;  %v1405_v32 = vpack.c.bf16 %v1387_v29, %v1385_v28 }
 0x29e   : > { %1628 = vmatprep.subr.bf16.mxu1 %v3689_v33  ;;  %v1384_v33 = vld [vmem:[%s4684_s29 + $0xc0] sm:$0xff] }
 0x2a0   : > { %3353 = vmatpush3.bf16.xpose.msra.mxu0 %v2146_v51 }
 0x2a1   : > { %1629 = vmatpush1.bf16.msra.mxu1 %v3691_v34  ;;  %3354 = vmatprep.subr.bf16.mxu0 %v2147_v56  ;;  %v1386_v34 = vld [vmem:[%s4684_s29 + $0xd0] sm:$0xff] }
 0x2a2   : > { %1630 = vmatprep.subr.bf16.mxu1 %v3692_v35  ;;  %v1389_v35 = vld [vmem:[%s4684_s29 + $0xe8] sm:$0xff]  ;;  %v1404_v37 = vpack.c.bf16 %v1386_v34, %v1384_v33 }
 0x2a5   : > { %1631 = vmatpush1.bf16.msra.mxu1 %v3694_v40  ;;  %v1407_v40 = vpack.c.bf16 %v1391_v36, %v1389_v35 }
 0x2a6   : > { %1632 = vmatprep.subr.bf16.mxu1 %v3695_v41  ;;  %v1388_v41 = vld [vmem:[%s4684_s29 + $0xe0] sm:$0xff] }
 0x2a8   : > { %3355 = vmatpush3.bf16.xpose.msra.mxu0 %v2147_v56 }
 0x2a9   : > { %1633 = vmatpush1.bf16.msra.mxu1 %v3697_v44  ;;  %3356 = vmatprep.subr.bf16.mxu0 %v2148_v1  ;;  %v1390_v44 = vld [vmem:[%s4684_s29 + $0xf0] sm:$0xff]  ;;  %s5321_s29 = scalar_lea.hbm %s5502_s12, %s3211_s9 }
 0x2aa   : > { %1634 = vmatprep.subr.bf16.mxu1 %v3698_v45  ;;  %v1406_v45 = vpack.c.bf16 %v1390_v44, %v1388_v41 }
 0x2ad   : > { %1635 = vmatpush1.bf16.msra.mxu1 %v3700_v47  ;;  %v2149_v47 = vld [vmem:[#allocation2 + $0x68] sm:$0xff] }
 0x2ae   : > { %1636 = vmatprep.subr.bf16.mxu1 %v3701_v48  ;;  %v1780_v48 = vld [vmem:[#allocation2 + $0x70] sm:$0xff] }
 0x2b0   : > { %3357 = vmatpush3.bf16.xpose.msra.mxu0 %v2148_v1 }
 0x2b1   : > { %1637 = vmatpush1.bf16.msra.mxu1 %v3703_v49  ;;  %3358 = vmatprep.subr.bf16.mxu0 %v2149_v47  ;;  %v2150_v49 = vld [vmem:[#allocation2 + $0x78] sm:$0xff] }
 0x2b2   : > { %1638 = vmatprep.subr.bf16.mxu1 %v3704_v50  ;;  %v1442_v50 = vlaneseq }
 0x2b4   : > { %v4885_v51 = vshrl.u32 %v1442_v50, 7 }
 0x2b5   : > { %1639 = vmatpush1.bf16.msra.mxu1 %v3706_v52 }
 0x2b6   : > { %1640 = vmatprep.subr.bf16.mxu1 %v3707_v53  ;;  %v1444_v52 = vsub.s32 0, %v4885_v51  ;;  %v1440_v53 = vld [vmem:[%s5498_s24] sm:$0x3]  ;;  %s4091_s24 = scalar_lea.vmem %s5323_s15, 4096 }
 0x2b7   : > { %p4092_p4 = scmp.ne.s32.totalorder %s5323_s15, %s4091_s24 }
 0x2b8   : > { %3359 = vmatpush3.bf16.xpose.msra.mxu0 %v2149_v47 }
 0x2b9   : > { %1641 = vmatpush1.bf16.msra.mxu1 %v3709_v54  ;;  %3360 = vmatprep.subr.bf16.mxu0 %v2150_v49  ;;  %v1448_v54 = vsub.s32 1, %v4885_v51  ;;  %p4093_p0 = pnand %p4092_p4, %p5503_p1 }
 0x2ba   : > { %1642 = vmatprep.subr.bf16.mxu1 %v3710_v55  ;;  %v4894_v55 = vrot.slane %v1440_v53, %v1444_v52 }
 0x2bb   : > { %v4898_v56 = vrot.slane %v1440_v53, %v1448_v54  ;;  %p4094_p8 = pneg %p4093_p0 }
 0x2bd   : > { %1643 = vmatpush1.bf16.msra.mxu1 %v3712_v57 }
 0x2be   : > { %3282 = vmatprep.subr.bf16.mxu1 %v1773_v62 }
 0x2c0   : > { %1645 = vmatmul.mubr.bf16.vlgmr.msra.gmra.mrb[0].mxu1 %v1392_v63  ;;  %3361 = vmatpush3.bf16.xpose.msra.mxu0 %v2150_v49 }
 0x2c1   : > { %1654 = vmatprep.mubr.bf16.mxu1 %v1395_v0 }
 0x2c6   : > { %3283 = vmatpush3.bf16.xpose.msra.mxu1 %v1773_v62 }
 0x2c7   : > { %3284 = vmatprep.subr.bf16.mxu1 %v1774_v7 }
 0x2c8   : > { %1655 = vmatmul.mubr.bf16.gmra.mrb[4].mxu1 %v1394_v6 }
 0x2c9   : > { %1664 = vmatprep.mubr.bf16.mxu1 %v1397_v8 }
 0x2ce   : > { %3285 = vmatpush3.bf16.xpose.msra.mxu1 %v1774_v7 }
 0x2cf   : > { %3286 = vmatprep.subr.bf16.mxu1 %v1775_v14 }
 0x2d0   : > { %1665 = vmatmul.mubr.bf16.gmra.mrb[8].mxu1 %v1396_v13 }
 0x2d1   : > { %1674 = vmatprep.mubr.bf16.mxu1 %v1399_v15 }
 0x2d6   : > { %3287 = vmatpush3.bf16.xpose.msra.mxu1 %v1775_v14 }
 0x2d7   : > { %3288 = vmatprep.subr.bf16.mxu1 %v1776_v19 }
 0x2d8   : > { %1675 = vmatmul.mubr.bf16.gmra.mrb[12].mxu1 %v1398_v18 }
 0x2d9   : > { %1684 = vmatprep.mubr.bf16.mxu1 %v1401_v20 }
 0x2de   : > { %3289 = vmatpush3.bf16.xpose.msra.mxu1 %v1776_v19 }
 0x2df   : > { %3290 = vmatprep.subr.bf16.mxu1 %v1777_v24 }
 0x2e0   : > { %1685 = vmatmul.mubr.bf16.gmra.mrb[16].mxu1 %v1400_v23 }
 0x2e1   : > { %1694 = vmatprep.mubr.bf16.mxu1 %v1403_v25 }
 0x2e6   : > { %3291 = vmatpush3.bf16.xpose.msra.mxu1 %v1777_v24 }
 0x2e7   : > { %3292 = vmatprep.subr.bf16.mxu1 %v1778_v31 }
 0x2e8   : > { %1695 = vmatmul.mubr.bf16.gmra.mrb[20].mxu1 %v1402_v30 }
 0x2e9   : > { %1704 = vmatprep.mubr.bf16.mxu1 %v1405_v32 }
 0x2ee   : > { %3293 = vmatpush3.bf16.xpose.msra.mxu1 %v1778_v31 }
 0x2ef   : > { %3294 = vmatprep.subr.bf16.mxu1 %v1779_v46 }
 0x2f0   : > { %1705 = vmatmul.mubr.bf16.gmra.mrb[24].mxu1 %v1404_v37 }
 0x2f1   : > { %1714 = vmatprep.mubr.bf16.mxu1 %v1407_v40 }
 0x2f6   : > { %3295 = vmatpush3.bf16.xpose.msra.mxu1 %v1779_v46 }
 0x2f7   : > { %3296 = vmatprep.subr.bf16.mxu1 %v1780_v48 }
 0x2f8   : > { %1715 = vmatmul.mubr.bf16.gmra.mrb[28].mxu1 %v1406_v45 }
 0x2fe   : > { %3297 = vmatpush3.bf16.xpose.msra.mxu1 %v1780_v48 }
 0x393   : > { %v1646_v57 = vpop.f32.mrb[0].mxu1 }
 0x394   : > { %v1647_v58 = vadd.f32 %v1646_v57, %v4894_v55  ;;  %v1648_v59 = vpop.f32.mrb[1].mxu1 }
 0x395   : > { %v1649_v60 = vadd.f32 %v1648_v59, %v4898_v56  ;;  %v1650_v61 = vpop.f32.mrb[2].mxu1 }
 0x396   : > { %v1651_v62 = vadd.f32 %v1650_v61, %v4894_v55  ;;  %v1652_v63 = vpop.f32.mrb[3].mxu1  ;;  %v1725_v1 = vmul.f32 0.088388346, %v1647_v58 }
 0x397   : > { %v1653_v0 = vadd.f32 %v1652_v63, %v4898_v56  ;;  %v1726_v3 = vmul.f32 0.088388346, %v1649_v60 }
 0x398   : > { %v1727_v2 = vmul.f32 0.088388346, %v1651_v62 }
 0x399   : > { %v1728_v4 = vmul.f32 0.088388346, %v1653_v0 }
 0x39a   : > { %v1757_v5 = vpack.c.bf16 %v1727_v2, %v1725_v1 }
 0x39b   : > { %v1656_v6 = vpop.f32.mrb[4].mxu1  ;;  %v1758_v7 = vpack.c.bf16 %v1728_v4, %v1726_v3 }
 0x39c   : > { %v1657_v8 = vadd.f32 %v1656_v6, %v4894_v55  ;;  %v1658_v9 = vpop.f32.mrb[5].mxu1  ;;  %3298 = vmatprep.mubr.bf16.mxu1 %v1757_v5 }
 0x39d   : > { %v1659_v10 = vadd.f32 %v1658_v9, %v4898_v56  ;;  %v1660_v11 = vpop.f32.mrb[6].mxu1  ;;  %3362 = vmatprep.mubr.bf16.mxu0 %v1758_v7 }
 0x39e   : > { %v1661_v12 = vadd.f32 %v1660_v11, %v4894_v55  ;;  %v1662_v13 = vpop.f32.mrb[7].mxu1  ;;  %v1729_v15 = vmul.f32 0.088388346, %v1657_v8 }
 0x39f   : > { %v1663_v14 = vadd.f32 %v1662_v13, %v4898_v56  ;;  %v1730_v17 = vmul.f32 0.088388346, %v1659_v10 }
 0x3a0   : > { %v1731_v16 = vmul.f32 0.088388346, %v1661_v12 }
 0x3a1   : > { %v1732_v38 = vmul.f32 0.088388346, %v1663_v14 }
 0x3a2   : > { %v1759_v39 = vpack.c.bf16 %v1731_v16, %v1729_v15 }
 0x3a3   : > { %v1760_v18 = vpack.c.bf16 %v1732_v38, %v1730_v17  ;;  %v1666_v19 = vpop.f32.mrb[8].mxu1 }
 0x3a4   : > { %v1667_v20 = vadd.f32 %v1666_v19, %v4894_v55  ;;  %v1668_v42 = vpop.f32.mrb[9].mxu1  ;;  %3299 = vmatmul.mubr.bf16.vlgmr.msra.gmra.mrb[32].mxu1 %v1759_v39 }
 0x3a5   : > { %v1669_v43 = vadd.f32 %v1668_v42, %v4898_v56  ;;  %v1670_v21 = vpop.f32.mrb[10].mxu1  ;;  %3363 = vmatmul.mubr.bf16.vlgmr.msra.gmra.mrb[0].mxu0 %v1760_v18 }
 0x3a6   : > { %v1671_v22 = vadd.f32 %v1670_v21, %v4894_v55  ;;  %v1672_v23 = vpop.f32.mrb[11].mxu1  ;;  %v1733_v25 = vmul.f32 0.088388346, %v1667_v20 }
 0x3a7   : > { %v1673_v24 = vadd.f32 %v1672_v23, %v4898_v56  ;;  %v1734_v27 = vmul.f32 0.088388346, %v1669_v43 }
 0x3a8   : > { %v1735_v26 = vmul.f32 0.088388346, %v1671_v22 }
 0x3a9   : > { %v1736_v28 = vmul.f32 0.088388346, %v1673_v24 }
 0x3aa   : > { %v1761_v29 = vpack.c.bf16 %v1735_v26, %v1733_v25 }
 0x3ab   : > { %v1762_v30 = vpack.c.bf16 %v1736_v28, %v1734_v27  ;;  %v1676_v31 = vpop.f32.mrb[12].mxu1 }
 0x3ac   : > { %v1677_v32 = vadd.f32 %v1676_v31, %v4894_v55  ;;  %v1678_v33 = vpop.f32.mrb[13].mxu1  ;;  %3302 = vmatprep.mubr.bf16.mxu1 %v1761_v29 }
 0x3ad   : > { %v1679_v34 = vadd.f32 %v1678_v33, %v4898_v56  ;;  %v1680_v35 = vpop.f32.mrb[14].mxu1  ;;  %3366 = vmatprep.mubr.bf16.mxu0 %v1762_v30 }
 0x3ae   : > { %v1681_v36 = vadd.f32 %v1680_v35, %v4894_v55  ;;  %v1682_v37 = vpop.f32.mrb[15].mxu1  ;;  %v1737_v41 = vmul.f32 0.088388346, %v1677_v32 }
 0x3af   : > { %v1683_v40 = vadd.f32 %v1682_v37, %v4898_v56  ;;  %v1738_v45 = vmul.f32 0.088388346, %v1679_v34 }
 0x3b0   : > { %v1739_v44 = vmul.f32 0.088388346, %v1681_v36 }
 0x3b1   : > { %v1740_v46 = vmul.f32 0.088388346, %v1683_v40 }
 0x3b2   : > { %v1763_v47 = vpack.c.bf16 %v1739_v44, %v1737_v41 }
 0x3b3   : > { %v1764_v48 = vpack.c.bf16 %v1740_v46, %v1738_v45  ;;  %v1686_v49 = vpop.f32.mrb[16].mxu1  ;;  %v1781_v46 = vld [vmem:[#allocation3] sm:$0xff] }
 0x3b4   : > { %v1687_v50 = vadd.f32 %v1686_v49, %v4894_v55  ;;  %v1688_v53 = vpop.f32.mrb[17].mxu1  ;;  %3303 = vmatmul.mubr.bf16.gmra.mrb[36].mxu1 %v1763_v47  ;;  %v1782_v47 = vld [vmem:[#allocation3 + $0x10] sm:$0xff]  ;;  %3314 = vmatprep.subr.bf16.mxu1 %v1781_v46 }
 0x3b5   : > { %v1689_v57 = vadd.f32 %v1688_v53, %v4898_v56  ;;  %v1690_v58 = vpop.f32.mrb[18].mxu1  ;;  %3367 = vmatmul.mubr.bf16.gmra.mrb[4].mxu0 %v1764_v48  ;;  %3315 = vmatpush3.bf16.msra.mxu1 %v1781_v46  ;;  %v1783_v48 = vld [vmem:[#allocation3 + $0x20] sm:$0xff] }
 0x3b6   : > { %v1691_v59 = vadd.f32 %v1690_v58, %v4894_v55  ;;  %v1692_v60 = vpop.f32.mrb[19].mxu1  ;;  %v1741_v62 = vmul.f32 0.088388346, %v1687_v50  ;;  %3316 = vmatprep.subr.bf16.mxu1 %v1782_v47 }
 0x3b7   : > { %v1693_v61 = vadd.f32 %v1692_v60, %v4898_v56  ;;  %v1742_v0 = vmul.f32 0.088388346, %v1689_v57 }
 0x3b8   : > { %v1743_v63 = vmul.f32 0.088388346, %v1691_v59 }
 0x3b9   : > { %v1744_v1 = vmul.f32 0.088388346, %v1693_v61  ;;  %3317 = vmatpush3.bf16.msra.mxu1 %v1782_v47 }
 0x3ba   : > { %v1765_v2 = vpack.c.bf16 %v1743_v63, %v1741_v62  ;;  %3318 = vmatprep.subr.bf16.mxu1 %v1783_v48  ;;  %v1784_v63 = vld [vmem:[#allocation3 + $0x30] sm:$0xff] }
 0x3bb   : > { %v1766_v3 = vpack.c.bf16 %v1744_v1, %v1742_v0  ;;  %v1696_v4 = vpop.f32.mrb[20].mxu1 }
 0x3bc   : > { %v1697_v5 = vadd.f32 %v1696_v4, %v4894_v55  ;;  %v1698_v6 = vpop.f32.mrb[21].mxu1  ;;  %3306 = vmatprep.mubr.bf16.mxu1 %v1765_v2 }
 0x3bd   : > { %v1699_v7 = vadd.f32 %v1698_v6, %v4898_v56  ;;  %v1700_v8 = vpop.f32.mrb[22].mxu1  ;;  %3370 = vmatprep.mubr.bf16.mxu0 %v1766_v3  ;;  %3319 = vmatpush3.bf16.msra.mxu1 %v1783_v48  ;;  %v1786_v6 = vld [vmem:[#allocation3 + $0x50] sm:$0xff] }
 0x3be   : > { %v1701_v9 = vadd.f32 %v1700_v8, %v4894_v55  ;;  %v1702_v10 = vpop.f32.mrb[23].mxu1  ;;  %v1745_v12 = vmul.f32 0.088388346, %v1697_v5  ;;  %3320 = vmatprep.subr.bf16.mxu1 %v1784_v63  ;;  %v1785_v5 = vld [vmem:[#allocation3 + $0x40] sm:$0xff] }
 0x3bf   : > { %v1703_v11 = vadd.f32 %v1702_v10, %v4898_v56  ;;  %v1746_v14 = vmul.f32 0.088388346, %v1699_v7  ;;  %v1787_v7 = vld [vmem:[#allocation3 + $0x60] sm:$0xff] }
 0x3c0   : > { %v1747_v13 = vmul.f32 0.088388346, %v1701_v9 }
 0x3c1   : > { %v1748_v15 = vmul.f32 0.088388346, %v1703_v11  ;;  %3321 = vmatpush3.bf16.msra.mxu1 %v1784_v63  ;;  %v1788_v11 = vld [vmem:[#allocation3 + $0x70] sm:$0xff] }
 0x3c2   : > { %v1767_v16 = vpack.c.bf16 %v1747_v13, %v1745_v12  ;;  %3322 = vmatprep.subr.bf16.mxu1 %v1785_v5 }
 0x3c3   : > { %v1768_v17 = vpack.c.bf16 %v1748_v15, %v1746_v14  ;;  %v1706_v38 = vpop.f32.mrb[24].mxu1 }
 0x3c4   : > { %v1707_v39 = vadd.f32 %v1706_v38, %v4894_v55  ;;  %v1708_v18 = vpop.f32.mrb[25].mxu1  ;;  %3307 = vmatmul.mubr.bf16.gmra.mrb[40].mxu1 %v1767_v16 }
 0x3c5   : > { %v1709_v19 = vadd.f32 %v1708_v18, %v4898_v56  ;;  %v1710_v20 = vpop.f32.mrb[26].mxu1  ;;  %3371 = vmatmul.mubr.bf16.gmra.mrb[8].mxu0 %v1768_v17  ;;  %3323 = vmatpush3.bf16.msra.mxu1 %v1785_v5 }
 0x3c6   : > { %v1711_v42 = vadd.f32 %v1710_v20, %v4894_v55  ;;  %v1712_v43 = vpop.f32.mrb[27].mxu1  ;;  %v1749_v22 = vmul.f32 0.088388346, %v1707_v39  ;;  %3324 = vmatprep.subr.bf16.mxu1 %v1786_v6 }
 0x3c7   : > { %v1713_v21 = vadd.f32 %v1712_v43, %v4898_v56  ;;  %v1750_v24 = vmul.f32 0.088388346, %v1709_v19 }
 0x3c8   : > { %v1751_v23 = vmul.f32 0.088388346, %v1711_v42 }
 0x3c9   : > { %v1752_v25 = vmul.f32 0.088388346, %v1713_v21  ;;  %3325 = vmatpush3.bf16.msra.mxu1 %v1786_v6  ;;  %v2151_v21 = vld [vmem:[#allocation3 + $0x8] sm:$0xff] }
 0x3ca   : > { %v1769_v26 = vpack.c.bf16 %v1751_v23, %v1749_v22  ;;  %3326 = vmatprep.subr.bf16.mxu1 %v1787_v7  ;;  %v2153_v6 = vld [vmem:[#allocation3 + $0x28] sm:$0xff] }
 0x3cb   : > { %v1770_v27 = vpack.c.bf16 %v1752_v25, %v1750_v24  ;;  %v1716_v28 = vpop.f32.mrb[28].mxu1 }
 0x3cc   : > { %v1717_v29 = vadd.f32 %v1716_v28, %v4894_v55  ;;  %v1718_v30 = vpop.f32.mrb[29].mxu1  ;;  %3310 = vmatprep.mubr.bf16.mxu1 %v1769_v26 }
 0x3cd   : > { %v1719_v31 = vadd.f32 %v1718_v30, %v4898_v56  ;;  %v1720_v32 = vpop.f32.mrb[30].mxu1  ;;  %3374 = vmatprep.mubr.bf16.mxu0 %v1770_v27  ;;  %3327 = vmatpush3.bf16.msra.mxu1 %v1787_v7 }
 0x3ce   : > { %v1721_v33 = vadd.f32 %v1720_v32, %v4894_v55  ;;  %v1722_v34 = vpop.f32.mrb[31].mxu1  ;;  %v1753_v36 = vmul.f32 0.088388346, %v1717_v29  ;;  %3328 = vmatprep.subr.bf16.mxu1 %v1788_v11 }
 0x3cf   : > { %v1723_v35 = vadd.f32 %v1722_v34, %v4898_v56  ;;  %v1754_v40 = vmul.f32 0.088388346, %v1719_v31 }
 0x3d0   : > { %v1755_v37 = vmul.f32 0.088388346, %v1721_v33 }
 0x3d1   : > { %v1756_v41 = vmul.f32 0.088388346, %v1723_v35  ;;  %3329 = vmatpush3.bf16.msra.mxu1 %v1788_v11 }
 0x3d2   : > { %v1771_v44 = vpack.c.bf16 %v1755_v37, %v1753_v36  ;;  %3378 = vmatprep.subr.bf16.mxu1 %v2151_v21 }
 0x3d3   : > { %v1772_v45 = vpack.c.bf16 %v1756_v41, %v1754_v40 }
 0x3d4   : > { %3311 = vmatmul.mubr.bf16.gmra.mrb[44].mxu1 %v1771_v44 }
 0x3d5   : > { %3375 = vmatmul.mubr.bf16.gmra.mrb[12].mxu0 %v1772_v45 }
 0x477   : > { %v4932_v55 = vpop.f32.mrb[32].mxu1 }
 0x478   : > { %v4934_v56 = vpop.f32.mrb[0].mxu0  ;;  %1890 = vmax.xlane.f32.xlu1 %v4932_v55  ;;  %v4937_v49 = vpop.f32.mrb[33].mxu1 }
 0x479   : > { %v4939_v50 = vpop.f32.mrb[1].mxu0  ;;  %1886 = vmax.xlane.f32.xlu0 %v4937_v49  ;;  %v4942_v53 = vpop.f32.mrb[34].mxu1 }
 0x47a   : > { %v4944_v57 = vpop.f32.mrb[35].mxu1  ;;  %v4946_v58 = vpop.f32.mrb[2].mxu0 }
 0x47b   : > { %v4948_v59 = vpop.f32.mrb[3].mxu0 }
 0x47c   : > { %1892 = vmax.xlane.f32.xlu1 %v4942_v53 }
 0x47d   : > { %1888 = vmax.xlane.f32.xlu0 %v4944_v57 }
 0x487   : > { %v4952_v60 = vpop.f32.mrb[36].mxu1 }
 0x488   : > { %v4954_v61 = vpop.f32.mrb[37].mxu1  ;;  %v4956_v62 = vpop.f32.mrb[4].mxu0 }
 0x489   : > { %v4958_v0 = vpop.f32.mrb[5].mxu0  ;;  %1894 = vmax.xlane.f32.xlu0 %v4954_v61  ;;  %v4961_v1 = vpop.f32.mrb[38].mxu1 }
 0x48a   : > { %v4963_v2 = vpop.f32.mrb[39].mxu1  ;;  %v4965_v3 = vpop.f32.mrb[6].mxu0 }
 0x48b   : > { %v4967_v4 = vpop.f32.mrb[7].mxu0  ;;  %1896 = vmax.xlane.f32.xlu1 %v4963_v2 }
 0x48d   : > { %1898 = vmax.xlane.f32.xlu0 %v4952_v60 }
 0x48f   : > { %1900 = vmax.xlane.f32.xlu1 %v4961_v1 }
 0x497   : > { %v4972_v8 = vpop.f32.mrb[40].mxu1 }
 0x498   : > { %v4974_v9 = vpop.f32.mrb[41].mxu1  ;;  %v4976_v10 = vpop.f32.mrb[8].mxu0 }
 0x499   : > { %v4978_v12 = vpop.f32.mrb[9].mxu0  ;;  %1902 = vmax.xlane.f32.xlu0 %v4974_v9  ;;  %v4981_v13 = vpop.f32.mrb[42].mxu1 }
 0x49a   : > { %v4983_v14 = vpop.f32.mrb[43].mxu1  ;;  %v4985_v15 = vpop.f32.mrb[10].mxu0 }
 0x49b   : > { %v4987_v16 = vpop.f32.mrb[11].mxu0  ;;  %1904 = vmax.xlane.f32.xlu1 %v4983_v14 }
 0x49d   : > { %1906 = vmax.xlane.f32.xlu0 %v4972_v8 }
 0x49f   : > { %1908 = vmax.xlane.f32.xlu1 %v4981_v13 }
 0x4a7   : > { %v4992_v17 = vpop.f32.mrb[44].mxu1 }
 0x4a8   : > { %v4994_v38 = vpop.f32.mrb[45].mxu1  ;;  %v4996_v39 = vpop.f32.mrb[12].mxu0 }
 0x4a9   : > { %v4998_v18 = vpop.f32.mrb[13].mxu0  ;;  %1910 = vmax.xlane.f32.xlu0 %v4994_v38  ;;  %v5001_v19 = vpop.f32.mrb[46].mxu1 }
 0x4aa   : > { %v5003_v20 = vpop.f32.mrb[47].mxu1  ;;  %v5005_v42 = vpop.f32.mrb[14].mxu0 }
 0x4ab   : > { %v5007_v43 = vpop.f32.mrb[15].mxu0  ;;  %1912 = vmax.xlane.f32.xlu1 %v5003_v20 }
 0x4ad   : > { %1914 = vmax.xlane.f32.xlu0 %v4992_v17 }
 0x4af   : > { %1916 = vmax.xlane.f32.xlu1 %v5001_v19 }
 0x4b1   : > { %2256 = vmax.xlane.f32.xlu0 %v4939_v50 }
 0x4b3   : > { %2258 = vmax.xlane.f32.xlu1 %v4948_v59 }
 0x4b5   : > { %2260 = vmax.xlane.f32.xlu0 %v4934_v56 }
 0x4b7   : > { %2262 = vmax.xlane.f32.xlu1 %v4946_v58 }
 0x4b9   : > { %2264 = vmax.xlane.f32.xlu0 %v4958_v0 }
 0x4bb   : > { %2266 = vmax.xlane.f32.xlu1 %v4967_v4 }
 0x4bd   : > { %2268 = vmax.xlane.f32.xlu0 %v4956_v62 }
 0x4bf   : > { %2270 = vmax.xlane.f32.xlu1 %v4965_v3 }
 0x4c1   : > { %2272 = vmax.xlane.f32.xlu0 %v4978_v12 }
 0x4c3   : > { %2274 = vmax.xlane.f32.xlu1 %v4987_v16 }
 0x4c5   : > { %2276 = vmax.xlane.f32.xlu0 %v4976_v10 }
 0x4c7   : > { %2278 = vmax.xlane.f32.xlu1 %v4985_v15 }
 0x4c9   : > { %2280 = vmax.xlane.f32.xlu0 %v4998_v18 }
 0x4cb   : > { %2282 = vmax.xlane.f32.xlu1 %v5007_v43 }
 0x4cd   : > { %2284 = vmax.xlane.f32.xlu0 %v4996_v39 }
 0x4cf   : > { %2286 = vmax.xlane.f32.xlu1 %v5005_v42 }
 0x505   : > { %v1891_v22 = vpop.xlane.xlu1 %1890 }
 0x506   : > { %v1887_v23 = vpop.xlane.xlu0 %1886  ;;  %v1920_v25 = vsub.f32 %v4932_v55, %v1891_v22 }
 0x507   : > { %v1918_v24 = vsub.f32 %v4937_v49, %v1887_v23 }
 0x508   : > { %v1938_v31 = vmul.f32 1.442695, %v1920_v25 }
 0x509   : > { %v1934_v26 = vmul.f32 1.442695, %v1918_v24  ;;  %v1893_v27 = vpop.xlane.xlu1 %1892  ;;  %v2155_v24 = vld [vmem:[#allocation3 + $0x48] sm:$0xff] }
 0x50a   : > { %v1921_v28 = vsub.f32 %v4942_v53, %v1893_v27  ;;  %v1889_v29 = vpop.xlane.xlu0 %1888 }
 0x50b   : > { %v1919_v30 = vsub.f32 %v4944_v57, %v1889_v29  ;;  %3761 = vpow2.f32 %v1934_v26 }
 0x50c   : > { %v1940_v32 = vmul.f32 1.442695, %v1921_v28 }
 0x50d   : > { %v1936_v33 = vmul.f32 1.442695, %v1919_v30 }
 0x50e   : > { %3763 = vpow2.f32 %v1940_v32 }
 0x50f   : > { %3765 = vpow2.f32 %v1936_v33 }
 0x510   : > { %3767 = vpow2.f32 %v1938_v31 }
 0x515   : > { %v5032_v35 = vpop.eup %3761 }
 0x516   : > { %v1895_v34 = vpop.xlane.xlu0 %1894 }
 0x517   : > { %v1922_v36 = vsub.f32 %v4954_v61, %v1895_v34  ;;  %v2152_v61 = vld [vmem:[#allocation3 + $0x18] sm:$0xff] }
 0x518   : > { %v5035_v37 = vpop.eup %3763  ;;  %v1897_v40 = vpop.xlane.xlu1 %1896  ;;  %v2156_v34 = vld [vmem:[#allocation3 + $0x58] sm:$0xff] }
 0x519   : > { %v5037_v41 = vpop.eup %3765  ;;  %v1942_v44 = vmul.f32 1.442695, %v1922_v36  ;;  %v1923_v45 = vsub.f32 %v4963_v2, %v1897_v40  ;;  %v2157_v40 = vld [vmem:[#allocation3 + $0x68] sm:$0xff] }
 0x51a   : > { %v5040_v46 = vpop.eup %3767  ;;  %v1899_v47 = vpop.xlane.xlu0 %1898  ;;  %v1998_v48 = vpack.c.bf16 %v5037_v41, %v5032_v35 }
 0x51b   : > { %v1944_v55 = vmul.f32 1.442695, %v1923_v45  ;;  %v1924_v49 = vsub.f32 %v4952_v60, %v1899_v47  ;;  %v1999_v53 = vpack.c.bf16 %v5035_v37, %v5040_v46  ;;  %3769 = vpow2.f32 %v1942_v44  ;;  %v2154_v60 = vld [vmem:[#allocation3 + $0x38] sm:$0xff] }
 0x51c   : > { %3330 = vmatprep.mubr.bf16.mxu1 %v1998_v48  ;;  %v1901_v57 = vpop.xlane.xlu1 %1900 }
 0x51d   : > { %3771 = vpow2.f32 %v1944_v55  ;;  %v1946_v63 = vmul.f32 1.442695, %v1924_v49  ;;  %v1925_v2 = vsub.f32 %v4961_v1, %v1901_v57  ;;  %3331 = vmatmul.mubr.bf16.vlgmr.msra.gmra.mrb[48].mxu1 %v1999_v53 }
 0x51e   : > { %3379 = vmatpush3.bf16.msra.mxu1 %v2151_v21 }
 0x51f   : > { %v1948_v5 = vmul.f32 1.442695, %v1925_v2  ;;  %3380 = vmatprep.subr.bf16.mxu1 %v2152_v61  ;;  %3773 = vpow2.f32 %v1946_v63 }
 0x521   : > { %3775 = vpow2.f32 %v1948_v5 }
 0x522   : > { %3381 = vmatpush3.bf16.msra.mxu1 %v2152_v61 }
 0x523   : > { %3382 = vmatprep.subr.bf16.mxu1 %v2153_v6 }
 0x525   : > { %v5048_v7 = vpop.eup %3769 }
 0x526   : > { %v1903_v11 = vpop.xlane.xlu0 %1902  ;;  %3383 = vmatpush3.bf16.msra.mxu1 %v2153_v6 }
 0x527   : > { %v5050_v22 = vpop.eup %3771  ;;  %v1926_v23 = vsub.f32 %v4974_v9, %v1903_v11  ;;  %3384 = vmatprep.subr.bf16.mxu1 %v2154_v60 }
 0x528   : > { %v1905_v1 = vpop.xlane.xlu1 %1904  ;;  %v2000_v21 = vpack.c.bf16 %v5050_v22, %v5048_v7 }
 0x529   : > { %v1950_v25 = vmul.f32 1.442695, %v1926_v23  ;;  %v1927_v26 = vsub.f32 %v4983_v14, %v1905_v1  ;;  %v5056_v27 = vpop.eup %3773 }
 0x52a   : > { %3334 = vmatprep.mubr.bf16.mxu1 %v2000_v21  ;;  %v1907_v28 = vpop.xlane.xlu0 %1906  ;;  %3385 = vmatpush3.bf16.msra.mxu1 %v2154_v60 }
 0x52b   : > { %v5058_v29 = vpop.eup %3775  ;;  %v1952_v30 = vmul.f32 1.442695, %v1927_v26  ;;  %v1928_v31 = vsub.f32 %v4972_v8, %v1907_v28  ;;  %3386 = vmatprep.subr.bf16.mxu1 %v2155_v24  ;;  %3777 = vpow2.f32 %v1950_v25  ;;  %v2158_v8 = vld [vmem:[#allocation3 + $0x78] sm:$0xff] }
 0x52c   : > { %v1909_v9 = vpop.xlane.xlu1 %1908  ;;  %v2001_v32 = vpack.c.bf16 %v5058_v29, %v5056_v27 }
 0x52d   : > { %3779 = vpow2.f32 %v1952_v30  ;;  %v1954_v33 = vmul.f32 1.442695, %v1928_v31  ;;  %v1929_v14 = vsub.f32 %v4981_v13, %v1909_v9 }
 0x52e   : > { %3335 = vmatmul.mubr.bf16.gmra.mrb[52].mxu1 %v2001_v32 }
 0x52f   : > { %v1956_v36 = vmul.f32 1.442695, %v1929_v14  ;;  %3387 = vmatpush3.bf16.msra.mxu1 %v2155_v24  ;;  %3781 = vpow2.f32 %v1954_v33 }
 0x530   : > { %3388 = vmatprep.subr.bf16.mxu1 %v2156_v34 }
 0x531   : > { %3783 = vpow2.f32 %v1956_v36 }
 0x533   : > { %3389 = vmatpush3.bf16.msra.mxu1 %v2156_v34 }
 0x534   : > { %3390 = vmatprep.subr.bf16.mxu1 %v2157_v40 }
 0x535   : > { %v5064_v44 = vpop.eup %3777 }
 0x536   : > { %v1911_v45 = vpop.xlane.xlu0 %1910 }
 0x537   : > { %v5066_v47 = vpop.eup %3779  ;;  %v1930_v48 = vsub.f32 %v4994_v38, %v1911_v45  ;;  %3391 = vmatpush3.bf16.msra.mxu1 %v2157_v40 }
 0x538   : > { %v1913_v13 = vpop.xlane.xlu1 %1912  ;;  %v2002_v55 = vpack.c.bf16 %v5066_v47, %v5064_v44  ;;  %3392 = vmatprep.subr.bf16.mxu1 %v2158_v8 }
 0x539   : > { %v1958_v49 = vmul.f32 1.442695, %v1930_v48  ;;  %v1931_v53 = vsub.f32 %v5003_v20, %v1913_v13  ;;  %v5072_v57 = vpop.eup %3781 }
 0x53a   : > { %3338 = vmatprep.mubr.bf16.mxu1 %v2002_v55  ;;  %v1915_v61 = vpop.xlane.xlu0 %1914 }
 0x53b   : > { %v5074_v63 = vpop.eup %3783  ;;  %v1960_v2 = vmul.f32 1.442695, %v1931_v53  ;;  %v1932_v5 = vsub.f32 %v4992_v17, %v1915_v61  ;;  %3393 = vmatpush3.bf16.msra.mxu1 %v2158_v8  ;;  %3785 = vpow2.f32 %v1958_v49 }
 0x53c   : > { %v1917_v38 = vpop.xlane.xlu1 %1916  ;;  %v2003_v6 = vpack.c.bf16 %v5074_v63, %v5072_v57 }
 0x53d   : > { %3787 = vpow2.f32 %v1960_v2  ;;  %v1962_v60 = vmul.f32 1.442695, %v1932_v5  ;;  %v1933_v11 = vsub.f32 %v5001_v19, %v1917_v38 }
 0x53e   : > { %3339 = vmatmul.mubr.bf16.gmra.mrb[56].mxu1 %v2003_v6  ;;  %v2257_v20 = vpop.xlane.xlu0 %2256 }
 0x53f   : > { %v1964_v23 = vmul.f32 1.442695, %v1933_v11  ;;  %v2288_v1 = vsub.f32 %v4939_v50, %v2257_v20  ;;  %3789 = vpow2.f32 %v1962_v60 }
 0x540   : > { %v2259_v21 = vpop.xlane.xlu1 %2258 }
 0x541   : > { %3791 = vpow2.f32 %v1964_v23  ;;  %v2304_v24 = vmul.f32 1.442695, %v2288_v1  ;;  %v2289_v17 = vsub.f32 %v4948_v59, %v2259_v21 }
 0x542   : > { %v2261_v25 = vpop.xlane.xlu0 %2260 }
 0x543   : > { %3793 = vpow2.f32 %v2304_v24  ;;  %v2306_v26 = vmul.f32 1.442695, %v2289_v17  ;;  %v2290_v28 = vsub.f32 %v4934_v56, %v2261_v25 }
 0x544   : > { %v2263_v30 = vpop.xlane.xlu1 %2262 }
 0x545   : > { %3795 = vpow2.f32 %v2306_v26  ;;  %v2308_v31 = vmul.f32 1.442695, %v2290_v28  ;;  %v2291_v19 = vsub.f32 %v4946_v58, %v2263_v30  ;;  %v5084_v9 = vpop.eup %3785 }
 0x546   : > { %v2265_v32 = vpop.xlane.xlu0 %2264 }
 0x547   : > { %v5086_v50 = vpop.eup %3787  ;;  %v2310_v33 = vmul.f32 1.442695, %v2291_v19  ;;  %v2292_v14 = vsub.f32 %v4958_v0, %v2265_v32  ;;  %3797 = vpow2.f32 %v2308_v31 }
 0x548   : > { %v2267_v59 = vpop.xlane.xlu1 %2266  ;;  %v2004_v34 = vpack.c.bf16 %v5086_v50, %v5084_v9 }
 0x549   : > { %3799 = vpow2.f32 %v2310_v33  ;;  %v2312_v56 = vmul.f32 1.442695, %v2292_v14  ;;  %v2293_v36 = vsub.f32 %v4967_v4, %v2267_v59  ;;  %v5092_v40 = vpop.eup %3789 }
 0x54a   : > { %v2269_v58 = vpop.xlane.xlu0 %2268  ;;  %3342 = vmatprep.mubr.bf16.mxu1 %v2004_v34 }
 0x54b   : > { %v5094_v8 = vpop.eup %3791  ;;  %v2314_v45 = vmul.f32 1.442695, %v2293_v36  ;;  %v2294_v48 = vsub.f32 %v4956_v62, %v2269_v58  ;;  %3801 = vpow2.f32 %v2312_v56 }
 0x54c   : > { %v2271_v0 = vpop.xlane.xlu1 %2270  ;;  %v2005_v13 = vpack.c.bf16 %v5094_v8, %v5092_v40 }
 0x54d   : > { %v3794_v55 = vpop.eup %3793  ;;  %3803 = vpow2.f32 %v2314_v45  ;;  %v2316_v49 = vmul.f32 1.442695, %v2294_v48  ;;  %v2295_v53 = vsub.f32 %v4965_v3, %v2271_v0 }
 0x54e   : > { %2336 = vadd.xlane.f32.xlu0 %v3794_v55  ;;  %v2273_v4 = vpop.xlane.xlu0 %2272  ;;  %3343 = vmatmul.mubr.bf16.gmra.mrb[60].mxu1 %v2005_v13 }
 0x54f   : > { %v3796_v61 = vpop.eup %3795  ;;  %v2318_v2 = vmul.f32 1.442695, %v2295_v53  ;;  %v2296_v5 = vsub.f32 %v4978_v12, %v2273_v4  ;;  %3805 = vpow2.f32 %v2316_v49  ;;  %v3718_v53 = vld [vmem:[#allocation15 + $0x14] ss:$8 sps:$4 sm:$0xff]   ;;  %v3716_v4 = vld [vmem:[#allocation15 + $0x10] ss:$8 sps:$4 sm:$0xff]  }
 0x550   : > { %2338 = vadd.xlane.f32.xlu1 %v3796_v61  ;;  %v2275_v62 = vpop.xlane.xlu1 %2274  ;;  %v2368_v38 = vpack.c.bf16 %v3796_v61, %v3794_v55  ;;  %v3724_v61 = vld [vmem:[#allocation15 + $0x34] ss:$8 sps:$4 sm:$0xff]  }
 0x551   : > { %3807 = vpow2.f32 %v2318_v2  ;;  %v2320_v6 = vmul.f32 1.442695, %v2296_v5  ;;  %v2297_v60 = vsub.f32 %v4987_v16, %v2275_v62  ;;  %v3798_v11 = vpop.eup %3797  ;;  %v3725_v2 = vld [vmem:[#allocation15 + $0x40] ss:$8 sps:$4 sm:$0xff]   ;;  %v3730_v5 = vld [vmem:[#allocation15 + $0x54] ss:$8 sps:$4 sm:$0xff]  }
 0x552   : > { %1966 = vadd.xlane.f32.xlu0 %v5032_v35  ;;  %v2277_v20 = vpop.xlane.xlu0 %2276  ;;  %3394 = vmatprep.mubr.bf16.mxu1 %v2368_v38  ;;  %v3731_v62 = vld [vmem:[#allocation15 + $0x60] ss:$8 sps:$4 sm:$0xff]   ;;  %v3736_v38 = vld [vmem:[#allocation15 + $0x74] ss:$8 sps:$4 sm:$0xff]  }
 0x553   : > { %v3800_v3 = vpop.eup %3799  ;;  %v2322_v23 = vmul.f32 1.442695, %v2297_v60  ;;  %v2298_v1 = vsub.f32 %v4976_v10, %v2277_v20  ;;  %3809 = vpow2.f32 %v2320_v6  ;;  %v3739_v6 = vld [vmem:[#allocation15 + $0x84] ss:$8 sps:$4 sm:$0xff]   ;;  %v3742_v60 = vld [vmem:[#allocation15 + $0x94] ss:$8 sps:$4 sm:$0xff]  }
 0x554   : > { %1968 = vadd.xlane.f32.xlu1 %v5037_v41  ;;  %v2279_v12 = vpop.xlane.xlu1 %2278  ;;  %v2369_v21 = vpack.c.bf16 %v3800_v3, %v3798_v11  ;;  %v3745_v20 = vld [vmem:[#allocation15 + $0xa4] ss:$8 sps:$4 sm:$0xff]  }
 0x555   : > { %3811 = vpow2.f32 %v2322_v23  ;;  %v2324_v24 = vmul.f32 1.442695, %v2298_v1  ;;  %v2299_v17 = vsub.f32 %v4985_v15, %v2279_v12  ;;  %v3802_v25 = vpop.eup %3801  ;;  %v3746_v23 = vld [vmem:[#allocation15 + $0xb0] ss:$8 sps:$4 sm:$0xff]   ;;  %v3749_v1 = vld [vmem:[#allocation15 + $0xc0] ss:$8 sps:$4 sm:$0xff]  }
 0x556   : > { %2340 = vadd.xlane.f32.xlu0 %v3798_v11  ;;  %v2281_v16 = vpop.xlane.xlu0 %2280  ;;  %3395 = vmatmul.mubr.bf16.vlgmr.msra.gmra.mrb[64].mxu1 %v2369_v21  ;;  %v3740_v11 = vld [vmem:[#allocation15 + $0x90] ss:$8 sps:$4 sm:$0xff]   ;;  %v3754_v12 = vld [vmem:[#allocation15 + $0xd4] ss:$8 sps:$4 sm:$0xff]  }
 0x557   : > { %v3804_v35 = vpop.eup %3803  ;;  %v2326_v26 = vmul.f32 1.442695, %v2299_v17  ;;  %v2300_v28 = vsub.f32 %v4998_v18, %v2281_v16  ;;  %3813 = vpow2.f32 %v2324_v24  ;;  %v3752_v21 = vld [vmem:[#allocation15 + $0xd0] ss:$8 sps:$4 sm:$0xff]   ;;  %v3757_v24 = vld [vmem:[#allocation15 + $0xe4] ss:$8 sps:$4 sm:$0xff]  }
 0x558   : > { %2342 = vadd.xlane.f32.xlu1 %v3800_v3  ;;  %v2283_v10 = vpop.xlane.xlu1 %2282  ;;  %v2370_v30 = vpack.c.bf16 %v3804_v35, %v3802_v25  ;;  %v3743_v3 = vld [vmem:[#allocation15 + $0xa0] ss:$8 sps:$4 sm:$0xff]   ;;  %v3758_v16 = vld [vmem:[#allocation15 + $0xf0] ss:$8 sps:$4 sm:$0xff]  }
 0x559   : > { %3815 = vpow2.f32 %v2326_v26  ;;  %v2328_v41 = vmul.f32 1.442695, %v2300_v28  ;;  %v2301_v31 = vsub.f32 %v5007_v43, %v2283_v10  ;;  %v3806_v19 = vpop.eup %3805  ;;  %v3755_v17 = vld [vmem:[#allocation15 + $0xe0] ss:$8 sps:$4 sm:$0xff]  }
 0x55a   : > { %1970 = vadd.xlane.f32.xlu0 %v5040_v46  ;;  %v2285_v15 = vpop.xlane.xlu0 %2284  ;;  %3398 = vmatprep.mubr.bf16.mxu1 %v2370_v30 }
 0x55b   : > { %v3808_v32 = vpop.eup %3807  ;;  %v2330_v33 = vmul.f32 1.442695, %v2301_v31  ;;  %v2302_v14 = vsub.f32 %v4996_v39, %v2285_v15  ;;  %3817 = vpow2.f32 %v2328_v41 }
 0x55c   : > { %1972 = vadd.xlane.f32.xlu1 %v5035_v37  ;;  %v2287_v18 = vpop.xlane.xlu1 %2286  ;;  %v2371_v59 = vpack.c.bf16 %v3808_v32, %v3806_v19 }
 0x55d   : > { %3819 = vpow2.f32 %v2330_v33  ;;  %v2332_v34 = vmul.f32 1.442695, %v2302_v14  ;;  %v2303_v56 = vsub.f32 %v5005_v42, %v2287_v18  ;;  %v3810_v36 = vpop.eup %3809 }
 0x55e   : > { %2344 = vadd.xlane.f32.xlu0 %v3802_v25  ;;  %3399 = vmatmul.mubr.bf16.gmra.mrb[68].mxu1 %v2371_v59  ;;  %v3760_v25 = vld [vmem:[#allocation15 + $0xf4] ss:$8 sps:$4 sm:$0xff]  }
 0x55f   : > { %v3812_v43 = vpop.eup %3811  ;;  %v2334_v46 = vmul.f32 1.442695, %v2303_v56  ;;  %3821 = vpow2.f32 %v2332_v34 }
 0x560   : > { %2346 = vadd.xlane.f32.xlu1 %v3804_v35  ;;  %v2372_v58 = vpack.c.bf16 %v3812_v43, %v3810_v36 }
 0x561   : > { %3823 = vpow2.f32 %v2334_v46  ;;  %v3814_v45 = vpop.eup %3813 }
 0x562   : > { %1974 = vadd.xlane.f32.xlu0 %v5048_v7  ;;  %3402 = vmatprep.mubr.bf16.mxu1 %v2372_v58  ;;  %v3715_v7 = vld [vmem:[#allocation15 + $0x4] ss:$8 sps:$4 sm:$0xff]  }
 0x563   : > { %v3816_v39 = vpop.eup %3815  ;;  %2717 = vmatprep.subr.bf16.mxu0 %v3715_v7 }
 0x564   : > { %1976 = vadd.xlane.f32.xlu1 %v5050_v22  ;;  %v2373_v37 = vpack.c.bf16 %v3816_v39, %v3814_v45  ;;  %v3713_v22 = vld [vmem:[#allocation15] ss:$8 sps:$4 sm:$0xff]  }
 0x565   : > { %v3818_v48 = vpop.eup %3817  ;;  %2718 = vmatpush1.bf16.msra.mxu0 %v3713_v22 }
 0x566   : > { %2348 = vadd.xlane.f32.xlu0 %v3806_v19  ;;  %3403 = vmatmul.mubr.bf16.gmra.mrb[72].mxu1 %v2373_v37 }
 0x567   : > { %v3820_v42 = vpop.eup %3819  ;;  %2719 = vmatprep.subr.bf16.mxu0 %v3718_v53 }
 0x568   : > { %2350 = vadd.xlane.f32.xlu1 %v3808_v32  ;;  %v2374_v0 = vpack.c.bf16 %v3820_v42, %v3818_v48 }
 0x569   : > { %v3822_v13 = vpop.eup %3821  ;;  %2720 = vmatpush1.bf16.msra.mxu0 %v3716_v4 }
 0x56a   : > { %1978 = vadd.xlane.f32.xlu0 %v5056_v27  ;;  %3406 = vmatprep.mubr.bf16.mxu1 %v2374_v0  ;;  %v3721_v27 = vld [vmem:[#allocation15 + $0x24] ss:$8 sps:$4 sm:$0xff]  }
 0x56b   : > { %v3824_v55 = vpop.eup %3823  ;;  %2721 = vmatprep.subr.bf16.mxu0 %v3721_v27 }
 0x56c   : > { %1980 = vadd.xlane.f32.xlu1 %v5058_v29  ;;  %v2375_v49 = vpack.c.bf16 %v3824_v55, %v3822_v13  ;;  %v3719_v29 = vld [vmem:[#allocation15 + $0x20] ss:$8 sps:$4 sm:$0xff]  }
 0x56d   : > { %2722 = vmatpush1.bf16.msra.mxu0 %v3719_v29 }
 0x56e   : > { %2352 = vadd.xlane.f32.xlu0 %v3810_v36  ;;  %3407 = vmatmul.mubr.bf16.gmra.mrb[76].mxu1 %v2375_v49 }
 0x56f   : > { %2723 = vmatprep.subr.bf16.mxu0 %v3724_v61 }
 0x570   : > { %2354 = vadd.xlane.f32.xlu1 %v3812_v43 }
 0x572   : > { %1982 = vadd.xlane.f32.xlu0 %v5064_v44  ;;  %v3722_v44 = vld [vmem:[#allocation15 + $0x30] ss:$8 sps:$4 sm:$0xff]  }
 0x573   : > { %2724 = vmatpush1.bf16.msra.mxu0 %v3722_v44 }
 0x574   : > { %1984 = vadd.xlane.f32.xlu1 %v5066_v47  ;;  %v3727_v47 = vld [vmem:[#allocation15 + $0x44] ss:$8 sps:$4 sm:$0xff]  }
 0x575   : > { %2725 = vmatprep.subr.bf16.mxu0 %v3727_v47 }
 0x576   : > { %2356 = vadd.xlane.f32.xlu0 %v3814_v45 }
 0x577   : > { %2726 = vmatpush1.bf16.msra.mxu0 %v3725_v2 }
 0x578   : > { %2358 = vadd.xlane.f32.xlu1 %v3816_v39  ;;  %2727 = vmatprep.subr.bf16.mxu0 %v3730_v5 }
 0x57a   : > { %1986 = vadd.xlane.f32.xlu0 %v5072_v57  ;;  %v3728_v57 = vld [vmem:[#allocation15 + $0x50] ss:$8 sps:$4 sm:$0xff]  }
 0x57b   : > { %2728 = vmatpush1.bf16.msra.mxu0 %v3728_v57 }
 0x57c   : > { %1988 = vadd.xlane.f32.xlu1 %v5074_v63  ;;  %v3733_v63 = vld [vmem:[#allocation15 + $0x64] ss:$8 sps:$4 sm:$0xff]  }
 0x57d   : > { %2729 = vmatprep.subr.bf16.mxu0 %v3733_v63 }
 0x57e   : > { %2360 = vadd.xlane.f32.xlu0 %v3818_v48 }
 0x57f   : > { %2730 = vmatpush1.bf16.msra.mxu0 %v3731_v62 }
 0x580   : > { %2362 = vadd.xlane.f32.xlu1 %v3820_v42  ;;  %2731 = vmatprep.subr.bf16.mxu0 %v3736_v38 }
 0x582   : > { %1990 = vadd.xlane.f32.xlu0 %v5084_v9  ;;  %v3734_v9 = vld [vmem:[#allocation15 + $0x70] ss:$8 sps:$4 sm:$0xff]  }
 0x583   : > { %2732 = vmatpush1.bf16.msra.mxu0 %v3734_v9 }
 0x584   : > { %1992 = vadd.xlane.f32.xlu1 %v5086_v50  ;;  %v3737_v50 = vld [vmem:[#allocation15 + $0x80] ss:$8 sps:$4 sm:$0xff]   ;;  %2733 = vmatprep.subr.bf16.mxu0 %v3739_v6 }
 0x586   : > { %2364 = vadd.xlane.f32.xlu0 %v3822_v13 }
 0x587   : > { %2734 = vmatpush1.bf16.msra.mxu0 %v3737_v50 }
 0x588   : > { %2366 = vadd.xlane.f32.xlu1 %v3824_v55  ;;  %2735 = vmatprep.subr.bf16.mxu0 %v3742_v60 }
 0x58a   : > { %1994 = vadd.xlane.f32.xlu0 %v5092_v40  ;;  %v3748_v40 = vld [vmem:[#allocation15 + $0xb4] ss:$8 sps:$4 sm:$0xff]  }
 0x58b   : > { %2736 = vmatpush1.bf16.msra.mxu0 %v3740_v11 }
 0x58c   : > { %1996 = vadd.xlane.f32.xlu1 %v5094_v8  ;;  %2737 = vmatprep.subr.bf16.mxu0 %v3745_v20  ;;  %v3751_v8 = vld [vmem:[#allocation15 + $0xc4] ss:$8 sps:$4 sm:$0xff]  }
 0x58f   : > { %2738 = vmatpush1.bf16.msra.mxu0 %v3743_v3 }
 0x590   : > { %2739 = vmatprep.subr.bf16.mxu0 %v3748_v40 }
 0x593   : > { %2740 = vmatpush1.bf16.msra.mxu0 %v3746_v23 }
 0x594   : > { %2741 = vmatprep.subr.bf16.mxu0 %v3751_v8 }
 0x597   : > { %2742 = vmatpush1.bf16.msra.mxu0 %v3749_v1 }
 0x598   : > { %2743 = vmatprep.subr.bf16.mxu0 %v3754_v12 }
 0x59b   : > { %2744 = vmatpush1.bf16.msra.mxu0 %v3752_v21 }
 0x59c   : > { %2745 = vmatprep.subr.bf16.mxu0 %v3757_v24 }
 0x59f   : > { %2746 = vmatpush1.bf16.msra.mxu0 %v3755_v17 }
 0x5a0   : > { %2747 = vmatprep.subr.bf16.mxu0 %v3760_v25 }
 0x5a3   : > { %2748 = vmatpush1.bf16.msra.mxu0 %v3758_v16 }
 0x5db   : > { %v5124_v35 = vpop.xlane.xlu0 %2336 }
 0x5dd   : > { %v5126_v26 = vpop.xlane.xlu1 %2338 }
 0x5df   : > { %v1967_v28 = vpop.xlane.xlu0 %1966 }
 0x5e0   : > { %3825 = vrcp.f32 %v1967_v28 }
 0x5e1   : > { %v1969_v10 = vpop.xlane.xlu1 %1968 }
 0x5e3   : > { %v5128_v30 = vpop.xlane.xlu0 %2340 }
 0x5e5   : > { %v5130_v41 = vpop.xlane.xlu1 %2342 }
 0x5e7   : > { %v1971_v31 = vpop.xlane.xlu0 %1970 }
 0x5e8   : > { %3827 = vrcp.f32 %v1971_v31 }
 0x5e9   : > { %3829 = vrcp.f32 %v1969_v10  ;;  %v1973_v19 = vpop.xlane.xlu1 %1972 }
 0x5ea   : > { %3831 = vrcp.f32 %v1973_v19  ;;  %v3826_v18 = vpop.eup %3825 }
 0x5eb   : > { %v5132_v15 = vpop.xlane.xlu0 %2344 }
 0x5ed   : > { %v5134_v32 = vpop.xlane.xlu1 %2346 }
 0x5ef   : > { %v1975_v33 = vpop.xlane.xlu0 %1974 }
 0x5f0   : > { %v3332_v14 = vpop.f32.mrb[48].mxu1  ;;  %3833 = vrcp.f32 %v1975_v33 }
 0x5f1   : > { %v1977_v59 = vpop.xlane.xlu1 %1976  ;;  %v2040_v34 = vpop.f32.mrb[49].mxu1 }
 0x5f2   : > { %v3828_v56 = vpop.eup %3827  ;;  %v3333_v36 = vpop.f32.mrb[50].mxu1  ;;  %v5138_v39 = vmul.f32 %v3826_v18, %v2040_v34 }
 0x5f3   : > { %v3830_v43 = vpop.eup %3829  ;;  %v5136_v46 = vpop.xlane.xlu0 %2348  ;;  %v5142_v48 = vmul.f32 %v3828_v56, %v3332_v14 }
 0x5f4   : > { %v2043_v58 = vpop.f32.mrb[51].mxu1  ;;  %v3832_v45 = vpop.eup %3831 }
 0x5f5   : > { %v5140_v37 = vmul.f32 %v3830_v43, %v2043_v58  ;;  %v5144_v42 = vmul.f32 %v3832_v45, %v3333_v36  ;;  %v5146_v0 = vpop.xlane.xlu1 %2350 }
 0x5f7   : > { %v2135_v13 = vpack.c.bf16 %v5140_v37, %v5138_v39  ;;  %v2136_v55 = vpack.c.bf16 %v5144_v42, %v5142_v48  ;;  %v1979_v49 = vpop.xlane.xlu0 %1978 }
 0x5f8   : > { %3835 = vrcp.f32 %v1979_v49 }
 0x5f9   : > { %3837 = vrcp.f32 %v1977_v59  ;;  %v1981_v7 = vpop.xlane.xlu1 %1980 }
 0x5fa   : > { %3839 = vrcp.f32 %v1981_v7  ;;  %v3834_v27 = vpop.eup %3833 }
 0x5fb   : > { %v5152_v22 = vpop.xlane.xlu0 %2352 }
 0x5fd   : > { %v5154_v53 = vpop.xlane.xlu1 %2354 }
 0x5ff   : > { %v1983_v4 = vpop.xlane.xlu0 %1982 }
 0x600   : > { %3841 = vrcp.f32 %v1983_v4 }
 0x601   : > { %v1985_v29 = vpop.xlane.xlu1 %1984  ;;  %v3336_v61 = vpop.f32.mrb[52].mxu1 }
 0x602   : > { %v3836_v44 = vpop.eup %3835  ;;  %v2056_v47 = vpop.f32.mrb[53].mxu1 }
 0x603   : > { %v3838_v2 = vpop.eup %3837  ;;  %v5156_v5 = vpop.xlane.xlu0 %2356  ;;  %v5158_v38 = vmul.f32 %v3836_v44, %v3336_v61  ;;  %v5160_v9 = vmul.f32 %v3834_v27, %v2056_v47 }
 0x604   : > { %v3337_v57 = vpop.f32.mrb[54].mxu1  ;;  %v3840_v63 = vpop.eup %3839 }
 0x605   : > { %v2059_v62 = vpop.f32.mrb[55].mxu1  ;;  %v5162_v6 = vmul.f32 %v3840_v63, %v3337_v57  ;;  %v5166_v60 = vpop.xlane.xlu1 %2358 }
 0x606   : > { %v5164_v50 = vmul.f32 %v3838_v2, %v2059_v62 }
 0x607   : > { %v2138_v11 = vpack.c.bf16 %v5162_v6, %v5158_v38  ;;  %v1987_v3 = vpop.xlane.xlu0 %1986  ;;  %v2545_v38 = vld [vmem:[%s5499_s1] sm:$0x3]  ;;  %s4097_s1 = scalar_lea.vmem %s4096_s4, 8192 }
 0x608   : > { %v2137_v20 = vpack.c.bf16 %v5164_v50, %v5160_v9  ;;  %3843 = vrcp.f32 %v1987_v3  ;;  %v5249_v9 = vrot.slane %v2545_v38, %v1444_v52  ;;  %v5253_v6 = vrot.slane %v2545_v38, %v1448_v54  ;;  %p4099_p7 = scmp.lt.s32.totalorder %s4097_s1, %s4091_s24 }
 0x609   : > { %3845 = vrcp.f32 %v1985_v29  ;;  %v1989_v40 = vpop.xlane.xlu1 %1988 }
 0x60a   : > { %3847 = vrcp.f32 %v1989_v40  ;;  %v3842_v12 = vpop.eup %3841  ;;  %p4100_p2 = por %p4099_p7, %p4098_p9 }
 0x60b   : > { %v5172_v23 = vpop.xlane.xlu0 %2360 }
 0x60c   : > { %p4101_p10 = pnand %p4100_p2, %p4094_p8 }
 0x60d   : > { %v5174_v8 = vpop.xlane.xlu1 %2362 }
 0x60f   : > { %v1991_v1 = vpop.xlane.xlu0 %1990 }
 0x610   : > { %3849 = vrcp.f32 %v1991_v1 }
 0x611   : > { %v1993_v21 = vpop.xlane.xlu1 %1992  ;;  %v3340_v24 = vpop.f32.mrb[56].mxu1 }
 0x612   : > { %v3844_v17 = vpop.eup %3843  ;;  %v2072_v25 = vpop.f32.mrb[57].mxu1 }
 0x613   : > { %v3846_v16 = vpop.eup %3845  ;;  %v5176_v28 = vpop.xlane.xlu0 %2364  ;;  %v5178_v33 = vmul.f32 %v3844_v17, %v3340_v24  ;;  %v5180_v14 = vmul.f32 %v3842_v12, %v2072_v25 }
 0x614   : > { %v3341_v10 = vpop.f32.mrb[58].mxu1  ;;  %v3848_v31 = vpop.eup %3847 }
 0x615   : > { %v2075_v19 = vpop.f32.mrb[59].mxu1  ;;  %v5182_v18 = vmul.f32 %v3848_v31, %v3341_v10  ;;  %v5186_v34 = vpop.xlane.xlu1 %2366 }
 0x616   : > { %v5184_v59 = vmul.f32 %v3846_v16, %v2075_v19 }
 0x617   : > { %v2140_v56 = vpack.c.bf16 %v5182_v18, %v5178_v33  ;;  %v1995_v43 = vpop.xlane.xlu0 %1994 }
 0x618   : > { %v2139_v36 = vpack.c.bf16 %v5184_v59, %v5180_v14  ;;  %3851 = vrcp.f32 %v1995_v43 }
 0x619   : > { %3853 = vrcp.f32 %v1993_v21  ;;  %v1997_v58 = vpop.xlane.xlu1 %1996 }
 0x61a   : > { %3855 = vrcp.f32 %v1997_v58  ;;  %v3850_v45 = vpop.eup %3849 }
 0x61b   : > { %3857 = vrcp.f32 %v5124_v35 }
 0x61c   : > { %3859 = vrcp.f32 %v5128_v30 }
 0x61d   : > { %3861 = vrcp.f32 %v5130_v41 }
 0x61e   : > { %3863 = vrcp.f32 %v5126_v26 }
 0x61f   : > { %3865 = vrcp.f32 %v5132_v15 }
 0x620   : > { %3867 = vrcp.f32 %v5136_v46 }
 0x621   : > { %v3344_v49 = vpop.f32.mrb[60].mxu1  ;;  %3869 = vrcp.f32 %v5146_v0 }
 0x622   : > { %v3852_v7 = vpop.eup %3851  ;;  %v2088_v4 = vpop.f32.mrb[61].mxu1  ;;  %3871 = vrcp.f32 %v5134_v32 }
 0x623   : > { %v3854_v27 = vpop.eup %3853  ;;  %v3345_v29 = vpop.f32.mrb[62].mxu1  ;;  %v5196_v47 = vmul.f32 %v3852_v7, %v3344_v49  ;;  %v5198_v2 = vmul.f32 %v3850_v45, %v2088_v4  ;;  %3873 = vrcp.f32 %v5152_v22 }
 0x624   : > { %v3856_v61 = vpop.eup %3855  ;;  %v2091_v44 = vpop.f32.mrb[63].mxu1  ;;  %3875 = vrcp.f32 %v5156_v5 }
 0x625   : > { %v5200_v57 = vmul.f32 %v3856_v61, %v3345_v29  ;;  %v5202_v35 = vmul.f32 %v3854_v27, %v2091_v44  ;;  %v3858_v41 = vpop.eup %3857  ;;  %3877 = vrcp.f32 %v5166_v60 }
 0x626   : > { %v3860_v62 = vpop.eup %3859  ;;  %3879 = vrcp.f32 %v5154_v53 }
 0x627   : > { %v2142_v30 = vpack.c.bf16 %v5200_v57, %v5196_v47  ;;  %v2141_v26 = vpack.c.bf16 %v5202_v35, %v5198_v2  ;;  %v3862_v40 = vpop.eup %3861  ;;  %3881 = vrcp.f32 %v5172_v23 }
 0x628   : > { %v3864_v12 = vpop.eup %3863  ;;  %3883 = vrcp.f32 %v5176_v28 }
 0x629   : > { %v3396_v63 = vpop.f32.mrb[64].mxu1  ;;  %v3866_v0 = vpop.eup %3865  ;;  %3885 = vrcp.f32 %v5186_v34 }
 0x62a   : > { %v2410_v3 = vpop.f32.mrb[65].mxu1  ;;  %v2491_v15 = vmul.f32 %v3860_v62, %v3396_v63  ;;  %v3868_v32 = vpop.eup %3867  ;;  %3887 = vrcp.f32 %v5174_v8 }
 0x62b   : > { %v3397_v1 = vpop.f32.mrb[66].mxu1  ;;  %v2489_v17 = vmul.f32 %v3858_v41, %v2410_v3  ;;  %v3870_v19 = vpop.eup %3869 }
 0x62c   : > { %v2492_v21 = vmul.f32 %v3862_v40, %v3397_v1  ;;  %v2413_v24 = vpop.f32.mrb[67].mxu1  ;;  %v3872_v22 = vpop.eup %3871 }
 0x62d   : > { %v2490_v25 = vmul.f32 %v3864_v12, %v2413_v24  ;;  %v3874_v53 = vpop.eup %3873 }
 0x62e   : > { %v2506_v16 = vpack.c.bf16 %v2492_v21, %v2491_v15  ;;  %v3876_v37 = vpop.eup %3875 }
 0x62f   : > { %v2505_v46 = vpack.c.bf16 %v2490_v25, %v2489_v17  ;;  %v3878_v27 = vpop.eup %3877 }
 0x630   : > { %v3880_v61 = vpop.eup %3879 }
 0x631   : > { %v3400_v10 = vpop.f32.mrb[68].mxu1  ;;  %2749 = vmatprep.mubr.bf16.mxu0 %v2505_v46  ;;  %v3882_v3 = vpop.eup %3881 }
 0x632   : > { %v2426_v31 = vpop.f32.mrb[69].mxu1  ;;  %2750 = vmatmul.mubr.bf16.vlgmr.msra.gmra.mrb[16].mxu0 %v2135_v13  ;;  %v2495_v58 = vmul.f32 %v3868_v32, %v3400_v10  ;;  %v3884_v1 = vpop.eup %3883 }
 0x633   : > { %v3401_v43 = vpop.f32.mrb[70].mxu1  ;;  %2759 = vmatprep.mubr.bf16.mxu0 %v2506_v16  ;;  %v2493_v49 = vmul.f32 %v3866_v0, %v2426_v31  ;;  %v3886_v48 = vpop.eup %3885 }
 0x634   : > { %v2496_v45 = vmul.f32 %v3870_v19, %v3401_v43  ;;  %v2429_v5 = vpop.f32.mrb[71].mxu1 }
 0x635   : > { %v2494_v7 = vmul.f32 %v3872_v22, %v2429_v5 }
 0x636   : > { %v2508_v60 = vpack.c.bf16 %v2496_v45, %v2495_v58 }
 0x637   : > { %v2507_v4 = vpack.c.bf16 %v2494_v7, %v2493_v49 }
 0x639   : > { %v3404_v39 = vpop.f32.mrb[72].mxu1 }
 0x63a   : > { %v2442_v13 = vpop.f32.mrb[73].mxu1  ;;  %2760 = vmatmul.mubr.bf16.gmra.mrb[20].mxu0 %v2136_v55  ;;  %v2499_v23 = vmul.f32 %v3876_v37, %v3404_v39  ;;  %v3888_v55 = vpop.eup %3887 }
 0x63b   : > { %v3405_v29 = vpop.f32.mrb[74].mxu1  ;;  %2769 = vmatprep.mubr.bf16.mxu0 %v2507_v4  ;;  %v2497_v28 = vmul.f32 %v3874_v53, %v2442_v13 }
 0x63c   : > { %v2500_v44 = vmul.f32 %v3878_v27, %v3405_v29  ;;  %v2445_v41 = vpop.f32.mrb[75].mxu1 }
 0x63d   : > { %v2498_v63 = vmul.f32 %v3880_v61, %v2445_v41 }
 0x63e   : > { %v2510_v62 = vpack.c.bf16 %v2500_v44, %v2499_v23 }
 0x63f   : > { %v2509_v34 = vpack.c.bf16 %v2498_v63, %v2497_v28 }
 0x641   : > { %v3408_v40 = vpop.f32.mrb[76].mxu1 }
 0x642   : > { %v2458_v8 = vpop.f32.mrb[77].mxu1  ;;  %2770 = vmatmul.mubr.bf16.gmra.mrb[24].mxu0 %v2137_v20  ;;  %v2503_v12 = vmul.f32 %v3884_v1, %v3408_v40 }
 0x643   : > { %v3409_v42 = vpop.f32.mrb[78].mxu1  ;;  %2779 = vmatprep.mubr.bf16.mxu0 %v2508_v60  ;;  %v2501_v24 = vmul.f32 %v3882_v3, %v2458_v8 }
 0x644   : > { %v2504_v15 = vmul.f32 %v3886_v48, %v3409_v42  ;;  %v2461_v21 = vpop.f32.mrb[79].mxu1 }
 0x645   : > { %v2502_v17 = vmul.f32 %v3888_v55, %v2461_v21 }
 0x646   : > { %v2512_v25 = vpack.c.bf16 %v2504_v15, %v2503_v12 }
 0x647   : > { %v2511_v16 = vpack.c.bf16 %v2502_v17, %v2501_v24 }
 0x64a   : > { %2780 = vmatmul.mubr.bf16.gmra.mrb[28].mxu0 %v2138_v11 }
 0x64b   : > { %2789 = vmatprep.mubr.bf16.mxu0 %v2509_v34 }
 0x652   : > { %2790 = vmatmul.mubr.bf16.gmra.mrb[32].mxu0 %v2139_v36 }
 0x653   : > { %2799 = vmatprep.mubr.bf16.mxu0 %v2510_v62 }
 0x65a   : > { %2800 = vmatmul.mubr.bf16.gmra.mrb[36].mxu0 %v2140_v56 }
 0x65b   : > { %2809 = vmatprep.mubr.bf16.mxu0 %v2511_v16 }
 0x662   : > { %2810 = vmatmul.mubr.bf16.gmra.mrb[40].mxu0 %v2141_v26 }
 0x663   : > { %2819 = vmatprep.mubr.bf16.mxu0 %v2512_v25 }
 0x66a   : > { %2820 = vmatmul.mubr.bf16.gmra.mrb[44].mxu0 %v2142_v30 }
 0x705   : > { %v2751_v50 = vpop.f32.mrb[16].mxu0 }
 0x706   : > { %v2752_v11 = vadd.f32 %v2751_v50, %v5249_v9  ;;  %v2753_v20 = vpop.f32.mrb[17].mxu0 }
 0x707   : > { %v2754_v33 = vadd.f32 %v2753_v20, %v5253_v6  ;;  %v2755_v14 = vpop.f32.mrb[18].mxu0 }
 0x708   : > { %2830 = vst [vmem:[%s4708_s7] sm:$0xff] %v2752_v11  ;;  %v2756_v18 = vadd.f32 %v2755_v14, %v5249_v9  ;;  %v2757_v59 = vpop.f32.mrb[19].mxu0 }
 0x709   : > { %2831 = vst [vmem:[%s4708_s7 + $0x8] sm:$0xff] %v2754_v33  ;;  %v2758_v51 = vadd.f32 %v2757_v59, %v5253_v6 }
 0x70a   : > { %2832 = vst [vmem:[%s4708_s7 + $0x10] sm:$0xff] %v2756_v18 }
 0x70b   : > { %2833 = vst [vmem:[%s4708_s7 + $0x18] sm:$0xff] %v2758_v51 }
 0x70d   : > { %v2761_v52 = vpop.f32.mrb[20].mxu0 }
 0x70e   : > { %v2762_v54 = vadd.f32 %v2761_v52, %v5249_v9  ;;  %v2763_v56 = vpop.f32.mrb[21].mxu0 }
 0x70f   : > { %v2764_v36 = vadd.f32 %v2763_v56, %v5253_v6  ;;  %v2765_v47 = vpop.f32.mrb[22].mxu0 }
 0x710   : > { %2834 = vst [vmem:[%s4708_s7 + $0x20] sm:$0xff] %v2762_v54  ;;  %v2766_v2 = vadd.f32 %v2765_v47, %v5249_v9  ;;  %v2767_v57 = vpop.f32.mrb[23].mxu0 }
 0x711   : > { %2835 = vst [vmem:[%s4708_s7 + $0x28] sm:$0xff] %v2764_v36  ;;  %v2768_v35 = vadd.f32 %v2767_v57, %v5253_v6 }
 0x712   : > { %2836 = vst [vmem:[%s4708_s7 + $0x30] sm:$0xff] %v2766_v2 }
 0x713   : > { %2837 = vst [vmem:[%s4708_s7 + $0x38] sm:$0xff] %v2768_v35 }
 0x715   : > { %v2771_v30 = vpop.f32.mrb[24].mxu0 }
 0x716   : > { %v2772_v26 = vadd.f32 %v2771_v30, %v5249_v9  ;;  %v2773_v46 = vpop.f32.mrb[25].mxu0 }
 0x717   : > { %v2774_v0 = vadd.f32 %v2773_v46, %v5253_v6  ;;  %v2775_v10 = vpop.f32.mrb[26].mxu0 }
 0x718   : > { %2838 = vst [vmem:[%s4708_s7 + $0x40] sm:$0xff] %v2772_v26  ;;  %v2776_v32 = vadd.f32 %v2775_v10, %v5249_v9  ;;  %v2777_v31 = vpop.f32.mrb[27].mxu0 }
 0x719   : > { %2839 = vst [vmem:[%s4708_s7 + $0x48] sm:$0xff] %v2774_v0  ;;  %v2778_v19 = vadd.f32 %v2777_v31, %v5253_v6 }
 0x71a   : > { %2840 = vst [vmem:[%s4708_s7 + $0x50] sm:$0xff] %v2776_v32 }
 0x71b   : > { %2841 = vst [vmem:[%s4708_s7 + $0x58] sm:$0xff] %v2778_v19 }
 0x71d   : > { %v2781_v43 = vpop.f32.mrb[28].mxu0 }
 0x71e   : > { %v2782_v22 = vadd.f32 %v2781_v43, %v5249_v9  ;;  %v2783_v58 = vpop.f32.mrb[29].mxu0 }
 0x71f   : > { %v2784_v45 = vadd.f32 %v2783_v58, %v5253_v6  ;;  %v2785_v5 = vpop.f32.mrb[30].mxu0 }
 0x720   : > { %2842 = vst [vmem:[%s4708_s7 + $0x60] sm:$0xff] %v2782_v22  ;;  %v2786_v49 = vadd.f32 %v2785_v5, %v5249_v9  ;;  %v2787_v7 = vpop.f32.mrb[31].mxu0 }
 0x721   : > { %2843 = vst [vmem:[%s4708_s7 + $0x68] sm:$0xff] %v2784_v45  ;;  %v2788_v60 = vadd.f32 %v2787_v7, %v5253_v6 }
 0x722   : > { %2844 = vst [vmem:[%s4708_s7 + $0x70] sm:$0xff] %v2786_v49 }
 0x723   : > { %2845 = vst [vmem:[%s4708_s7 + $0x78] sm:$0xff] %v2788_v60 }
 0x725   : > { %v2791_v4 = vpop.f32.mrb[32].mxu0 }
 0x726   : > { %v2792_v53 = vadd.f32 %v2791_v4, %v5249_v9  ;;  %v2793_v39 = vpop.f32.mrb[33].mxu0 }
 0x727   : > { %v2794_v37 = vadd.f32 %v2793_v39, %v5253_v6  ;;  %v2795_v13 = vpop.f32.mrb[34].mxu0 }
 0x728   : > { %2846 = vst [vmem:[%s4708_s7 + $0x80] sm:$0xff] %v2792_v53  ;;  %v2796_v27 = vadd.f32 %v2795_v13, %v5249_v9  ;;  %v2797_v29 = vpop.f32.mrb[35].mxu0 }
 0x729   : > { %2847 = vst [vmem:[%s4708_s7 + $0x88] sm:$0xff] %v2794_v37  ;;  %v2798_v61 = vadd.f32 %v2797_v29, %v5253_v6 }
 0x72a   : > { %2848 = vst [vmem:[%s4708_s7 + $0x90] sm:$0xff] %v2796_v27 }
 0x72b   : > { %2849 = vst [vmem:[%s4708_s7 + $0x98] sm:$0xff] %v2798_v61 }
 0x72d   : > { %v2801_v23 = vpop.f32.mrb[36].mxu0 }
 0x72e   : > { %v2802_v44 = vadd.f32 %v2801_v23, %v5249_v9  ;;  %v2803_v41 = vpop.f32.mrb[37].mxu0 }
 0x72f   : > { %v2804_v28 = vadd.f32 %v2803_v41, %v5253_v6  ;;  %v2805_v63 = vpop.f32.mrb[38].mxu0 }
 0x730   : > { %2850 = vst [vmem:[%s4708_s7 + $0xa0] sm:$0xff] %v2802_v44  ;;  %v2806_v62 = vadd.f32 %v2805_v63, %v5249_v9  ;;  %v2807_v34 = vpop.f32.mrb[39].mxu0 }
 0x731   : > { %2851 = vst [vmem:[%s4708_s7 + $0xa8] sm:$0xff] %v2804_v28  ;;  %v2808_v3 = vadd.f32 %v2807_v34, %v5253_v6 }
 0x732   : > { %2852 = vst [vmem:[%s4708_s7 + $0xb0] sm:$0xff] %v2806_v62 }
 0x733   : > { %2853 = vst [vmem:[%s4708_s7 + $0xb8] sm:$0xff] %v2808_v3 }
 0x735   : > { %v2811_v40 = vpop.f32.mrb[40].mxu0 }
 0x736   : > { %v2812_v1 = vadd.f32 %v2811_v40, %v5249_v9  ;;  %v2813_v8 = vpop.f32.mrb[41].mxu0 }
 0x737   : > { %v2814_v48 = vadd.f32 %v2813_v8, %v5253_v6  ;;  %v2815_v42 = vpop.f32.mrb[42].mxu0 }
 0x738   : > { %2854 = vst [vmem:[%s4708_s7 + $0xc0] sm:$0xff] %v2812_v1  ;;  %v2816_v55 = vadd.f32 %v2815_v42, %v5249_v9  ;;  %v2817_v12 = vpop.f32.mrb[43].mxu0 }
 0x739   : > { %2855 = vst [vmem:[%s4708_s7 + $0xc8] sm:$0xff] %v2814_v48  ;;  %v2818_v15 = vadd.f32 %v2817_v12, %v5253_v6 }
 0x73a   : > { %2856 = vst [vmem:[%s4708_s7 + $0xd0] sm:$0xff] %v2816_v55 }
 0x73b   : > { %2857 = vst [vmem:[%s4708_s7 + $0xd8] sm:$0xff] %v2818_v15 }
 0x73d   : > { %v2821_v21 = vpop.f32.mrb[44].mxu0 }
 0x73e   : > { %v2822_v24 = vadd.f32 %v2821_v21, %v5249_v9  ;;  %v2823_v17 = vpop.f32.mrb[45].mxu0 }
 0x73f   : > { %v2824_v25 = vadd.f32 %v2823_v17, %v5253_v6  ;;  %v2825_v16 = vpop.f32.mrb[46].mxu0 }
 0x740   : > { %2858 = vst [vmem:[%s4708_s7 + $0xe0] sm:$0xff] %v2822_v24  ;;  %v2826_v38 = vadd.f32 %v2825_v16, %v5249_v9  ;;  %v2827_v50 = vpop.f32.mrb[47].mxu0 }
 0x741   : > { %2859 = vst [vmem:[%s4708_s7 + $0xe8] sm:$0xff] %v2824_v25  ;;  %v2828_v11 = vadd.f32 %v2827_v50, %v5253_v6 }
 0x742   : > { %2860 = vst [vmem:[%s4708_s7 + $0xf0] sm:$0xff] %v2826_v38 }
 0x743   : > { %2861 = vst [vmem:[%s4708_s7 + $0xf8] sm:$0xff] %v2828_v11 }
 0x744   : > { %4104 = shalt.err (!%p4101_p10)
}
 0x745   : > { %s4105_s7 = scalar_lea.hbm %s5321_s29, 4096  ;;  %s4109_s5 = scalar_lea.hbm %s5502_s12, 16384 }
 0x746   : > { %p4106_p3 = scmp.ne.s32.totalorder %s5321_s29, %s4105_s7  ;;  %p4110_p12 = scmp.lt.u32.totalorder %s5321_s29, %s5502_s12 }
 0x747   : > { %p4111_p11 = scmp.lt.u32.totalorder %s4109_s5, %s4105_s7  ;;  %p4113_p4 = scmp.lt.u32.totalorder %s4105_s7, %s5321_s29 }
 0x748   : > { %p4107_p5 = pnand %p4106_p3, %p5503_p1 }
 0x749   : > { %p4112_p13 = por %p4111_p11, %p4110_p12 }
 0x74a   : > { %p4108_p6 = pneg %p4107_p5 }
 0x74b   : > { %p4114_p0 = por %p4113_p4, %p4112_p13 }
 0x74d   : > { %p4115_p8 = pnand %p4114_p0, %p4108_p6 }
 0x74f   : > { %4118 = shalt.err (!%p4115_p8)
}
 0x750   : > { %s4239_s9 = smov 256   ;;  %s4240_s30 = smov 16  }
 0x751   : > { %3432 = dma.vmem_to_hbm [thread:$0]  (%p5503_p1), %s5323_s15, 4096, %s5321_s29, %s2863_s23, %s4239_s9, %s4239_s9, %s4240_s30  }
 0x752 PF: > { %p3470_p9 = scmp.ge.s32.totalorder %s4225_s27, 2  ;;  %s2894_s8 = sand.u32 1, %s4197_s20  }
 0x753   : > { %p5504_p7 = scmp.ne.s32.totalorder %s5475_s10, 0  ;;  %s2895_s24 = scalar_lea.sflag [#allocation6], %s2894_s8 }
 0x755   : > { %p3458_p2 = pnand %p3470_p9, %p5504_p7 }
 0x757   : > { %4180 = dma.done.wait (!%p3458_p2), %s2895_s24, 4096  }
 0x758   : > { %4182 = vsyncadd (!%p3458_p2), %s2895_s24, 4294963200  ;;  %s32_s27 = sadd.s32 1, %s4225_s27   ;;  %s5505_s17 = sld [smem:[#allocation22_spill]] }
 0x759   : > { %p29_p10 = scmp.ge.s32.totalorder %s32_s27, 6   ;;  %s5506_s4 = sld [smem:[#allocation23_spill]] }
 0x75a   : > { %s5507_s6 = smov %s4597_s18  ;;  %s5508_s13 = sld [smem:[#allocation29_spill]] }
 0x75b   : > { %s5510_s19 = smov %s5525_s11  ;;  %s5511_s20 = smov %s4201_s21 }
 0x75c   : > { %s5512_s21 = smov %s4205_s22  ;;  %s5513_s22 = smov %s5507_s6 }
 0x75d   : > { %s5514_s23 = smov %s4217_s25  ;;  %s5515_s24 = smov %s4221_s26 }
 0x75e   : > { %s5517_s26 = smov %s5523_s14  ;;  %31 = sbr.rel (!%p29_p10) target bundleno = 25 (0x19), region = 153 }
 0x75f   : > { %s5509_s18 = smov %s5506_s4 }
 0x760   : > { %s5516_s25 = smov %s5508_s13 }
 0x765   :  { %2900 = vsyncpa [#allocation5], 1 }
 0x766   :  { %2902 = vsyncpa [#allocation5 + $0x1], 1 }
 0x767   :  { %2903 = vsyncpa [#allocation8], 1 }
 0x768   :  { %2905 = vsyncpa [#allocation8 + $0x1], 1 }
 0x769   :  { %2906 = vsyncpa [#allocation11], 1 }
 0x76a   :  { %2907 = vsyncpa [#allocation14], 1 }
 0x76b   :  { %2908 = vsyncpa [#allocation6], 1 }
 0x76c   :  { %2910 = vsyncpa [#allocation6 + $0x1], 1 }

</bundles_post_ra>
